<compile_context>
chip_gen: v5e
topology: v5e:2x2
jax: 0.10.0
libtpu: 0.0.40
codegen_flags: <defaults>
</compile_context>

<pallas_src>
import functools
import math

import numpy as np

import jax
import jax.numpy as jnp
from jax import lax
from jax.experimental import pallas as pl
from jax.experimental.pallas import tpu as pltpu


# --------------------------------------------------------------------------
# in-kernel helpers
# --------------------------------------------------------------------------
_EPS = 1e-5


def _gelu(x):
    # TODO(synk): PyTorch nn.GELU defaults to exact erf-GELU; the tanh
    # approximation is used in-kernel (guaranteed Mosaic lowering, EUP tanh).
    return jax.nn.gelu(x, approximate=True)


def _mm(a, b):
    # MXU matmul: bf16 operands, f32 accumulate.
    return jnp.dot(a.astype(jnp.bfloat16), b.astype(jnp.bfloat16),
                   preferred_element_type=jnp.float32)


def _mm_t(a, b):
    # a @ b.T without materialising a transpose.
    return lax.dot_general(a.astype(jnp.bfloat16), b.astype(jnp.bfloat16),
                           (((1,), (1,)), ((), ())),
                           preferred_element_type=jnp.float32)


def _ln(x, g, b, eps=_EPS):
    mu = jnp.mean(x, axis=-1, keepdims=True)
    xc = x - mu
    var = jnp.mean(xc * xc, axis=-1, keepdims=True)
    return xc * lax.rsqrt(var + eps) * g + b


def _softmax_last(x):
    m = jnp.max(x, axis=-1, keepdims=True)
    e = jnp.exp(x - m)
    return e * pl.reciprocal(jnp.sum(e, axis=-1, keepdims=True), approx=True)


def _softmax_axis0(x):
    m = jnp.max(x, axis=0, keepdims=True)
    e = jnp.exp(x - m)
    return e * pl.reciprocal(jnp.sum(e, axis=0, keepdims=True), approx=True)


def _cp(n_axes):
    # every grid axis below is independent -> allow TensorCore sharding.
    return pltpu.CompilerParams(dimension_semantics=("parallel",) * n_axes)


def _row_tile(n, pref=256):
    """Row-tile: full extent when small, else a 256-row (8-aligned) tile so
    double-buffered blocks stay well inside v7x's 64 MiB VMEM."""
    if n <= pref:
        return n
    return max(8, (pref // 8) * 8)


def _w2(b):
    return b.reshape(1, b.shape[0])


# --------------------------------------------------------------------------
# fused kernels
# --------------------------------------------------------------------------
def _transition_kernel(x_ref, g_ref, b_ref, w1_ref, b1_ref, w2_ref, b2_ref, o_ref):
    x = x_ref[...]
    h = _ln(x, g_ref[...], b_ref[...])
    h = _gelu(_mm(h, w1_ref[...]) + b1_ref[...])
    o_ref[...] = _mm(h, w2_ref[...]) + b2_ref[...] + x          # residual fused


def fused_transition(x, p):
    """x + Linear(GELU(Linear(LN(x)))), row-tiled, weights resident."""
    # TODO(synk): Transition source not provided; LN -> Linear -> GELU -> Linear assumed.
    lead, d = x.shape[:-1], x.shape[-1]
    dh = p['w1']['w'].shape[1]
    n = int(np.prod(lead))
    tn = _row_tile(n)
    out = pl.pallas_call(
        _transition_kernel,
        out_shape=jax.ShapeDtypeStruct((n, d), jnp.float32),
        grid=(pl.cdiv(n, tn),),
        in_specs=[pl.BlockSpec((tn, d), lambda i: (i, 0)),
                  pl.BlockSpec((1, d), lambda i: (0, 0)),
                  pl.BlockSpec((1, d), lambda i: (0, 0)),
                  pl.BlockSpec((d, dh), lambda i: (0, 0)),
                  pl.BlockSpec((1, dh), lambda i: (0, 0)),
                  pl.BlockSpec((dh, d), lambda i: (0, 0)),
                  pl.BlockSpec((1, d), lambda i: (0, 0))],
        out_specs=pl.BlockSpec((tn, d), lambda i: (i, 0)),
        compiler_params=_cp(1),
    )(x.reshape(n, d), _w2(p['ln']['g']), _w2(p['ln']['b']),
      p['w1']['w'], _w2(p['w1']['b']), p['w2']['w'], _w2(p['w2']['b']))
    return out.reshape(*lead, d)


def _ln_gelu_linear_kernel(x_ref, g_ref, b_ref, w_ref, bias_ref, o_ref):
    h = _gelu(_ln(x_ref[...], g_ref[...], b_ref[...]))
    o_ref[...] = _mm(h, w_ref[...]) + bias_ref[...]


def fused_ln_gelu_linear(x, ln_p, lin_p):
    lead, d = x.shape[:-1], x.shape[-1]
    m = lin_p['w'].shape[1]
    n = int(np.prod(lead))
    tn = _row_tile(n)
    out = pl.pallas_call(
        _ln_gelu_linear_kernel,
        out_shape=jax.ShapeDtypeStruct((n, m), jnp.float32),
        grid=(pl.cdiv(n, tn),),
        in_specs=[pl.BlockSpec((tn, d), lambda i: (i, 0)),
                  pl.BlockSpec((1, d), lambda i: (0, 0)),
                  pl.BlockSpec((1, d), lambda i: (0, 0)),
                  pl.BlockSpec((d, m), lambda i: (0, 0)),
                  pl.BlockSpec((1, m), lambda i: (0, 0))],
        out_specs=pl.BlockSpec((tn, m), lambda i: (i, 0)),
        compiler_params=_cp(1),
    )(x.reshape(n, d), _w2(ln_p['g']), _w2(ln_p['b']), lin_p['w'], _w2(lin_p['b']))
    return out.reshape(*lead, m)


def _encode_reparam_kernel(seq_ref, eps_ref, w_ref, b_ref, z_ref, mu_ref, lv_ref, *, s_dim):
    s = jnp.maximum(seq_ref[...], 0.0)                         # torch.relu
    zz = _mm(s, w_ref[...]) + b_ref[...]                       # (tn, 2S)
    mu = zz[:, :s_dim]
    lv = zz[:, s_dim:]
    mu_ref[...] = mu
    lv_ref[...] = lv
    z_ref[...] = mu + eps_ref[...] * jnp.exp(0.5 * lv)         # reparameterisation


def fused_encode_reparam(seq, eps, p):
    B, L, S = seq.shape
    n = B * L
    tn = _row_tile(n)
    z, mu, lv = pl.pallas_call(
        functools.partial(_encode_reparam_kernel, s_dim=S),
        out_shape=(jax.ShapeDtypeStruct((n, S), jnp.float32),) * 3,
        grid=(pl.cdiv(n, tn),),
        in_specs=[pl.BlockSpec((tn, S), lambda i: (i, 0)),
                  pl.BlockSpec((tn, S), lambda i: (i, 0)),
                  pl.BlockSpec((S, 2 * S), lambda i: (0, 0)),
                  pl.BlockSpec((1, 2 * S), lambda i: (0, 0))],
        out_specs=[pl.BlockSpec((tn, S), lambda i: (i, 0))] * 3,
        compiler_params=_cp(1),
    )(seq.reshape(n, S), eps.reshape(n, S), p['w'], _w2(p['b']))
    return z.reshape(B, L, S), mu.reshape(B, L, S), lv.reshape(B, L, S)


def _opm_kernel(msa_ref, seq_ref, lg_ref, lb_ref, wa_ref, ba_ref, wb_ref, bb_ref,
                wo_ref, bo_ref, o_ref, *, hidden, inv_depth):
    _, D, L, Em = msa_ref.shape
    H = hidden
    m = _ln(msa_ref[0].reshape(D * L, Em), lg_ref[...], lb_ref[...])
    a = (_mm(m, wa_ref[...]) + ba_ref[...]).reshape(D, L, H)
    b = (_mm(m, wb_ref[...]) + bb_ref[...]).reshape(D, L, H)
    wo = wo_ref[...]
    acc = seq_ref[0] + bo_ref[...]          # residual (seq = opm(msa) + seq) + out bias
    # depth-mean outer product folded straight into the (H*H -> S) projection so
    # the L x H x H tensor never leaves registers/VMEM.
    # TODO(synk): for large H restructure as a single (L, H*H) @ (H*H, S) MXU matmul.
    for h1 in range(H):
        col = jnp.sum(a[:, :, h1:h1 + 1] * b, axis=0) * inv_depth       # (L, H)
        acc = acc + _mm(col, wo[h1 * H:(h1 + 1) * H, :])
    o_ref[0] = acc


def fused_outer_product_mean(msa, seq, p):
    # TODO(synk): OuterProductMean source not provided; AF-style position-wise
    # outer product averaged over MSA depth is assumed.
    B, D, L, Em = msa.shape
    S = seq.shape[-1]
    H = p['a']['w'].shape[1]
    return pl.pallas_call(
        functools.partial(_opm_kernel, hidden=H, inv_depth=1.0 / D),
        out_shape=jax.ShapeDtypeStruct((B, L, S), jnp.float32),
        grid=(B,),
        in_specs=[pl.BlockSpec((1, D, L, Em), lambda i: (i, 0, 0, 0)),
                  pl.BlockSpec((1, L, S), lambda i: (i, 0, 0)),
                  pl.BlockSpec((1, Em), lambda i: (0, 0)),
                  pl.BlockSpec((1, Em), lambda i: (0, 0)),
                  pl.BlockSpec((Em, H), lambda i: (0, 0)),
                  pl.BlockSpec((1, H), lambda i: (0, 0)),
                  pl.BlockSpec((Em, H), lambda i: (0, 0)),
                  pl.BlockSpec((1, H), lambda i: (0, 0)),
                  pl.BlockSpec((H * H, S), lambda i: (0, 0)),
                  pl.BlockSpec((1, S), lambda i: (0, 0))],
        out_specs=pl.BlockSpec((1, L, S), lambda i: (i, 0, 0)),
        compiler_params=_cp(1),
    )(msa, seq, _w2(p['ln']['g']), _w2(p['ln']['b']),
      p['a']['w'], _w2(p['a']['b']), p['b']['w'], _w2(p['b']['b']),
      p['o']['w'], _w2(p['o']['b']))


def _pwa_kernel(msa_ref, seq_ref, mg_ref, mb_ref, wv_ref, wg_ref, bg_ref,
                sg_ref, sb_ref, watt_ref, wo_ref, bo_ref, o_ref, *, heads, dh):
    _, D, L, Em = msa_ref.shape
    m = _ln(msa_ref[0].reshape(D * L, Em), mg_ref[...], mb_ref[...])
    v = _mm(m, wv_ref[...])                                     # (D*L, heads*dh)
    g = jax.nn.sigmoid(_mm(m, wg_ref[...]) + bg_ref[...])       # gate
    s = _ln(seq_ref[0], sg_ref[...], sb_ref[...])               # (L, S)
    w = _softmax_axis0(_mm(s, watt_ref[...]))                   # (L, heads), softmax over L
    wo, bo = wo_ref[...], bo_ref[...]
    # TODO(synk): depth loop is statically unrolled (fine for small msa_depth);
    # for deep MSAs restructure as batched dots over the depth axis.
    for d in range(D):
        vd = v[d * L:(d + 1) * L, :]
        gd = g[d * L:(d + 1) * L, :]
        out_d = msa_ref[0, d] + bo                              # residual (pwa + msa)
        for h in range(heads):
            c0, c1 = h * dh, (h + 1) * dh
            avg = jnp.sum(vd[:, c0:c1] * w[:, h:h + 1], axis=0, keepdims=True)  # (1, dh)
            out_d = out_d + _mm(gd[:, c0:c1] * avg, wo[c0:c1, :])
        o_ref[0, d] = out_d


def fused_pair_weighted_averaging(msa, seq, p, heads, dh):
    # TODO(synk): PairWeightedAveraging source not provided; a seq-conditioned,
    # gated, softmax-over-positions weighted average is assumed (eval: no dropout).
    B, D, L, Em = msa.shape
    S = seq.shape[-1]
    hd = heads * dh
    return pl.pallas_call(
        functools.partial(_pwa_kernel, heads=heads, dh=dh),
        out_shape=jax.ShapeDtypeStruct((B, D, L, Em), jnp.float32),
        grid=(B,),
        in_specs=[pl.BlockSpec((1, D, L, Em), lambda i: (i, 0, 0, 0)),
                  pl.BlockSpec((1, L, S), lambda i: (i, 0, 0)),
                  pl.BlockSpec((1, Em), lambda i: (0, 0)),
                  pl.BlockSpec((1, Em), lambda i: (0, 0)),
                  pl.BlockSpec((Em, hd), lambda i: (0, 0)),
                  pl.BlockSpec((Em, hd), lambda i: (0, 0)),
                  pl.BlockSpec((1, hd), lambda i: (0, 0)),
                  pl.BlockSpec((1, S), lambda i: (0, 0)),
                  pl.BlockSpec((1, S), lambda i: (0, 0)),
                  pl.BlockSpec((S, heads), lambda i: (0, 0)),
                  pl.BlockSpec((hd, Em), lambda i: (0, 0)),
                  pl.BlockSpec((1, Em), lambda i: (0, 0))],
        out_specs=pl.BlockSpec((1, D, L, Em), lambda i: (i, 0, 0, 0)),
        compiler_params=_cp(1),
    )(msa, seq, _w2(p['msa_ln']['g']), _w2(p['msa_ln']['b']),
      p['v']['w'], p['g']['w'], _w2(p['g']['b']),
      _w2(p['seq_ln']['g']), _w2(p['seq_ln']['b']),
      p['att']['w'], p['o']['w'], _w2(p['o']['b']))


def _mha_kernel(x_ref, g_ref, b_ref, wq_ref, bq_ref, wk_ref, bk_ref,
                wv_ref, bv_ref, wo_ref, bo_ref, o_ref, *, heads):
    x = x_ref[0]                                   # (T, E)
    E = x.shape[-1]
    dh = E // heads
    scale = 1.0 / math.sqrt(dh)
    h = _ln(x, g_ref[...], b_ref[...])
    wq, bq = wq_ref[...], bq_ref[...]
    wk, bk = wk_ref[...], bk_ref[...]
    wv, bv = wv_ref[...], bv_ref[...]
    wo = wo_ref[...]
    out = x + bo_ref[...]                          # residual + out-proj bias
    for hh in range(heads):
        c0, c1 = hh * dh, (hh + 1) * dh
        q = _mm(h, wq[:, c0:c1]) + bq[:, c0:c1]
        k = _mm(h, wk[:, c0:c1]) + bk[:, c0:c1]
        v = _mm(h, wv[:, c0:c1]) + bv[:, c0:c1]
        p = _softmax_last(_mm_t(q, k) * scale)     # (T, T)
        out = out + _mm(_mm(p, v), wo[c0:c1, :])   # per-head slice of out projection
    o_ref[0] = out


def fused_mha(x, p, heads):
    """Pre-LN multi-head self-attention + residual; one grid step per sequence
    (independent -> sharded across TensorCores)."""
    BH, T, E = x.shape
    return pl.pallas_call(
        functools.partial(_mha_kernel, heads=heads),
        out_shape=jax.ShapeDtypeStruct((BH, T, E), jnp.float32),
        grid=(BH,),
        in_specs=[pl.BlockSpec((1, T, E), lambda i: (i, 0, 0)),
                  pl.BlockSpec((1, E), lambda i: (0, 0)),
                  pl.BlockSpec((1, E), lambda i: (0, 0)),
                  pl.BlockSpec((E, E), lambda i: (0, 0)),
                  pl.BlockSpec((1, E), lambda i: (0, 0)),
                  pl.BlockSpec((E, E), lambda i: (0, 0)),
                  pl.BlockSpec((1, E), lambda i: (0, 0)),
                  pl.BlockSpec((E, E), lambda i: (0, 0)),
                  pl.BlockSpec((1, E), lambda i: (0, 0)),
                  pl.BlockSpec((E, E), lambda i: (0, 0)),
                  pl.BlockSpec((1, E), lambda i: (0, 0))],
        out_specs=pl.BlockSpec((1, T, E), lambda i: (i, 0, 0)),
        compiler_params=_cp(1),
    )(x, _w2(p['ln']['g']), _w2(p['ln']['b']),
      p['q']['w'], _w2(p['q']['b']), p['k']['w'], _w2(p['k']['b']),
      p['v']['w'], _w2(p['v']['b']), p['o']['w'], _w2(p['o']['b']))


def _decoder_init_kernel(z_ref, perm_ref, pos_ref, wz_ref, wp_ref, bz_ref,
                         g_ref, b_ref, o_ref, *, depth):
    z = z_ref[0]                                   # (L, S)
    pp = _mm(perm_ref[0], pos_ref[...])            # perm @ pos table, (D, P)
    p_seq = _mm(z, wz_ref[...]) + bz_ref[...]      # z part of decode_z, (L, Dm)
    p_pos = _mm(pp, wp_ref[...])                   # pos part of decode_z, (D, Dm)
    # decode_z(concat(z, pos)) == z @ Wz + pos @ Wp + b, then before_norm.
    # TODO(synk): static unroll over msa depth; vectorize for large depth.
    for d in range(depth):
        o_ref[0, d] = _ln(p_seq + p_pos[d:d + 1, :], g_ref[...], b_ref[...])


def fused_decoder_init(z, perm, pos_table, dec_p, norm_p):
    B, L, S = z.shape
    D, P = pos_table.shape
    Dm = dec_p['w'].shape[1]
    wz = dec_p['w'][:S, :]
    wp = dec_p['w'][S:, :]
    return pl.pallas_call(
        functools.partial(_decoder_init_kernel, depth=D),
        out_shape=jax.ShapeDtypeStruct((B, D, L, Dm), jnp.float32),
        grid=(B,),
        in_specs=[pl.BlockSpec((1, L, S), lambda i: (i, 0, 0)),
                  pl.BlockSpec((1, D, D), lambda i: (i, 0, 0)),
                  pl.BlockSpec((D, P), lambda i: (0, 0)),
                  pl.BlockSpec((S, Dm), lambda i: (0, 0)),
                  pl.BlockSpec((P, Dm), lambda i: (0, 0)),
                  pl.BlockSpec((1, Dm), lambda i: (0, 0)),
                  pl.BlockSpec((1, Dm), lambda i: (0, 0)),
                  pl.BlockSpec((1, Dm), lambda i: (0, 0))],
        out_specs=pl.BlockSpec((1, D, L, Dm), lambda i: (i, 0, 0, 0)),
        compiler_params=_cp(1),
    )(z, perm, pos_table, wz, wp, _w2(dec_p['b']), _w2(norm_p['g']), _w2(norm_p['b']))


def _score_kernel(x_ref, n_ref, w_ref, b_ref, o_ref):
    x = x_ref[...] + n_ref[...] * 0.05             # node_features + noise * 0.05
    o_ref[...] = _mm(x, w_ref[...]) + b_ref[...]


def _perm_kernel(sc_ref, ss_ref, o_ref, *, tau_inv):
    # Builds perm.transpose(2,1) directly: column-softmax (over the raw-score
    # index) of -|score_i - sorted_j| / tau.
    q = -jnp.abs(sc_ref[0] - ss_ref[0]) * tau_inv  # (D, D)
    o_ref[0] = _softmax_axis0(q)


def permuter_forward(p, node, noise, tau=1.0):
    B, D, K = node.shape
    scores = pl.pallas_call(
        _score_kernel,
        out_shape=jax.ShapeDtypeStruct((B * D, 1), jnp.float32),
        grid=(1,),
        in_specs=[pl.BlockSpec((B * D, K), lambda i: (0, 0)),
                  pl.BlockSpec((B * D, K), lambda i: (0, 0)),
                  pl.BlockSpec((K, 1), lambda i: (0, 0)),
                  pl.BlockSpec((1, 1), lambda i: (0, 0))],
        out_specs=pl.BlockSpec((B * D, 1), lambda i: (0, 0)),
        compiler_params=_cp(1),
    )(node.reshape(B * D, K), noise.reshape(B * D, K), p['w'], _w2(p['b']))
    scores = scores.reshape(B, D, 1)
    scores_sorted = -jnp.sort(-scores, axis=1)     # descending sort (JAX glue)
    return pl.pallas_call(
        functools.partial(_perm_kernel, tau_inv=1.0 / tau),
        out_shape=jax.ShapeDtypeStruct((B, D, D), jnp.float32),
        grid=(B,),
        in_specs=[pl.BlockSpec((1, D, 1), lambda i: (i, 0, 0)),
                  pl.BlockSpec((1, 1, D), lambda i: (i, 0, 0))],
        out_specs=pl.BlockSpec((1, D, D), lambda i: (i, 0, 0)),
        compiler_params=_cp(1),
    )(scores, scores_sorted.reshape(B, 1, D))


# --------------------------------------------------------------------------
# model composition
# --------------------------------------------------------------------------
def msa_encoder(params, seq, msa_tok, eps, cfg):
    msa = params['embed'][msa_tok]                 # embedding gather (JAX glue)
    for lp in params['layers']:
        seq = fused_outer_product_mean(msa, seq, lp['opm'])
        msa = fused_pair_weighted_averaging(msa, seq, lp['pwa'],
                                            cfg['enc_pwa_heads'], cfg['enc_pwa_dh'])
        msa = fused_transition(msa, lp['msa_trans'])
        seq = fused_transition(seq, lp['seq_trans'])
    z, mu, logvar = fused_encode_reparam(seq, eps, params['encode_z'])
    return z, mu, logvar, msa


def axial_transformer_layer(x, p, num_heads):
    # TODO(synk): AxialTransformerLayer (ESM) source not provided; pre-LN untied
    # row attention + column attention + FFN (dropout = eval identity) assumed.
    B, D, L, E = x.shape
    x = fused_mha(x.reshape(B * D, L, E), p['row'], num_heads).reshape(B, D, L, E)
    xc = x.transpose(0, 2, 1, 3).reshape(B * L, D, E)        # only transpose needed
    xc = fused_mha(xc, p['col'], num_heads)
    x = xc.reshape(B, L, D, E).transpose(0, 2, 1, 3)
    return fused_transition(x, p['ffn'])                     # FFN + residual fused


def msa_decoder(params, z, perm, cfg):
    x = fused_decoder_init(z, perm, params['pos_table'],
                           params['decode_z'], params['before_norm'])
    for lp in params['layers']:
        x = axial_transformer_layer(x, lp, cfg['dec_heads'])
    return fused_ln_gelu_linear(x, params['after_norm'], params['to_logits'])


def msavae_forward(params, seq, msa_tok, eps, perm_noise, cfg):
    z, mu, logvar, msa = msa_encoder(params['encoder'], seq, msa_tok, eps, cfg)
    B, D, L, Em = msa.shape
    perm = permuter_forward(params['permuter'], msa.reshape(B, D, L * Em), perm_noise)
    logits = msa_decoder(params['decoder'], z, perm, cfg)
    return logits, perm, mu, logvar


# --------------------------------------------------------------------------
# deterministic parameter initialisation
# --------------------------------------------------------------------------
def sinusoidal_positional_encoding(length, dim):
    # TODO(synk): PositionalEncoding source not provided; standard sinusoidal table assumed.
    pos = np.arange(length)[:, None].astype(np.float64)
    i = np.arange(dim)[None, :]
    angle = pos / np.power(10000.0, (2 * (i // 2)) / dim)
    pe = np.zeros((length, dim))
    pe[:, 0::2] = np.sin(angle[:, 0::2])
    pe[:, 1::2] = np.cos(angle[:, 1::2])
    return jnp.asarray(pe, jnp.float32)


def init_params(key, cfg):
    keys = iter(jax.random.split(key, 512))

    def dense(din, dout, scale=0.1, bias=True):
        w = jax.random.normal(next(keys), (din, dout), jnp.float32) * scale
        b = (jax.random.normal(next(keys), (dout,), jnp.float32) * 0.01) if bias \
            else jnp.zeros((dout,), jnp.float32)
        return {'w': w, 'b': b}

    def ln(d):
        return {'g': jnp.ones((d,), jnp.float32), 'b': jnp.zeros((d,), jnp.float32)}

    A, Em, S = cfg['alphabet'], cfg['enc_msa_dim'], cfg['seq_dim']
    Hopm, heads, dh = cfg['enc_opm_hidden'], cfg['enc_pwa_heads'], cfg['enc_pwa_dh']
    L, Dm, P = cfg['max_seq_len'], cfg['dec_msa_dim'], cfg['dec_pos_dim']

    embed = jax.random.normal(next(keys), (A, Em), jnp.float32) * 0.1
    embed = embed.at[cfg['padding_idx']].set(0.0)              # nn.Embedding padding_idx row

    enc_layers = []
    for _ in range(cfg['enc_depth']):
        enc_layers.append({
            'opm': {'ln': ln(Em), 'a': dense(Em, Hopm), 'b': dense(Em, Hopm),
                    'o': dense(Hopm * Hopm, S)},
            'pwa': {'msa_ln': ln(Em), 'seq_ln': ln(S),
                    'v': dense(Em, heads * dh, bias=False),
                    'g': dense(Em, heads * dh),
                    'att': dense(S, heads, bias=False),
                    'o': dense(heads * dh, Em)},
            'msa_trans': {'ln': ln(Em), 'w1': dense(Em, 4 * Em), 'w2': dense(4 * Em, Em)},
            'seq_trans': {'ln': ln(S), 'w1': dense(S, 4 * S), 'w2': dense(4 * S, S)},
        })
    encoder = {'embed': embed, 'layers': enc_layers, 'encode_z': dense(S, 2 * S)}

    permuter_p = dense(L * Em, 1)

    def attn_block(d):
        return {'ln': ln(d), 'q': dense(d, d), 'k': dense(d, d),
                'v': dense(d, d), 'o': dense(d, d)}

    dec_layers = []
    for _ in range(cfg['dec_depth']):
        dec_layers.append({
            'row': attn_block(Dm),
            'col': attn_block(Dm),
            'ffn': {'ln': ln(Dm), 'w1': dense(Dm, cfg['dec_ffn']),
                    'w2': dense(cfg['dec_ffn'], Dm)},
        })
    # TODO(synk): LearnedPositionalEmbedding (embed_positions) is constructed in the
    # reference but never used in its forward, so it is omitted here.
    decoder = {'decode_z': dense(S + P, Dm), 'before_norm': ln(Dm), 'after_norm': ln(Dm),
               'layers': dec_layers, 'to_logits': dense(Dm, A),
               'pos_table': sinusoidal_positional_encoding(cfg['msa_depth'], P)}

    return {'encoder': encoder, 'permuter': permuter_p, 'decoder': decoder}


# --------------------------------------------------------------------------
if __name__ == "__main__":
    CFG = dict(batch=2, msa_depth=4, max_seq_len=8, alphabet=12, padding_idx=0,
               seq_dim=16, enc_msa_dim=16, enc_opm_hidden=8, enc_pwa_heads=2,
               enc_pwa_dh=8, enc_depth=1, dec_pos_dim=8, dec_msa_dim=16,
               dec_ffn=32, dec_heads=2, dec_depth=1)

    key = jax.random.PRNGKey(0)
    kp, kseq, kmsa, keps, knoise = jax.random.split(key, 5)
    params = init_params(kp, CFG)

    B, D, L = CFG['batch'], CFG['msa_depth'], CFG['max_seq_len']
    S, Em, A = CFG['seq_dim'], CFG['enc_msa_dim'], CFG['alphabet']

    seq = jax.random.normal(kseq, (B, L, S), jnp.float32)          # pooled sequence rep
    msa_tok = jax.random.randint(kmsa, (B, D, L), 0, A)            # MSA tokens
    eps = jax.random.normal(keps, (B, L, S), jnp.float32)          # VAE reparam noise
    perm_noise = jax.random.normal(knoise, (B, D, L * Em), jnp.float32)  # permuter noise

    fwd = jax.jit(lambda p, s, t, e, n: msavae_forward(p, s, t, e, n, CFG))
    logits, perm, mu, logvar = fwd(params, seq, msa_tok, eps, perm_noise)
    jax.block_until_ready((logits, perm, mu, logvar))

    assert logits.shape == (B, D, L, A)
    assert perm.shape == (B, D, D)
    assert mu.shape == (B, L, S) and logvar.shape == (B, L, S)
    assert bool(jnp.all(jnp.isfinite(logits))) and bool(jnp.all(jnp.isfinite(perm)))
    print("KERNEL_OK")
</pallas_src>

<mosaic_0001>
module attributes {stable_mosaic.version = 11 : i64} {
  func.func @_transition_kernel(%arg0: i32, %arg1: memref<64x16xf32, #tpu.memory_space<vmem>>, %arg2: memref<1x16xf32, #tpu.memory_space<vmem>>, %arg3: memref<1x16xf32, #tpu.memory_space<vmem>>, %arg4: memref<16x64xf32, #tpu.memory_space<vmem>>, %arg5: memref<1x64xf32, #tpu.memory_space<vmem>>, %arg6: memref<64x16xf32, #tpu.memory_space<vmem>>, %arg7: memref<1x16xf32, #tpu.memory_space<vmem>>, %arg8: memref<64x16xf32, #tpu.memory_space<vmem>>) attributes {dimension_semantics = [#tpu.dimension_semantics<parallel>], iteration_bounds = array<i64: 1>, scalar_prefetch = 0 : i64, scratch_operands = 0 : i64, tpu.core_type = #tpu.core_type<tc>, window_params = [{transform_indices = @transform_0, window_bounds = array<i64: 64, 16>}, {pipeline_mode = #tpu.pipeline_mode<synchronous>, transform_indices = @transform_1, window_bounds = array<i64: 1, 16>}, {pipeline_mode = #tpu.pipeline_mode<synchronous>, transform_indices = @transform_2, window_bounds = array<i64: 1, 16>}, {pipeline_mode = #tpu.pipeline_mode<synchronous>, transform_indices = @transform_3, window_bounds = array<i64: 16, 64>}, {pipeline_mode = #tpu.pipeline_mode<synchronous>, transform_indices = @transform_4, window_bounds = array<i64: 1, 64>}, {pipeline_mode = #tpu.pipeline_mode<synchronous>, transform_indices = @transform_5, window_bounds = array<i64: 64, 16>}, {pipeline_mode = #tpu.pipeline_mode<synchronous>, transform_indices = @transform_6, window_bounds = array<i64: 1, 16>}, {transform_indices = @transform_7, window_bounds = array<i64: 64, 16>}]} {
    %c0 = arith.constant 0 : index
    %c0_0 = arith.constant 0 : index
    %0 = vector.load %arg1[%c0, %c0_0] : memref<64x16xf32, #tpu.memory_space<vmem>>, vector<64x16xf32>
    %c0_1 = arith.constant 0 : index
    %c0_2 = arith.constant 0 : index
    %1 = vector.load %arg2[%c0_1, %c0_2] : memref<1x16xf32, #tpu.memory_space<vmem>>, vector<1x16xf32>
    %c0_3 = arith.constant 0 : index
    %c0_4 = arith.constant 0 : index
    %2 = vector.load %arg3[%c0_3, %c0_4] : memref<1x16xf32, #tpu.memory_space<vmem>>, vector<1x16xf32>
    %cst = arith.constant dense<0.000000e+00> : vector<64xf32>
    %3 = vector.multi_reduction <add>, %0, %cst [1] : vector<64x16xf32> to vector<64xf32>
    %4 = vector.shape_cast %3 : vector<64xf32> to vector<64x1xf32>
    %cst_5 = arith.constant 1.600000e+01 : f32
    %5 = vector.broadcast %cst_5 : f32 to vector<64x1xf32>
    %6 = arith.divf %4, %5 : vector<64x1xf32>
    %7 = vector.broadcast %6 : vector<64x1xf32> to vector<64x16xf32>
    %8 = arith.subf %0, %7 : vector<64x16xf32>
    %9 = arith.mulf %8, %8 : vector<64x16xf32>
    %cst_6 = arith.constant dense<0.000000e+00> : vector<64xf32>
    %10 = vector.multi_reduction <add>, %9, %cst_6 [1] : vector<64x16xf32> to vector<64xf32>
    %11 = vector.shape_cast %10 : vector<64xf32> to vector<64x1xf32>
    %cst_7 = arith.constant 1.600000e+01 : f32
    %12 = vector.broadcast %cst_7 : f32 to vector<64x1xf32>
    %13 = arith.divf %11, %12 : vector<64x1xf32>
    %cst_8 = arith.constant 9.99999974E-6 : f32
    %14 = vector.broadcast %cst_8 : f32 to vector<64x1xf32>
    %15 = arith.addf %13, %14 : vector<64x1xf32>
    %16 = math.rsqrt %15 : vector<64x1xf32>
    %17 = vector.broadcast %16 : vector<64x1xf32> to vector<64x16xf32>
    %18 = arith.mulf %8, %17 : vector<64x16xf32>
    %19 = vector.broadcast %1 : vector<1x16xf32> to vector<64x16xf32>
    %20 = arith.mulf %18, %19 : vector<64x16xf32>
    %21 = vector.broadcast %2 : vector<1x16xf32> to vector<64x16xf32>
    %22 = arith.addf %20, %21 : vector<64x16xf32>
    %c0_9 = arith.constant 0 : index
    %c0_10 = arith.constant 0 : index
    %23 = vector.load %arg4[%c0_9, %c0_10] : memref<16x64xf32, #tpu.memory_space<vmem>>, vector<16x64xf32>
    %24 = arith.truncf %22 : vector<64x16xf32> to vector<64x16xbf16>
    %25 = arith.truncf %23 : vector<16x64xf32> to vector<16x64xbf16>
    %cst_11 = arith.constant dense<0.000000e+00> : vector<64x64xf32>
    %26 = tpu.matmul %24, %25, %cst_11 {dimension_numbers = #tpu.dot_dimension_numbers<[1], [0], [0], [1], [0, 0, 1, 1], [], []>} : vector<64x16xbf16>, vector<16x64xbf16>, vector<64x64xf32> -> vector<64x64xf32>
    %c0_12 = arith.constant 0 : index
    %c0_13 = arith.constant 0 : index
    %27 = vector.load %arg5[%c0_12, %c0_13] : memref<1x64xf32, #tpu.memory_space<vmem>>, vector<1x64xf32>
    %28 = vector.broadcast %27 : vector<1x64xf32> to vector<64x64xf32>
    %29 = arith.addf %26, %28 : vector<64x64xf32>
    %30 = arith.mulf %29, %29 : vector<64x64xf32>
    %31 = arith.mulf %29, %30 : vector<64x64xf32>
    %cst_14 = arith.constant 4.471500e-02 : f32
    %32 = vector.broadcast %cst_14 : f32 to vector<64x64xf32>
    %33 = arith.mulf %32, %31 : vector<64x64xf32>
    %34 = arith.addf %29, %33 : vector<64x64xf32>
    %cst_15 = arith.constant 0.797884583 : f32
    %35 = vector.broadcast %cst_15 : f32 to vector<64x64xf32>
    %36 = arith.mulf %35, %34 : vector<64x64xf32>
    %37 = math.tanh %36 : vector<64x64xf32>
    %cst_16 = arith.constant 1.000000e+00 : f32
    %38 = vector.broadcast %cst_16 : f32 to vector<64x64xf32>
    %39 = arith.addf %38, %37 : vector<64x64xf32>
    %cst_17 = arith.constant 5.000000e-01 : f32
    %40 = vector.broadcast %cst_17 : f32 to vector<64x64xf32>
    %41 = arith.mulf %40, %39 : vector<64x64xf32>
    %42 = arith.mulf %29, %41 : vector<64x64xf32>
    %c0_18 = arith.constant 0 : index
    %c0_19 = arith.constant 0 : index
    %43 = vector.load %arg6[%c0_18, %c0_19] : memref<64x16xf32, #tpu.memory_space<vmem>>, vector<64x16xf32>
    %44 = arith.truncf %42 : vector<64x64xf32> to vector<64x64xbf16>
    %45 = arith.truncf %43 : vector<64x16xf32> to vector<64x16xbf16>
    %cst_20 = arith.constant dense<0.000000e+00> : vector<64x16xf32>
    %46 = tpu.matmul %44, %45, %cst_20 {dimension_numbers = #tpu.dot_dimension_numbers<[1], [0], [0], [1], [0, 0, 1, 1], [], []>} : vector<64x64xbf16>, vector<64x16xbf16>, vector<64x16xf32> -> vector<64x16xf32>
    %c0_21 = arith.constant 0 : index
    %c0_22 = arith.constant 0 : index
    %47 = vector.load %arg7[%c0_21, %c0_22] : memref<1x16xf32, #tpu.memory_space<vmem>>, vector<1x16xf32>
    %48 = vector.broadcast %47 : vector<1x16xf32> to vector<64x16xf32>
    %49 = arith.addf %46, %48 : vector<64x16xf32>
    %50 = arith.addf %49, %0 : vector<64x16xf32>
    %c0_23 = arith.constant 0 : index
    %c0_24 = arith.constant 0 : index
    %51 = vector.load %arg8[%c0_23, %c0_24] : memref<64x16xf32, #tpu.memory_space<vmem>>, vector<64x16xf32>
    tpu.vector_store %arg8[%c0_23, %c0_24], %50 {strides = array<i32>} : memref<64x16xf32, #tpu.memory_space<vmem>>, vector<64x16xf32>,
    return
  }
  func.func @transform_0(%arg0: i32) -> (i32, i32) {
    %c0_i32 = arith.constant 0 : i32
    %c0_i32_0 = arith.constant 0 : i32
    return %arg0, %c0_i32 : i32, i32
  }
  func.func @transform_1(%arg0: i32) -> (i32, i32) {
    %c0_i32 = arith.constant 0 : i32
    %c0_i32_0 = arith.constant 0 : i32
    %c0_i32_1 = arith.constant 0 : i32
    return %c0_i32, %c0_i32_0 : i32, i32
  }
  func.func @transform_2(%arg0: i32) -> (i32, i32) {
    %c0_i32 = arith.constant 0 : i32
    %c0_i32_0 = arith.constant 0 : i32
    %c0_i32_1 = arith.constant 0 : i32
    return %c0_i32, %c0_i32_0 : i32, i32
  }
  func.func @transform_3(%arg0: i32) -> (i32, i32) {
    %c0_i32 = arith.constant 0 : i32
    %c0_i32_0 = arith.constant 0 : i32
    %c0_i32_1 = arith.constant 0 : i32
    return %c0_i32, %c0_i32_0 : i32, i32
  }
  func.func @transform_4(%arg0: i32) -> (i32, i32) {
    %c0_i32 = arith.constant 0 : i32
    %c0_i32_0 = arith.constant 0 : i32
    %c0_i32_1 = arith.constant 0 : i32
    return %c0_i32, %c0_i32_0 : i32, i32
  }
  func.func @transform_5(%arg0: i32) -> (i32, i32) {
    %c0_i32 = arith.constant 0 : i32
    %c0_i32_0 = arith.constant 0 : i32
    %c0_i32_1 = arith.constant 0 : i32
    return %c0_i32, %c0_i32_0 : i32, i32
  }
  func.func @transform_6(%arg0: i32) -> (i32, i32) {
    %c0_i32 = arith.constant 0 : i32
    %c0_i32_0 = arith.constant 0 : i32
    %c0_i32_1 = arith.constant 0 : i32
    return %c0_i32, %c0_i32_0 : i32, i32
  }
  func.func @transform_7(%arg0: i32) -> (i32, i32) {
    %c0_i32 = arith.constant 0 : i32
    %c0_i32_0 = arith.constant 0 : i32
    return %arg0, %c0_i32 : i32, i32
  }
}

module attributes {stable_mosaic.version = 11 : i64} {
  func.func @_pwa_kernel(%arg0: i32, %arg1: memref<1x4x8x16xf32, #tpu.memory_space<vmem>>, %arg2: memref<1x8x16xf32, #tpu.memory_space<vmem>>, %arg3: memref<1x16xf32, #tpu.memory_space<vmem>>, %arg4: memref<1x16xf32, #tpu.memory_space<vmem>>, %arg5: memref<16x16xf32, #tpu.memory_space<vmem>>, %arg6: memref<16x16xf32, #tpu.memory_space<vmem>>, %arg7: memref<1x16xf32, #tpu.memory_space<vmem>>, %arg8: memref<1x16xf32, #tpu.memory_space<vmem>>, %arg9: memref<1x16xf32, #tpu.memory_space<vmem>>, %arg10: memref<16x2xf32, #tpu.memory_space<vmem>>, %arg11: memref<16x16xf32, #tpu.memory_space<vmem>>, %arg12: memref<1x16xf32, #tpu.memory_space<vmem>>, %arg13: memref<1x4x8x16xf32, #tpu.memory_space<vmem>>) attributes {dimension_semantics = [#tpu.dimension_semantics<parallel>], iteration_bounds = array<i64: 2>, scalar_prefetch = 0 : i64, scratch_operands = 0 : i64, tpu.core_type = #tpu.core_type<tc>, window_params = [{transform_indices = @transform_0, window_bounds = array<i64: 1, 4, 8, 16>}, {transform_indices = @transform_1, window_bounds = array<i64: 1, 8, 16>}, {pipeline_mode = #tpu.pipeline_mode<synchronous>, transform_indices = @transform_2, window_bounds = array<i64: 1, 16>}, {pipeline_mode = #tpu.pipeline_mode<synchronous>, transform_indices = @transform_3, window_bounds = array<i64: 1, 16>}, {pipeline_mode = #tpu.pipeline_mode<synchronous>, transform_indices = @transform_4, window_bounds = array<i64: 16, 16>}, {pipeline_mode = #tpu.pipeline_mode<synchronous>, transform_indices = @transform_5, window_bounds = array<i64: 16, 16>}, {pipeline_mode = #tpu.pipeline_mode<synchronous>, transform_indices = @transform_6, window_bounds = array<i64: 1, 16>}, {pipeline_mode = #tpu.pipeline_mode<synchronous>, transform_indices = @transform_7, window_bounds = array<i64: 1, 16>}, {pipeline_mode = #tpu.pipeline_mode<synchronous>, transform_indices = @transform_8, window_bounds = array<i64: 1, 16>}, {pipeline_mode = #tpu.pipeline_mode<synchronous>, transform_indices = @transform_9, window_bounds = array<i64: 16, 2>}, {pipeline_mode = #tpu.pipeline_mode<synchronous>, transform_indices = @transform_10, window_bounds = array<i64: 16, 16>}, {pipeline_mode = #tpu.pipeline_mode<synchronous>, transform_indices = @transform_11, window_bounds = array<i64: 1, 16>}, {transform_indices = @transform_12, window_bounds = array<i64: 1, 4, 8, 16>}]} {
    %c0 = arith.constant 0 : index
    %c0_0 = arith.constant 0 : index
    %c0_1 = arith.constant 0 : index
    %c0_2 = arith.constant 0 : index
    %0 = vector.load %arg1[%c0, %c0_0, %c0_1, %c0_2] : memref<1x4x8x16xf32, #tpu.memory_space<vmem>>, vector<1x4x8x16xf32>
    %1 = vector.shape_cast %0 : vector<1x4x8x16xf32> to vector<4x8x16xf32>
    %2 = vector.shape_cast %1 : vector<4x8x16xf32> to vector<32x16xf32>
    %c0_3 = arith.constant 0 : index
    %c0_4 = arith.constant 0 : index
    %3 = vector.load %arg3[%c0_3, %c0_4] : memref<1x16xf32, #tpu.memory_space<vmem>>, vector<1x16xf32>
    %c0_5 = arith.constant 0 : index
    %c0_6 = arith.constant 0 : index
    %4 = vector.load %arg4[%c0_5, %c0_6] : memref<1x16xf32, #tpu.memory_space<vmem>>, vector<1x16xf32>
    %cst = arith.constant dense<0.000000e+00> : vector<32xf32>
    %5 = vector.multi_reduction <add>, %2, %cst [1] : vector<32x16xf32> to vector<32xf32>
    %6 = vector.shape_cast %5 : vector<32xf32> to vector<32x1xf32>
    %cst_7 = arith.constant 1.600000e+01 : f32
    %7 = vector.broadcast %cst_7 : f32 to vector<32x1xf32>
    %8 = arith.divf %6, %7 : vector<32x1xf32>
    %9 = vector.broadcast %8 : vector<32x1xf32> to vector<32x16xf32>
    %10 = arith.subf %2, %9 : vector<32x16xf32>
    %11 = arith.mulf %10, %10 : vector<32x16xf32>
    %cst_8 = arith.constant dense<0.000000e+00> : vector<32xf32>
    %12 = vector.multi_reduction <add>, %11, %cst_8 [1] : vector<32x16xf32> to vector<32xf32>
    %13 = vector.shape_cast %12 : vector<32xf32> to vector<32x1xf32>
    %cst_9 = arith.constant 1.600000e+01 : f32
    %14 = vector.broadcast %cst_9 : f32 to vector<32x1xf32>
    %15 = arith.divf %13, %14 : vector<32x1xf32>
    %cst_10 = arith.constant 9.99999974E-6 : f32
    %16 = vector.broadcast %cst_10 : f32 to vector<32x1xf32>
    %17 = arith.addf %15, %16 : vector<32x1xf32>
    %18 = math.rsqrt %17 : vector<32x1xf32>
    %19 = vector.broadcast %18 : vector<32x1xf32> to vector<32x16xf32>
    %20 = arith.mulf %10, %19 : vector<32x16xf32>
    %21 = vector.broadcast %3 : vector<1x16xf32> to vector<32x16xf32>
    %22 = arith.mulf %20, %21 : vector<32x16xf32>
    %23 = vector.broadcast %4 : vector<1x16xf32> to vector<32x16xf32>
    %24 = arith.addf %22, %23 : vector<32x16xf32>
    %c0_11 = arith.constant 0 : index
    %c0_12 = arith.constant 0 : index
    %25 = vector.load %arg5[%c0_11, %c0_12] : memref<16x16xf32, #tpu.memory_space<vmem>>, vector<16x16xf32>
    %26 = arith.truncf %24 : vector<32x16xf32> to vector<32x16xbf16>
    %27 = arith.truncf %25 : vector<16x16xf32> to vector<16x16xbf16>
    %cst_13 = arith.constant dense<0.000000e+00> : vector<32x16xf32>
    %28 = tpu.matmul %26, %27, %cst_13 {dimension_numbers = #tpu.dot_dimension_numbers<[1], [0], [0], [1], [0, 0, 1, 1], [], []>} : vector<32x16xbf16>, vector<16x16xbf16>, vector<32x16xf32> -> vector<32x16xf32>
    %c0_14 = arith.constant 0 : index
    %c0_15 = arith.constant 0 : index
    %29 = vector.load %arg6[%c0_14, %c0_15] : memref<16x16xf32, #tpu.memory_space<vmem>>, vector<16x16xf32>
    %30 = arith.truncf %24 : vector<32x16xf32> to vector<32x16xbf16>
    %31 = arith.truncf %29 : vector<16x16xf32> to vector<16x16xbf16>
    %cst_16 = arith.constant dense<0.000000e+00> : vector<32x16xf32>
    %32 = tpu.matmul %30, %31, %cst_16 {dimension_numbers = #tpu.dot_dimension_numbers<[1], [0], [0], [1], [0, 0, 1, 1], [], []>} : vector<32x16xbf16>, vector<16x16xbf16>, vector<32x16xf32> -> vector<32x16xf32>
    %c0_17 = arith.constant 0 : index
    %c0_18 = arith.constant 0 : index
    %33 = vector.load %arg7[%c0_17, %c0_18] : memref<1x16xf32, #tpu.memory_space<vmem>>, vector<1x16xf32>
    %34 = vector.broadcast %33 : vector<1x16xf32> to vector<32x16xf32>
    %35 = arith.addf %32, %34 : vector<32x16xf32>
    %36 = arith.negf %35 : vector<32x16xf32>
    %37 = math.exp %36 : vector<32x16xf32>
    %cst_19 = arith.constant 1.000000e+00 : f32
    %38 = vector.broadcast %cst_19 : f32 to vector<32x16xf32>
    %39 = arith.addf %38, %37 : vector<32x16xf32>
    %40 = arith.divf %38, %39 : vector<32x16xf32>
    %c0_20 = arith.constant 0 : index
    %c0_21 = arith.constant 0 : index
    %c0_22 = arith.constant 0 : index
    %41 = vector.load %arg2[%c0_20, %c0_21, %c0_22] : memref<1x8x16xf32, #tpu.memory_space<vmem>>, vector<1x8x16xf32>
    %42 = vector.shape_cast %41 : vector<1x8x16xf32> to vector<8x16xf32>
    %c0_23 = arith.constant 0 : index
    %c0_24 = arith.constant 0 : index
    %43 = vector.load %arg8[%c0_23, %c0_24] : memref<1x16xf32, #tpu.memory_space<vmem>>, vector<1x16xf32>
    %c0_25 = arith.constant 0 : index
    %c0_26 = arith.constant 0 : index
    %44 = vector.load %arg9[%c0_25, %c0_26] : memref<1x16xf32, #tpu.memory_space<vmem>>, vector<1x16xf32>
    %cst_27 = arith.constant dense<0.000000e+00> : vector<8xf32>
    %45 = vector.multi_reduction <add>, %42, %cst_27 [1] : vector<8x16xf32> to vector<8xf32>
    %46 = vector.shape_cast %45 : vector<8xf32> to vector<8x1xf32>
    %cst_28 = arith.constant 1.600000e+01 : f32
    %47 = vector.broadcast %cst_28 : f32 to vector<8x1xf32>
    %48 = arith.divf %46, %47 : vector<8x1xf32>
    %49 = vector.broadcast %48 : vector<8x1xf32> to vector<8x16xf32>
    %50 = arith.subf %42, %49 : vector<8x16xf32>
    %51 = arith.mulf %50, %50 : vector<8x16xf32>
    %cst_29 = arith.constant dense<0.000000e+00> : vector<8xf32>
    %52 = vector.multi_reduction <add>, %51, %cst_29 [1] : vector<8x16xf32> to vector<8xf32>
    %53 = vector.shape_cast %52 : vector<8xf32> to vector<8x1xf32>
    %cst_30 = arith.constant 1.600000e+01 : f32
    %54 = vector.broadcast %cst_30 : f32 to vector<8x1xf32>
    %55 = arith.divf %53, %54 : vector<8x1xf32>
    %cst_31 = arith.constant 9.99999974E-6 : f32
    %56 = vector.broadcast %cst_31 : f32 to vector<8x1xf32>
    %57 = arith.addf %55, %56 : vector<8x1xf32>
    %58 = math.rsqrt %57 : vector<8x1xf32>
    %59 = vector.broadcast %58 : vector<8x1xf32> to vector<8x16xf32>
    %60 = arith.mulf %50, %59 : vector<8x16xf32>
    %61 = vector.broadcast %43 : vector<1x16xf32> to vector<8x16xf32>
    %62 = arith.mulf %60, %61 : vector<8x16xf32>
    %63 = vector.broadcast %44 : vector<1x16xf32> to vector<8x16xf32>
    %64 = arith.addf %62, %63 : vector<8x16xf32>
    %c0_32 = arith.constant 0 : index
    %c0_33 = arith.constant 0 : index
    %65 = vector.load %arg10[%c0_32, %c0_33] : memref<16x2xf32, #tpu.memory_space<vmem>>, vector<16x2xf32>
    %66 = arith.truncf %64 : vector<8x16xf32> to vector<8x16xbf16>
    %67 = arith.truncf %65 : vector<16x2xf32> to vector<16x2xbf16>
    %cst_34 = arith.constant dense<0.000000e+00> : vector<8x2xf32>
    %68 = tpu.matmul %66, %67, %cst_34 {dimension_numbers = #tpu.dot_dimension_numbers<[1], [0], [0], [1], [0, 0, 1, 1], [], []>} : vector<8x16xbf16>, vector<16x2xbf16>, vector<8x2xf32> -> vector<8x2xf32>
    %cst_35 = arith.constant dense<0xFF800000> : vector<2xf32>
    %69 = vector.multi_reduction <maximumf>, %68, %cst_35 [0] : vector<8x2xf32> to vector<2xf32>
    %70 = vector.shape_cast %69 : vector<2xf32> to vector<1x2xf32>
    %71 = vector.broadcast %70 : vector<1x2xf32> to vector<8x2xf32>
    %72 = arith.subf %68, %71 : vector<8x2xf32>
    %73 = math.exp %72 : vector<8x2xf32>
    %cst_36 = arith.constant dense<0.000000e+00> : vector<2xf32>
    %74 = vector.multi_reduction <add>, %73, %cst_36 [0] : vector<8x2xf32> to vector<2xf32>
    %75 = vector.shape_cast %74 : vector<2xf32> to vector<1x2xf32>
    %76 = tpu.reciprocal %75 {approx = true} : vector<1x2xf32> -> vector<1x2xf32>
    %77 = vector.broadcast %76 : vector<1x2xf32> to vector<8x2xf32>
    %78 = arith.mulf %73, %77 : vector<8x2xf32>
    %c0_37 = arith.constant 0 : index
    %c0_38 = arith.constant 0 : index
    %79 = vector.load %arg11[%c0_37, %c0_38] : memref<16x16xf32, #tpu.memory_space<vmem>>, vector<16x16xf32>
    %c0_39 = arith.constant 0 : index
    %c0_40 = arith.constant 0 : index
    %80 = vector.load %arg12[%c0_39, %c0_40] : memref<1x16xf32, #tpu.memory_space<vmem>>, vector<1x16xf32>
    %81 = vector.extract_strided_slice %28 {offsets = [0, 0], sizes = [8, 16], strides = [1, 1]} : vector<32x16xf32> to vector<8x16xf32>
    %82 = vector.extract_strided_slice %40 {offsets = [0, 0], sizes = [8, 16], strides = [1, 1]} : vector<32x16xf32> to vector<8x16xf32>
    %c0_41 = arith.constant 0 : index
    %c0_42 = arith.constant 0 : index
    %c0_43 = arith.constant 0 : index
    %c0_44 = arith.constant 0 : index
    %83 = vector.load %arg1[%c0_41, %c0_42, %c0_43, %c0_44] : memref<1x4x8x16xf32, #tpu.memory_space<vmem>>, vector<1x1x8x16xf32>
    %84 = vector.shape_cast %83 : vector<1x1x8x16xf32> to vector<8x16xf32>
    %85 = vector.broadcast %80 : vector<1x16xf32> to vector<8x16xf32>
    %86 = arith.addf %84, %85 : vector<8x16xf32>
    %87 = vector.extract_strided_slice %81 {offsets = [0, 0], sizes = [8, 8], strides = [1, 1]} : vector<8x16xf32> to vector<8x8xf32>
    %88 = vector.extract_strided_slice %78 {offsets = [0, 0], sizes = [8, 1], strides = [1, 1]} : vector<8x2xf32> to vector<8x1xf32>
    %89 = vector.broadcast %88 : vector<8x1xf32> to vector<8x8xf32>
    %90 = arith.mulf %87, %89 : vector<8x8xf32>
    %cst_45 = arith.constant dense<0.000000e+00> : vector<8xf32>
    %91 = vector.multi_reduction <add>, %90, %cst_45 [0] : vector<8x8xf32> to vector<8xf32>
    %92 = vector.shape_cast %91 : vector<8xf32> to vector<1x8xf32>
    %93 = vector.extract_strided_slice %82 {offsets = [0, 0], sizes = [8, 8], strides = [1, 1]} : vector<8x16xf32> to vector<8x8xf32>
    %94 = vector.broadcast %92 : vector<1x8xf32> to vector<8x8xf32>
    %95 = arith.mulf %93, %94 : vector<8x8xf32>
    %96 = vector.extract_strided_slice %79 {offsets = [0, 0], sizes = [8, 16], strides = [1, 1]} : vector<16x16xf32> to vector<8x16xf32>
    %97 = arith.truncf %95 : vector<8x8xf32> to vector<8x8xbf16>
    %98 = arith.truncf %96 : vector<8x16xf32> to vector<8x16xbf16>
    %cst_46 = arith.constant dense<0.000000e+00> : vector<8x16xf32>
    %99 = tpu.matmul %97, %98, %cst_46 {dimension_numbers = #tpu.dot_dimension_numbers<[1], [0], [0], [1], [0, 0, 1, 1], [], []>} : vector<8x8xbf16>, vector<8x16xbf16>, vector<8x16xf32> -> vector<8x16xf32>
    %100 = arith.addf %86, %99 : vector<8x16xf32>
    %101 = vector.extract_strided_slice %81 {offsets = [0, 8], sizes = [8, 8], strides = [1, 1]} : vector<8x16xf32> to vector<8x8xf32>
    %102 = vector.extract_strided_slice %78 {offsets = [0, 1], sizes = [8, 1], strides = [1, 1]} : vector<8x2xf32> to vector<8x1xf32>
    %103 = vector.broadcast %102 : vector<8x1xf32> to vector<8x8xf32>
    %104 = arith.mulf %101, %103 : vector<8x8xf32>
    %cst_47 = arith.constant dense<0.000000e+00> : vector<8xf32>
    %105 = vector.multi_reduction <add>, %104, %cst_47 [0] : vector<8x8xf32> to vector<8xf32>
    %106 = vector.shape_cast %105 : vector<8xf32> to vector<1x8xf32>
    %107 = vector.extract_strided_slice %82 {offsets = [0, 8], sizes = [8, 8], strides = [1, 1]} : vector<8x16xf32> to vector<8x8xf32>
    %108 = vector.broadcast %106 : vector<1x8xf32> to vector<8x8xf32>
    %109 = arith.mulf %107, %108 : vector<8x8xf32>
    %110 = vector.extract_strided_slice %79 {offsets = [8, 0], sizes = [8, 16], strides = [1, 1]} : vector<16x16xf32> to vector<8x16xf32>
    %111 = arith.truncf %109 : vector<8x8xf32> to vector<8x8xbf16>
    %112 = arith.truncf %110 : vector<8x16xf32> to vector<8x16xbf16>
    %cst_48 = arith.constant dense<0.000000e+00> : vector<8x16xf32>
    %113 = tpu.matmul %111, %112, %cst_48 {dimension_numbers = #tpu.dot_dimension_numbers<[1], [0], [0], [1], [0, 0, 1, 1], [], []>} : vector<8x8xbf16>, vector<8x16xbf16>, vector<8x16xf32> -> vector<8x16xf32>
    %114 = arith.addf %100, %113 : vector<8x16xf32>
    %c0_49 = arith.constant 0 : index
    %c0_50 = arith.constant 0 : index
    %c0_51 = arith.constant 0 : index
    %c0_52 = arith.constant 0 : index
    %115 = vector.load %arg13[%c0_49, %c0_50, %c0_51, %c0_52] : memref<1x4x8x16xf32, #tpu.memory_space<vmem>>, vector<1x1x8x16xf32>
    %116 = vector.shape_cast %115 : vector<1x1x8x16xf32> to vector<8x16xf32>
    %117 = vector.shape_cast %114 : vector<8x16xf32> to vector<1x1x8x16xf32>
    tpu.vector_store %arg13[%c0_49, %c0_50, %c0_51, %c0_52], %117 {strides = array<i32>} : memref<1x4x8x16xf32, #tpu.memory_space<vmem>>, vector<1x1x8x16xf32>,
    %118 = vector.extract_strided_slice %28 {offsets = [8, 0], sizes = [8, 16], strides = [1, 1]} : vector<32x16xf32> to vector<8x16xf32>
    %119 = vector.extract_strided_slice %40 {offsets = [8, 0], sizes = [8, 16], strides = [1, 1]} : vector<32x16xf32> to vector<8x16xf32>
    %c0_53 = arith.constant 0 : index
    %c1 = arith.constant 1 : index
    %c0_54 = arith.constant 0 : index
    %c0_55 = arith.constant 0 : index
    %120 = vector.load %arg1[%c0_53, %c1, %c0_54, %c0_55] : memref<1x4x8x16xf32, #tpu.memory_space<vmem>>, vector<1x1x8x16xf32>
    %121 = vector.shape_cast %120 : vector<1x1x8x16xf32> to vector<8x16xf32>
    %122 = vector.broadcast %80 : vector<1x16xf32> to vector<8x16xf32>
    %123 = arith.addf %121, %122 : vector<8x16xf32>
    %124 = vector.extract_strided_slice %118 {offsets = [0, 0], sizes = [8, 8], strides = [1, 1]} : vector<8x16xf32> to vector<8x8xf32>
    %125 = vector.extract_strided_slice %78 {offsets = [0, 0], sizes = [8, 1], strides = [1, 1]} : vector<8x2xf32> to vector<8x1xf32>
    %126 = vector.broadcast %125 : vector<8x1xf32> to vector<8x8xf32>
    %127 = arith.mulf %124, %126 : vector<8x8xf32>
    %cst_56 = arith.constant dense<0.000000e+00> : vector<8xf32>
    %128 = vector.multi_reduction <add>, %127, %cst_56 [0] : vector<8x8xf32> to vector<8xf32>
    %129 = vector.shape_cast %128 : vector<8xf32> to vector<1x8xf32>
    %130 = vector.extract_strided_slice %119 {offsets = [0, 0], sizes = [8, 8], strides = [1, 1]} : vector<8x16xf32> to vector<8x8xf32>
    %131 = vector.broadcast %129 : vector<1x8xf32> to vector<8x8xf32>
    %132 = arith.mulf %130, %131 : vector<8x8xf32>
    %133 = vector.extract_strided_slice %79 {offsets = [0, 0], sizes = [8, 16], strides = [1, 1]} : vector<16x16xf32> to vector<8x16xf32>
    %134 = arith.truncf %132 : vector<8x8xf32> to vector<8x8xbf16>
    %135 = arith.truncf %133 : vector<8x16xf32> to vector<8x16xbf16>
    %cst_57 = arith.constant dense<0.000000e+00> : vector<8x16xf32>
    %136 = tpu.matmul %134, %135, %cst_57 {dimension_numbers = #tpu.dot_dimension_numbers<[1], [0], [0], [1], [0, 0, 1, 1], [], []>} : vector<8x8xbf16>, vector<8x16xbf16>, vector<8x16xf32> -> vector<8x16xf32>
    %137 = arith.addf %123, %136 : vector<8x16xf32>
    %138 = vector.extract_strided_slice %118 {offsets = [0, 8], sizes = [8, 8], strides = [1, 1]} : vector<8x16xf32> to vector<8x8xf32>
    %139 = vector.extract_strided_slice %78 {offsets = [0, 1], sizes = [8, 1], strides = [1, 1]} : vector<8x2xf32> to vector<8x1xf32>
    %140 = vector.broadcast %139 : vector<8x1xf32> to vector<8x8xf32>
    %141 = arith.mulf %138, %140 : vector<8x8xf32>
    %cst_58 = arith.constant dense<0.000000e+00> : vector<8xf32>
    %142 = vector.multi_reduction <add>, %141, %cst_58 [0] : vector<8x8xf32> to vector<8xf32>
    %143 = vector.shape_cast %142 : vector<8xf32> to vector<1x8xf32>
    %144 = vector.extract_strided_slice %119 {offsets = [0, 8], sizes = [8, 8], strides = [1, 1]} : vector<8x16xf32> to vector<8x8xf32>
    %145 = vector.broadcast %143 : vector<1x8xf32> to vector<8x8xf32>
    %146 = arith.mulf %144, %145 : vector<8x8xf32>
    %147 = vector.extract_strided_slice %79 {offsets = [8, 0], sizes = [8, 16], strides = [1, 1]} : vector<16x16xf32> to vector<8x16xf32>
    %148 = arith.truncf %146 : vector<8x8xf32> to vector<8x8xbf16>
    %149 = arith.truncf %147 : vector<8x16xf32> to vector<8x16xbf16>
    %cst_59 = arith.constant dense<0.000000e+00> : vector<8x16xf32>
    %150 = tpu.matmul %148, %149, %cst_59 {dimension_numbers = #tpu.dot_dimension_numbers<[1], [0], [0], [1], [0, 0, 1, 1], [], []>} : vector<8x8xbf16>, vector<8x16xbf16>, vector<8x16xf32> -> vector<8x16xf32>
    %151 = arith.addf %137, %150 : vector<8x16xf32>
    %c0_60 = arith.constant 0 : index
    %c1_61 = arith.constant 1 : index
    %c0_62 = arith.constant 0 : index
    %c0_63 = arith.constant 0 : index
    %152 = vector.load %arg13[%c0_60, %c1_61, %c0_62, %c0_63] : memref<1x4x8x16xf32, #tpu.memory_space<vmem>>, vector<1x1x8x16xf32>
    %153 = vector.shape_cast %152 : vector<1x1x8x16xf32> to vector<8x16xf32>
    %154 = vector.shape_cast %151 : vector<8x16xf32> to vector<1x1x8x16xf32>
    tpu.vector_store %arg13[%c0_60, %c1_61, %c0_62, %c0_63], %154 {strides = array<i32>} : memref<1x4x8x16xf32, #tpu.memory_space<vmem>>, vector<1x1x8x16xf32>,
    %155 = vector.extract_strided_slice %28 {offsets = [16, 0], sizes = [8, 16], strides = [1, 1]} : vector<32x16xf32> to vector<8x16xf32>
    %156 = vector.extract_strided_slice %40 {offsets = [16, 0], sizes = [8, 16], strides = [1, 1]} : vector<32x16xf32> to vector<8x16xf32>
    %c0_64 = arith.constant 0 : index
    %c2 = arith.constant 2 : index
    %c0_65 = arith.constant 0 : index
    %c0_66 = arith.constant 0 : index
    %157 = vector.load %arg1[%c0_64, %c2, %c0_65, %c0_66] : memref<1x4x8x16xf32, #tpu.memory_space<vmem>>, vector<1x1x8x16xf32>
    %158 = vector.shape_cast %157 : vector<1x1x8x16xf32> to vector<8x16xf32>
    %159 = vector.broadcast %80 : vector<1x16xf32> to vector<8x16xf32>
    %160 = arith.addf %158, %159 : vector<8x16xf32>
    %161 = vector.extract_strided_slice %155 {offsets = [0, 0], sizes = [8, 8], strides = [1, 1]} : vector<8x16xf32> to vector<8x8xf32>
    %162 = vector.extract_strided_slice %78 {offsets = [0, 0], sizes = [8, 1], strides = [1, 1]} : vector<8x2xf32> to vector<8x1xf32>
    %163 = vector.broadcast %162 : vector<8x1xf32> to vector<8x8xf32>
    %164 = arith.mulf %161, %163 : vector<8x8xf32>
    %cst_67 = arith.constant dense<0.000000e+00> : vector<8xf32>
    %165 = vector.multi_reduction <add>, %164, %cst_67 [0] : vector<8x8xf32> to vector<8xf32>
    %166 = vector.shape_cast %165 : vector<8xf32> to vector<1x8xf32>
    %167 = vector.extract_strided_slice %156 {offsets = [0, 0], sizes = [8, 8], strides = [1, 1]} : vector<8x16xf32> to vector<8x8xf32>
    %168 = vector.broadcast %166 : vector<1x8xf32> to vector<8x8xf32>
    %169 = arith.mulf %167, %168 : vector<8x8xf32>
    %170 = vector.extract_strided_slice %79 {offsets = [0, 0], sizes = [8, 16], strides = [1, 1]} : vector<16x16xf32> to vector<8x16xf32>
    %171 = arith.truncf %169 : vector<8x8xf32> to vector<8x8xbf16>
    %172 = arith.truncf %170 : vector<8x16xf32> to vector<8x16xbf16>
    %cst_68 = arith.constant dense<0.000000e+00> : vector<8x16xf32>
    %173 = tpu.matmul %171, %172, %cst_68 {dimension_numbers = #tpu.dot_dimension_numbers<[1], [0], [0], [1], [0, 0, 1, 1], [], []>} : vector<8x8xbf16>, vector<8x16xbf16>, vector<8x16xf32> -> vector<8x16xf32>
    %174 = arith.addf %160, %173 : vector<8x16xf32>
    %175 = vector.extract_strided_slice %155 {offsets = [0, 8], sizes = [8, 8], strides = [1, 1]} : vector<8x16xf32> to vector<8x8xf32>
    %176 = vector.extract_strided_slice %78 {offsets = [0, 1], sizes = [8, 1], strides = [1, 1]} : vector<8x2xf32> to vector<8x1xf32>
    %177 = vector.broadcast %176 : vector<8x1xf32> to vector<8x8xf32>
    %178 = arith.mulf %175, %177 : vector<8x8xf32>
    %cst_69 = arith.constant dense<0.000000e+00> : vector<8xf32>
    %179 = vector.multi_reduction <add>, %178, %cst_69 [0] : vector<8x8xf32> to vector<8xf32>
    %180 = vector.shape_cast %179 : vector<8xf32> to vector<1x8xf32>
    %181 = vector.extract_strided_slice %156 {offsets = [0, 8], sizes = [8, 8], strides = [1, 1]} : vector<8x16xf32> to vector<8x8xf32>
    %182 = vector.broadcast %180 : vector<1x8xf32> to vector<8x8xf32>
    %183 = arith.mulf %181, %182 : vector<8x8xf32>
    %184 = vector.extract_strided_slice %79 {offsets = [8, 0], sizes = [8, 16], strides = [1, 1]} : vector<16x16xf32> to vector<8x16xf32>
    %185 = arith.truncf %183 : vector<8x8xf32> to vector<8x8xbf16>
    %186 = arith.truncf %184 : vector<8x16xf32> to vector<8x16xbf16>
    %cst_70 = arith.constant dense<0.000000e+00> : vector<8x16xf32>
    %187 = tpu.matmul %185, %186, %cst_70 {dimension_numbers = #tpu.dot_dimension_numbers<[1], [0], [0], [1], [0, 0, 1, 1], [], []>} : vector<8x8xbf16>, vector<8x16xbf16>, vector<8x16xf32> -> vector<8x16xf32>
    %188 = arith.addf %174, %187 : vector<8x16xf32>
    %c0_71 = arith.constant 0 : index
    %c2_72 = arith.constant 2 : index
    %c0_73 = arith.constant 0 : index
    %c0_74 = arith.constant 0 : index
    %189 = vector.load %arg13[%c0_71, %c2_72, %c0_73, %c0_74] : memref<1x4x8x16xf32, #tpu.memory_space<vmem>>, vector<1x1x8x16xf32>
    %190 = vector.shape_cast %189 : vector<1x1x8x16xf32> to vector<8x16xf32>
    %191 = vector.shape_cast %188 : vector<8x16xf32> to vector<1x1x8x16xf32>
    tpu.vector_store %arg13[%c0_71, %c2_72, %c0_73, %c0_74], %191 {strides = array<i32>} : memref<1x4x8x16xf32, #tpu.memory_space<vmem>>, vector<1x1x8x16xf32>,
    %192 = vector.extract_strided_slice %28 {offsets = [24, 0], sizes = [8, 16], strides = [1, 1]} : vector<32x16xf32> to vector<8x16xf32>
    %193 = vector.extract_strided_slice %40 {offsets = [24, 0], sizes = [8, 16], strides = [1, 1]} : vector<32x16xf32> to vector<8x16xf32>
    %c0_75 = arith.constant 0 : index
    %c3 = arith.constant 3 : index
    %c0_76 = arith.constant 0 : index
    %c0_77 = arith.constant 0 : index
    %194 = vector.load %arg1[%c0_75, %c3, %c0_76, %c0_77] : memref<1x4x8x16xf32, #tpu.memory_space<vmem>>, vector<1x1x8x16xf32>
    %195 = vector.shape_cast %194 : vector<1x1x8x16xf32> to vector<8x16xf32>
    %196 = vector.broadcast %80 : vector<1x16xf32> to vector<8x16xf32>
    %197 = arith.addf %195, %196 : vector<8x16xf32>
    %198 = vector.extract_strided_slice %192 {offsets = [0, 0], sizes = [8, 8], strides = [1, 1]} : vector<8x16xf32> to vector<8x8xf32>
    %199 = vector.extract_strided_slice %78 {offsets = [0, 0], sizes = [8, 1], strides = [1, 1]} : vector<8x2xf32> to vector<8x1xf32>
    %200 = vector.broadcast %199 : vector<8x1xf32> to vector<8x8xf32>
    %201 = arith.mulf %198, %200 : vector<8x8xf32>
    %cst_78 = arith.constant dense<0.000000e+00> : vector<8xf32>
    %202 = vector.multi_reduction <add>, %201, %cst_78 [0] : vector<8x8xf32> to vector<8xf32>
    %203 = vector.shape_cast %202 : vector<8xf32> to vector<1x8xf32>
    %204 = vector.extract_strided_slice %193 {offsets = [0, 0], sizes = [8, 8], strides = [1, 1]} : vector<8x16xf32> to vector<8x8xf32>
    %205 = vector.broadcast %203 : vector<1x8xf32> to vector<8x8xf32>
    %206 = arith.mulf %204, %205 : vector<8x8xf32>
    %207 = vector.extract_strided_slice %79 {offsets = [0, 0], sizes = [8, 16], strides = [1, 1]} : vector<16x16xf32> to vector<8x16xf32>
    %208 = arith.truncf %206 : vector<8x8xf32> to vector<8x8xbf16>
    %209 = arith.truncf %207 : vector<8x16xf32> to vector<8x16xbf16>
    %cst_79 = arith.constant dense<0.000000e+00> : vector<8x16xf32>
    %210 = tpu.matmul %208, %209, %cst_79 {dimension_numbers = #tpu.dot_dimension_numbers<[1], [0], [0], [1], [0, 0, 1, 1], [], []>} : vector<8x8xbf16>, vector<8x16xbf16>, vector<8x16xf32> -> vector<8x16xf32>
    %211 = arith.addf %197, %210 : vector<8x16xf32>
    %212 = vector.extract_strided_slice %192 {offsets = [0, 8], sizes = [8, 8], strides = [1, 1]} : vector<8x16xf32> to vector<8x8xf32>
    %213 = vector.extract_strided_slice %78 {offsets = [0, 1], sizes = [8, 1], strides = [1, 1]} : vector<8x2xf32> to vector<8x1xf32>
    %214 = vector.broadcast %213 : vector<8x1xf32> to vector<8x8xf32>
    %215 = arith.mulf %212, %214 : vector<8x8xf32>
    %cst_80 = arith.constant dense<0.000000e+00> : vector<8xf32>
    %216 = vector.multi_reduction <add>, %215, %cst_80 [0] : vector<8x8xf32> to vector<8xf32>
    %217 = vector.shape_cast %216 : vector<8xf32> to vector<1x8xf32>
    %218 = vector.extract_strided_slice %193 {offsets = [0, 8], sizes = [8, 8], strides = [1, 1]} : vector<8x16xf32> to vector<8x8xf32>
    %219 = vector.broadcast %217 : vector<1x8xf32> to vector<8x8xf32>
    %220 = arith.mulf %218, %219 : vector<8x8xf32>
    %221 = vector.extract_strided_slice %79 {offsets = [8, 0], sizes = [8, 16], strides = [1, 1]} : vector<16x16xf32> to vector<8x16xf32>
    %222 = arith.truncf %220 : vector<8x8xf32> to vector<8x8xbf16>
    %223 = arith.truncf %221 : vector<8x16xf32> to vector<8x16xbf16>
    %cst_81 = arith.constant dense<0.000000e+00> : vector<8x16xf32>
    %224 = tpu.matmul %222, %223, %cst_81 {dimension_numbers = #tpu.dot_dimension_numbers<[1], [0], [0], [1], [0, 0, 1, 1], [], []>} : vector<8x8xbf16>, vector<8x16xbf16>, vector<8x16xf32> -> vector<8x16xf32>
    %225 = arith.addf %211, %224 : vector<8x16xf32>
    %c0_82 = arith.constant 0 : index
    %c3_83 = arith.constant 3 : index
    %c0_84 = arith.constant 0 : index
    %c0_85 = arith.constant 0 : index
    %226 = vector.load %arg13[%c0_82, %c3_83, %c0_84, %c0_85] : memref<1x4x8x16xf32, #tpu.memory_space<vmem>>, vector<1x1x8x16xf32>
    %227 = vector.shape_cast %226 : vector<1x1x8x16xf32> to vector<8x16xf32>
    %228 = vector.shape_cast %225 : vector<8x16xf32> to vector<1x1x8x16xf32>
    tpu.vector_store %arg13[%c0_82, %c3_83, %c0_84, %c0_85], %228 {strides = array<i32>} : memref<1x4x8x16xf32, #tpu.memory_space<vmem>>, vector<1x1x8x16xf32>,
    return
  }
  func.func @transform_0(%arg0: i32) -> (i32, i32, i32, i32) {
    %c0_i32 = arith.constant 0 : i32
    %c0_i32_0 = arith.constant 0 : i32
    %c0_i32_1 = arith.constant 0 : i32
    %c0_i32_2 = arith.constant 0 : i32
    return %arg0, %c0_i32, %c0_i32_0, %c0_i32_1 : i32, i32, i32, i32
  }
  func.func @transform_1(%arg0: i32) -> (i32, i32, i32) {
    %c0_i32 = arith.constant 0 : i32
    %c0_i32_0 = arith.constant 0 : i32
    %c0_i32_1 = arith.constant 0 : i32
    return %arg0, %c0_i32, %c0_i32_0 : i32, i32, i32
  }
  func.func @transform_2(%arg0: i32) -> (i32, i32) {
    %c0_i32 = arith.constant 0 : i32
    %c0_i32_0 = arith.constant 0 : i32
    %c0_i32_1 = arith.constant 0 : i32
    return %c0_i32, %c0_i32_0 : i32, i32
  }
  func.func @transform_3(%arg0: i32) -> (i32, i32) {
    %c0_i32 = arith.constant 0 : i32
    %c0_i32_0 = arith.constant 0 : i32
    %c0_i32_1 = arith.constant 0 : i32
    return %c0_i32, %c0_i32_0 : i32, i32
  }
  func.func @transform_4(%arg0: i32) -> (i32, i32) {
    %c0_i32 = arith.constant 0 : i32
    %c0_i32_0 = arith.constant 0 : i32
    %c0_i32_1 = arith.constant 0 : i32
    return %c0_i32, %c0_i32_0 : i32, i32
  }
  func.func @transform_5(%arg0: i32) -> (i32, i32) {
    %c0_i32 = arith.constant 0 : i32
    %c0_i32_0 = arith.constant 0 : i32
    %c0_i32_1 = arith.constant 0 : i32
    return %c0_i32, %c0_i32_0 : i32, i32
  }
  func.func @transform_6(%arg0: i32) -> (i32, i32) {
    %c0_i32 = arith.constant 0 : i32
    %c0_i32_0 = arith.constant 0 : i32
    %c0_i32_1 = arith.constant 0 : i32
    return %c0_i32, %c0_i32_0 : i32, i32
  }
  func.func @transform_7(%arg0: i32) -> (i32, i32) {
    %c0_i32 = arith.constant 0 : i32
    %c0_i32_0 = arith.constant 0 : i32
    %c0_i32_1 = arith.constant 0 : i32
    return %c0_i32, %c0_i32_0 : i32, i32
  }
  func.func @transform_8(%arg0: i32) -> (i32, i32) {
    %c0_i32 = arith.constant 0 : i32
    %c0_i32_0 = arith.constant 0 : i32
    %c0_i32_1 = arith.constant 0 : i32
    return %c0_i32, %c0_i32_0 : i32, i32
  }
  func.func @transform_9(%arg0: i32) -> (i32, i32) {
    %c0_i32 = arith.constant 0 : i32
    %c0_i32_0 = arith.constant 0 : i32
    %c0_i32_1 = arith.constant 0 : i32
    return %c0_i32, %c0_i32_0 : i32, i32
  }
  func.func @transform_10(%arg0: i32) -> (i32, i32) {
    %c0_i32 = arith.constant 0 : i32
    %c0_i32_0 = arith.constant 0 : i32
    %c0_i32_1 = arith.constant 0 : i32
    return %c0_i32, %c0_i32_0 : i32, i32
  }
  func.func @transform_11(%arg0: i32) -> (i32, i32) {
    %c0_i32 = arith.constant 0 : i32
    %c0_i32_0 = arith.constant 0 : i32
    %c0_i32_1 = arith.constant 0 : i32
    return %c0_i32, %c0_i32_0 : i32, i32
  }
  func.func @transform_12(%arg0: i32) -> (i32, i32, i32, i32) {
    %c0_i32 = arith.constant 0 : i32
    %c0_i32_0 = arith.constant 0 : i32
    %c0_i32_1 = arith.constant 0 : i32
    %c0_i32_2 = arith.constant 0 : i32
    return %arg0, %c0_i32, %c0_i32_0, %c0_i32_1 : i32, i32, i32, i32
  }
}

module attributes {stable_mosaic.version = 11 : i64} {
  func.func @_opm_kernel(%arg0: i32, %arg1: memref<1x4x8x16xf32, #tpu.memory_space<vmem>>, %arg2: memref<1x8x16xf32, #tpu.memory_space<vmem>>, %arg3: memref<1x16xf32, #tpu.memory_space<vmem>>, %arg4: memref<1x16xf32, #tpu.memory_space<vmem>>, %arg5: memref<16x8xf32, #tpu.memory_space<vmem>>, %arg6: memref<1x8xf32, #tpu.memory_space<vmem>>, %arg7: memref<16x8xf32, #tpu.memory_space<vmem>>, %arg8: memref<1x8xf32, #tpu.memory_space<vmem>>, %arg9: memref<64x16xf32, #tpu.memory_space<vmem>>, %arg10: memref<1x16xf32, #tpu.memory_space<vmem>>, %arg11: memref<1x8x16xf32, #tpu.memory_space<vmem>>) attributes {dimension_semantics = [#tpu.dimension_semantics<parallel>], iteration_bounds = array<i64: 2>, scalar_prefetch = 0 : i64, scratch_operands = 0 : i64, tpu.core_type = #tpu.core_type<tc>, window_params = [{transform_indices = @transform_0, window_bounds = array<i64: 1, 4, 8, 16>}, {transform_indices = @transform_1, window_bounds = array<i64: 1, 8, 16>}, {pipeline_mode = #tpu.pipeline_mode<synchronous>, transform_indices = @transform_2, window_bounds = array<i64: 1, 16>}, {pipeline_mode = #tpu.pipeline_mode<synchronous>, transform_indices = @transform_3, window_bounds = array<i64: 1, 16>}, {pipeline_mode = #tpu.pipeline_mode<synchronous>, transform_indices = @transform_4, window_bounds = array<i64: 16, 8>}, {pipeline_mode = #tpu.pipeline_mode<synchronous>, transform_indices = @transform_5, window_bounds = array<i64: 1, 8>}, {pipeline_mode = #tpu.pipeline_mode<synchronous>, transform_indices = @transform_6, window_bounds = array<i64: 16, 8>}, {pipeline_mode = #tpu.pipeline_mode<synchronous>, transform_indices = @transform_7, window_bounds = array<i64: 1, 8>}, {pipeline_mode = #tpu.pipeline_mode<synchronous>, transform_indices = @transform_8, window_bounds = array<i64: 64, 16>}, {pipeline_mode = #tpu.pipeline_mode<synchronous>, transform_indices = @transform_9, window_bounds = array<i64: 1, 16>}, {transform_indices = @transform_10, window_bounds = array<i64: 1, 8, 16>}]} {
    %c0 = arith.constant 0 : index
    %c0_0 = arith.constant 0 : index
    %c0_1 = arith.constant 0 : index
    %c0_2 = arith.constant 0 : index
    %0 = vector.load %arg1[%c0, %c0_0, %c0_1, %c0_2] : memref<1x4x8x16xf32, #tpu.memory_space<vmem>>, vector<1x4x8x16xf32>
    %1 = vector.shape_cast %0 : vector<1x4x8x16xf32> to vector<4x8x16xf32>
    %2 = vector.shape_cast %1 : vector<4x8x16xf32> to vector<32x16xf32>
    %c0_3 = arith.constant 0 : index
    %c0_4 = arith.constant 0 : index
    %3 = vector.load %arg3[%c0_3, %c0_4] : memref<1x16xf32, #tpu.memory_space<vmem>>, vector<1x16xf32>
    %c0_5 = arith.constant 0 : index
    %c0_6 = arith.constant 0 : index
    %4 = vector.load %arg4[%c0_5, %c0_6] : memref<1x16xf32, #tpu.memory_space<vmem>>, vector<1x16xf32>
    %cst = arith.constant dense<0.000000e+00> : vector<32xf32>
    %5 = vector.multi_reduction <add>, %2, %cst [1] : vector<32x16xf32> to vector<32xf32>
    %6 = vector.shape_cast %5 : vector<32xf32> to vector<32x1xf32>
    %cst_7 = arith.constant 1.600000e+01 : f32
    %7 = vector.broadcast %cst_7 : f32 to vector<32x1xf32>
    %8 = arith.divf %6, %7 : vector<32x1xf32>
    %9 = vector.broadcast %8 : vector<32x1xf32> to vector<32x16xf32>
    %10 = arith.subf %2, %9 : vector<32x16xf32>
    %11 = arith.mulf %10, %10 : vector<32x16xf32>
    %cst_8 = arith.constant dense<0.000000e+00> : vector<32xf32>
    %12 = vector.multi_reduction <add>, %11, %cst_8 [1] : vector<32x16xf32> to vector<32xf32>
    %13 = vector.shape_cast %12 : vector<32xf32> to vector<32x1xf32>
    %cst_9 = arith.constant 1.600000e+01 : f32
    %14 = vector.broadcast %cst_9 : f32 to vector<32x1xf32>
    %15 = arith.divf %13, %14 : vector<32x1xf32>
    %cst_10 = arith.constant 9.99999974E-6 : f32
    %16 = vector.broadcast %cst_10 : f32 to vector<32x1xf32>
    %17 = arith.addf %15, %16 : vector<32x1xf32>
    %18 = math.rsqrt %17 : vector<32x1xf32>
    %19 = vector.broadcast %18 : vector<32x1xf32> to vector<32x16xf32>
    %20 = arith.mulf %10, %19 : vector<32x16xf32>
    %21 = vector.broadcast %3 : vector<1x16xf32> to vector<32x16xf32>
    %22 = arith.mulf %20, %21 : vector<32x16xf32>
    %23 = vector.broadcast %4 : vector<1x16xf32> to vector<32x16xf32>
    %24 = arith.addf %22, %23 : vector<32x16xf32>
    %c0_11 = arith.constant 0 : index
    %c0_12 = arith.constant 0 : index
    %25 = vector.load %arg5[%c0_11, %c0_12] : memref<16x8xf32, #tpu.memory_space<vmem>>, vector<16x8xf32>
    %26 = arith.truncf %24 : vector<32x16xf32> to vector<32x16xbf16>
    %27 = arith.truncf %25 : vector<16x8xf32> to vector<16x8xbf16>
    %cst_13 = arith.constant dense<0.000000e+00> : vector<32x8xf32>
    %28 = tpu.matmul %26, %27, %cst_13 {dimension_numbers = #tpu.dot_dimension_numbers<[1], [0], [0], [1], [0, 0, 1, 1], [], []>} : vector<32x16xbf16>, vector<16x8xbf16>, vector<32x8xf32> -> vector<32x8xf32>
    %c0_14 = arith.constant 0 : index
    %c0_15 = arith.constant 0 : index
    %29 = vector.load %arg6[%c0_14, %c0_15] : memref<1x8xf32, #tpu.memory_space<vmem>>, vector<1x8xf32>
    %30 = vector.broadcast %29 : vector<1x8xf32> to vector<32x8xf32>
    %31 = arith.addf %28, %30 : vector<32x8xf32>
    %32 = vector.shape_cast %31 : vector<32x8xf32> to vector<4x8x8xf32>
    %c0_16 = arith.constant 0 : index
    %c0_17 = arith.constant 0 : index
    %33 = vector.load %arg7[%c0_16, %c0_17] : memref<16x8xf32, #tpu.memory_space<vmem>>, vector<16x8xf32>
    %34 = arith.truncf %24 : vector<32x16xf32> to vector<32x16xbf16>
    %35 = arith.truncf %33 : vector<16x8xf32> to vector<16x8xbf16>
    %cst_18 = arith.constant dense<0.000000e+00> : vector<32x8xf32>
    %36 = tpu.matmul %34, %35, %cst_18 {dimension_numbers = #tpu.dot_dimension_numbers<[1], [0], [0], [1], [0, 0, 1, 1], [], []>} : vector<32x16xbf16>, vector<16x8xbf16>, vector<32x8xf32> -> vector<32x8xf32>
    %c0_19 = arith.constant 0 : index
    %c0_20 = arith.constant 0 : index
    %37 = vector.load %arg8[%c0_19, %c0_20] : memref<1x8xf32, #tpu.memory_space<vmem>>, vector<1x8xf32>
    %38 = vector.broadcast %37 : vector<1x8xf32> to vector<32x8xf32>
    %39 = arith.addf %36, %38 : vector<32x8xf32>
    %40 = vector.shape_cast %39 : vector<32x8xf32> to vector<4x8x8xf32>
    %c0_21 = arith.constant 0 : index
    %c0_22 = arith.constant 0 : index
    %41 = vector.load %arg9[%c0_21, %c0_22] : memref<64x16xf32, #tpu.memory_space<vmem>>, vector<64x16xf32>
    %c0_23 = arith.constant 0 : index
    %c0_24 = arith.constant 0 : index
    %c0_25 = arith.constant 0 : index
    %42 = vector.load %arg2[%c0_23, %c0_24, %c0_25] : memref<1x8x16xf32, #tpu.memory_space<vmem>>, vector<1x8x16xf32>
    %43 = vector.shape_cast %42 : vector<1x8x16xf32> to vector<8x16xf32>
    %c0_26 = arith.constant 0 : index
    %c0_27 = arith.constant 0 : index
    %44 = vector.load %arg10[%c0_26, %c0_27] : memref<1x16xf32, #tpu.memory_space<vmem>>, vector<1x16xf32>
    %45 = vector.broadcast %44 : vector<1x16xf32> to vector<8x16xf32>
    %46 = arith.addf %43, %45 : vector<8x16xf32>
    %47 = vector.extract_strided_slice %32 {offsets = [0, 0, 0], sizes = [4, 8, 1], strides = [1, 1, 1]} : vector<4x8x8xf32> to vector<4x8x1xf32>
    %48 = vector.broadcast %47 : vector<4x8x1xf32> to vector<4x8x8xf32>
    %49 = arith.mulf %48, %40 : vector<4x8x8xf32>
    %cst_28 = arith.constant dense<0.000000e+00> : vector<8x8xf32>
    %50 = vector.multi_reduction <add>, %49, %cst_28 [0] : vector<4x8x8xf32> to vector<8x8xf32>
    %cst_29 = arith.constant 2.500000e-01 : f32
    %51 = vector.broadcast %cst_29 : f32 to vector<8x8xf32>
    %52 = arith.mulf %50, %51 : vector<8x8xf32>
    %53 = vector.extract_strided_slice %41 {offsets = [0, 0], sizes = [8, 16], strides = [1, 1]} : vector<64x16xf32> to vector<8x16xf32>
    %54 = arith.truncf %52 : vector<8x8xf32> to vector<8x8xbf16>
    %55 = arith.truncf %53 : vector<8x16xf32> to vector<8x16xbf16>
    %cst_30 = arith.constant dense<0.000000e+00> : vector<8x16xf32>
    %56 = tpu.matmul %54, %55, %cst_30 {dimension_numbers = #tpu.dot_dimension_numbers<[1], [0], [0], [1], [0, 0, 1, 1], [], []>} : vector<8x8xbf16>, vector<8x16xbf16>, vector<8x16xf32> -> vector<8x16xf32>
    %57 = arith.addf %46, %56 : vector<8x16xf32>
    %58 = vector.extract_strided_slice %32 {offsets = [0, 0, 1], sizes = [4, 8, 1], strides = [1, 1, 1]} : vector<4x8x8xf32> to vector<4x8x1xf32>
    %59 = vector.broadcast %58 : vector<4x8x1xf32> to vector<4x8x8xf32>
    %60 = arith.mulf %59, %40 : vector<4x8x8xf32>
    %cst_31 = arith.constant dense<0.000000e+00> : vector<8x8xf32>
    %61 = vector.multi_reduction <add>, %60, %cst_31 [0] : vector<4x8x8xf32> to vector<8x8xf32>
    %cst_32 = arith.constant 2.500000e-01 : f32
    %62 = vector.broadcast %cst_32 : f32 to vector<8x8xf32>
    %63 = arith.mulf %61, %62 : vector<8x8xf32>
    %64 = vector.extract_strided_slice %41 {offsets = [8, 0], sizes = [8, 16], strides = [1, 1]} : vector<64x16xf32> to vector<8x16xf32>
    %65 = arith.truncf %63 : vector<8x8xf32> to vector<8x8xbf16>
    %66 = arith.truncf %64 : vector<8x16xf32> to vector<8x16xbf16>
    %cst_33 = arith.constant dense<0.000000e+00> : vector<8x16xf32>
    %67 = tpu.matmul %65, %66, %cst_33 {dimension_numbers = #tpu.dot_dimension_numbers<[1], [0], [0], [1], [0, 0, 1, 1], [], []>} : vector<8x8xbf16>, vector<8x16xbf16>, vector<8x16xf32> -> vector<8x16xf32>
    %68 = arith.addf %57, %67 : vector<8x16xf32>
    %69 = vector.extract_strided_slice %32 {offsets = [0, 0, 2], sizes = [4, 8, 1], strides = [1, 1, 1]} : vector<4x8x8xf32> to vector<4x8x1xf32>
    %70 = vector.broadcast %69 : vector<4x8x1xf32> to vector<4x8x8xf32>
    %71 = arith.mulf %70, %40 : vector<4x8x8xf32>
    %cst_34 = arith.constant dense<0.000000e+00> : vector<8x8xf32>
    %72 = vector.multi_reduction <add>, %71, %cst_34 [0] : vector<4x8x8xf32> to vector<8x8xf32>
    %cst_35 = arith.constant 2.500000e-01 : f32
    %73 = vector.broadcast %cst_35 : f32 to vector<8x8xf32>
    %74 = arith.mulf %72, %73 : vector<8x8xf32>
    %75 = vector.extract_strided_slice %41 {offsets = [16, 0], sizes = [8, 16], strides = [1, 1]} : vector<64x16xf32> to vector<8x16xf32>
    %76 = arith.truncf %74 : vector<8x8xf32> to vector<8x8xbf16>
    %77 = arith.truncf %75 : vector<8x16xf32> to vector<8x16xbf16>
    %cst_36 = arith.constant dense<0.000000e+00> : vector<8x16xf32>
    %78 = tpu.matmul %76, %77, %cst_36 {dimension_numbers = #tpu.dot_dimension_numbers<[1], [0], [0], [1], [0, 0, 1, 1], [], []>} : vector<8x8xbf16>, vector<8x16xbf16>, vector<8x16xf32> -> vector<8x16xf32>
    %79 = arith.addf %68, %78 : vector<8x16xf32>
    %80 = vector.extract_strided_slice %32 {offsets = [0, 0, 3], sizes = [4, 8, 1], strides = [1, 1, 1]} : vector<4x8x8xf32> to vector<4x8x1xf32>
    %81 = vector.broadcast %80 : vector<4x8x1xf32> to vector<4x8x8xf32>
    %82 = arith.mulf %81, %40 : vector<4x8x8xf32>
    %cst_37 = arith.constant dense<0.000000e+00> : vector<8x8xf32>
    %83 = vector.multi_reduction <add>, %82, %cst_37 [0] : vector<4x8x8xf32> to vector<8x8xf32>
    %cst_38 = arith.constant 2.500000e-01 : f32
    %84 = vector.broadcast %cst_38 : f32 to vector<8x8xf32>
    %85 = arith.mulf %83, %84 : vector<8x8xf32>
    %86 = vector.extract_strided_slice %41 {offsets = [24, 0], sizes = [8, 16], strides = [1, 1]} : vector<64x16xf32> to vector<8x16xf32>
    %87 = arith.truncf %85 : vector<8x8xf32> to vector<8x8xbf16>
    %88 = arith.truncf %86 : vector<8x16xf32> to vector<8x16xbf16>
    %cst_39 = arith.constant dense<0.000000e+00> : vector<8x16xf32>
    %89 = tpu.matmul %87, %88, %cst_39 {dimension_numbers = #tpu.dot_dimension_numbers<[1], [0], [0], [1], [0, 0, 1, 1], [], []>} : vector<8x8xbf16>, vector<8x16xbf16>, vector<8x16xf32> -> vector<8x16xf32>
    %90 = arith.addf %79, %89 : vector<8x16xf32>
    %91 = vector.extract_strided_slice %32 {offsets = [0, 0, 4], sizes = [4, 8, 1], strides = [1, 1, 1]} : vector<4x8x8xf32> to vector<4x8x1xf32>
    %92 = vector.broadcast %91 : vector<4x8x1xf32> to vector<4x8x8xf32>
    %93 = arith.mulf %92, %40 : vector<4x8x8xf32>
    %cst_40 = arith.constant dense<0.000000e+00> : vector<8x8xf32>
    %94 = vector.multi_reduction <add>, %93, %cst_40 [0] : vector<4x8x8xf32> to vector<8x8xf32>
    %cst_41 = arith.constant 2.500000e-01 : f32
    %95 = vector.broadcast %cst_41 : f32 to vector<8x8xf32>
    %96 = arith.mulf %94, %95 : vector<8x8xf32>
    %97 = vector.extract_strided_slice %41 {offsets = [32, 0], sizes = [8, 16], strides = [1, 1]} : vector<64x16xf32> to vector<8x16xf32>
    %98 = arith.truncf %96 : vector<8x8xf32> to vector<8x8xbf16>
    %99 = arith.truncf %97 : vector<8x16xf32> to vector<8x16xbf16>
    %cst_42 = arith.constant dense<0.000000e+00> : vector<8x16xf32>
    %100 = tpu.matmul %98, %99, %cst_42 {dimension_numbers = #tpu.dot_dimension_numbers<[1], [0], [0], [1], [0, 0, 1, 1], [], []>} : vector<8x8xbf16>, vector<8x16xbf16>, vector<8x16xf32> -> vector<8x16xf32>
    %101 = arith.addf %90, %100 : vector<8x16xf32>
    %102 = vector.extract_strided_slice %32 {offsets = [0, 0, 5], sizes = [4, 8, 1], strides = [1, 1, 1]} : vector<4x8x8xf32> to vector<4x8x1xf32>
    %103 = vector.broadcast %102 : vector<4x8x1xf32> to vector<4x8x8xf32>
    %104 = arith.mulf %103, %40 : vector<4x8x8xf32>
    %cst_43 = arith.constant dense<0.000000e+00> : vector<8x8xf32>
    %105 = vector.multi_reduction <add>, %104, %cst_43 [0] : vector<4x8x8xf32> to vector<8x8xf32>
    %cst_44 = arith.constant 2.500000e-01 : f32
    %106 = vector.broadcast %cst_44 : f32 to vector<8x8xf32>
    %107 = arith.mulf %105, %106 : vector<8x8xf32>
    %108 = vector.extract_strided_slice %41 {offsets = [40, 0], sizes = [8, 16], strides = [1, 1]} : vector<64x16xf32> to vector<8x16xf32>
    %109 = arith.truncf %107 : vector<8x8xf32> to vector<8x8xbf16>
    %110 = arith.truncf %108 : vector<8x16xf32> to vector<8x16xbf16>
    %cst_45 = arith.constant dense<0.000000e+00> : vector<8x16xf32>
    %111 = tpu.matmul %109, %110, %cst_45 {dimension_numbers = #tpu.dot_dimension_numbers<[1], [0], [0], [1], [0, 0, 1, 1], [], []>} : vector<8x8xbf16>, vector<8x16xbf16>, vector<8x16xf32> -> vector<8x16xf32>
    %112 = arith.addf %101, %111 : vector<8x16xf32>
    %113 = vector.extract_strided_slice %32 {offsets = [0, 0, 6], sizes = [4, 8, 1], strides = [1, 1, 1]} : vector<4x8x8xf32> to vector<4x8x1xf32>
    %114 = vector.broadcast %113 : vector<4x8x1xf32> to vector<4x8x8xf32>
    %115 = arith.mulf %114, %40 : vector<4x8x8xf32>
    %cst_46 = arith.constant dense<0.000000e+00> : vector<8x8xf32>
    %116 = vector.multi_reduction <add>, %115, %cst_46 [0] : vector<4x8x8xf32> to vector<8x8xf32>
    %cst_47 = arith.constant 2.500000e-01 : f32
    %117 = vector.broadcast %cst_47 : f32 to vector<8x8xf32>
    %118 = arith.mulf %116, %117 : vector<8x8xf32>
    %119 = vector.extract_strided_slice %41 {offsets = [48, 0], sizes = [8, 16], strides = [1, 1]} : vector<64x16xf32> to vector<8x16xf32>
    %120 = arith.truncf %118 : vector<8x8xf32> to vector<8x8xbf16>
    %121 = arith.truncf %119 : vector<8x16xf32> to vector<8x16xbf16>
    %cst_48 = arith.constant dense<0.000000e+00> : vector<8x16xf32>
    %122 = tpu.matmul %120, %121, %cst_48 {dimension_numbers = #tpu.dot_dimension_numbers<[1], [0], [0], [1], [0, 0, 1, 1], [], []>} : vector<8x8xbf16>, vector<8x16xbf16>, vector<8x16xf32> -> vector<8x16xf32>
    %123 = arith.addf %112, %122 : vector<8x16xf32>
    %124 = vector.extract_strided_slice %32 {offsets = [0, 0, 7], sizes = [4, 8, 1], strides = [1, 1, 1]} : vector<4x8x8xf32> to vector<4x8x1xf32>
    %125 = vector.broadcast %124 : vector<4x8x1xf32> to vector<4x8x8xf32>
    %126 = arith.mulf %125, %40 : vector<4x8x8xf32>
    %cst_49 = arith.constant dense<0.000000e+00> : vector<8x8xf32>
    %127 = vector.multi_reduction <add>, %126, %cst_49 [0] : vector<4x8x8xf32> to vector<8x8xf32>
    %cst_50 = arith.constant 2.500000e-01 : f32
    %128 = vector.broadcast %cst_50 : f32 to vector<8x8xf32>
    %129 = arith.mulf %127, %128 : vector<8x8xf32>
    %130 = vector.extract_strided_slice %41 {offsets = [56, 0], sizes = [8, 16], strides = [1, 1]} : vector<64x16xf32> to vector<8x16xf32>
    %131 = arith.truncf %129 : vector<8x8xf32> to vector<8x8xbf16>
    %132 = arith.truncf %130 : vector<8x16xf32> to vector<8x16xbf16>
    %cst_51 = arith.constant dense<0.000000e+00> : vector<8x16xf32>
    %133 = tpu.matmul %131, %132, %cst_51 {dimension_numbers = #tpu.dot_dimension_numbers<[1], [0], [0], [1], [0, 0, 1, 1], [], []>} : vector<8x8xbf16>, vector<8x16xbf16>, vector<8x16xf32> -> vector<8x16xf32>
    %134 = arith.addf %123, %133 : vector<8x16xf32>
    %c0_52 = arith.constant 0 : index
    %c0_53 = arith.constant 0 : index
    %c0_54 = arith.constant 0 : index
    %135 = vector.load %arg11[%c0_52, %c0_53, %c0_54] : memref<1x8x16xf32, #tpu.memory_space<vmem>>, vector<1x8x16xf32>
    %136 = vector.shape_cast %135 : vector<1x8x16xf32> to vector<8x16xf32>
    %137 = vector.shape_cast %134 : vector<8x16xf32> to vector<1x8x16xf32>
    tpu.vector_store %arg11[%c0_52, %c0_53, %c0_54], %137 {strides = array<i32>} : memref<1x8x16xf32, #tpu.memory_space<vmem>>, vector<1x8x16xf32>,
    return
  }
  func.func @transform_0(%arg0: i32) -> (i32, i32, i32, i32) {
    %c0_i32 = arith.constant 0 : i32
    %c0_i32_0 = arith.constant 0 : i32
    %c0_i32_1 = arith.constant 0 : i32
    %c0_i32_2 = arith.constant 0 : i32
    return %arg0, %c0_i32, %c0_i32_0, %c0_i32_1 : i32, i32, i32, i32
  }
  func.func @transform_1(%arg0: i32) -> (i32, i32, i32) {
    %c0_i32 = arith.constant 0 : i32
    %c0_i32_0 = arith.constant 0 : i32
    %c0_i32_1 = arith.constant 0 : i32
    return %arg0, %c0_i32, %c0_i32_0 : i32, i32, i32
  }
  func.func @transform_2(%arg0: i32) -> (i32, i32) {
    %c0_i32 = arith.constant 0 : i32
    %c0_i32_0 = arith.constant 0 : i32
    %c0_i32_1 = arith.constant 0 : i32
    return %c0_i32, %c0_i32_0 : i32, i32
  }
  func.func @transform_3(%arg0: i32) -> (i32, i32) {
    %c0_i32 = arith.constant 0 : i32
    %c0_i32_0 = arith.constant 0 : i32
    %c0_i32_1 = arith.constant 0 : i32
    return %c0_i32, %c0_i32_0 : i32, i32
  }
  func.func @transform_4(%arg0: i32) -> (i32, i32) {
    %c0_i32 = arith.constant 0 : i32
    %c0_i32_0 = arith.constant 0 : i32
    %c0_i32_1 = arith.constant 0 : i32
    return %c0_i32, %c0_i32_0 : i32, i32
  }
  func.func @transform_5(%arg0: i32) -> (i32, i32) {
    %c0_i32 = arith.constant 0 : i32
    %c0_i32_0 = arith.constant 0 : i32
    %c0_i32_1 = arith.constant 0 : i32
    return %c0_i32, %c0_i32_0 : i32, i32
  }
  func.func @transform_6(%arg0: i32) -> (i32, i32) {
    %c0_i32 = arith.constant 0 : i32
    %c0_i32_0 = arith.constant 0 : i32
    %c0_i32_1 = arith.constant 0 : i32
    return %c0_i32, %c0_i32_0 : i32, i32
  }
  func.func @transform_7(%arg0: i32) -> (i32, i32) {
    %c0_i32 = arith.constant 0 : i32
    %c0_i32_0 = arith.constant 0 : i32
    %c0_i32_1 = arith.constant 0 : i32
    return %c0_i32, %c0_i32_0 : i32, i32
  }
  func.func @transform_8(%arg0: i32) -> (i32, i32) {
    %c0_i32 = arith.constant 0 : i32
    %c0_i32_0 = arith.constant 0 : i32
    %c0_i32_1 = arith.constant 0 : i32
    return %c0_i32, %c0_i32_0 : i32, i32
  }
  func.func @transform_9(%arg0: i32) -> (i32, i32) {
    %c0_i32 = arith.constant 0 : i32
    %c0_i32_0 = arith.constant 0 : i32
    %c0_i32_1 = arith.constant 0 : i32
    return %c0_i32, %c0_i32_0 : i32, i32
  }
  func.func @transform_10(%arg0: i32) -> (i32, i32, i32) {
    %c0_i32 = arith.constant 0 : i32
    %c0_i32_0 = arith.constant 0 : i32
    %c0_i32_1 = arith.constant 0 : i32
    return %arg0, %c0_i32, %c0_i32_0 : i32, i32, i32
  }
}

module attributes {stable_mosaic.version = 11 : i64} {
  func.func @_score_kernel(%arg0: i32, %arg1: memref<8x128xf32, #tpu.memory_space<vmem>>, %arg2: memref<8x128xf32, #tpu.memory_space<vmem>>, %arg3: memref<128x1xf32, #tpu.memory_space<vmem>>, %arg4: memref<1x1xf32, #tpu.memory_space<vmem>>, %arg5: memref<8x1xf32, #tpu.memory_space<vmem>>) attributes {dimension_semantics = [#tpu.dimension_semantics<parallel>], iteration_bounds = array<i64: 1>, scalar_prefetch = 0 : i64, scratch_operands = 0 : i64, tpu.core_type = #tpu.core_type<tc>, window_params = [{pipeline_mode = #tpu.pipeline_mode<synchronous>, transform_indices = @transform_0, window_bounds = array<i64: 8, 128>}, {pipeline_mode = #tpu.pipeline_mode<synchronous>, transform_indices = @transform_1, window_bounds = array<i64: 8, 128>}, {pipeline_mode = #tpu.pipeline_mode<synchronous>, transform_indices = @transform_2, window_bounds = array<i64: 128, 1>}, {pipeline_mode = #tpu.pipeline_mode<synchronous>, transform_indices = @transform_3, window_bounds = array<i64: 1, 1>}, {pipeline_mode = #tpu.pipeline_mode<synchronous>, transform_indices = @transform_4, window_bounds = array<i64: 8, 1>}]} {
    %c0 = arith.constant 0 : index
    %c0_0 = arith.constant 0 : index
    %0 = vector.load %arg1[%c0, %c0_0] : memref<8x128xf32, #tpu.memory_space<vmem>>, vector<8x128xf32>
    %c0_1 = arith.constant 0 : index
    %c0_2 = arith.constant 0 : index
    %1 = vector.load %arg2[%c0_1, %c0_2] : memref<8x128xf32, #tpu.memory_space<vmem>>, vector<8x128xf32>
    %cst = arith.constant 5.000000e-02 : f32
    %2 = vector.broadcast %cst : f32 to vector<8x128xf32>
    %3 = arith.mulf %1, %2 : vector<8x128xf32>
    %4 = arith.addf %0, %3 : vector<8x128xf32>
    %c0_3 = arith.constant 0 : index
    %c0_4 = arith.constant 0 : index
    %5 = vector.load %arg3[%c0_3, %c0_4] : memref<128x1xf32, #tpu.memory_space<vmem>>, vector<128x1xf32>
    %6 = arith.truncf %4 : vector<8x128xf32> to vector<8x128xbf16>
    %7 = arith.truncf %5 : vector<128x1xf32> to vector<128x1xbf16>
    %cst_5 = arith.constant dense<0.000000e+00> : vector<8x1xf32>
    %8 = tpu.matmul %6, %7, %cst_5 {dimension_numbers = #tpu.dot_dimension_numbers<[1], [0], [0], [1], [0, 0, 1, 1], [], []>} : vector<8x128xbf16>, vector<128x1xbf16>, vector<8x1xf32> -> vector<8x1xf32>
    %c0_6 = arith.constant 0 : index
    %c0_7 = arith.constant 0 : index
    %9 = vector.load %arg4[%c0_6, %c0_7] : memref<1x1xf32, #tpu.memory_space<vmem>>, vector<1x1xf32>
    %10 = vector.broadcast %9 : vector<1x1xf32> to vector<8x1xf32>
    %11 = arith.addf %8, %10 : vector<8x1xf32>
    %c0_8 = arith.constant 0 : index
    %c0_9 = arith.constant 0 : index
    %12 = vector.load %arg5[%c0_8, %c0_9] : memref<8x1xf32, #tpu.memory_space<vmem>>, vector<8x1xf32>
    tpu.vector_store %arg5[%c0_8, %c0_9], %11 {strides = array<i32>} : memref<8x1xf32, #tpu.memory_space<vmem>>, vector<8x1xf32>,
    return
  }
  func.func @transform_0(%arg0: i32) -> (i32, i32) {
    %c0_i32 = arith.constant 0 : i32
    %c0_i32_0 = arith.constant 0 : i32
    %c0_i32_1 = arith.constant 0 : i32
    return %c0_i32, %c0_i32_0 : i32, i32
  }
  func.func @transform_1(%arg0: i32) -> (i32, i32) {
    %c0_i32 = arith.constant 0 : i32
    %c0_i32_0 = arith.constant 0 : i32
    %c0_i32_1 = arith.constant 0 : i32
    return %c0_i32, %c0_i32_0 : i32, i32
  }
  func.func @transform_2(%arg0: i32) -> (i32, i32) {
    %c0_i32 = arith.constant 0 : i32
    %c0_i32_0 = arith.constant 0 : i32
    %c0_i32_1 = arith.constant 0 : i32
    return %c0_i32, %c0_i32_0 : i32, i32
  }
  func.func @transform_3(%arg0: i32) -> (i32, i32) {
    %c0_i32 = arith.constant 0 : i32
    %c0_i32_0 = arith.constant 0 : i32
    %c0_i32_1 = arith.constant 0 : i32
    return %c0_i32, %c0_i32_0 : i32, i32
  }
  func.func @transform_4(%arg0: i32) -> (i32, i32) {
    %c0_i32 = arith.constant 0 : i32
    %c0_i32_0 = arith.constant 0 : i32
    %c0_i32_1 = arith.constant 0 : i32
    return %c0_i32, %c0_i32_0 : i32, i32
  }
}

module attributes {stable_mosaic.version = 11 : i64} {
  func.func @_transition_kernel(%arg0: i32, %arg1: memref<16x16xf32, #tpu.memory_space<vmem>>, %arg2: memref<1x16xf32, #tpu.memory_space<vmem>>, %arg3: memref<1x16xf32, #tpu.memory_space<vmem>>, %arg4: memref<16x64xf32, #tpu.memory_space<vmem>>, %arg5: memref<1x64xf32, #tpu.memory_space<vmem>>, %arg6: memref<64x16xf32, #tpu.memory_space<vmem>>, %arg7: memref<1x16xf32, #tpu.memory_space<vmem>>, %arg8: memref<16x16xf32, #tpu.memory_space<vmem>>) attributes {dimension_semantics = [#tpu.dimension_semantics<parallel>], iteration_bounds = array<i64: 1>, scalar_prefetch = 0 : i64, scratch_operands = 0 : i64, tpu.core_type = #tpu.core_type<tc>, window_params = [{transform_indices = @transform_0, window_bounds = array<i64: 16, 16>}, {pipeline_mode = #tpu.pipeline_mode<synchronous>, transform_indices = @transform_1, window_bounds = array<i64: 1, 16>}, {pipeline_mode = #tpu.pipeline_mode<synchronous>, transform_indices = @transform_2, window_bounds = array<i64: 1, 16>}, {pipeline_mode = #tpu.pipeline_mode<synchronous>, transform_indices = @transform_3, window_bounds = array<i64: 16, 64>}, {pipeline_mode = #tpu.pipeline_mode<synchronous>, transform_indices = @transform_4, window_bounds = array<i64: 1, 64>}, {pipeline_mode = #tpu.pipeline_mode<synchronous>, transform_indices = @transform_5, window_bounds = array<i64: 64, 16>}, {pipeline_mode = #tpu.pipeline_mode<synchronous>, transform_indices = @transform_6, window_bounds = array<i64: 1, 16>}, {transform_indices = @transform_7, window_bounds = array<i64: 16, 16>}]} {
    %c0 = arith.constant 0 : index
    %c0_0 = arith.constant 0 : index
    %0 = vector.load %arg1[%c0, %c0_0] : memref<16x16xf32, #tpu.memory_space<vmem>>, vector<16x16xf32>
    %c0_1 = arith.constant 0 : index
    %c0_2 = arith.constant 0 : index
    %1 = vector.load %arg2[%c0_1, %c0_2] : memref<1x16xf32, #tpu.memory_space<vmem>>, vector<1x16xf32>
    %c0_3 = arith.constant 0 : index
    %c0_4 = arith.constant 0 : index
    %2 = vector.load %arg3[%c0_3, %c0_4] : memref<1x16xf32, #tpu.memory_space<vmem>>, vector<1x16xf32>
    %cst = arith.constant dense<0.000000e+00> : vector<16xf32>
    %3 = vector.multi_reduction <add>, %0, %cst [1] : vector<16x16xf32> to vector<16xf32>
    %4 = vector.shape_cast %3 : vector<16xf32> to vector<16x1xf32>
    %cst_5 = arith.constant 1.600000e+01 : f32
    %5 = vector.broadcast %cst_5 : f32 to vector<16x1xf32>
    %6 = arith.divf %4, %5 : vector<16x1xf32>
    %7 = vector.broadcast %6 : vector<16x1xf32> to vector<16x16xf32>
    %8 = arith.subf %0, %7 : vector<16x16xf32>
    %9 = arith.mulf %8, %8 : vector<16x16xf32>
    %cst_6 = arith.constant dense<0.000000e+00> : vector<16xf32>
    %10 = vector.multi_reduction <add>, %9, %cst_6 [1] : vector<16x16xf32> to vector<16xf32>
    %11 = vector.shape_cast %10 : vector<16xf32> to vector<16x1xf32>
    %cst_7 = arith.constant 1.600000e+01 : f32
    %12 = vector.broadcast %cst_7 : f32 to vector<16x1xf32>
    %13 = arith.divf %11, %12 : vector<16x1xf32>
    %cst_8 = arith.constant 9.99999974E-6 : f32
    %14 = vector.broadcast %cst_8 : f32 to vector<16x1xf32>
    %15 = arith.addf %13, %14 : vector<16x1xf32>
    %16 = math.rsqrt %15 : vector<16x1xf32>
    %17 = vector.broadcast %16 : vector<16x1xf32> to vector<16x16xf32>
    %18 = arith.mulf %8, %17 : vector<16x16xf32>
    %19 = vector.broadcast %1 : vector<1x16xf32> to vector<16x16xf32>
    %20 = arith.mulf %18, %19 : vector<16x16xf32>
    %21 = vector.broadcast %2 : vector<1x16xf32> to vector<16x16xf32>
    %22 = arith.addf %20, %21 : vector<16x16xf32>
    %c0_9 = arith.constant 0 : index
    %c0_10 = arith.constant 0 : index
    %23 = vector.load %arg4[%c0_9, %c0_10] : memref<16x64xf32, #tpu.memory_space<vmem>>, vector<16x64xf32>
    %24 = arith.truncf %22 : vector<16x16xf32> to vector<16x16xbf16>
    %25 = arith.truncf %23 : vector<16x64xf32> to vector<16x64xbf16>
    %cst_11 = arith.constant dense<0.000000e+00> : vector<16x64xf32>
    %26 = tpu.matmul %24, %25, %cst_11 {dimension_numbers = #tpu.dot_dimension_numbers<[1], [0], [0], [1], [0, 0, 1, 1], [], []>} : vector<16x16xbf16>, vector<16x64xbf16>, vector<16x64xf32> -> vector<16x64xf32>
    %c0_12 = arith.constant 0 : index
    %c0_13 = arith.constant 0 : index
    %27 = vector.load %arg5[%c0_12, %c0_13] : memref<1x64xf32, #tpu.memory_space<vmem>>, vector<1x64xf32>
    %28 = vector.broadcast %27 : vector<1x64xf32> to vector<16x64xf32>
    %29 = arith.addf %26, %28 : vector<16x64xf32>
    %30 = arith.mulf %29, %29 : vector<16x64xf32>
    %31 = arith.mulf %29, %30 : vector<16x64xf32>
    %cst_14 = arith.constant 4.471500e-02 : f32
    %32 = vector.broadcast %cst_14 : f32 to vector<16x64xf32>
    %33 = arith.mulf %32, %31 : vector<16x64xf32>
    %34 = arith.addf %29, %33 : vector<16x64xf32>
    %cst_15 = arith.constant 0.797884583 : f32
    %35 = vector.broadcast %cst_15 : f32 to vector<16x64xf32>
    %36 = arith.mulf %35, %34 : vector<16x64xf32>
    %37 = math.tanh %36 : vector<16x64xf32>
    %cst_16 = arith.constant 1.000000e+00 : f32
    %38 = vector.broadcast %cst_16 : f32 to vector<16x64xf32>
    %39 = arith.addf %38, %37 : vector<16x64xf32>
    %cst_17 = arith.constant 5.000000e-01 : f32
    %40 = vector.broadcast %cst_17 : f32 to vector<16x64xf32>
    %41 = arith.mulf %40, %39 : vector<16x64xf32>
    %42 = arith.mulf %29, %41 : vector<16x64xf32>
    %c0_18 = arith.constant 0 : index
    %c0_19 = arith.constant 0 : index
    %43 = vector.load %arg6[%c0_18, %c0_19] : memref<64x16xf32, #tpu.memory_space<vmem>>, vector<64x16xf32>
    %44 = arith.truncf %42 : vector<16x64xf32> to vector<16x64xbf16>
    %45 = arith.truncf %43 : vector<64x16xf32> to vector<64x16xbf16>
    %cst_20 = arith.constant dense<0.000000e+00> : vector<16x16xf32>
    %46 = tpu.matmul %44, %45, %cst_20 {dimension_numbers = #tpu.dot_dimension_numbers<[1], [0], [0], [1], [0, 0, 1, 1], [], []>} : vector<16x64xbf16>, vector<64x16xbf16>, vector<16x16xf32> -> vector<16x16xf32>
    %c0_21 = arith.constant 0 : index
    %c0_22 = arith.constant 0 : index
    %47 = vector.load %arg7[%c0_21, %c0_22] : memref<1x16xf32, #tpu.memory_space<vmem>>, vector<1x16xf32>
    %48 = vector.broadcast %47 : vector<1x16xf32> to vector<16x16xf32>
    %49 = arith.addf %46, %48 : vector<16x16xf32>
    %50 = arith.addf %49, %0 : vector<16x16xf32>
    %c0_23 = arith.constant 0 : index
    %c0_24 = arith.constant 0 : index
    %51 = vector.load %arg8[%c0_23, %c0_24] : memref<16x16xf32, #tpu.memory_space<vmem>>, vector<16x16xf32>
    tpu.vector_store %arg8[%c0_23, %c0_24], %50 {strides = array<i32>} : memref<16x16xf32, #tpu.memory_space<vmem>>, vector<16x16xf32>,
    return
  }
  func.func @transform_0(%arg0: i32) -> (i32, i32) {
    %c0_i32 = arith.constant 0 : i32
    %c0_i32_0 = arith.constant 0 : i32
    return %arg0, %c0_i32 : i32, i32
  }
  func.func @transform_1(%arg0: i32) -> (i32, i32) {
    %c0_i32 = arith.constant 0 : i32
    %c0_i32_0 = arith.constant 0 : i32
    %c0_i32_1 = arith.constant 0 : i32
    return %c0_i32, %c0_i32_0 : i32, i32
  }
  func.func @transform_2(%arg0: i32) -> (i32, i32) {
    %c0_i32 = arith.constant 0 : i32
    %c0_i32_0 = arith.constant 0 : i32
    %c0_i32_1 = arith.constant 0 : i32
    return %c0_i32, %c0_i32_0 : i32, i32
  }
  func.func @transform_3(%arg0: i32) -> (i32, i32) {
    %c0_i32 = arith.constant 0 : i32
    %c0_i32_0 = arith.constant 0 : i32
    %c0_i32_1 = arith.constant 0 : i32
    return %c0_i32, %c0_i32_0 : i32, i32
  }
  func.func @transform_4(%arg0: i32) -> (i32, i32) {
    %c0_i32 = arith.constant 0 : i32
    %c0_i32_0 = arith.constant 0 : i32
    %c0_i32_1 = arith.constant 0 : i32
    return %c0_i32, %c0_i32_0 : i32, i32
  }
  func.func @transform_5(%arg0: i32) -> (i32, i32) {
    %c0_i32 = arith.constant 0 : i32
    %c0_i32_0 = arith.constant 0 : i32
    %c0_i32_1 = arith.constant 0 : i32
    return %c0_i32, %c0_i32_0 : i32, i32
  }
  func.func @transform_6(%arg0: i32) -> (i32, i32) {
    %c0_i32 = arith.constant 0 : i32
    %c0_i32_0 = arith.constant 0 : i32
    %c0_i32_1 = arith.constant 0 : i32
    return %c0_i32, %c0_i32_0 : i32, i32
  }
  func.func @transform_7(%arg0: i32) -> (i32, i32) {
    %c0_i32 = arith.constant 0 : i32
    %c0_i32_0 = arith.constant 0 : i32
    return %arg0, %c0_i32 : i32, i32
  }
}

module attributes {stable_mosaic.version = 11 : i64} {
  func.func @_perm_kernel(%arg0: i32, %arg1: memref<1x4x1xf32, #tpu.memory_space<vmem>>, %arg2: memref<1x1x4xf32, #tpu.memory_space<vmem>>, %arg3: memref<1x4x4xf32, #tpu.memory_space<vmem>>) attributes {dimension_semantics = [#tpu.dimension_semantics<parallel>], iteration_bounds = array<i64: 2>, scalar_prefetch = 0 : i64, scratch_operands = 0 : i64, tpu.core_type = #tpu.core_type<tc>, window_params = [{transform_indices = @transform_0, window_bounds = array<i64: 1, 4, 1>}, {transform_indices = @transform_1, window_bounds = array<i64: 1, 1, 4>}, {transform_indices = @transform_2, window_bounds = array<i64: 1, 4, 4>}]} {
    %c0 = arith.constant 0 : index
    %c0_0 = arith.constant 0 : index
    %c0_1 = arith.constant 0 : index
    %0 = vector.load %arg1[%c0, %c0_0, %c0_1] : memref<1x4x1xf32, #tpu.memory_space<vmem>>, vector<1x4x1xf32>
    %1 = vector.shape_cast %0 : vector<1x4x1xf32> to vector<4x1xf32>
    %c0_2 = arith.constant 0 : index
    %c0_3 = arith.constant 0 : index
    %c0_4 = arith.constant 0 : index
    %2 = vector.load %arg2[%c0_2, %c0_3, %c0_4] : memref<1x1x4xf32, #tpu.memory_space<vmem>>, vector<1x1x4xf32>
    %3 = vector.shape_cast %2 : vector<1x1x4xf32> to vector<1x4xf32>
    %4 = vector.broadcast %1 : vector<4x1xf32> to vector<4x4xf32>
    %5 = vector.broadcast %3 : vector<1x4xf32> to vector<4x4xf32>
    %6 = arith.subf %4, %5 : vector<4x4xf32>
    %7 = math.absf %6 : vector<4x4xf32>
    %cst = arith.constant 0.000000e+00 : f32
    %8 = vector.broadcast %cst : f32 to vector<4x4xf32>
    %9 = arith.subf %8, %7 : vector<4x4xf32>
    %cst_5 = arith.constant 1.000000e+00 : f32
    %10 = vector.broadcast %cst_5 : f32 to vector<4x4xf32>
    %11 = arith.mulf %9, %10 : vector<4x4xf32>
    %cst_6 = arith.constant dense<0xFF800000> : vector<4xf32>
    %12 = vector.multi_reduction <maximumf>, %11, %cst_6 [0] : vector<4x4xf32> to vector<4xf32>
    %13 = vector.shape_cast %12 : vector<4xf32> to vector<1x4xf32>
    %14 = vector.broadcast %13 : vector<1x4xf32> to vector<4x4xf32>
    %15 = arith.subf %11, %14 : vector<4x4xf32>
    %16 = math.exp %15 : vector<4x4xf32>
    %cst_7 = arith.constant dense<0.000000e+00> : vector<4xf32>
    %17 = vector.multi_reduction <add>, %16, %cst_7 [0] : vector<4x4xf32> to vector<4xf32>
    %18 = vector.shape_cast %17 : vector<4xf32> to vector<1x4xf32>
    %19 = tpu.reciprocal %18 {approx = true} : vector<1x4xf32> -> vector<1x4xf32>
    %20 = vector.broadcast %19 : vector<1x4xf32> to vector<4x4xf32>
    %21 = arith.mulf %16, %20 : vector<4x4xf32>
    %c0_8 = arith.constant 0 : index
    %c0_9 = arith.constant 0 : index
    %c0_10 = arith.constant 0 : index
    %22 = vector.load %arg3[%c0_8, %c0_9, %c0_10] : memref<1x4x4xf32, #tpu.memory_space<vmem>>, vector<1x4x4xf32>
    %23 = vector.shape_cast %22 : vector<1x4x4xf32> to vector<4x4xf32>
    %24 = vector.shape_cast %21 : vector<4x4xf32> to vector<1x4x4xf32>
    tpu.vector_store %arg3[%c0_8, %c0_9, %c0_10], %24 {strides = array<i32>} : memref<1x4x4xf32, #tpu.memory_space<vmem>>, vector<1x4x4xf32>,
    return
  }
  func.func @transform_0(%arg0: i32) -> (i32, i32, i32) {
    %c0_i32 = arith.constant 0 : i32
    %c0_i32_0 = arith.constant 0 : i32
    %c0_i32_1 = arith.constant 0 : i32
    return %arg0, %c0_i32, %c0_i32_0 : i32, i32, i32
  }
  func.func @transform_1(%arg0: i32) -> (i32, i32, i32) {
    %c0_i32 = arith.constant 0 : i32
    %c0_i32_0 = arith.constant 0 : i32
    %c0_i32_1 = arith.constant 0 : i32
    return %arg0, %c0_i32, %c0_i32_0 : i32, i32, i32
  }
  func.func @transform_2(%arg0: i32) -> (i32, i32, i32) {
    %c0_i32 = arith.constant 0 : i32
    %c0_i32_0 = arith.constant 0 : i32
    %c0_i32_1 = arith.constant 0 : i32
    return %arg0, %c0_i32, %c0_i32_0 : i32, i32, i32
  }
}

module attributes {stable_mosaic.version = 11 : i64} {
  func.func @_encode_reparam_kernel(%arg0: i32, %arg1: memref<16x16xf32, #tpu.memory_space<vmem>>, %arg2: memref<16x16xf32, #tpu.memory_space<vmem>>, %arg3: memref<16x32xf32, #tpu.memory_space<vmem>>, %arg4: memref<1x32xf32, #tpu.memory_space<vmem>>, %arg5: memref<16x16xf32, #tpu.memory_space<vmem>>, %arg6: memref<16x16xf32, #tpu.memory_space<vmem>>, %arg7: memref<16x16xf32, #tpu.memory_space<vmem>>) attributes {dimension_semantics = [#tpu.dimension_semantics<parallel>], iteration_bounds = array<i64: 1>, scalar_prefetch = 0 : i64, scratch_operands = 0 : i64, tpu.core_type = #tpu.core_type<tc>, window_params = [{transform_indices = @transform_0, window_bounds = array<i64: 16, 16>}, {transform_indices = @transform_1, window_bounds = array<i64: 16, 16>}, {pipeline_mode = #tpu.pipeline_mode<synchronous>, transform_indices = @transform_2, window_bounds = array<i64: 16, 32>}, {pipeline_mode = #tpu.pipeline_mode<synchronous>, transform_indices = @transform_3, window_bounds = array<i64: 1, 32>}, {transform_indices = @transform_4, window_bounds = array<i64: 16, 16>}, {transform_indices = @transform_5, window_bounds = array<i64: 16, 16>}, {transform_indices = @transform_6, window_bounds = array<i64: 16, 16>}]} {
    %c0 = arith.constant 0 : index
    %c0_0 = arith.constant 0 : index
    %0 = vector.load %arg1[%c0, %c0_0] : memref<16x16xf32, #tpu.memory_space<vmem>>, vector<16x16xf32>
    %cst = arith.constant 0.000000e+00 : f32
    %1 = vector.broadcast %cst : f32 to vector<16x16xf32>
    %2 = arith.maximumf %0, %1 : vector<16x16xf32>
    %c0_1 = arith.constant 0 : index
    %c0_2 = arith.constant 0 : index
    %3 = vector.load %arg3[%c0_1, %c0_2] : memref<16x32xf32, #tpu.memory_space<vmem>>, vector<16x32xf32>
    %4 = arith.truncf %2 : vector<16x16xf32> to vector<16x16xbf16>
    %5 = arith.truncf %3 : vector<16x32xf32> to vector<16x32xbf16>
    %cst_3 = arith.constant dense<0.000000e+00> : vector<16x32xf32>
    %6 = tpu.matmul %4, %5, %cst_3 {dimension_numbers = #tpu.dot_dimension_numbers<[1], [0], [0], [1], [0, 0, 1, 1], [], []>} : vector<16x16xbf16>, vector<16x32xbf16>, vector<16x32xf32> -> vector<16x32xf32>
    %c0_4 = arith.constant 0 : index
    %c0_5 = arith.constant 0 : index
    %7 = vector.load %arg4[%c0_4, %c0_5] : memref<1x32xf32, #tpu.memory_space<vmem>>, vector<1x32xf32>
    %8 = vector.broadcast %7 : vector<1x32xf32> to vector<16x32xf32>
    %9 = arith.addf %6, %8 : vector<16x32xf32>
    %10 = vector.extract_strided_slice %9 {offsets = [0, 0], sizes = [16, 16], strides = [1, 1]} : vector<16x32xf32> to vector<16x16xf32>
    %11 = vector.extract_strided_slice %9 {offsets = [0, 16], sizes = [16, 16], strides = [1, 1]} : vector<16x32xf32> to vector<16x16xf32>
    %c0_6 = arith.constant 0 : index
    %c0_7 = arith.constant 0 : index
    %12 = vector.load %arg6[%c0_6, %c0_7] : memref<16x16xf32, #tpu.memory_space<vmem>>, vector<16x16xf32>
    tpu.vector_store %arg6[%c0_6, %c0_7], %10 {strides = array<i32>} : memref<16x16xf32, #tpu.memory_space<vmem>>, vector<16x16xf32>,
    %c0_8 = arith.constant 0 : index
    %c0_9 = arith.constant 0 : index
    %13 = vector.load %arg7[%c0_8, %c0_9] : memref<16x16xf32, #tpu.memory_space<vmem>>, vector<16x16xf32>
    tpu.vector_store %arg7[%c0_8, %c0_9], %11 {strides = array<i32>} : memref<16x16xf32, #tpu.memory_space<vmem>>, vector<16x16xf32>,
    %c0_10 = arith.constant 0 : index
    %c0_11 = arith.constant 0 : index
    %14 = vector.load %arg2[%c0_10, %c0_11] : memref<16x16xf32, #tpu.memory_space<vmem>>, vector<16x16xf32>
    %cst_12 = arith.constant 5.000000e-01 : f32
    %15 = vector.broadcast %cst_12 : f32 to vector<16x16xf32>
    %16 = arith.mulf %15, %11 : vector<16x16xf32>
    %17 = math.exp %16 : vector<16x16xf32>
    %18 = arith.mulf %14, %17 : vector<16x16xf32>
    %19 = arith.addf %10, %18 : vector<16x16xf32>
    %c0_13 = arith.constant 0 : index
    %c0_14 = arith.constant 0 : index
    %20 = vector.load %arg5[%c0_13, %c0_14] : memref<16x16xf32, #tpu.memory_space<vmem>>, vector<16x16xf32>
    tpu.vector_store %arg5[%c0_13, %c0_14], %19 {strides = array<i32>} : memref<16x16xf32, #tpu.memory_space<vmem>>, vector<16x16xf32>,
    return
  }
  func.func @transform_0(%arg0: i32) -> (i32, i32) {
    %c0_i32 = arith.constant 0 : i32
    %c0_i32_0 = arith.constant 0 : i32
    return %arg0, %c0_i32 : i32, i32
  }
  func.func @transform_1(%arg0: i32) -> (i32, i32) {
    %c0_i32 = arith.constant 0 : i32
    %c0_i32_0 = arith.constant 0 : i32
    return %arg0, %c0_i32 : i32, i32
  }
  func.func @transform_2(%arg0: i32) -> (i32, i32) {
    %c0_i32 = arith.constant 0 : i32
    %c0_i32_0 = arith.constant 0 : i32
    %c0_i32_1 = arith.constant 0 : i32
    return %c0_i32, %c0_i32_0 : i32, i32
  }
  func.func @transform_3(%arg0: i32) -> (i32, i32) {
    %c0_i32 = arith.constant 0 : i32
    %c0_i32_0 = arith.constant 0 : i32
    %c0_i32_1 = arith.constant 0 : i32
    return %c0_i32, %c0_i32_0 : i32, i32
  }
  func.func @transform_4(%arg0: i32) -> (i32, i32) {
    %c0_i32 = arith.constant 0 : i32
    %c0_i32_0 = arith.constant 0 : i32
    return %arg0, %c0_i32 : i32, i32
  }
  func.func @transform_5(%arg0: i32) -> (i32, i32) {
    %c0_i32 = arith.constant 0 : i32
    %c0_i32_0 = arith.constant 0 : i32
    return %arg0, %c0_i32 : i32, i32
  }
  func.func @transform_6(%arg0: i32) -> (i32, i32) {
    %c0_i32 = arith.constant 0 : i32
    %c0_i32_0 = arith.constant 0 : i32
    return %arg0, %c0_i32 : i32, i32
  }
}

module attributes {stable_mosaic.version = 11 : i64} {
  func.func @_decoder_init_kernel(%arg0: i32, %arg1: memref<1x8x16xf32, #tpu.memory_space<vmem>>, %arg2: memref<1x4x4xf32, #tpu.memory_space<vmem>>, %arg3: memref<4x8xf32, #tpu.memory_space<vmem>>, %arg4: memref<16x16xf32, #tpu.memory_space<vmem>>, %arg5: memref<8x16xf32, #tpu.memory_space<vmem>>, %arg6: memref<1x16xf32, #tpu.memory_space<vmem>>, %arg7: memref<1x16xf32, #tpu.memory_space<vmem>>, %arg8: memref<1x16xf32, #tpu.memory_space<vmem>>, %arg9: memref<1x4x8x16xf32, #tpu.memory_space<vmem>>) attributes {dimension_semantics = [#tpu.dimension_semantics<parallel>], iteration_bounds = array<i64: 2>, scalar_prefetch = 0 : i64, scratch_operands = 0 : i64, tpu.core_type = #tpu.core_type<tc>, window_params = [{transform_indices = @transform_0, window_bounds = array<i64: 1, 8, 16>}, {transform_indices = @transform_1, window_bounds = array<i64: 1, 4, 4>}, {pipeline_mode = #tpu.pipeline_mode<synchronous>, transform_indices = @transform_2, window_bounds = array<i64: 4, 8>}, {pipeline_mode = #tpu.pipeline_mode<synchronous>, transform_indices = @transform_3, window_bounds = array<i64: 16, 16>}, {pipeline_mode = #tpu.pipeline_mode<synchronous>, transform_indices = @transform_4, window_bounds = array<i64: 8, 16>}, {pipeline_mode = #tpu.pipeline_mode<synchronous>, transform_indices = @transform_5, window_bounds = array<i64: 1, 16>}, {pipeline_mode = #tpu.pipeline_mode<synchronous>, transform_indices = @transform_6, window_bounds = array<i64: 1, 16>}, {pipeline_mode = #tpu.pipeline_mode<synchronous>, transform_indices = @transform_7, window_bounds = array<i64: 1, 16>}, {transform_indices = @transform_8, window_bounds = array<i64: 1, 4, 8, 16>}]} {
    %c0 = arith.constant 0 : index
    %c0_0 = arith.constant 0 : index
    %c0_1 = arith.constant 0 : index
    %0 = vector.load %arg1[%c0, %c0_0, %c0_1] : memref<1x8x16xf32, #tpu.memory_space<vmem>>, vector<1x8x16xf32>
    %1 = vector.shape_cast %0 : vector<1x8x16xf32> to vector<8x16xf32>
    %c0_2 = arith.constant 0 : index
    %c0_3 = arith.constant 0 : index
    %c0_4 = arith.constant 0 : index
    %2 = vector.load %arg2[%c0_2, %c0_3, %c0_4] : memref<1x4x4xf32, #tpu.memory_space<vmem>>, vector<1x4x4xf32>
    %3 = vector.shape_cast %2 : vector<1x4x4xf32> to vector<4x4xf32>
    %c0_5 = arith.constant 0 : index
    %c0_6 = arith.constant 0 : index
    %4 = vector.load %arg3[%c0_5, %c0_6] : memref<4x8xf32, #tpu.memory_space<vmem>>, vector<4x8xf32>
    %5 = arith.truncf %3 : vector<4x4xf32> to vector<4x4xbf16>
    %6 = arith.truncf %4 : vector<4x8xf32> to vector<4x8xbf16>
    %cst = arith.constant dense<0.000000e+00> : vector<4x8xf32>
    %7 = tpu.matmul %5, %6, %cst {dimension_numbers = #tpu.dot_dimension_numbers<[1], [0], [0], [1], [0, 0, 1, 1], [], []>} : vector<4x4xbf16>, vector<4x8xbf16>, vector<4x8xf32> -> vector<4x8xf32>
    %c0_7 = arith.constant 0 : index
    %c0_8 = arith.constant 0 : index
    %8 = vector.load %arg4[%c0_7, %c0_8] : memref<16x16xf32, #tpu.memory_space<vmem>>, vector<16x16xf32>
    %9 = arith.truncf %1 : vector<8x16xf32> to vector<8x16xbf16>
    %10 = arith.truncf %8 : vector<16x16xf32> to vector<16x16xbf16>
    %cst_9 = arith.constant dense<0.000000e+00> : vector<8x16xf32>
    %11 = tpu.matmul %9, %10, %cst_9 {dimension_numbers = #tpu.dot_dimension_numbers<[1], [0], [0], [1], [0, 0, 1, 1], [], []>} : vector<8x16xbf16>, vector<16x16xbf16>, vector<8x16xf32> -> vector<8x16xf32>
    %c0_10 = arith.constant 0 : index
    %c0_11 = arith.constant 0 : index
    %12 = vector.load %arg6[%c0_10, %c0_11] : memref<1x16xf32, #tpu.memory_space<vmem>>, vector<1x16xf32>
    %13 = vector.broadcast %12 : vector<1x16xf32> to vector<8x16xf32>
    %14 = arith.addf %11, %13 : vector<8x16xf32>
    %c0_12 = arith.constant 0 : index
    %c0_13 = arith.constant 0 : index
    %15 = vector.load %arg5[%c0_12, %c0_13] : memref<8x16xf32, #tpu.memory_space<vmem>>, vector<8x16xf32>
    %16 = arith.truncf %7 : vector<4x8xf32> to vector<4x8xbf16>
    %17 = arith.truncf %15 : vector<8x16xf32> to vector<8x16xbf16>
    %cst_14 = arith.constant dense<0.000000e+00> : vector<4x16xf32>
    %18 = tpu.matmul %16, %17, %cst_14 {dimension_numbers = #tpu.dot_dimension_numbers<[1], [0], [0], [1], [0, 0, 1, 1], [], []>} : vector<4x8xbf16>, vector<8x16xbf16>, vector<4x16xf32> -> vector<4x16xf32>
    %19 = vector.extract_strided_slice %18 {offsets = [0, 0], sizes = [1, 16], strides = [1, 1]} : vector<4x16xf32> to vector<1x16xf32>
    %20 = vector.broadcast %19 : vector<1x16xf32> to vector<8x16xf32>
    %21 = arith.addf %14, %20 : vector<8x16xf32>
    %c0_15 = arith.constant 0 : index
    %c0_16 = arith.constant 0 : index
    %22 = vector.load %arg7[%c0_15, %c0_16] : memref<1x16xf32, #tpu.memory_space<vmem>>, vector<1x16xf32>
    %c0_17 = arith.constant 0 : index
    %c0_18 = arith.constant 0 : index
    %23 = vector.load %arg8[%c0_17, %c0_18] : memref<1x16xf32, #tpu.memory_space<vmem>>, vector<1x16xf32>
    %cst_19 = arith.constant dense<0.000000e+00> : vector<8xf32>
    %24 = vector.multi_reduction <add>, %21, %cst_19 [1] : vector<8x16xf32> to vector<8xf32>
    %25 = vector.shape_cast %24 : vector<8xf32> to vector<8x1xf32>
    %cst_20 = arith.constant 1.600000e+01 : f32
    %26 = vector.broadcast %cst_20 : f32 to vector<8x1xf32>
    %27 = arith.divf %25, %26 : vector<8x1xf32>
    %28 = vector.broadcast %27 : vector<8x1xf32> to vector<8x16xf32>
    %29 = arith.subf %21, %28 : vector<8x16xf32>
    %30 = arith.mulf %29, %29 : vector<8x16xf32>
    %cst_21 = arith.constant dense<0.000000e+00> : vector<8xf32>
    %31 = vector.multi_reduction <add>, %30, %cst_21 [1] : vector<8x16xf32> to vector<8xf32>
    %32 = vector.shape_cast %31 : vector<8xf32> to vector<8x1xf32>
    %cst_22 = arith.constant 1.600000e+01 : f32
    %33 = vector.broadcast %cst_22 : f32 to vector<8x1xf32>
    %34 = arith.divf %32, %33 : vector<8x1xf32>
    %cst_23 = arith.constant 9.99999974E-6 : f32
    %35 = vector.broadcast %cst_23 : f32 to vector<8x1xf32>
    %36 = arith.addf %34, %35 : vector<8x1xf32>
    %37 = math.rsqrt %36 : vector<8x1xf32>
    %38 = vector.broadcast %37 : vector<8x1xf32> to vector<8x16xf32>
    %39 = arith.mulf %29, %38 : vector<8x16xf32>
    %40 = vector.broadcast %22 : vector<1x16xf32> to vector<8x16xf32>
    %41 = arith.mulf %39, %40 : vector<8x16xf32>
    %42 = vector.broadcast %23 : vector<1x16xf32> to vector<8x16xf32>
    %43 = arith.addf %41, %42 : vector<8x16xf32>
    %c0_24 = arith.constant 0 : index
    %c0_25 = arith.constant 0 : index
    %c0_26 = arith.constant 0 : index
    %c0_27 = arith.constant 0 : index
    %44 = vector.load %arg9[%c0_24, %c0_25, %c0_26, %c0_27] : memref<1x4x8x16xf32, #tpu.memory_space<vmem>>, vector<1x1x8x16xf32>
    %45 = vector.shape_cast %44 : vector<1x1x8x16xf32> to vector<8x16xf32>
    %46 = vector.shape_cast %43 : vector<8x16xf32> to vector<1x1x8x16xf32>
    tpu.vector_store %arg9[%c0_24, %c0_25, %c0_26, %c0_27], %46 {strides = array<i32>} : memref<1x4x8x16xf32, #tpu.memory_space<vmem>>, vector<1x1x8x16xf32>,
    %47 = vector.extract_strided_slice %18 {offsets = [1, 0], sizes = [1, 16], strides = [1, 1]} : vector<4x16xf32> to vector<1x16xf32>
    %48 = vector.broadcast %47 : vector<1x16xf32> to vector<8x16xf32>
    %49 = arith.addf %14, %48 : vector<8x16xf32>
    %c0_28 = arith.constant 0 : index
    %c0_29 = arith.constant 0 : index
    %50 = vector.load %arg7[%c0_28, %c0_29] : memref<1x16xf32, #tpu.memory_space<vmem>>, vector<1x16xf32>
    %c0_30 = arith.constant 0 : index
    %c0_31 = arith.constant 0 : index
    %51 = vector.load %arg8[%c0_30, %c0_31] : memref<1x16xf32, #tpu.memory_space<vmem>>, vector<1x16xf32>
    %cst_32 = arith.constant dense<0.000000e+00> : vector<8xf32>
    %52 = vector.multi_reduction <add>, %49, %cst_32 [1] : vector<8x16xf32> to vector<8xf32>
    %53 = vector.shape_cast %52 : vector<8xf32> to vector<8x1xf32>
    %cst_33 = arith.constant 1.600000e+01 : f32
    %54 = vector.broadcast %cst_33 : f32 to vector<8x1xf32>
    %55 = arith.divf %53, %54 : vector<8x1xf32>
    %56 = vector.broadcast %55 : vector<8x1xf32> to vector<8x16xf32>
    %57 = arith.subf %49, %56 : vector<8x16xf32>
    %58 = arith.mulf %57, %57 : vector<8x16xf32>
    %cst_34 = arith.constant dense<0.000000e+00> : vector<8xf32>
    %59 = vector.multi_reduction <add>, %58, %cst_34 [1] : vector<8x16xf32> to vector<8xf32>
    %60 = vector.shape_cast %59 : vector<8xf32> to vector<8x1xf32>
    %cst_35 = arith.constant 1.600000e+01 : f32
    %61 = vector.broadcast %cst_35 : f32 to vector<8x1xf32>
    %62 = arith.divf %60, %61 : vector<8x1xf32>
    %cst_36 = arith.constant 9.99999974E-6 : f32
    %63 = vector.broadcast %cst_36 : f32 to vector<8x1xf32>
    %64 = arith.addf %62, %63 : vector<8x1xf32>
    %65 = math.rsqrt %64 : vector<8x1xf32>
    %66 = vector.broadcast %65 : vector<8x1xf32> to vector<8x16xf32>
    %67 = arith.mulf %57, %66 : vector<8x16xf32>
    %68 = vector.broadcast %50 : vector<1x16xf32> to vector<8x16xf32>
    %69 = arith.mulf %67, %68 : vector<8x16xf32>
    %70 = vector.broadcast %51 : vector<1x16xf32> to vector<8x16xf32>
    %71 = arith.addf %69, %70 : vector<8x16xf32>
    %c0_37 = arith.constant 0 : index
    %c1 = arith.constant 1 : index
    %c0_38 = arith.constant 0 : index
    %c0_39 = arith.constant 0 : index
    %72 = vector.load %arg9[%c0_37, %c1, %c0_38, %c0_39] : memref<1x4x8x16xf32, #tpu.memory_space<vmem>>, vector<1x1x8x16xf32>
    %73 = vector.shape_cast %72 : vector<1x1x8x16xf32> to vector<8x16xf32>
    %74 = vector.shape_cast %71 : vector<8x16xf32> to vector<1x1x8x16xf32>
    tpu.vector_store %arg9[%c0_37, %c1, %c0_38, %c0_39], %74 {strides = array<i32>} : memref<1x4x8x16xf32, #tpu.memory_space<vmem>>, vector<1x1x8x16xf32>,
    %75 = vector.extract_strided_slice %18 {offsets = [2, 0], sizes = [1, 16], strides = [1, 1]} : vector<4x16xf32> to vector<1x16xf32>
    %76 = vector.broadcast %75 : vector<1x16xf32> to vector<8x16xf32>
    %77 = arith.addf %14, %76 : vector<8x16xf32>
    %c0_40 = arith.constant 0 : index
    %c0_41 = arith.constant 0 : index
    %78 = vector.load %arg7[%c0_40, %c0_41] : memref<1x16xf32, #tpu.memory_space<vmem>>, vector<1x16xf32>
    %c0_42 = arith.constant 0 : index
    %c0_43 = arith.constant 0 : index
    %79 = vector.load %arg8[%c0_42, %c0_43] : memref<1x16xf32, #tpu.memory_space<vmem>>, vector<1x16xf32>
    %cst_44 = arith.constant dense<0.000000e+00> : vector<8xf32>
    %80 = vector.multi_reduction <add>, %77, %cst_44 [1] : vector<8x16xf32> to vector<8xf32>
    %81 = vector.shape_cast %80 : vector<8xf32> to vector<8x1xf32>
    %cst_45 = arith.constant 1.600000e+01 : f32
    %82 = vector.broadcast %cst_45 : f32 to vector<8x1xf32>
    %83 = arith.divf %81, %82 : vector<8x1xf32>
    %84 = vector.broadcast %83 : vector<8x1xf32> to vector<8x16xf32>
    %85 = arith.subf %77, %84 : vector<8x16xf32>
    %86 = arith.mulf %85, %85 : vector<8x16xf32>
    %cst_46 = arith.constant dense<0.000000e+00> : vector<8xf32>
    %87 = vector.multi_reduction <add>, %86, %cst_46 [1] : vector<8x16xf32> to vector<8xf32>
    %88 = vector.shape_cast %87 : vector<8xf32> to vector<8x1xf32>
    %cst_47 = arith.constant 1.600000e+01 : f32
    %89 = vector.broadcast %cst_47 : f32 to vector<8x1xf32>
    %90 = arith.divf %88, %89 : vector<8x1xf32>
    %cst_48 = arith.constant 9.99999974E-6 : f32
    %91 = vector.broadcast %cst_48 : f32 to vector<8x1xf32>
    %92 = arith.addf %90, %91 : vector<8x1xf32>
    %93 = math.rsqrt %92 : vector<8x1xf32>
    %94 = vector.broadcast %93 : vector<8x1xf32> to vector<8x16xf32>
    %95 = arith.mulf %85, %94 : vector<8x16xf32>
    %96 = vector.broadcast %78 : vector<1x16xf32> to vector<8x16xf32>
    %97 = arith.mulf %95, %96 : vector<8x16xf32>
    %98 = vector.broadcast %79 : vector<1x16xf32> to vector<8x16xf32>
    %99 = arith.addf %97, %98 : vector<8x16xf32>
    %c0_49 = arith.constant 0 : index
    %c2 = arith.constant 2 : index
    %c0_50 = arith.constant 0 : index
    %c0_51 = arith.constant 0 : index
    %100 = vector.load %arg9[%c0_49, %c2, %c0_50, %c0_51] : memref<1x4x8x16xf32, #tpu.memory_space<vmem>>, vector<1x1x8x16xf32>
    %101 = vector.shape_cast %100 : vector<1x1x8x16xf32> to vector<8x16xf32>
    %102 = vector.shape_cast %99 : vector<8x16xf32> to vector<1x1x8x16xf32>
    tpu.vector_store %arg9[%c0_49, %c2, %c0_50, %c0_51], %102 {strides = array<i32>} : memref<1x4x8x16xf32, #tpu.memory_space<vmem>>, vector<1x1x8x16xf32>,
    %103 = vector.extract_strided_slice %18 {offsets = [3, 0], sizes = [1, 16], strides = [1, 1]} : vector<4x16xf32> to vector<1x16xf32>
    %104 = vector.broadcast %103 : vector<1x16xf32> to vector<8x16xf32>
    %105 = arith.addf %14, %104 : vector<8x16xf32>
    %c0_52 = arith.constant 0 : index
    %c0_53 = arith.constant 0 : index
    %106 = vector.load %arg7[%c0_52, %c0_53] : memref<1x16xf32, #tpu.memory_space<vmem>>, vector<1x16xf32>
    %c0_54 = arith.constant 0 : index
    %c0_55 = arith.constant 0 : index
    %107 = vector.load %arg8[%c0_54, %c0_55] : memref<1x16xf32, #tpu.memory_space<vmem>>, vector<1x16xf32>
    %cst_56 = arith.constant dense<0.000000e+00> : vector<8xf32>
    %108 = vector.multi_reduction <add>, %105, %cst_56 [1] : vector<8x16xf32> to vector<8xf32>
    %109 = vector.shape_cast %108 : vector<8xf32> to vector<8x1xf32>
    %cst_57 = arith.constant 1.600000e+01 : f32
    %110 = vector.broadcast %cst_57 : f32 to vector<8x1xf32>
    %111 = arith.divf %109, %110 : vector<8x1xf32>
    %112 = vector.broadcast %111 : vector<8x1xf32> to vector<8x16xf32>
    %113 = arith.subf %105, %112 : vector<8x16xf32>
    %114 = arith.mulf %113, %113 : vector<8x16xf32>
    %cst_58 = arith.constant dense<0.000000e+00> : vector<8xf32>
    %115 = vector.multi_reduction <add>, %114, %cst_58 [1] : vector<8x16xf32> to vector<8xf32>
    %116 = vector.shape_cast %115 : vector<8xf32> to vector<8x1xf32>
    %cst_59 = arith.constant 1.600000e+01 : f32
    %117 = vector.broadcast %cst_59 : f32 to vector<8x1xf32>
    %118 = arith.divf %116, %117 : vector<8x1xf32>
    %cst_60 = arith.constant 9.99999974E-6 : f32
    %119 = vector.broadcast %cst_60 : f32 to vector<8x1xf32>
    %120 = arith.addf %118, %119 : vector<8x1xf32>
    %121 = math.rsqrt %120 : vector<8x1xf32>
    %122 = vector.broadcast %121 : vector<8x1xf32> to vector<8x16xf32>
    %123 = arith.mulf %113, %122 : vector<8x16xf32>
    %124 = vector.broadcast %106 : vector<1x16xf32> to vector<8x16xf32>
    %125 = arith.mulf %123, %124 : vector<8x16xf32>
    %126 = vector.broadcast %107 : vector<1x16xf32> to vector<8x16xf32>
    %127 = arith.addf %125, %126 : vector<8x16xf32>
    %c0_61 = arith.constant 0 : index
    %c3 = arith.constant 3 : index
    %c0_62 = arith.constant 0 : index
    %c0_63 = arith.constant 0 : index
    %128 = vector.load %arg9[%c0_61, %c3, %c0_62, %c0_63] : memref<1x4x8x16xf32, #tpu.memory_space<vmem>>, vector<1x1x8x16xf32>
    %129 = vector.shape_cast %128 : vector<1x1x8x16xf32> to vector<8x16xf32>
    %130 = vector.shape_cast %127 : vector<8x16xf32> to vector<1x1x8x16xf32>
    tpu.vector_store %arg9[%c0_61, %c3, %c0_62, %c0_63], %130 {strides = array<i32>} : memref<1x4x8x16xf32, #tpu.memory_space<vmem>>, vector<1x1x8x16xf32>,
    return
  }
  func.func @transform_0(%arg0: i32) -> (i32, i32, i32) {
    %c0_i32 = arith.constant 0 : i32
    %c0_i32_0 = arith.constant 0 : i32
    %c0_i32_1 = arith.constant 0 : i32
    return %arg0, %c0_i32, %c0_i32_0 : i32, i32, i32
  }
  func.func @transform_1(%arg0: i32) -> (i32, i32, i32) {
    %c0_i32 = arith.constant 0 : i32
    %c0_i32_0 = arith.constant 0 : i32
    %c0_i32_1 = arith.constant 0 : i32
    return %arg0, %c0_i32, %c0_i32_0 : i32, i32, i32
  }
  func.func @transform_2(%arg0: i32) -> (i32, i32) {
    %c0_i32 = arith.constant 0 : i32
    %c0_i32_0 = arith.constant 0 : i32
    %c0_i32_1 = arith.constant 0 : i32
    return %c0_i32, %c0_i32_0 : i32, i32
  }
  func.func @transform_3(%arg0: i32) -> (i32, i32) {
    %c0_i32 = arith.constant 0 : i32
    %c0_i32_0 = arith.constant 0 : i32
    %c0_i32_1 = arith.constant 0 : i32
    return %c0_i32, %c0_i32_0 : i32, i32
  }
  func.func @transform_4(%arg0: i32) -> (i32, i32) {
    %c0_i32 = arith.constant 0 : i32
    %c0_i32_0 = arith.constant 0 : i32
    %c0_i32_1 = arith.constant 0 : i32
    return %c0_i32, %c0_i32_0 : i32, i32
  }
  func.func @transform_5(%arg0: i32) -> (i32, i32) {
    %c0_i32 = arith.constant 0 : i32
    %c0_i32_0 = arith.constant 0 : i32
    %c0_i32_1 = arith.constant 0 : i32
    return %c0_i32, %c0_i32_0 : i32, i32
  }
  func.func @transform_6(%arg0: i32) -> (i32, i32) {
    %c0_i32 = arith.constant 0 : i32
    %c0_i32_0 = arith.constant 0 : i32
    %c0_i32_1 = arith.constant 0 : i32
    return %c0_i32, %c0_i32_0 : i32, i32
  }
  func.func @transform_7(%arg0: i32) -> (i32, i32) {
    %c0_i32 = arith.constant 0 : i32
    %c0_i32_0 = arith.constant 0 : i32
    %c0_i32_1 = arith.constant 0 : i32
    return %c0_i32, %c0_i32_0 : i32, i32
  }
  func.func @transform_8(%arg0: i32) -> (i32, i32, i32, i32) {
    %c0_i32 = arith.constant 0 : i32
    %c0_i32_0 = arith.constant 0 : i32
    %c0_i32_1 = arith.constant 0 : i32
    %c0_i32_2 = arith.constant 0 : i32
    return %arg0, %c0_i32, %c0_i32_0, %c0_i32_1 : i32, i32, i32, i32
  }
}

module attributes {stable_mosaic.version = 11 : i64} {
  func.func @_mha_kernel(%arg0: i32, %arg1: memref<1x8x16xf32, #tpu.memory_space<vmem>>, %arg2: memref<1x16xf32, #tpu.memory_space<vmem>>, %arg3: memref<1x16xf32, #tpu.memory_space<vmem>>, %arg4: memref<16x16xf32, #tpu.memory_space<vmem>>, %arg5: memref<1x16xf32, #tpu.memory_space<vmem>>, %arg6: memref<16x16xf32, #tpu.memory_space<vmem>>, %arg7: memref<1x16xf32, #tpu.memory_space<vmem>>, %arg8: memref<16x16xf32, #tpu.memory_space<vmem>>, %arg9: memref<1x16xf32, #tpu.memory_space<vmem>>, %arg10: memref<16x16xf32, #tpu.memory_space<vmem>>, %arg11: memref<1x16xf32, #tpu.memory_space<vmem>>, %arg12: memref<1x8x16xf32, #tpu.memory_space<vmem>>) attributes {dimension_semantics = [#tpu.dimension_semantics<parallel>], iteration_bounds = array<i64: 8>, scalar_prefetch = 0 : i64, scratch_operands = 0 : i64, tpu.core_type = #tpu.core_type<tc>, window_params = [{transform_indices = @transform_0, window_bounds = array<i64: 1, 8, 16>}, {pipeline_mode = #tpu.pipeline_mode<synchronous>, transform_indices = @transform_1, window_bounds = array<i64: 1, 16>}, {pipeline_mode = #tpu.pipeline_mode<synchronous>, transform_indices = @transform_2, window_bounds = array<i64: 1, 16>}, {pipeline_mode = #tpu.pipeline_mode<synchronous>, transform_indices = @transform_3, window_bounds = array<i64: 16, 16>}, {pipeline_mode = #tpu.pipeline_mode<synchronous>, transform_indices = @transform_4, window_bounds = array<i64: 1, 16>}, {pipeline_mode = #tpu.pipeline_mode<synchronous>, transform_indices = @transform_5, window_bounds = array<i64: 16, 16>}, {pipeline_mode = #tpu.pipeline_mode<synchronous>, transform_indices = @transform_6, window_bounds = array<i64: 1, 16>}, {pipeline_mode = #tpu.pipeline_mode<synchronous>, transform_indices = @transform_7, window_bounds = array<i64: 16, 16>}, {pipeline_mode = #tpu.pipeline_mode<synchronous>, transform_indices = @transform_8, window_bounds = array<i64: 1, 16>}, {pipeline_mode = #tpu.pipeline_mode<synchronous>, transform_indices = @transform_9, window_bounds = array<i64: 16, 16>}, {pipeline_mode = #tpu.pipeline_mode<synchronous>, transform_indices = @transform_10, window_bounds = array<i64: 1, 16>}, {transform_indices = @transform_11, window_bounds = array<i64: 1, 8, 16>}]} {
    %c0 = arith.constant 0 : index
    %c0_0 = arith.constant 0 : index
    %c0_1 = arith.constant 0 : index
    %0 = vector.load %arg1[%c0, %c0_0, %c0_1] : memref<1x8x16xf32, #tpu.memory_space<vmem>>, vector<1x8x16xf32>
    %1 = vector.shape_cast %0 : vector<1x8x16xf32> to vector<8x16xf32>
    %c0_2 = arith.constant 0 : index
    %c0_3 = arith.constant 0 : index
    %2 = vector.load %arg2[%c0_2, %c0_3] : memref<1x16xf32, #tpu.memory_space<vmem>>, vector<1x16xf32>
    %c0_4 = arith.constant 0 : index
    %c0_5 = arith.constant 0 : index
    %3 = vector.load %arg3[%c0_4, %c0_5] : memref<1x16xf32, #tpu.memory_space<vmem>>, vector<1x16xf32>
    %cst = arith.constant dense<0.000000e+00> : vector<8xf32>
    %4 = vector.multi_reduction <add>, %1, %cst [1] : vector<8x16xf32> to vector<8xf32>
    %5 = vector.shape_cast %4 : vector<8xf32> to vector<8x1xf32>
    %cst_6 = arith.constant 1.600000e+01 : f32
    %6 = vector.broadcast %cst_6 : f32 to vector<8x1xf32>
    %7 = arith.divf %5, %6 : vector<8x1xf32>
    %8 = vector.broadcast %7 : vector<8x1xf32> to vector<8x16xf32>
    %9 = arith.subf %1, %8 : vector<8x16xf32>
    %10 = arith.mulf %9, %9 : vector<8x16xf32>
    %cst_7 = arith.constant dense<0.000000e+00> : vector<8xf32>
    %11 = vector.multi_reduction <add>, %10, %cst_7 [1] : vector<8x16xf32> to vector<8xf32>
    %12 = vector.shape_cast %11 : vector<8xf32> to vector<8x1xf32>
    %cst_8 = arith.constant 1.600000e+01 : f32
    %13 = vector.broadcast %cst_8 : f32 to vector<8x1xf32>
    %14 = arith.divf %12, %13 : vector<8x1xf32>
    %cst_9 = arith.constant 9.99999974E-6 : f32
    %15 = vector.broadcast %cst_9 : f32 to vector<8x1xf32>
    %16 = arith.addf %14, %15 : vector<8x1xf32>
    %17 = math.rsqrt %16 : vector<8x1xf32>
    %18 = vector.broadcast %17 : vector<8x1xf32> to vector<8x16xf32>
    %19 = arith.mulf %9, %18 : vector<8x16xf32>
    %20 = vector.broadcast %2 : vector<1x16xf32> to vector<8x16xf32>
    %21 = arith.mulf %19, %20 : vector<8x16xf32>
    %22 = vector.broadcast %3 : vector<1x16xf32> to vector<8x16xf32>
    %23 = arith.addf %21, %22 : vector<8x16xf32>
    %c0_10 = arith.constant 0 : index
    %c0_11 = arith.constant 0 : index
    %24 = vector.load %arg4[%c0_10, %c0_11] : memref<16x16xf32, #tpu.memory_space<vmem>>, vector<16x16xf32>
    %c0_12 = arith.constant 0 : index
    %c0_13 = arith.constant 0 : index
    %25 = vector.load %arg5[%c0_12, %c0_13] : memref<1x16xf32, #tpu.memory_space<vmem>>, vector<1x16xf32>
    %c0_14 = arith.constant 0 : index
    %c0_15 = arith.constant 0 : index
    %26 = vector.load %arg6[%c0_14, %c0_15] : memref<16x16xf32, #tpu.memory_space<vmem>>, vector<16x16xf32>
    %c0_16 = arith.constant 0 : index
    %c0_17 = arith.constant 0 : index
    %27 = vector.load %arg7[%c0_16, %c0_17] : memref<1x16xf32, #tpu.memory_space<vmem>>, vector<1x16xf32>
    %c0_18 = arith.constant 0 : index
    %c0_19 = arith.constant 0 : index
    %28 = vector.load %arg8[%c0_18, %c0_19] : memref<16x16xf32, #tpu.memory_space<vmem>>, vector<16x16xf32>
    %c0_20 = arith.constant 0 : index
    %c0_21 = arith.constant 0 : index
    %29 = vector.load %arg9[%c0_20, %c0_21] : memref<1x16xf32, #tpu.memory_space<vmem>>, vector<1x16xf32>
    %c0_22 = arith.constant 0 : index
    %c0_23 = arith.constant 0 : index
    %30 = vector.load %arg10[%c0_22, %c0_23] : memref<16x16xf32, #tpu.memory_space<vmem>>, vector<16x16xf32>
    %c0_24 = arith.constant 0 : index
    %c0_25 = arith.constant 0 : index
    %31 = vector.load %arg11[%c0_24, %c0_25] : memref<1x16xf32, #tpu.memory_space<vmem>>, vector<1x16xf32>
    %32 = vector.broadcast %31 : vector<1x16xf32> to vector<8x16xf32>
    %33 = arith.addf %1, %32 : vector<8x16xf32>
    %34 = vector.extract_strided_slice %24 {offsets = [0, 0], sizes = [16, 8], strides = [1, 1]} : vector<16x16xf32> to vector<16x8xf32>
    %35 = arith.truncf %23 : vector<8x16xf32> to vector<8x16xbf16>
    %36 = arith.truncf %34 : vector<16x8xf32> to vector<16x8xbf16>
    %cst_26 = arith.constant dense<0.000000e+00> : vector<8x8xf32>
    %37 = tpu.matmul %35, %36, %cst_26 {dimension_numbers = #tpu.dot_dimension_numbers<[1], [0], [0], [1], [0, 0, 1, 1], [], []>} : vector<8x16xbf16>, vector<16x8xbf16>, vector<8x8xf32> -> vector<8x8xf32>
    %38 = vector.extract_strided_slice %25 {offsets = [0, 0], sizes = [1, 8], strides = [1, 1]} : vector<1x16xf32> to vector<1x8xf32>
    %39 = vector.broadcast %38 : vector<1x8xf32> to vector<8x8xf32>
    %40 = arith.addf %37, %39 : vector<8x8xf32>
    %41 = vector.extract_strided_slice %26 {offsets = [0, 0], sizes = [16, 8], strides = [1, 1]} : vector<16x16xf32> to vector<16x8xf32>
    %42 = arith.truncf %23 : vector<8x16xf32> to vector<8x16xbf16>
    %43 = arith.truncf %41 : vector<16x8xf32> to vector<16x8xbf16>
    %cst_27 = arith.constant dense<0.000000e+00> : vector<8x8xf32>
    %44 = tpu.matmul %42, %43, %cst_27 {dimension_numbers = #tpu.dot_dimension_numbers<[1], [0], [0], [1], [0, 0, 1, 1], [], []>} : vector<8x16xbf16>, vector<16x8xbf16>, vector<8x8xf32> -> vector<8x8xf32>
    %45 = vector.extract_strided_slice %27 {offsets = [0, 0], sizes = [1, 8], strides = [1, 1]} : vector<1x16xf32> to vector<1x8xf32>
    %46 = vector.broadcast %45 : vector<1x8xf32> to vector<8x8xf32>
    %47 = arith.addf %44, %46 : vector<8x8xf32>
    %48 = vector.extract_strided_slice %28 {offsets = [0, 0], sizes = [16, 8], strides = [1, 1]} : vector<16x16xf32> to vector<16x8xf32>
    %49 = arith.truncf %23 : vector<8x16xf32> to vector<8x16xbf16>
    %50 = arith.truncf %48 : vector<16x8xf32> to vector<16x8xbf16>
    %cst_28 = arith.constant dense<0.000000e+00> : vector<8x8xf32>
    %51 = tpu.matmul %49, %50, %cst_28 {dimension_numbers = #tpu.dot_dimension_numbers<[1], [0], [0], [1], [0, 0, 1, 1], [], []>} : vector<8x16xbf16>, vector<16x8xbf16>, vector<8x8xf32> -> vector<8x8xf32>
    %52 = vector.extract_strided_slice %29 {offsets = [0, 0], sizes = [1, 8], strides = [1, 1]} : vector<1x16xf32> to vector<1x8xf32>
    %53 = vector.broadcast %52 : vector<1x8xf32> to vector<8x8xf32>
    %54 = arith.addf %51, %53 : vector<8x8xf32>
    %55 = arith.truncf %40 : vector<8x8xf32> to vector<8x8xbf16>
    %56 = arith.truncf %47 : vector<8x8xf32> to vector<8x8xbf16>
    %cst_29 = arith.constant dense<0.000000e+00> : vector<8x8xf32>
    %57 = tpu.matmul %55, %56, %cst_29 {dimension_numbers = #tpu.dot_dimension_numbers<[1], [1], [0], [0], [0, 0, 1, 0], [], []>} : vector<8x8xbf16>, vector<8x8xbf16>, vector<8x8xf32> -> vector<8x8xf32>
    %cst_30 = arith.constant 0.353553385 : f32
    %58 = vector.broadcast %cst_30 : f32 to vector<8x8xf32>
    %59 = arith.mulf %57, %58 : vector<8x8xf32>
    %cst_31 = arith.constant dense<0xFF800000> : vector<8xf32>
    %60 = vector.multi_reduction <maximumf>, %59, %cst_31 [1] : vector<8x8xf32> to vector<8xf32>
    %61 = vector.shape_cast %60 : vector<8xf32> to vector<8x1xf32>
    %62 = vector.broadcast %61 : vector<8x1xf32> to vector<8x8xf32>
    %63 = arith.subf %59, %62 : vector<8x8xf32>
    %64 = math.exp %63 : vector<8x8xf32>
    %cst_32 = arith.constant dense<0.000000e+00> : vector<8xf32>
    %65 = vector.multi_reduction <add>, %64, %cst_32 [1] : vector<8x8xf32> to vector<8xf32>
    %66 = vector.shape_cast %65 : vector<8xf32> to vector<8x1xf32>
    %67 = tpu.reciprocal %66 {approx = true} : vector<8x1xf32> -> vector<8x1xf32>
    %68 = vector.broadcast %67 : vector<8x1xf32> to vector<8x8xf32>
    %69 = arith.mulf %64, %68 : vector<8x8xf32>
    %70 = arith.truncf %69 : vector<8x8xf32> to vector<8x8xbf16>
    %71 = arith.truncf %54 : vector<8x8xf32> to vector<8x8xbf16>
    %cst_33 = arith.constant dense<0.000000e+00> : vector<8x8xf32>
    %72 = tpu.matmul %70, %71, %cst_33 {dimension_numbers = #tpu.dot_dimension_numbers<[1], [0], [0], [1], [0, 0, 1, 1], [], []>} : vector<8x8xbf16>, vector<8x8xbf16>, vector<8x8xf32> -> vector<8x8xf32>
    %73 = vector.extract_strided_slice %30 {offsets = [0, 0], sizes = [8, 16], strides = [1, 1]} : vector<16x16xf32> to vector<8x16xf32>
    %74 = arith.truncf %72 : vector<8x8xf32> to vector<8x8xbf16>
    %75 = arith.truncf %73 : vector<8x16xf32> to vector<8x16xbf16>
    %cst_34 = arith.constant dense<0.000000e+00> : vector<8x16xf32>
    %76 = tpu.matmul %74, %75, %cst_34 {dimension_numbers = #tpu.dot_dimension_numbers<[1], [0], [0], [1], [0, 0, 1, 1], [], []>} : vector<8x8xbf16>, vector<8x16xbf16>, vector<8x16xf32> -> vector<8x16xf32>
    %77 = arith.addf %33, %76 : vector<8x16xf32>
    %78 = vector.extract_strided_slice %24 {offsets = [0, 8], sizes = [16, 8], strides = [1, 1]} : vector<16x16xf32> to vector<16x8xf32>
    %79 = arith.truncf %23 : vector<8x16xf32> to vector<8x16xbf16>
    %80 = arith.truncf %78 : vector<16x8xf32> to vector<16x8xbf16>
    %cst_35 = arith.constant dense<0.000000e+00> : vector<8x8xf32>
    %81 = tpu.matmul %79, %80, %cst_35 {dimension_numbers = #tpu.dot_dimension_numbers<[1], [0], [0], [1], [0, 0, 1, 1], [], []>} : vector<8x16xbf16>, vector<16x8xbf16>, vector<8x8xf32> -> vector<8x8xf32>
    %82 = vector.extract_strided_slice %25 {offsets = [0, 8], sizes = [1, 8], strides = [1, 1]} : vector<1x16xf32> to vector<1x8xf32>
    %83 = vector.broadcast %82 : vector<1x8xf32> to vector<8x8xf32>
    %84 = arith.addf %81, %83 : vector<8x8xf32>
    %85 = vector.extract_strided_slice %26 {offsets = [0, 8], sizes = [16, 8], strides = [1, 1]} : vector<16x16xf32> to vector<16x8xf32>
    %86 = arith.truncf %23 : vector<8x16xf32> to vector<8x16xbf16>
    %87 = arith.truncf %85 : vector<16x8xf32> to vector<16x8xbf16>
    %cst_36 = arith.constant dense<0.000000e+00> : vector<8x8xf32>
    %88 = tpu.matmul %86, %87, %cst_36 {dimension_numbers = #tpu.dot_dimension_numbers<[1], [0], [0], [1], [0, 0, 1, 1], [], []>} : vector<8x16xbf16>, vector<16x8xbf16>, vector<8x8xf32> -> vector<8x8xf32>
    %89 = vector.extract_strided_slice %27 {offsets = [0, 8], sizes = [1, 8], strides = [1, 1]} : vector<1x16xf32> to vector<1x8xf32>
    %90 = vector.broadcast %89 : vector<1x8xf32> to vector<8x8xf32>
    %91 = arith.addf %88, %90 : vector<8x8xf32>
    %92 = vector.extract_strided_slice %28 {offsets = [0, 8], sizes = [16, 8], strides = [1, 1]} : vector<16x16xf32> to vector<16x8xf32>
    %93 = arith.truncf %23 : vector<8x16xf32> to vector<8x16xbf16>
    %94 = arith.truncf %92 : vector<16x8xf32> to vector<16x8xbf16>
    %cst_37 = arith.constant dense<0.000000e+00> : vector<8x8xf32>
    %95 = tpu.matmul %93, %94, %cst_37 {dimension_numbers = #tpu.dot_dimension_numbers<[1], [0], [0], [1], [0, 0, 1, 1], [], []>} : vector<8x16xbf16>, vector<16x8xbf16>, vector<8x8xf32> -> vector<8x8xf32>
    %96 = vector.extract_strided_slice %29 {offsets = [0, 8], sizes = [1, 8], strides = [1, 1]} : vector<1x16xf32> to vector<1x8xf32>
    %97 = vector.broadcast %96 : vector<1x8xf32> to vector<8x8xf32>
    %98 = arith.addf %95, %97 : vector<8x8xf32>
    %99 = arith.truncf %84 : vector<8x8xf32> to vector<8x8xbf16>
    %100 = arith.truncf %91 : vector<8x8xf32> to vector<8x8xbf16>
    %cst_38 = arith.constant dense<0.000000e+00> : vector<8x8xf32>
    %101 = tpu.matmul %99, %100, %cst_38 {dimension_numbers = #tpu.dot_dimension_numbers<[1], [1], [0], [0], [0, 0, 1, 0], [], []>} : vector<8x8xbf16>, vector<8x8xbf16>, vector<8x8xf32> -> vector<8x8xf32>
    %cst_39 = arith.constant 0.353553385 : f32
    %102 = vector.broadcast %cst_39 : f32 to vector<8x8xf32>
    %103 = arith.mulf %101, %102 : vector<8x8xf32>
    %cst_40 = arith.constant dense<0xFF800000> : vector<8xf32>
    %104 = vector.multi_reduction <maximumf>, %103, %cst_40 [1] : vector<8x8xf32> to vector<8xf32>
    %105 = vector.shape_cast %104 : vector<8xf32> to vector<8x1xf32>
    %106 = vector.broadcast %105 : vector<8x1xf32> to vector<8x8xf32>
    %107 = arith.subf %103, %106 : vector<8x8xf32>
    %108 = math.exp %107 : vector<8x8xf32>
    %cst_41 = arith.constant dense<0.000000e+00> : vector<8xf32>
    %109 = vector.multi_reduction <add>, %108, %cst_41 [1] : vector<8x8xf32> to vector<8xf32>
    %110 = vector.shape_cast %109 : vector<8xf32> to vector<8x1xf32>
    %111 = tpu.reciprocal %110 {approx = true} : vector<8x1xf32> -> vector<8x1xf32>
    %112 = vector.broadcast %111 : vector<8x1xf32> to vector<8x8xf32>
    %113 = arith.mulf %108, %112 : vector<8x8xf32>
    %114 = arith.truncf %113 : vector<8x8xf32> to vector<8x8xbf16>
    %115 = arith.truncf %98 : vector<8x8xf32> to vector<8x8xbf16>
    %cst_42 = arith.constant dense<0.000000e+00> : vector<8x8xf32>
    %116 = tpu.matmul %114, %115, %cst_42 {dimension_numbers = #tpu.dot_dimension_numbers<[1], [0], [0], [1], [0, 0, 1, 1], [], []>} : vector<8x8xbf16>, vector<8x8xbf16>, vector<8x8xf32> -> vector<8x8xf32>
    %117 = vector.extract_strided_slice %30 {offsets = [8, 0], sizes = [8, 16], strides = [1, 1]} : vector<16x16xf32> to vector<8x16xf32>
    %118 = arith.truncf %116 : vector<8x8xf32> to vector<8x8xbf16>
    %119 = arith.truncf %117 : vector<8x16xf32> to vector<8x16xbf16>
    %cst_43 = arith.constant dense<0.000000e+00> : vector<8x16xf32>
    %120 = tpu.matmul %118, %119, %cst_43 {dimension_numbers = #tpu.dot_dimension_numbers<[1], [0], [0], [1], [0, 0, 1, 1], [], []>} : vector<8x8xbf16>, vector<8x16xbf16>, vector<8x16xf32> -> vector<8x16xf32>
    %121 = arith.addf %77, %120 : vector<8x16xf32>
    %c0_44 = arith.constant 0 : index
    %c0_45 = arith.constant 0 : index
    %c0_46 = arith.constant 0 : index
    %122 = vector.load %arg12[%c0_44, %c0_45, %c0_46] : memref<1x8x16xf32, #tpu.memory_space<vmem>>, vector<1x8x16xf32>
    %123 = vector.shape_cast %122 : vector<1x8x16xf32> to vector<8x16xf32>
    %124 = vector.shape_cast %121 : vector<8x16xf32> to vector<1x8x16xf32>
    tpu.vector_store %arg12[%c0_44, %c0_45, %c0_46], %124 {strides = array<i32>} : memref<1x8x16xf32, #tpu.memory_space<vmem>>, vector<1x8x16xf32>,
    return
  }
  func.func @transform_0(%arg0: i32) -> (i32, i32, i32) {
    %c0_i32 = arith.constant 0 : i32
    %c0_i32_0 = arith.constant 0 : i32
    %c0_i32_1 = arith.constant 0 : i32
    return %arg0, %c0_i32, %c0_i32_0 : i32, i32, i32
  }
  func.func @transform_1(%arg0: i32) -> (i32, i32) {
    %c0_i32 = arith.constant 0 : i32
    %c0_i32_0 = arith.constant 0 : i32
    %c0_i32_1 = arith.constant 0 : i32
    return %c0_i32, %c0_i32_0 : i32, i32
  }
  func.func @transform_2(%arg0: i32) -> (i32, i32) {
    %c0_i32 = arith.constant 0 : i32
    %c0_i32_0 = arith.constant 0 : i32
    %c0_i32_1 = arith.constant 0 : i32
    return %c0_i32, %c0_i32_0 : i32, i32
  }
  func.func @transform_3(%arg0: i32) -> (i32, i32) {
    %c0_i32 = arith.constant 0 : i32
    %c0_i32_0 = arith.constant 0 : i32
    %c0_i32_1 = arith.constant 0 : i32
    return %c0_i32, %c0_i32_0 : i32, i32
  }
  func.func @transform_4(%arg0: i32) -> (i32, i32) {
    %c0_i32 = arith.constant 0 : i32
    %c0_i32_0 = arith.constant 0 : i32
    %c0_i32_1 = arith.constant 0 : i32
    return %c0_i32, %c0_i32_0 : i32, i32
  }
  func.func @transform_5(%arg0: i32) -> (i32, i32) {
    %c0_i32 = arith.constant 0 : i32
    %c0_i32_0 = arith.constant 0 : i32
    %c0_i32_1 = arith.constant 0 : i32
    return %c0_i32, %c0_i32_0 : i32, i32
  }
  func.func @transform_6(%arg0: i32) -> (i32, i32) {
    %c0_i32 = arith.constant 0 : i32
    %c0_i32_0 = arith.constant 0 : i32
    %c0_i32_1 = arith.constant 0 : i32
    return %c0_i32, %c0_i32_0 : i32, i32
  }
  func.func @transform_7(%arg0: i32) -> (i32, i32) {
    %c0_i32 = arith.constant 0 : i32
    %c0_i32_0 = arith.constant 0 : i32
    %c0_i32_1 = arith.constant 0 : i32
    return %c0_i32, %c0_i32_0 : i32, i32
  }
  func.func @transform_8(%arg0: i32) -> (i32, i32) {
    %c0_i32 = arith.constant 0 : i32
    %c0_i32_0 = arith.constant 0 : i32
    %c0_i32_1 = arith.constant 0 : i32
    return %c0_i32, %c0_i32_0 : i32, i32
  }
  func.func @transform_9(%arg0: i32) -> (i32, i32) {
    %c0_i32 = arith.constant 0 : i32
    %c0_i32_0 = arith.constant 0 : i32
    %c0_i32_1 = arith.constant 0 : i32
    return %c0_i32, %c0_i32_0 : i32, i32
  }
  func.func @transform_10(%arg0: i32) -> (i32, i32) {
    %c0_i32 = arith.constant 0 : i32
    %c0_i32_0 = arith.constant 0 : i32
    %c0_i32_1 = arith.constant 0 : i32
    return %c0_i32, %c0_i32_0 : i32, i32
  }
  func.func @transform_11(%arg0: i32) -> (i32, i32, i32) {
    %c0_i32 = arith.constant 0 : i32
    %c0_i32_0 = arith.constant 0 : i32
    %c0_i32_1 = arith.constant 0 : i32
    return %arg0, %c0_i32, %c0_i32_0 : i32, i32, i32
  }
}

module attributes {stable_mosaic.version = 11 : i64} {
  func.func @_mha_kernel(%arg0: i32, %arg1: memref<1x4x16xf32, #tpu.memory_space<vmem>>, %arg2: memref<1x16xf32, #tpu.memory_space<vmem>>, %arg3: memref<1x16xf32, #tpu.memory_space<vmem>>, %arg4: memref<16x16xf32, #tpu.memory_space<vmem>>, %arg5: memref<1x16xf32, #tpu.memory_space<vmem>>, %arg6: memref<16x16xf32, #tpu.memory_space<vmem>>, %arg7: memref<1x16xf32, #tpu.memory_space<vmem>>, %arg8: memref<16x16xf32, #tpu.memory_space<vmem>>, %arg9: memref<1x16xf32, #tpu.memory_space<vmem>>, %arg10: memref<16x16xf32, #tpu.memory_space<vmem>>, %arg11: memref<1x16xf32, #tpu.memory_space<vmem>>, %arg12: memref<1x4x16xf32, #tpu.memory_space<vmem>>) attributes {dimension_semantics = [#tpu.dimension_semantics<parallel>], iteration_bounds = array<i64: 16>, scalar_prefetch = 0 : i64, scratch_operands = 0 : i64, tpu.core_type = #tpu.core_type<tc>, window_params = [{transform_indices = @transform_0, window_bounds = array<i64: 1, 4, 16>}, {pipeline_mode = #tpu.pipeline_mode<synchronous>, transform_indices = @transform_1, window_bounds = array<i64: 1, 16>}, {pipeline_mode = #tpu.pipeline_mode<synchronous>, transform_indices = @transform_2, window_bounds = array<i64: 1, 16>}, {pipeline_mode = #tpu.pipeline_mode<synchronous>, transform_indices = @transform_3, window_bounds = array<i64: 16, 16>}, {pipeline_mode = #tpu.pipeline_mode<synchronous>, transform_indices = @transform_4, window_bounds = array<i64: 1, 16>}, {pipeline_mode = #tpu.pipeline_mode<synchronous>, transform_indices = @transform_5, window_bounds = array<i64: 16, 16>}, {pipeline_mode = #tpu.pipeline_mode<synchronous>, transform_indices = @transform_6, window_bounds = array<i64: 1, 16>}, {pipeline_mode = #tpu.pipeline_mode<synchronous>, transform_indices = @transform_7, window_bounds = array<i64: 16, 16>}, {pipeline_mode = #tpu.pipeline_mode<synchronous>, transform_indices = @transform_8, window_bounds = array<i64: 1, 16>}, {pipeline_mode = #tpu.pipeline_mode<synchronous>, transform_indices = @transform_9, window_bounds = array<i64: 16, 16>}, {pipeline_mode = #tpu.pipeline_mode<synchronous>, transform_indices = @transform_10, window_bounds = array<i64: 1, 16>}, {transform_indices = @transform_11, window_bounds = array<i64: 1, 4, 16>}]} {
    %c0 = arith.constant 0 : index
    %c0_0 = arith.constant 0 : index
    %c0_1 = arith.constant 0 : index
    %0 = vector.load %arg1[%c0, %c0_0, %c0_1] : memref<1x4x16xf32, #tpu.memory_space<vmem>>, vector<1x4x16xf32>
    %1 = vector.shape_cast %0 : vector<1x4x16xf32> to vector<4x16xf32>
    %c0_2 = arith.constant 0 : index
    %c0_3 = arith.constant 0 : index
    %2 = vector.load %arg2[%c0_2, %c0_3] : memref<1x16xf32, #tpu.memory_space<vmem>>, vector<1x16xf32>
    %c0_4 = arith.constant 0 : index
    %c0_5 = arith.constant 0 : index
    %3 = vector.load %arg3[%c0_4, %c0_5] : memref<1x16xf32, #tpu.memory_space<vmem>>, vector<1x16xf32>
    %cst = arith.constant dense<0.000000e+00> : vector<4xf32>
    %4 = vector.multi_reduction <add>, %1, %cst [1] : vector<4x16xf32> to vector<4xf32>
    %5 = vector.shape_cast %4 : vector<4xf32> to vector<4x1xf32>
    %cst_6 = arith.constant 1.600000e+01 : f32
    %6 = vector.broadcast %cst_6 : f32 to vector<4x1xf32>
    %7 = arith.divf %5, %6 : vector<4x1xf32>
    %8 = vector.broadcast %7 : vector<4x1xf32> to vector<4x16xf32>
    %9 = arith.subf %1, %8 : vector<4x16xf32>
    %10 = arith.mulf %9, %9 : vector<4x16xf32>
    %cst_7 = arith.constant dense<0.000000e+00> : vector<4xf32>
    %11 = vector.multi_reduction <add>, %10, %cst_7 [1] : vector<4x16xf32> to vector<4xf32>
    %12 = vector.shape_cast %11 : vector<4xf32> to vector<4x1xf32>
    %cst_8 = arith.constant 1.600000e+01 : f32
    %13 = vector.broadcast %cst_8 : f32 to vector<4x1xf32>
    %14 = arith.divf %12, %13 : vector<4x1xf32>
    %cst_9 = arith.constant 9.99999974E-6 : f32
    %15 = vector.broadcast %cst_9 : f32 to vector<4x1xf32>
    %16 = arith.addf %14, %15 : vector<4x1xf32>
    %17 = math.rsqrt %16 : vector<4x1xf32>
    %18 = vector.broadcast %17 : vector<4x1xf32> to vector<4x16xf32>
    %19 = arith.mulf %9, %18 : vector<4x16xf32>
    %20 = vector.broadcast %2 : vector<1x16xf32> to vector<4x16xf32>
    %21 = arith.mulf %19, %20 : vector<4x16xf32>
    %22 = vector.broadcast %3 : vector<1x16xf32> to vector<4x16xf32>
    %23 = arith.addf %21, %22 : vector<4x16xf32>
    %c0_10 = arith.constant 0 : index
    %c0_11 = arith.constant 0 : index
    %24 = vector.load %arg4[%c0_10, %c0_11] : memref<16x16xf32, #tpu.memory_space<vmem>>, vector<16x16xf32>
    %c0_12 = arith.constant 0 : index
    %c0_13 = arith.constant 0 : index
    %25 = vector.load %arg5[%c0_12, %c0_13] : memref<1x16xf32, #tpu.memory_space<vmem>>, vector<1x16xf32>
    %c0_14 = arith.constant 0 : index
    %c0_15 = arith.constant 0 : index
    %26 = vector.load %arg6[%c0_14, %c0_15] : memref<16x16xf32, #tpu.memory_space<vmem>>, vector<16x16xf32>
    %c0_16 = arith.constant 0 : index
    %c0_17 = arith.constant 0 : index
    %27 = vector.load %arg7[%c0_16, %c0_17] : memref<1x16xf32, #tpu.memory_space<vmem>>, vector<1x16xf32>
    %c0_18 = arith.constant 0 : index
    %c0_19 = arith.constant 0 : index
    %28 = vector.load %arg8[%c0_18, %c0_19] : memref<16x16xf32, #tpu.memory_space<vmem>>, vector<16x16xf32>
    %c0_20 = arith.constant 0 : index
    %c0_21 = arith.constant 0 : index
    %29 = vector.load %arg9[%c0_20, %c0_21] : memref<1x16xf32, #tpu.memory_space<vmem>>, vector<1x16xf32>
    %c0_22 = arith.constant 0 : index
    %c0_23 = arith.constant 0 : index
    %30 = vector.load %arg10[%c0_22, %c0_23] : memref<16x16xf32, #tpu.memory_space<vmem>>, vector<16x16xf32>
    %c0_24 = arith.constant 0 : index
    %c0_25 = arith.constant 0 : index
    %31 = vector.load %arg11[%c0_24, %c0_25] : memref<1x16xf32, #tpu.memory_space<vmem>>, vector<1x16xf32>
    %32 = vector.broadcast %31 : vector<1x16xf32> to vector<4x16xf32>
    %33 = arith.addf %1, %32 : vector<4x16xf32>
    %34 = vector.extract_strided_slice %24 {offsets = [0, 0], sizes = [16, 8], strides = [1, 1]} : vector<16x16xf32> to vector<16x8xf32>
    %35 = arith.truncf %23 : vector<4x16xf32> to vector<4x16xbf16>
    %36 = arith.truncf %34 : vector<16x8xf32> to vector<16x8xbf16>
    %cst_26 = arith.constant dense<0.000000e+00> : vector<4x8xf32>
    %37 = tpu.matmul %35, %36, %cst_26 {dimension_numbers = #tpu.dot_dimension_numbers<[1], [0], [0], [1], [0, 0, 1, 1], [], []>} : vector<4x16xbf16>, vector<16x8xbf16>, vector<4x8xf32> -> vector<4x8xf32>
    %38 = vector.extract_strided_slice %25 {offsets = [0, 0], sizes = [1, 8], strides = [1, 1]} : vector<1x16xf32> to vector<1x8xf32>
    %39 = vector.broadcast %38 : vector<1x8xf32> to vector<4x8xf32>
    %40 = arith.addf %37, %39 : vector<4x8xf32>
    %41 = vector.extract_strided_slice %26 {offsets = [0, 0], sizes = [16, 8], strides = [1, 1]} : vector<16x16xf32> to vector<16x8xf32>
    %42 = arith.truncf %23 : vector<4x16xf32> to vector<4x16xbf16>
    %43 = arith.truncf %41 : vector<16x8xf32> to vector<16x8xbf16>
    %cst_27 = arith.constant dense<0.000000e+00> : vector<4x8xf32>
    %44 = tpu.matmul %42, %43, %cst_27 {dimension_numbers = #tpu.dot_dimension_numbers<[1], [0], [0], [1], [0, 0, 1, 1], [], []>} : vector<4x16xbf16>, vector<16x8xbf16>, vector<4x8xf32> -> vector<4x8xf32>
    %45 = vector.extract_strided_slice %27 {offsets = [0, 0], sizes = [1, 8], strides = [1, 1]} : vector<1x16xf32> to vector<1x8xf32>
    %46 = vector.broadcast %45 : vector<1x8xf32> to vector<4x8xf32>
    %47 = arith.addf %44, %46 : vector<4x8xf32>
    %48 = vector.extract_strided_slice %28 {offsets = [0, 0], sizes = [16, 8], strides = [1, 1]} : vector<16x16xf32> to vector<16x8xf32>
    %49 = arith.truncf %23 : vector<4x16xf32> to vector<4x16xbf16>
    %50 = arith.truncf %48 : vector<16x8xf32> to vector<16x8xbf16>
    %cst_28 = arith.constant dense<0.000000e+00> : vector<4x8xf32>
    %51 = tpu.matmul %49, %50, %cst_28 {dimension_numbers = #tpu.dot_dimension_numbers<[1], [0], [0], [1], [0, 0, 1, 1], [], []>} : vector<4x16xbf16>, vector<16x8xbf16>, vector<4x8xf32> -> vector<4x8xf32>
    %52 = vector.extract_strided_slice %29 {offsets = [0, 0], sizes = [1, 8], strides = [1, 1]} : vector<1x16xf32> to vector<1x8xf32>
    %53 = vector.broadcast %52 : vector<1x8xf32> to vector<4x8xf32>
    %54 = arith.addf %51, %53 : vector<4x8xf32>
    %55 = arith.truncf %40 : vector<4x8xf32> to vector<4x8xbf16>
    %56 = arith.truncf %47 : vector<4x8xf32> to vector<4x8xbf16>
    %cst_29 = arith.constant dense<0.000000e+00> : vector<4x4xf32>
    %57 = tpu.matmul %55, %56, %cst_29 {dimension_numbers = #tpu.dot_dimension_numbers<[1], [1], [0], [0], [0, 0, 1, 0], [], []>} : vector<4x8xbf16>, vector<4x8xbf16>, vector<4x4xf32> -> vector<4x4xf32>
    %cst_30 = arith.constant 0.353553385 : f32
    %58 = vector.broadcast %cst_30 : f32 to vector<4x4xf32>
    %59 = arith.mulf %57, %58 : vector<4x4xf32>
    %cst_31 = arith.constant dense<0xFF800000> : vector<4xf32>
    %60 = vector.multi_reduction <maximumf>, %59, %cst_31 [1] : vector<4x4xf32> to vector<4xf32>
    %61 = vector.shape_cast %60 : vector<4xf32> to vector<4x1xf32>
    %62 = vector.broadcast %61 : vector<4x1xf32> to vector<4x4xf32>
    %63 = arith.subf %59, %62 : vector<4x4xf32>
    %64 = math.exp %63 : vector<4x4xf32>
    %cst_32 = arith.constant dense<0.000000e+00> : vector<4xf32>
    %65 = vector.multi_reduction <add>, %64, %cst_32 [1] : vector<4x4xf32> to vector<4xf32>
    %66 = vector.shape_cast %65 : vector<4xf32> to vector<4x1xf32>
    %67 = tpu.reciprocal %66 {approx = true} : vector<4x1xf32> -> vector<4x1xf32>
    %68 = vector.broadcast %67 : vector<4x1xf32> to vector<4x4xf32>
    %69 = arith.mulf %64, %68 : vector<4x4xf32>
    %70 = arith.truncf %69 : vector<4x4xf32> to vector<4x4xbf16>
    %71 = arith.truncf %54 : vector<4x8xf32> to vector<4x8xbf16>
    %cst_33 = arith.constant dense<0.000000e+00> : vector<4x8xf32>
    %72 = tpu.matmul %70, %71, %cst_33 {dimension_numbers = #tpu.dot_dimension_numbers<[1], [0], [0], [1], [0, 0, 1, 1], [], []>} : vector<4x4xbf16>, vector<4x8xbf16>, vector<4x8xf32> -> vector<4x8xf32>
    %73 = vector.extract_strided_slice %30 {offsets = [0, 0], sizes = [8, 16], strides = [1, 1]} : vector<16x16xf32> to vector<8x16xf32>
    %74 = arith.truncf %72 : vector<4x8xf32> to vector<4x8xbf16>
    %75 = arith.truncf %73 : vector<8x16xf32> to vector<8x16xbf16>
    %cst_34 = arith.constant dense<0.000000e+00> : vector<4x16xf32>
    %76 = tpu.matmul %74, %75, %cst_34 {dimension_numbers = #tpu.dot_dimension_numbers<[1], [0], [0], [1], [0, 0, 1, 1], [], []>} : vector<4x8xbf16>, vector<8x16xbf16>, vector<4x16xf32> -> vector<4x16xf32>
    %77 = arith.addf %33, %76 : vector<4x16xf32>
    %78 = vector.extract_strided_slice %24 {offsets = [0, 8], sizes = [16, 8], strides = [1, 1]} : vector<16x16xf32> to vector<16x8xf32>
    %79 = arith.truncf %23 : vector<4x16xf32> to vector<4x16xbf16>
    %80 = arith.truncf %78 : vector<16x8xf32> to vector<16x8xbf16>
    %cst_35 = arith.constant dense<0.000000e+00> : vector<4x8xf32>
    %81 = tpu.matmul %79, %80, %cst_35 {dimension_numbers = #tpu.dot_dimension_numbers<[1], [0], [0], [1], [0, 0, 1, 1], [], []>} : vector<4x16xbf16>, vector<16x8xbf16>, vector<4x8xf32> -> vector<4x8xf32>
    %82 = vector.extract_strided_slice %25 {offsets = [0, 8], sizes = [1, 8], strides = [1, 1]} : vector<1x16xf32> to vector<1x8xf32>
    %83 = vector.broadcast %82 : vector<1x8xf32> to vector<4x8xf32>
    %84 = arith.addf %81, %83 : vector<4x8xf32>
    %85 = vector.extract_strided_slice %26 {offsets = [0, 8], sizes = [16, 8], strides = [1, 1]} : vector<16x16xf32> to vector<16x8xf32>
    %86 = arith.truncf %23 : vector<4x16xf32> to vector<4x16xbf16>
    %87 = arith.truncf %85 : vector<16x8xf32> to vector<16x8xbf16>
    %cst_36 = arith.constant dense<0.000000e+00> : vector<4x8xf32>
    %88 = tpu.matmul %86, %87, %cst_36 {dimension_numbers = #tpu.dot_dimension_numbers<[1], [0], [0], [1], [0, 0, 1, 1], [], []>} : vector<4x16xbf16>, vector<16x8xbf16>, vector<4x8xf32> -> vector<4x8xf32>
    %89 = vector.extract_strided_slice %27 {offsets = [0, 8], sizes = [1, 8], strides = [1, 1]} : vector<1x16xf32> to vector<1x8xf32>
    %90 = vector.broadcast %89 : vector<1x8xf32> to vector<4x8xf32>
    %91 = arith.addf %88, %90 : vector<4x8xf32>
    %92 = vector.extract_strided_slice %28 {offsets = [0, 8], sizes = [16, 8], strides = [1, 1]} : vector<16x16xf32> to vector<16x8xf32>
    %93 = arith.truncf %23 : vector<4x16xf32> to vector<4x16xbf16>
    %94 = arith.truncf %92 : vector<16x8xf32> to vector<16x8xbf16>
    %cst_37 = arith.constant dense<0.000000e+00> : vector<4x8xf32>
    %95 = tpu.matmul %93, %94, %cst_37 {dimension_numbers = #tpu.dot_dimension_numbers<[1], [0], [0], [1], [0, 0, 1, 1], [], []>} : vector<4x16xbf16>, vector<16x8xbf16>, vector<4x8xf32> -> vector<4x8xf32>
    %96 = vector.extract_strided_slice %29 {offsets = [0, 8], sizes = [1, 8], strides = [1, 1]} : vector<1x16xf32> to vector<1x8xf32>
    %97 = vector.broadcast %96 : vector<1x8xf32> to vector<4x8xf32>
    %98 = arith.addf %95, %97 : vector<4x8xf32>
    %99 = arith.truncf %84 : vector<4x8xf32> to vector<4x8xbf16>
    %100 = arith.truncf %91 : vector<4x8xf32> to vector<4x8xbf16>
    %cst_38 = arith.constant dense<0.000000e+00> : vector<4x4xf32>
    %101 = tpu.matmul %99, %100, %cst_38 {dimension_numbers = #tpu.dot_dimension_numbers<[1], [1], [0], [0], [0, 0, 1, 0], [], []>} : vector<4x8xbf16>, vector<4x8xbf16>, vector<4x4xf32> -> vector<4x4xf32>
    %cst_39 = arith.constant 0.353553385 : f32
    %102 = vector.broadcast %cst_39 : f32 to vector<4x4xf32>
    %103 = arith.mulf %101, %102 : vector<4x4xf32>
    %cst_40 = arith.constant dense<0xFF800000> : vector<4xf32>
    %104 = vector.multi_reduction <maximumf>, %103, %cst_40 [1] : vector<4x4xf32> to vector<4xf32>
    %105 = vector.shape_cast %104 : vector<4xf32> to vector<4x1xf32>
    %106 = vector.broadcast %105 : vector<4x1xf32> to vector<4x4xf32>
    %107 = arith.subf %103, %106 : vector<4x4xf32>
    %108 = math.exp %107 : vector<4x4xf32>
    %cst_41 = arith.constant dense<0.000000e+00> : vector<4xf32>
    %109 = vector.multi_reduction <add>, %108, %cst_41 [1] : vector<4x4xf32> to vector<4xf32>
    %110 = vector.shape_cast %109 : vector<4xf32> to vector<4x1xf32>
    %111 = tpu.reciprocal %110 {approx = true} : vector<4x1xf32> -> vector<4x1xf32>
    %112 = vector.broadcast %111 : vector<4x1xf32> to vector<4x4xf32>
    %113 = arith.mulf %108, %112 : vector<4x4xf32>
    %114 = arith.truncf %113 : vector<4x4xf32> to vector<4x4xbf16>
    %115 = arith.truncf %98 : vector<4x8xf32> to vector<4x8xbf16>
    %cst_42 = arith.constant dense<0.000000e+00> : vector<4x8xf32>
    %116 = tpu.matmul %114, %115, %cst_42 {dimension_numbers = #tpu.dot_dimension_numbers<[1], [0], [0], [1], [0, 0, 1, 1], [], []>} : vector<4x4xbf16>, vector<4x8xbf16>, vector<4x8xf32> -> vector<4x8xf32>
    %117 = vector.extract_strided_slice %30 {offsets = [8, 0], sizes = [8, 16], strides = [1, 1]} : vector<16x16xf32> to vector<8x16xf32>
    %118 = arith.truncf %116 : vector<4x8xf32> to vector<4x8xbf16>
    %119 = arith.truncf %117 : vector<8x16xf32> to vector<8x16xbf16>
    %cst_43 = arith.constant dense<0.000000e+00> : vector<4x16xf32>
    %120 = tpu.matmul %118, %119, %cst_43 {dimension_numbers = #tpu.dot_dimension_numbers<[1], [0], [0], [1], [0, 0, 1, 1], [], []>} : vector<4x8xbf16>, vector<8x16xbf16>, vector<4x16xf32> -> vector<4x16xf32>
    %121 = arith.addf %77, %120 : vector<4x16xf32>
    %c0_44 = arith.constant 0 : index
    %c0_45 = arith.constant 0 : index
    %c0_46 = arith.constant 0 : index
    %122 = vector.load %arg12[%c0_44, %c0_45, %c0_46] : memref<1x4x16xf32, #tpu.memory_space<vmem>>, vector<1x4x16xf32>
    %123 = vector.shape_cast %122 : vector<1x4x16xf32> to vector<4x16xf32>
    %124 = vector.shape_cast %121 : vector<4x16xf32> to vector<1x4x16xf32>
    tpu.vector_store %arg12[%c0_44, %c0_45, %c0_46], %124 {strides = array<i32>} : memref<1x4x16xf32, #tpu.memory_space<vmem>>, vector<1x4x16xf32>,
    return
  }
  func.func @transform_0(%arg0: i32) -> (i32, i32, i32) {
    %c0_i32 = arith.constant 0 : i32
    %c0_i32_0 = arith.constant 0 : i32
    %c0_i32_1 = arith.constant 0 : i32
    return %arg0, %c0_i32, %c0_i32_0 : i32, i32, i32
  }
  func.func @transform_1(%arg0: i32) -> (i32, i32) {
    %c0_i32 = arith.constant 0 : i32
    %c0_i32_0 = arith.constant 0 : i32
    %c0_i32_1 = arith.constant 0 : i32
    return %c0_i32, %c0_i32_0 : i32, i32
  }
  func.func @transform_2(%arg0: i32) -> (i32, i32) {
    %c0_i32 = arith.constant 0 : i32
    %c0_i32_0 = arith.constant 0 : i32
    %c0_i32_1 = arith.constant 0 : i32
    return %c0_i32, %c0_i32_0 : i32, i32
  }
  func.func @transform_3(%arg0: i32) -> (i32, i32) {
    %c0_i32 = arith.constant 0 : i32
    %c0_i32_0 = arith.constant 0 : i32
    %c0_i32_1 = arith.constant 0 : i32
    return %c0_i32, %c0_i32_0 : i32, i32
  }
  func.func @transform_4(%arg0: i32) -> (i32, i32) {
    %c0_i32 = arith.constant 0 : i32
    %c0_i32_0 = arith.constant 0 : i32
    %c0_i32_1 = arith.constant 0 : i32
    return %c0_i32, %c0_i32_0 : i32, i32
  }
  func.func @transform_5(%arg0: i32) -> (i32, i32) {
    %c0_i32 = arith.constant 0 : i32
    %c0_i32_0 = arith.constant 0 : i32
    %c0_i32_1 = arith.constant 0 : i32
    return %c0_i32, %c0_i32_0 : i32, i32
  }
  func.func @transform_6(%arg0: i32) -> (i32, i32) {
    %c0_i32 = arith.constant 0 : i32
    %c0_i32_0 = arith.constant 0 : i32
    %c0_i32_1 = arith.constant 0 : i32
    return %c0_i32, %c0_i32_0 : i32, i32
  }
  func.func @transform_7(%arg0: i32) -> (i32, i32) {
    %c0_i32 = arith.constant 0 : i32
    %c0_i32_0 = arith.constant 0 : i32
    %c0_i32_1 = arith.constant 0 : i32
    return %c0_i32, %c0_i32_0 : i32, i32
  }
  func.func @transform_8(%arg0: i32) -> (i32, i32) {
    %c0_i32 = arith.constant 0 : i32
    %c0_i32_0 = arith.constant 0 : i32
    %c0_i32_1 = arith.constant 0 : i32
    return %c0_i32, %c0_i32_0 : i32, i32
  }
  func.func @transform_9(%arg0: i32) -> (i32, i32) {
    %c0_i32 = arith.constant 0 : i32
    %c0_i32_0 = arith.constant 0 : i32
    %c0_i32_1 = arith.constant 0 : i32
    return %c0_i32, %c0_i32_0 : i32, i32
  }
  func.func @transform_10(%arg0: i32) -> (i32, i32) {
    %c0_i32 = arith.constant 0 : i32
    %c0_i32_0 = arith.constant 0 : i32
    %c0_i32_1 = arith.constant 0 : i32
    return %c0_i32, %c0_i32_0 : i32, i32
  }
  func.func @transform_11(%arg0: i32) -> (i32, i32, i32) {
    %c0_i32 = arith.constant 0 : i32
    %c0_i32_0 = arith.constant 0 : i32
    %c0_i32_1 = arith.constant 0 : i32
    return %arg0, %c0_i32, %c0_i32_0 : i32, i32, i32
  }
}

module attributes {stable_mosaic.version = 11 : i64} {
  func.func @_transition_kernel(%arg0: i32, %arg1: memref<64x16xf32, #tpu.memory_space<vmem>>, %arg2: memref<1x16xf32, #tpu.memory_space<vmem>>, %arg3: memref<1x16xf32, #tpu.memory_space<vmem>>, %arg4: memref<16x32xf32, #tpu.memory_space<vmem>>, %arg5: memref<1x32xf32, #tpu.memory_space<vmem>>, %arg6: memref<32x16xf32, #tpu.memory_space<vmem>>, %arg7: memref<1x16xf32, #tpu.memory_space<vmem>>, %arg8: memref<64x16xf32, #tpu.memory_space<vmem>>) attributes {dimension_semantics = [#tpu.dimension_semantics<parallel>], iteration_bounds = array<i64: 1>, scalar_prefetch = 0 : i64, scratch_operands = 0 : i64, tpu.core_type = #tpu.core_type<tc>, window_params = [{transform_indices = @transform_0, window_bounds = array<i64: 64, 16>}, {pipeline_mode = #tpu.pipeline_mode<synchronous>, transform_indices = @transform_1, window_bounds = array<i64: 1, 16>}, {pipeline_mode = #tpu.pipeline_mode<synchronous>, transform_indices = @transform_2, window_bounds = array<i64: 1, 16>}, {pipeline_mode = #tpu.pipeline_mode<synchronous>, transform_indices = @transform_3, window_bounds = array<i64: 16, 32>}, {pipeline_mode = #tpu.pipeline_mode<synchronous>, transform_indices = @transform_4, window_bounds = array<i64: 1, 32>}, {pipeline_mode = #tpu.pipeline_mode<synchronous>, transform_indices = @transform_5, window_bounds = array<i64: 32, 16>}, {pipeline_mode = #tpu.pipeline_mode<synchronous>, transform_indices = @transform_6, window_bounds = array<i64: 1, 16>}, {transform_indices = @transform_7, window_bounds = array<i64: 64, 16>}]} {
    %c0 = arith.constant 0 : index
    %c0_0 = arith.constant 0 : index
    %0 = vector.load %arg1[%c0, %c0_0] : memref<64x16xf32, #tpu.memory_space<vmem>>, vector<64x16xf32>
    %c0_1 = arith.constant 0 : index
    %c0_2 = arith.constant 0 : index
    %1 = vector.load %arg2[%c0_1, %c0_2] : memref<1x16xf32, #tpu.memory_space<vmem>>, vector<1x16xf32>
    %c0_3 = arith.constant 0 : index
    %c0_4 = arith.constant 0 : index
    %2 = vector.load %arg3[%c0_3, %c0_4] : memref<1x16xf32, #tpu.memory_space<vmem>>, vector<1x16xf32>
    %cst = arith.constant dense<0.000000e+00> : vector<64xf32>
    %3 = vector.multi_reduction <add>, %0, %cst [1] : vector<64x16xf32> to vector<64xf32>
    %4 = vector.shape_cast %3 : vector<64xf32> to vector<64x1xf32>
    %cst_5 = arith.constant 1.600000e+01 : f32
    %5 = vector.broadcast %cst_5 : f32 to vector<64x1xf32>
    %6 = arith.divf %4, %5 : vector<64x1xf32>
    %7 = vector.broadcast %6 : vector<64x1xf32> to vector<64x16xf32>
    %8 = arith.subf %0, %7 : vector<64x16xf32>
    %9 = arith.mulf %8, %8 : vector<64x16xf32>
    %cst_6 = arith.constant dense<0.000000e+00> : vector<64xf32>
    %10 = vector.multi_reduction <add>, %9, %cst_6 [1] : vector<64x16xf32> to vector<64xf32>
    %11 = vector.shape_cast %10 : vector<64xf32> to vector<64x1xf32>
    %cst_7 = arith.constant 1.600000e+01 : f32
    %12 = vector.broadcast %cst_7 : f32 to vector<64x1xf32>
    %13 = arith.divf %11, %12 : vector<64x1xf32>
    %cst_8 = arith.constant 9.99999974E-6 : f32
    %14 = vector.broadcast %cst_8 : f32 to vector<64x1xf32>
    %15 = arith.addf %13, %14 : vector<64x1xf32>
    %16 = math.rsqrt %15 : vector<64x1xf32>
    %17 = vector.broadcast %16 : vector<64x1xf32> to vector<64x16xf32>
    %18 = arith.mulf %8, %17 : vector<64x16xf32>
    %19 = vector.broadcast %1 : vector<1x16xf32> to vector<64x16xf32>
    %20 = arith.mulf %18, %19 : vector<64x16xf32>
    %21 = vector.broadcast %2 : vector<1x16xf32> to vector<64x16xf32>
    %22 = arith.addf %20, %21 : vector<64x16xf32>
    %c0_9 = arith.constant 0 : index
    %c0_10 = arith.constant 0 : index
    %23 = vector.load %arg4[%c0_9, %c0_10] : memref<16x32xf32, #tpu.memory_space<vmem>>, vector<16x32xf32>
    %24 = arith.truncf %22 : vector<64x16xf32> to vector<64x16xbf16>
    %25 = arith.truncf %23 : vector<16x32xf32> to vector<16x32xbf16>
    %cst_11 = arith.constant dense<0.000000e+00> : vector<64x32xf32>
    %26 = tpu.matmul %24, %25, %cst_11 {dimension_numbers = #tpu.dot_dimension_numbers<[1], [0], [0], [1], [0, 0, 1, 1], [], []>} : vector<64x16xbf16>, vector<16x32xbf16>, vector<64x32xf32> -> vector<64x32xf32>
    %c0_12 = arith.constant 0 : index
    %c0_13 = arith.constant 0 : index
    %27 = vector.load %arg5[%c0_12, %c0_13] : memref<1x32xf32, #tpu.memory_space<vmem>>, vector<1x32xf32>
    %28 = vector.broadcast %27 : vector<1x32xf32> to vector<64x32xf32>
    %29 = arith.addf %26, %28 : vector<64x32xf32>
    %30 = arith.mulf %29, %29 : vector<64x32xf32>
    %31 = arith.mulf %29, %30 : vector<64x32xf32>
    %cst_14 = arith.constant 4.471500e-02 : f32
    %32 = vector.broadcast %cst_14 : f32 to vector<64x32xf32>
    %33 = arith.mulf %32, %31 : vector<64x32xf32>
    %34 = arith.addf %29, %33 : vector<64x32xf32>
    %cst_15 = arith.constant 0.797884583 : f32
    %35 = vector.broadcast %cst_15 : f32 to vector<64x32xf32>
    %36 = arith.mulf %35, %34 : vector<64x32xf32>
    %37 = math.tanh %36 : vector<64x32xf32>
    %cst_16 = arith.constant 1.000000e+00 : f32
    %38 = vector.broadcast %cst_16 : f32 to vector<64x32xf32>
    %39 = arith.addf %38, %37 : vector<64x32xf32>
    %cst_17 = arith.constant 5.000000e-01 : f32
    %40 = vector.broadcast %cst_17 : f32 to vector<64x32xf32>
    %41 = arith.mulf %40, %39 : vector<64x32xf32>
    %42 = arith.mulf %29, %41 : vector<64x32xf32>
    %c0_18 = arith.constant 0 : index
    %c0_19 = arith.constant 0 : index
    %43 = vector.load %arg6[%c0_18, %c0_19] : memref<32x16xf32, #tpu.memory_space<vmem>>, vector<32x16xf32>
    %44 = arith.truncf %42 : vector<64x32xf32> to vector<64x32xbf16>
    %45 = arith.truncf %43 : vector<32x16xf32> to vector<32x16xbf16>
    %cst_20 = arith.constant dense<0.000000e+00> : vector<64x16xf32>
    %46 = tpu.matmul %44, %45, %cst_20 {dimension_numbers = #tpu.dot_dimension_numbers<[1], [0], [0], [1], [0, 0, 1, 1], [], []>} : vector<64x32xbf16>, vector<32x16xbf16>, vector<64x16xf32> -> vector<64x16xf32>
    %c0_21 = arith.constant 0 : index
    %c0_22 = arith.constant 0 : index
    %47 = vector.load %arg7[%c0_21, %c0_22] : memref<1x16xf32, #tpu.memory_space<vmem>>, vector<1x16xf32>
    %48 = vector.broadcast %47 : vector<1x16xf32> to vector<64x16xf32>
    %49 = arith.addf %46, %48 : vector<64x16xf32>
    %50 = arith.addf %49, %0 : vector<64x16xf32>
    %c0_23 = arith.constant 0 : index
    %c0_24 = arith.constant 0 : index
    %51 = vector.load %arg8[%c0_23, %c0_24] : memref<64x16xf32, #tpu.memory_space<vmem>>, vector<64x16xf32>
    tpu.vector_store %arg8[%c0_23, %c0_24], %50 {strides = array<i32>} : memref<64x16xf32, #tpu.memory_space<vmem>>, vector<64x16xf32>,
    return
  }
  func.func @transform_0(%arg0: i32) -> (i32, i32) {
    %c0_i32 = arith.constant 0 : i32
    %c0_i32_0 = arith.constant 0 : i32
    return %arg0, %c0_i32 : i32, i32
  }
  func.func @transform_1(%arg0: i32) -> (i32, i32) {
    %c0_i32 = arith.constant 0 : i32
    %c0_i32_0 = arith.constant 0 : i32
    %c0_i32_1 = arith.constant 0 : i32
    return %c0_i32, %c0_i32_0 : i32, i32
  }
  func.func @transform_2(%arg0: i32) -> (i32, i32) {
    %c0_i32 = arith.constant 0 : i32
    %c0_i32_0 = arith.constant 0 : i32
    %c0_i32_1 = arith.constant 0 : i32
    return %c0_i32, %c0_i32_0 : i32, i32
  }
  func.func @transform_3(%arg0: i32) -> (i32, i32) {
    %c0_i32 = arith.constant 0 : i32
    %c0_i32_0 = arith.constant 0 : i32
    %c0_i32_1 = arith.constant 0 : i32
    return %c0_i32, %c0_i32_0 : i32, i32
  }
  func.func @transform_4(%arg0: i32) -> (i32, i32) {
    %c0_i32 = arith.constant 0 : i32
    %c0_i32_0 = arith.constant 0 : i32
    %c0_i32_1 = arith.constant 0 : i32
    return %c0_i32, %c0_i32_0 : i32, i32
  }
  func.func @transform_5(%arg0: i32) -> (i32, i32) {
    %c0_i32 = arith.constant 0 : i32
    %c0_i32_0 = arith.constant 0 : i32
    %c0_i32_1 = arith.constant 0 : i32
    return %c0_i32, %c0_i32_0 : i32, i32
  }
  func.func @transform_6(%arg0: i32) -> (i32, i32) {
    %c0_i32 = arith.constant 0 : i32
    %c0_i32_0 = arith.constant 0 : i32
    %c0_i32_1 = arith.constant 0 : i32
    return %c0_i32, %c0_i32_0 : i32, i32
  }
  func.func @transform_7(%arg0: i32) -> (i32, i32) {
    %c0_i32 = arith.constant 0 : i32
    %c0_i32_0 = arith.constant 0 : i32
    return %arg0, %c0_i32 : i32, i32
  }
}

module attributes {stable_mosaic.version = 11 : i64} {
  func.func @_ln_gelu_linear_kernel(%arg0: i32, %arg1: memref<64x16xf32, #tpu.memory_space<vmem>>, %arg2: memref<1x16xf32, #tpu.memory_space<vmem>>, %arg3: memref<1x16xf32, #tpu.memory_space<vmem>>, %arg4: memref<16x12xf32, #tpu.memory_space<vmem>>, %arg5: memref<1x12xf32, #tpu.memory_space<vmem>>, %arg6: memref<64x12xf32, #tpu.memory_space<vmem>>) attributes {dimension_semantics = [#tpu.dimension_semantics<parallel>], iteration_bounds = array<i64: 1>, scalar_prefetch = 0 : i64, scratch_operands = 0 : i64, tpu.core_type = #tpu.core_type<tc>, window_params = [{transform_indices = @transform_0, window_bounds = array<i64: 64, 16>}, {pipeline_mode = #tpu.pipeline_mode<synchronous>, transform_indices = @transform_1, window_bounds = array<i64: 1, 16>}, {pipeline_mode = #tpu.pipeline_mode<synchronous>, transform_indices = @transform_2, window_bounds = array<i64: 1, 16>}, {pipeline_mode = #tpu.pipeline_mode<synchronous>, transform_indices = @transform_3, window_bounds = array<i64: 16, 12>}, {pipeline_mode = #tpu.pipeline_mode<synchronous>, transform_indices = @transform_4, window_bounds = array<i64: 1, 12>}, {transform_indices = @transform_5, window_bounds = array<i64: 64, 12>}]} {
    %c0 = arith.constant 0 : index
    %c0_0 = arith.constant 0 : index
    %0 = vector.load %arg1[%c0, %c0_0] : memref<64x16xf32, #tpu.memory_space<vmem>>, vector<64x16xf32>
    %c0_1 = arith.constant 0 : index
    %c0_2 = arith.constant 0 : index
    %1 = vector.load %arg2[%c0_1, %c0_2] : memref<1x16xf32, #tpu.memory_space<vmem>>, vector<1x16xf32>
    %c0_3 = arith.constant 0 : index
    %c0_4 = arith.constant 0 : index
    %2 = vector.load %arg3[%c0_3, %c0_4] : memref<1x16xf32, #tpu.memory_space<vmem>>, vector<1x16xf32>
    %cst = arith.constant dense<0.000000e+00> : vector<64xf32>
    %3 = vector.multi_reduction <add>, %0, %cst [1] : vector<64x16xf32> to vector<64xf32>
    %4 = vector.shape_cast %3 : vector<64xf32> to vector<64x1xf32>
    %cst_5 = arith.constant 1.600000e+01 : f32
    %5 = vector.broadcast %cst_5 : f32 to vector<64x1xf32>
    %6 = arith.divf %4, %5 : vector<64x1xf32>
    %7 = vector.broadcast %6 : vector<64x1xf32> to vector<64x16xf32>
    %8 = arith.subf %0, %7 : vector<64x16xf32>
    %9 = arith.mulf %8, %8 : vector<64x16xf32>
    %cst_6 = arith.constant dense<0.000000e+00> : vector<64xf32>
    %10 = vector.multi_reduction <add>, %9, %cst_6 [1] : vector<64x16xf32> to vector<64xf32>
    %11 = vector.shape_cast %10 : vector<64xf32> to vector<64x1xf32>
    %cst_7 = arith.constant 1.600000e+01 : f32
    %12 = vector.broadcast %cst_7 : f32 to vector<64x1xf32>
    %13 = arith.divf %11, %12 : vector<64x1xf32>
    %cst_8 = arith.constant 9.99999974E-6 : f32
    %14 = vector.broadcast %cst_8 : f32 to vector<64x1xf32>
    %15 = arith.addf %13, %14 : vector<64x1xf32>
    %16 = math.rsqrt %15 : vector<64x1xf32>
    %17 = vector.broadcast %16 : vector<64x1xf32> to vector<64x16xf32>
    %18 = arith.mulf %8, %17 : vector<64x16xf32>
    %19 = vector.broadcast %1 : vector<1x16xf32> to vector<64x16xf32>
    %20 = arith.mulf %18, %19 : vector<64x16xf32>
    %21 = vector.broadcast %2 : vector<1x16xf32> to vector<64x16xf32>
    %22 = arith.addf %20, %21 : vector<64x16xf32>
    %23 = arith.mulf %22, %22 : vector<64x16xf32>
    %24 = arith.mulf %22, %23 : vector<64x16xf32>
    %cst_9 = arith.constant 4.471500e-02 : f32
    %25 = vector.broadcast %cst_9 : f32 to vector<64x16xf32>
    %26 = arith.mulf %25, %24 : vector<64x16xf32>
    %27 = arith.addf %22, %26 : vector<64x16xf32>
    %cst_10 = arith.constant 0.797884583 : f32
    %28 = vector.broadcast %cst_10 : f32 to vector<64x16xf32>
    %29 = arith.mulf %28, %27 : vector<64x16xf32>
    %30 = math.tanh %29 : vector<64x16xf32>
    %cst_11 = arith.constant 1.000000e+00 : f32
    %31 = vector.broadcast %cst_11 : f32 to vector<64x16xf32>
    %32 = arith.addf %31, %30 : vector<64x16xf32>
    %cst_12 = arith.constant 5.000000e-01 : f32
    %33 = vector.broadcast %cst_12 : f32 to vector<64x16xf32>
    %34 = arith.mulf %33, %32 : vector<64x16xf32>
    %35 = arith.mulf %22, %34 : vector<64x16xf32>
    %c0_13 = arith.constant 0 : index
    %c0_14 = arith.constant 0 : index
    %36 = vector.load %arg4[%c0_13, %c0_14] : memref<16x12xf32, #tpu.memory_space<vmem>>, vector<16x12xf32>
    %37 = arith.truncf %35 : vector<64x16xf32> to vector<64x16xbf16>
    %38 = arith.truncf %36 : vector<16x12xf32> to vector<16x12xbf16>
    %cst_15 = arith.constant dense<0.000000e+00> : vector<64x12xf32>
    %39 = tpu.matmul %37, %38, %cst_15 {dimension_numbers = #tpu.dot_dimension_numbers<[1], [0], [0], [1], [0, 0, 1, 1], [], []>} : vector<64x16xbf16>, vector<16x12xbf16>, vector<64x12xf32> -> vector<64x12xf32>
    %c0_16 = arith.constant 0 : index
    %c0_17 = arith.constant 0 : index
    %40 = vector.load %arg5[%c0_16, %c0_17] : memref<1x12xf32, #tpu.memory_space<vmem>>, vector<1x12xf32>
    %41 = vector.broadcast %40 : vector<1x12xf32> to vector<64x12xf32>
    %42 = arith.addf %39, %41 : vector<64x12xf32>
    %c0_18 = arith.constant 0 : index
    %c0_19 = arith.constant 0 : index
    %43 = vector.load %arg6[%c0_18, %c0_19] : memref<64x12xf32, #tpu.memory_space<vmem>>, vector<64x12xf32>
    tpu.vector_store %arg6[%c0_18, %c0_19], %42 {strides = array<i32>} : memref<64x12xf32, #tpu.memory_space<vmem>>, vector<64x12xf32>,
    return
  }
  func.func @transform_0(%arg0: i32) -> (i32, i32) {
    %c0_i32 = arith.constant 0 : i32
    %c0_i32_0 = arith.constant 0 : i32
    return %arg0, %c0_i32 : i32, i32
  }
  func.func @transform_1(%arg0: i32) -> (i32, i32) {
    %c0_i32 = arith.constant 0 : i32
    %c0_i32_0 = arith.constant 0 : i32
    %c0_i32_1 = arith.constant 0 : i32
    return %c0_i32, %c0_i32_0 : i32, i32
  }
  func.func @transform_2(%arg0: i32) -> (i32, i32) {
    %c0_i32 = arith.constant 0 : i32
    %c0_i32_0 = arith.constant 0 : i32
    %c0_i32_1 = arith.constant 0 : i32
    return %c0_i32, %c0_i32_0 : i32, i32
  }
  func.func @transform_3(%arg0: i32) -> (i32, i32) {
    %c0_i32 = arith.constant 0 : i32
    %c0_i32_0 = arith.constant 0 : i32
    %c0_i32_1 = arith.constant 0 : i32
    return %c0_i32, %c0_i32_0 : i32, i32
  }
  func.func @transform_4(%arg0: i32) -> (i32, i32) {
    %c0_i32 = arith.constant 0 : i32
    %c0_i32_0 = arith.constant 0 : i32
    %c0_i32_1 = arith.constant 0 : i32
    return %c0_i32, %c0_i32_0 : i32, i32
  }
  func.func @transform_5(%arg0: i32) -> (i32, i32) {
    %c0_i32 = arith.constant 0 : i32
    %c0_i32_0 = arith.constant 0 : i32
    return %arg0, %c0_i32 : i32, i32
  }
}

</mosaic_0001>

<bundles_post_ra>
// kernel: _lambda_.17
= control target key start
LH: loop header
LB: loop body
LE: loop exit
PB: predicated region body
PF: predicated region fallthrough
CT: control target
= control target key end

     0   :  { %vm65_vm0 = vcmask 7168   ;;  %s157_s2 = inlined_call_operand.vmem [shape: f32[128,1], index: 2, kind: input, shape index: {}]   ;;  %s158_s3 = inlined_call_operand.<no memory space> [shape: f32[1,1], index: 3, kind: input, shape index: {}]   ;;  %s159_s1 = inlined_call_operand.vmem [shape: f32[8,128], index: 1, kind: input, shape index: {}]   ;;  %s160_s0 = inlined_call_operand.vmem [shape: f32[8,128], index: 0, kind: input, shape index: {}]   ;;  %s161_s4 = inlined_call_operand.vmem [shape: f32[8,1], index: 4, kind: output, shape index: {}]  }
   0x1   :  { %v37_v0 = vld [vmem:[%s157_s2 + $0x70] sm:$0xff]  ;;  %v38_v1 = vld [vmem:[%s157_s2 + $0x78] sm:$0xff]  ;;  %v35_v2 = vld [vmem:[%s157_s2 + $0x60] sm:$0xff]  ;;  %v9_v5 = vstv %s158_s3 }
   0x2   :  { %v47_v3 = vpack.c.bf16 %v38_v1, %v37_v0  ;;  %v36_v4 = vld [vmem:[%s157_s2 + $0x68] sm:$0xff]  ;;  %10 = vst [vmem:[#allocation2] sm:$0x1] %v9_v5  ;;  %v33_v7 = vld [vmem:[%s157_s2 + $0x50] sm:$0xff]  ;;  %v34_v8 = vld [vmem:[%s157_s2 + $0x58] sm:$0xff] }
   0x3   :  { %v46_v6 = vpack.c.bf16 %v36_v4, %v35_v2  ;;  %v45_v9 = vpack.c.bf16 %v34_v8, %v33_v7  ;;  %v31_v10 = vld [vmem:[%s157_s2 + $0x40] sm:$0xff]  ;;  %v32_v11 = vld [vmem:[%s157_s2 + $0x48] sm:$0xff]  ;;  %v29_v13 = vld [vmem:[%s157_s2 + $0x30] sm:$0xff] }
   0x4   :  { %52 = vmatpush.bf16.msra.mxu0 %v47_v3  ;;  %v44_v12 = vpack.c.bf16 %v32_v11, %v31_v10  ;;  %v30_v14 = vld [vmem:[%s157_s2 + $0x38] sm:$0xff]  ;;  %v27_v16 = vld [vmem:[%s157_s2 + $0x20] sm:$0xff]  ;;  %v28_v17 = vld [vmem:[%s157_s2 + $0x28] sm:$0xff] }
   0x5   :  { %v43_v15 = vpack.c.bf16 %v30_v14, %v29_v13  ;;  %v42_v18 = vpack.c.bf16 %v28_v17, %v27_v16  ;;  %v20_v19 = vld [vmem:[%s159_s1] sm:$0xff]  ;;  %v25_v20 = vld [vmem:[%s157_s2 + $0x10] sm:$0xff]  ;;  %v26_v21 = vld [vmem:[%s157_s2 + $0x18] sm:$0xff] }
   0x6   :  { %v21_v22 = vmul.f32 0.05, %v20_v19  ;;  %v41_v23 = vpack.c.bf16 %v26_v21, %v25_v20  ;;  %v19_v24 = vld [vmem:[%s160_s0] sm:$0xff]  ;;  %v24_v26 = vld [vmem:[%s157_s2 + $0x8] sm:$0xff] }
   0x7   :  { %v23_v25 = vld [vmem:[%s157_s2] sm:$0xff] }
   0x8   :  { %53 = vmatpush.bf16.msra.mxu0 %v46_v6  ;;  %v22_v27 = vadd.f32 %v21_v22, %v19_v24  ;;  %v40_v28 = vpack.c.bf16 %v24_v26, %v23_v25 }
   0x9   :  { %v71_v30 = vld [vmem:[#allocation2] ss:$0 sm:$0xff] }
   0xa   :  { %v39_v29 = vpack.c.bf16 %v22_v27, %v22_v27 }
   0xc   :  { %54 = vmatpush.bf16.msra.mxu0 %v45_v9 }
  0x10   :  { %55 = vmatpush.bf16.msra.mxu0 %v44_v12 }
  0x14   :  { %56 = vmatpush.bf16.msra.mxu0 %v43_v15 }
  0x18   :  { %57 = vmatpush.bf16.msra.mxu0 %v42_v18 }
  0x1c   :  { %58 = vmatpush.bf16.msra.mxu0 %v41_v23 }
  0x20   :  { %59 = vmatpush.bf16.msra.mxu0 %v40_v28 }
  0x23   :  { %60 = vmatmul.bf16.vlgmr.msra.gmra.mxu0 %v39_v29 }
  0xa0   :  { %v61_v31 = vpop.f32.mrf.mxu0 }
  0xa1   :  { %v62_v32 = vadd.f32 %v71_v30, %v61_v31 }
  0xa3   :  { %66 = vst.msk [vmem:[%s161_s4] sm:$0xff] %vm65_vm0, %v62_v32 }
  0xa8   :  { %v63_v33 = vpop.f32.mrf.mxu0 }

// kernel: _lambda_.14
= control target key start
LH: loop header
LB: loop body
LE: loop exit
PB: predicated region body
PF: predicated region fallthrough
CT: control target
= control target key end

     0   :  { %vm37_vm0 = vcmask 130048   ;;  %v501_v16 = vmov 16.0   ;;  %s873_s0 = inlined_call_operand.vmem [shape: f32[64,16], index: 0, kind: input, shape index: {}]   ;;  %s874_s1 = inlined_call_operand.vmem [shape: f32[1,16], index: 1, kind: input, shape index: {}]   ;;  %s875_s2 = inlined_call_operand.vmem [shape: f32[1,16], index: 2, kind: input, shape index: {}]   ;;  %s876_s4 = inlined_call_operand.vmem [shape: f32[1,64], index: 4, kind: input, shape index: {}]   ;;  %s877_s3 = inlined_call_operand.vmem [shape: f32[16,64], index: 3, kind: input, shape index: {}]   ;;  %s878_s6 = inlined_call_operand.vmem [shape: f32[1,16], index: 6, kind: input, shape index: {}]   ;;  %s879_s5 = inlined_call_operand.vmem [shape: f32[64,16], index: 5, kind: input, shape index: {}]   ;;  %s880_s7 = inlined_call_operand.vmem [shape: f32[64,16], index: 7, kind: output, shape index: {}]  }
   0x1   :  { %v545_v0 = vld [vmem:[%s873_s0 + $0x20] sm:$0xff]  ;;  %v550_v1 = vld [vmem:[%s873_s0 + $0x10] sm:$0xff]  ;;  %v566_v6 = vld [vmem:[%s873_s0 + $0x28] sm:$0xff]  ;;  %467 = vrcp.f32 %v501_v16 }
   0x2   :  { %v555_v2 = vld [vmem:[%s873_s0] sm:$0xff]  ;;  %v50_v3 = vsel %vm37_vm0, %v545_v0, 0.0  ;;  %v44_v4 = vsel %vm37_vm0, %v550_v1, 0.0  ;;  %v571_v7 = vld [vmem:[%s873_s0 + $0x18] sm:$0xff]  ;;  %v576_v8 = vld [vmem:[%s873_s0 + $0x8] sm:$0xff]  ;;  %v53_v9 = vsel %vm37_vm0, %v566_v6, 0.0 }
   0x3   :  { %v38_v5 = vsel %vm37_vm0, %v555_v2, 0.0  ;;  %51 = vadd.xlane.f32.xlu1 %v50_v3  ;;  %45 = vadd.xlane.f32.xlu0 %v44_v4  ;;  %v47_v10 = vsel %vm37_vm0, %v571_v7, 0.0  ;;  %v41_v11 = vsel %vm37_vm0, %v576_v8, 0.0  ;;  %v587_v12 = vld [vmem:[%s873_s0 + $0x30] sm:$0xff]  ;;  %v592_v13 = vld [vmem:[%s873_s0 + $0x38] sm:$0xff] }
   0x4   :  { %39 = vadd.xlane.f32.xlu2 %v38_v5  ;;  %v56_v14 = vsel %vm37_vm0, %v587_v12, 0.0  ;;  %v59_v15 = vsel %vm37_vm0, %v592_v13, 0.0 }
   0x7   :  { %v468_v17 = vpop.eup %467 }
   0x8   :  { %v63_v18 = vmul.f32 16.0, %v468_v17  ;;  %vm67_vm1 = vweird.f32 %v468_v17 }
   0xa   :  { %v64_v19 = vsub.f32 1.0, %v63_v18 }
   0xb   :  { %54 = vadd.xlane.f32.xlu1 %v53_v9  ;;  %48 = vadd.xlane.f32.xlu0 %v47_v10  ;;  %v243_v10 = vld [vmem:[%s877_s3] sm:$0xff] }
   0xc   :  { %42 = vadd.xlane.f32.xlu2 %v41_v11  ;;  %v65_v20 = vmul.f32 %v468_v17, %v64_v19  ;;  %v244_v11 = vld [vmem:[%s877_s3 + $0x8] sm:$0xff] }
   0xe   :  { %v66_v21 = vadd.f32 %v468_v17, %v65_v20 }
  0x10   :  { %v598_v22 = vsel %vm67_vm1, %v468_v17, %v66_v21 }
  0x13   :  { %57 = vadd.xlane.f32.xlu0 %v56_v14  ;;  %60 = vadd.xlane.f32.xlu1 %v59_v15  ;;  %v249_v14 = vpack.c.bf16 %v244_v11, %v243_v10 }
  0x15   :  { %457 = vmatpush.bf16.msra.mxu3 %v249_v14  ;;  %273 = vmatpush.bf16.msra.mxu0 %v249_v14  ;;  %v704_v14 = vld [vmem:[%s874_s1] ss:$0 sm:$0xff] }
  0x76   :  { %v52_v23 = vpop.xlane.xlu1 %51  ;;  %v46_v24 = vpop.xlane.xlu0 %45 }
  0x77   :  { %v73_v25 = vmul.f32 %v598_v22, %v52_v23  ;;  %v71_v26 = vmul.f32 %v598_v22, %v46_v24  ;;  %v40_v27 = vpop.xlane.xlu2 %39 }
  0x78   :  { %v69_v36 = vmul.f32 %v598_v22, %v40_v27 }
  0x79   :  { %v603_v28 = vsub.f32 %v545_v0, %v73_v25  ;;  %v606_v29 = vsub.f32 %v550_v1, %v71_v26 }
  0x7a   :  { %v628_v44 = vsub.f32 %v555_v2, %v69_v36 }
  0x7b   :  { %v89_v30 = vmul.f32 %v603_v28, %v603_v28  ;;  %v87_v31 = vmul.f32 %v606_v29, %v606_v29 }
  0x7c   :  { %v85_v55 = vmul.f32 %v628_v44, %v628_v44 }
  0x7d   :  { %v105_v32 = vsel %vm37_vm0, %v89_v30, 0.0  ;;  %v99_v33 = vsel %vm37_vm0, %v87_v31, 0.0 }
  0x7e   :  { %106 = vadd.xlane.f32.xlu1 %v105_v32  ;;  %v55_v34 = vpop.xlane.xlu1 %54  ;;  %v49_v35 = vpop.xlane.xlu0 %48  ;;  %100 = vadd.xlane.f32.xlu2 %v99_v33  ;;  %v93_v59 = vsel %vm37_vm0, %v85_v55, 0.0 }
  0x7f   :  { %v74_v37 = vmul.f32 %v598_v22, %v55_v34  ;;  %v72_v38 = vmul.f32 %v598_v22, %v49_v35  ;;  %v43_v39 = vpop.xlane.xlu2 %42 }
  0x80   :  { %v70_v40 = vmul.f32 %v598_v22, %v43_v39 }
  0x81   :  { %v619_v41 = vsub.f32 %v566_v6, %v74_v37  ;;  %v622_v42 = vsub.f32 %v571_v7, %v72_v38 }
  0x82   :  { %v625_v43 = vsub.f32 %v576_v8, %v70_v40 }
  0x83   :  { %v88_v45 = vmul.f32 %v622_v42, %v622_v42  ;;  %v90_v46 = vmul.f32 %v619_v41, %v619_v41 }
  0x84   :  { %v86_v47 = vmul.f32 %v625_v43, %v625_v43 }
  0x85   :  { %v102_v48 = vsel %vm37_vm0, %v88_v45, 0.0  ;;  %v108_v49 = vsel %vm37_vm0, %v90_v46, 0.0 }
  0x86   :  { %103 = vadd.xlane.f32.xlu0 %v102_v48  ;;  %v58_v50 = vpop.xlane.xlu0 %57  ;;  %109 = vadd.xlane.f32.xlu2 %v108_v49  ;;  %v96_v51 = vsel %vm37_vm0, %v86_v47, 0.0  ;;  %v61_v52 = vpop.xlane.xlu1 %60 }
  0x87   :  { %v75_v53 = vmul.f32 %v598_v22, %v58_v50  ;;  %97 = vadd.xlane.f32.xlu1 %v96_v51  ;;  %v76_v54 = vmul.f32 %v598_v22, %v61_v52 }
  0x89   :  { %v644_v56 = vsub.f32 %v587_v12, %v75_v53  ;;  %v647_v57 = vsub.f32 %v592_v13, %v76_v54 }
  0x8b   :  { %v91_v58 = vmul.f32 %v644_v56, %v644_v56  ;;  %v92_v61 = vmul.f32 %v647_v57, %v647_v57 }
  0x8d   :  { %v111_v60 = vsel %vm37_vm0, %v91_v58, 0.0  ;;  %v114_v62 = vsel %vm37_vm0, %v92_v61, 0.0 }
  0x8e   :  { %112 = vadd.xlane.f32.xlu2 %v111_v60  ;;  %94 = vadd.xlane.f32.xlu0 %v93_v59 }
  0x96   :  { %115 = vadd.xlane.f32.xlu0 %v114_v62 }
  0xf1   :  { %v107_v63 = vpop.xlane.xlu1 %106  ;;  %v101_v3 = vpop.xlane.xlu2 %100 }
  0xf2   :  { %v119_v4 = vmul.f32 %v101_v3, %v598_v22  ;;  %v121_v5 = vmul.f32 %v107_v63, %v598_v22 }
  0xf4   :  { %v127_v9 = vadd.f32 1e-05, %v119_v4  ;;  %v664_v15 = vadd.f32 1e-05, %v121_v5 }
  0xf6   :  { %469 = vrsqrt.f32 %v127_v9  ;;  %vm159_vm3 = vweird.f32 %v127_v9  ;;  %vm179_vm13 = vweird.f32 %v664_v15 }
  0xf7   :  { %471 = vrsqrt.f32 %v664_v15 }
  0xf9   :  { %v104_v16 = vpop.xlane.xlu0 %103  ;;  %v110_v17 = vpop.xlane.xlu2 %109 }
  0xfa   :  { %v120_v18 = vmul.f32 %v104_v16, %v598_v22  ;;  %v98_v19 = vpop.xlane.xlu1 %97  ;;  %v122_v20 = vmul.f32 %v110_v17, %v598_v22 }
  0xfb   :  { %v118_v21 = vmul.f32 %v98_v19, %v598_v22 }
  0xfc   :  { %v128_v23 = vadd.f32 1e-05, %v120_v18  ;;  %v670_v24 = vadd.f32 1e-05, %v122_v20  ;;  %v470_v25 = vpop.eup %469 }
  0xfd   :  { %v126_v26 = vadd.f32 1e-05, %v118_v21  ;;  %v154_v27 = vmul.f32 %v470_v25, %v127_v9  ;;  %v673_v33 = vpop.eup %471  ;;  %vm160_vm2 = vweird.f32 %v470_v25 }
  0xfe   :  { %473 = vrsqrt.f32 %v128_v23  ;;  %v174_v45 = vmul.f32 %v673_v33, %v664_v15  ;;  %vm686_vm4 = vmor %vm159_vm3, %vm160_vm2  ;;  %vm169_vm5 = vweird.f32 %v128_v23  ;;  %vm189_vm11 = vweird.f32 %v670_v24 }
  0xff   :  { %475 = vrsqrt.f32 %v126_v26  ;;  %v155_v30 = vmul.f32 %v470_v25, %v154_v27  ;;  %vm149_vm7 = vweird.f32 %v126_v26  ;;  %vm180_vm14 = vweird.f32 %v673_v33 }
 0x100   :  { %477 = vrsqrt.f32 %v670_v24  ;;  %v175_v55 = vmul.f32 %v673_v33, %v174_v45  ;;  %vm740_vm3 = vmor %vm179_vm13, %vm180_vm14 }
 0x101   :  { %v95_v31 = vpop.xlane.xlu0 %94  ;;  %v113_v32 = vpop.xlane.xlu2 %112  ;;  %v156_v34 = vmul.f32 0.5, %v155_v30 }
 0x102   :  { %v117_v35 = vmul.f32 %v95_v31, %v598_v22  ;;  %v123_v39 = vmul.f32 %v113_v32, %v598_v22  ;;  %v176_v16 = vmul.f32 0.5, %v175_v55 }
 0x103   :  { %v157_v37 = vsub.f32 1.5, %v156_v34 }
 0x104   :  { %v474_v36 = vpop.eup %473  ;;  %v676_v38 = vadd.f32 1e-05, %v117_v35  ;;  %v690_v54 = vadd.f32 1e-05, %v123_v39  ;;  %v177_v27 = vsub.f32 1.5, %v176_v16  ;;  %v368_v39 = vld [vmem:[%s879_s5 + $0x8] sm:$0xff] }
 0x105   :  { %v476_v40 = vpop.eup %475  ;;  %v164_v46 = vmul.f32 %v474_v36, %v128_v23  ;;  %v158_v48 = vmul.f32 %v470_v25, %v157_v37  ;;  %vm170_vm6 = vweird.f32 %v474_v36  ;;  %v720_v23 = vld [vmem:[%s875_s2] ss:$0 sm:$0xff] }
 0x106   :  { %v681_v47 = vpop.eup %477  ;;  %v144_v49 = vmul.f32 %v476_v40, %v126_v26  ;;  %479 = vrsqrt.f32 %v676_v38  ;;  %vm150_vm8 = vweird.f32 %v476_v40  ;;  %vm171_vm9 = vmor %vm169_vm5, %vm170_vm6  ;;  %vm139_vm15 = vweird.f32 %v676_v38 }
 0x107   :  { %v165_v50 = vmul.f32 %v474_v36, %v164_v46  ;;  %v184_v51 = vmul.f32 %v681_v47, %v670_v24  ;;  %v162_v58 = vsel %vm686_vm4, %v470_v25, %v158_v48  ;;  %481 = vrsqrt.f32 %v690_v54  ;;  %vm709_vm10 = vmor %vm149_vm7, %vm150_vm8 }
 0x108   :  { %v145_v53 = vmul.f32 %v476_v40, %v144_v49  ;;  %v215_v9 = vmul.f32 %v162_v58, %v606_v29  ;;  %vm190_vm12 = vweird.f32 %v681_v47  ;;  %v178_v45 = vmul.f32 %v673_v33, %v177_v27 }
 0x109   :  { %v166_v59 = vmul.f32 0.5, %v165_v50  ;;  %v185_v60 = vmul.f32 %v681_v47, %v184_v51  ;;  %v116_v61 = vpop.xlane.xlu0 %115  ;;  %vm733_vm2 = vmor %vm189_vm11, %vm190_vm12  ;;  %vm199_vm7 = vweird.f32 %v690_v54  ;;  %vm387_vm11 = vcmask 523264  }
 0x10a   :  { %v146_v62 = vmul.f32 0.5, %v145_v53  ;;  %v124_v63 = vmul.f32 %v116_v61, %v598_v22  ;;  %v226_v26 = vmul.f32 %v704_v14, %v215_v9  ;;  %v182_v55 = vsel %vm740_vm3, %v673_v33, %v178_v45 }
 0x10b   :  { %v167_v3 = vsub.f32 1.5, %v166_v59  ;;  %v186_v4 = vmul.f32 0.5, %v185_v60 }
 0x10c   :  { %v480_v5 = vpop.eup %479  ;;  %v147_v10 = vsub.f32 1.5, %v146_v62  ;;  %v699_v11 = vadd.f32 1e-05, %v124_v63  ;;  %v237_v15 = vadd.f32 %v720_v23, %v226_v26  ;;  %v373_v26 = vld [vmem:[%s879_s5 + $0x30] sm:$0xff] }
 0x10d   :  { %v168_v17 = vmul.f32 %v474_v36, %v167_v3  ;;  %v134_v22 = vmul.f32 %v480_v5, %v676_v38  ;;  %v187_v20 = vsub.f32 1.5, %v186_v4  ;;  %v482_v32 = vpop.eup %481  ;;  %vm140_vm1 = vweird.f32 %v480_v5 }
 0x10e   :  { %v148_v18 = vmul.f32 %v476_v40, %v147_v10  ;;  %483 = vrsqrt.f32 %v699_v11  ;;  %v194_v48 = vmul.f32 %v482_v32, %v690_v54  ;;  %vm141_vm4 = vmor %vm139_vm15, %vm140_vm1  ;;  %vm209_vm5 = vweird.f32 %v699_v11 }
 0x10f   :  { %v172_v19 = vsel %vm171_vm9, %v474_v36, %v168_v17  ;;  %v135_v21 = vmul.f32 %v480_v5, %v134_v22  ;;  %v188_v34 = vmul.f32 %v681_v47, %v187_v20  ;;  %vm200_vm8 = vweird.f32 %v482_v32 }
 0x110   :  { %v216_v25 = vmul.f32 %v172_v19, %v622_v42  ;;  %v152_v30 = vsel %vm709_vm10, %v476_v40, %v148_v18  ;;  %v195_v58 = vmul.f32 %v482_v32, %v194_v48  ;;  %vm201_vm10 = vmor %vm199_vm7, %vm200_vm8 }
 0x111   :  { %v136_v31 = vmul.f32 0.5, %v135_v21  ;;  %v214_v37 = vmul.f32 %v152_v30, %v625_v43  ;;  %v192_v49 = vsel %vm733_vm2, %v681_v47, %v188_v34  ;;  %v217_v47 = vmul.f32 %v182_v55, %v603_v28  ;;  %v369_v30 = vld [vmem:[%s879_s5 + $0x10] sm:$0xff]  ;;  %v796_v34 = vld [vmem:[%s876_s4] ss:$0 sm:$0xff] }
 0x112   :  { %v227_v42 = vmul.f32 %v704_v14, %v216_v25  ;;  %v218_v59 = vmul.f32 %v192_v49, %v619_v41  ;;  %v196_v63 = vmul.f32 0.5, %v195_v58 }
 0x113   :  { %v137_v35 = vsub.f32 1.5, %v136_v31  ;;  %v225_v53 = vmul.f32 %v704_v14, %v214_v37  ;;  %v228_v33 = vmul.f32 %v704_v14, %v217_v47  ;;  %v370_v31 = vld [vmem:[%s879_s5 + $0x18] sm:$0xff]  ;;  %v367_v37 = vld [vmem:[%s879_s5] sm:$0xff] }
 0x114   :  { %v484_v36 = vpop.eup %483  ;;  %v238_v40 = vadd.f32 %v720_v23, %v227_v42  ;;  %v229_v4 = vmul.f32 %v704_v14, %v218_v59  ;;  %v197_v9 = vsub.f32 1.5, %v196_v63  ;;  %v380_v42 = vpack.c.bf16 %v370_v31, %v369_v30 }
 0x115   :  { %v138_v38 = vmul.f32 %v480_v5, %v137_v35  ;;  %v204_v43 = vmul.f32 %v484_v36, %v699_v11  ;;  %vm210_vm6 = vweird.f32 %v484_v36  ;;  %v239_v10 = vadd.f32 %v720_v23, %v228_v33 }
 0x116   :  { %v246_v24 = vpack.c.bf16 %v238_v40, %v237_v15  ;;  %v240_v41 = vadd.f32 %v720_v23, %v229_v4  ;;  %vm211_vm9 = vmor %vm209_vm5, %vm210_vm6  ;;  %v198_v16 = vmul.f32 %v482_v32, %v197_v9  ;;  %v379_v15 = vpack.c.bf16 %v368_v39, %v367_v37 }
 0x117   :  { %v142_v50 = vsel %vm141_vm4, %v480_v5, %v138_v38  ;;  %v205_v51 = vmul.f32 %v484_v36, %v204_v43 }
 0x118   :  { %v213_v52 = vmul.f32 %v142_v50, %v628_v44  ;;  %450 = vmatmul.msk.bf16.vlgmr.msra.gmra.mxu3 %vm37_vm0, %v246_v24  ;;  %v236_v44 = vadd.f32 %v720_v23, %v225_v53  ;;  %v247_v17 = vpack.c.bf16 %v240_v41, %v239_v10  ;;  %v202_v18 = vsel %vm201_vm10, %v482_v32, %v198_v16 }
 0x119   :  { %v206_v61 = vmul.f32 0.5, %v205_v51  ;;  %v219_v11 = vmul.f32 %v202_v18, %v644_v56 }
 0x11a   :  { %v224_v60 = vmul.f32 %v704_v14, %v213_v52 }
 0x11b   :  { %v207_v5 = vsub.f32 1.5, %v206_v61  ;;  %v230_v54 = vmul.f32 %v704_v14, %v219_v11 }
 0x11c   :  { %v235_v62 = vadd.f32 %v720_v23, %v224_v60 }
 0x11d   :  { %v208_v28 = vmul.f32 %v484_v36, %v207_v5  ;;  %v241_v21 = vadd.f32 %v720_v23, %v230_v54 }
 0x11e   :  { %v245_v3 = vpack.c.bf16 %v236_v44, %v235_v62 }
 0x11f   :  { %v212_v22 = vsel %vm211_vm9, %v484_v36, %v208_v28 }
 0x120   :  { %449 = vmatmul.msk.bf16.vlgmr.msra.gmra.mxu0 %vm37_vm0, %v245_v3  ;;  %v220_v29 = vmul.f32 %v212_v22, %v647_v57  ;;  %v374_v57 = vld [vmem:[%s879_s5 + $0x38] sm:$0xff] }
 0x121   :  { %v382_v56 = vpack.c.bf16 %v374_v57, %v373_v26 }
 0x122   :  { %v231_v19 = vmul.f32 %v704_v14, %v220_v29  ;;  %v371_v14 = vld [vmem:[%s879_s5 + $0x20] sm:$0xff] }
 0x123   :  { %404 = vmatpush.bf16.msra.mxu1 %v382_v56  ;;  %458 = vmatpush.bf16.msra.mxu2 %v382_v56 }
 0x124   :  { %v242_v20 = vadd.f32 %v720_v23, %v231_v19  ;;  %v372_v23 = vld [vmem:[%s879_s5 + $0x28] sm:$0xff] }
 0x125   :  { %v381_v27 = vpack.c.bf16 %v372_v23, %v371_v14 }
 0x126   :  { %v248_v25 = vpack.c.bf16 %v242_v20, %v241_v21 }
 0x127   :  { %405 = vmatpush.bf16.msra.mxu1 %v381_v27  ;;  %459 = vmatpush.bf16.msra.mxu2 %v381_v27 }
 0x128   :  { %451 = vmatmul.msk.bf16.gmra.mxu3 %vm37_vm0, %v247_v17 }
 0x12b   :  { %406 = vmatpush.bf16.msra.mxu1 %v380_v42  ;;  %460 = vmatpush.bf16.msra.mxu2 %v380_v42 }
 0x12f   :  { %407 = vmatpush.bf16.msra.mxu1 %v379_v15  ;;  %461 = vmatpush.bf16.msra.mxu2 %v379_v15 }
 0x138   :  { %452 = vmatmul.msk.bf16.gmra.mxu3 %vm37_vm0, %v248_v25 }
 0x19b   :  { %v280_v32 = vpop.f32.mrf.mxu3 }
 0x19c   :  { %v806_v38 = vadd.f32 %v796_v34, %v280_v32 }
 0x19d   :  { %v275_v35 = vpop.f32.mrf.mxu0 }
 0x19e   :  { %v276_v36 = vadd.f32 %v796_v34, %v275_v35  ;;  %v297_v52 = vmul.f32 %v806_v38, %v806_v38 }
 0x1a0   :  { %v295_v40 = vmul.f32 %v276_v36, %v276_v36  ;;  %v305_v61 = vmul.f32 %v297_v52, %v806_v38 }
 0x1a2   :  { %v303_v45 = vmul.f32 %v295_v40, %v276_v36  ;;  %v313_v4 = vmul.f32 0.044715, %v305_v61 }
 0x1a3   :  { %v282_v46 = vpop.f32.mrf.mxu3 }
 0x1a4   :  { %v311_v48 = vmul.f32 0.044715, %v303_v45  ;;  %v809_v43 = vadd.f32 %v796_v34, %v282_v46  ;;  %v321_v16 = vadd.f32 %v313_v4, %v806_v38 }
 0x1a5   :  { %v277_v24 = vpop.f32.mrf.mxu0 }
 0x1a6   :  { %v319_v49 = vadd.f32 %v311_v48, %v276_v36  ;;  %v298_v50 = vmul.f32 %v809_v43, %v809_v43  ;;  %v278_v51 = vadd.f32 %v796_v34, %v277_v24  ;;  %v329_v20 = vmul.f32 0.7978846, %v321_v16 }
 0x1a8   :  { %v327_v53 = vmul.f32 0.7978846, %v319_v49  ;;  %v296_v55 = vmul.f32 %v278_v51, %v278_v51  ;;  %v306_v58 = vmul.f32 %v298_v50, %v809_v43 }
 0x1aa   :  { %v304_v59 = vmul.f32 %v296_v55, %v278_v51  ;;  %485 = vtanh.f32 %v327_v53  ;;  %v314_v44 = vmul.f32 0.044715, %v306_v58 }
 0x1ab   :  { %v285_v60 = vpop.f32.mrf.mxu3 }
 0x1ac   :  { %v312_v47 = vmul.f32 0.044715, %v304_v59  ;;  %v286_v62 = vadd.f32 %v796_v34, %v285_v60  ;;  %v322_v9 = vadd.f32 %v314_v44, %v809_v43 }
 0x1ae   :  { %v320_v63 = vadd.f32 %v312_v47, %v278_v51  ;;  %v299_v3 = vmul.f32 %v286_v62, %v286_v62  ;;  %v330_v18 = vmul.f32 0.7978846, %v322_v9 }
 0x1b0   :  { %v328_v5 = vmul.f32 0.7978846, %v320_v63  ;;  %v307_v33 = vmul.f32 %v299_v3, %v286_v62  ;;  %v486_v41 = vpop.eup %485 }
 0x1b1   :  { %v343_v29 = vadd.f32 1.0, %v486_v41 }
 0x1b2   :  { %487 = vtanh.f32 %v328_v5  ;;  %v315_v28 = vmul.f32 0.044715, %v307_v33 }
 0x1b3   :  { %v287_v10 = vpop.f32.mrf.mxu3  ;;  %489 = vtanh.f32 %v330_v18  ;;  %v351_v26 = vmul.f32 0.5, %v343_v29 }
 0x1b4   :  { %v323_v17 = vadd.f32 %v315_v28, %v286_v62  ;;  %v288_v22 = vadd.f32 %v796_v34, %v287_v10 }
 0x1b5   :  { %v359_v30 = vmul.f32 %v351_v26, %v276_v36 }
 0x1b6   :  { %v331_v11 = vmul.f32 0.7978846, %v323_v17  ;;  %v300_v19 = vmul.f32 %v288_v22, %v288_v22 }
 0x1b8   :  { %v488_v54 = vpop.eup %487  ;;  %v308_v21 = vmul.f32 %v300_v19, %v288_v22  ;;  %491 = vtanh.f32 %v331_v11 }
 0x1b9   :  { %v344_v25 = vadd.f32 1.0, %v488_v54  ;;  %493 = vtanh.f32 %v329_v20  ;;  %v490_v35 = vpop.eup %489 }
 0x1ba   :  { %v316_v57 = vmul.f32 0.044715, %v308_v21  ;;  %v346_v24 = vadd.f32 1.0, %v490_v35 }
 0x1bb   :  { %v290_v56 = vpop.f32.mrf.mxu3  ;;  %v352_v14 = vmul.f32 0.5, %v344_v25 }
 0x1bc   :  { %v324_v23 = vadd.f32 %v316_v57, %v288_v22  ;;  %v291_v27 = vadd.f32 %v796_v34, %v290_v56  ;;  %v354_v59 = vmul.f32 0.5, %v346_v24 }
 0x1bd   :  { %v360_v31 = vmul.f32 %v352_v14, %v278_v51 }
 0x1be   :  { %v332_v32 = vmul.f32 0.7978846, %v324_v23  ;;  %v301_v42 = vmul.f32 %v291_v27, %v291_v27  ;;  %v492_v39 = vpop.eup %491  ;;  %v362_v4 = vmul.f32 %v354_v59, %v809_v43 }
 0x1bf   :  { %v375_v37 = vpack.c.bf16 %v360_v31, %v359_v30  ;;  %v494_v40 = vpop.eup %493  ;;  %v347_v48 = vadd.f32 1.0, %v492_v39 }
 0x1c0   :  { %495 = vtanh.f32 %v332_v32  ;;  %v309_v15 = vmul.f32 %v301_v42, %v291_v27  ;;  %v345_v36 = vadd.f32 1.0, %v494_v40 }
 0x1c1   :  { %453 = vmatmul.msk.bf16.vlgmr.msra.gmra.mxu1 %vm387_vm11, %v375_v37  ;;  %v355_v58 = vmul.f32 0.5, %v347_v48 }
 0x1c2   :  { %v317_v45 = vmul.f32 0.044715, %v309_v15  ;;  %v353_v47 = vmul.f32 0.5, %v345_v36 }
 0x1c3   :  { %v292_v46 = vpop.f32.mrf.mxu3  ;;  %v363_v63 = vmul.f32 %v355_v58, %v286_v62 }
 0x1c4   :  { %v325_v49 = vadd.f32 %v317_v45, %v291_v27  ;;  %v293_v50 = vadd.f32 %v796_v34, %v292_v46  ;;  %v361_v34 = vmul.f32 %v353_v47, %v806_v38  ;;  %v466_v38 = vld [vmem:[%s878_s6] ss:$0 sm:$0xff] }
 0x1c6   :  { %v496_v51 = vpop.eup %495  ;;  %v333_v52 = vmul.f32 0.7978846, %v325_v49  ;;  %v302_v53 = vmul.f32 %v293_v50, %v293_v50  ;;  %v376_v41 = vpack.c.bf16 %v362_v4, %v361_v34 }
 0x1c7   :  { %v348_v55 = vadd.f32 1.0, %v496_v51 }
 0x1c8   :  { %v310_v60 = vmul.f32 %v302_v53, %v293_v50  ;;  %497 = vtanh.f32 %v333_v52 }
 0x1c9   :  { %v356_v61 = vmul.f32 0.5, %v348_v55 }
 0x1ca   :  { %v318_v44 = vmul.f32 0.044715, %v310_v60 }
 0x1cb   :  { %v364_v3 = vmul.f32 %v356_v61, %v288_v22 }
 0x1cc   :  { %v326_v5 = vadd.f32 %v318_v44, %v293_v50 }
 0x1cd   :  { %v377_v33 = vpack.c.bf16 %v364_v3, %v363_v63 }
 0x1ce   :  { %v334_v9 = vmul.f32 0.7978846, %v326_v5  ;;  %v498_v28 = vpop.eup %497 }
 0x1cf   :  { %455 = vmatmul.msk.bf16.vlgmr.msra.gmra.mxu2 %vm387_vm11, %v377_v33  ;;  %v349_v10 = vadd.f32 1.0, %v498_v28 }
 0x1d0   :  { %499 = vtanh.f32 %v334_v9 }
 0x1d1   :  { %454 = vmatmul.msk.bf16.gmra.mxu1 %vm387_vm11, %v376_v41  ;;  %v357_v18 = vmul.f32 0.5, %v349_v10 }
 0x1d3   :  { %v365_v22 = vmul.f32 %v357_v18, %v291_v27 }
 0x1d6   :  { %v500_v16 = vpop.eup %499 }
 0x1d7   :  { %v350_v17 = vadd.f32 1.0, %v500_v16 }
 0x1d9   :  { %v358_v62 = vmul.f32 0.5, %v350_v17 }
 0x1db   :  { %v366_v29 = vmul.f32 %v358_v62, %v293_v50 }
 0x1dd   :  { %v378_v43 = vpack.c.bf16 %v366_v29, %v365_v22 }
 0x1df   :  { %456 = vmatmul.msk.bf16.gmra.mxu2 %vm387_vm11, %v378_v43 }
 0x23e   :  { %v409_v11 = vpop.f32.mrf.mxu1 }
 0x23f   :  { %v410_v19 = vadd.f32 %v466_v38, %v409_v11 }
 0x241   :  { %v429_v54 = vadd.f32 %v410_v19, %v555_v2 }
 0x243   :  { %437 = vst.msk [vmem:[%s880_s7] sm:$0xff] %vm37_vm0, %v429_v54 }
 0x246   :  { %v411_v20 = vpop.f32.mrf.mxu1 }
 0x247   :  { %v412_v21 = vadd.f32 %v466_v38, %v411_v20 }
 0x249   :  { %v430_v25 = vadd.f32 %v412_v21, %v576_v8 }
 0x24b   :  { %438 = vst.msk [vmem:[%s880_s7 + $0x8] sm:$0xff] %vm37_vm0, %v430_v25 }
 0x24e   :  { %v414_v26 = vpop.f32.mrf.mxu1 }
 0x24f   :  { %v415_v57 = vadd.f32 %v466_v38, %v414_v26 }
 0x251   :  { %v431_v56 = vadd.f32 %v415_v57, %v550_v1 }
 0x252   :  { %v419_v14 = vpop.f32.mrf.mxu2 }
 0x253   :  { %439 = vst.msk [vmem:[%s880_s7 + $0x10] sm:$0xff] %vm37_vm0, %v431_v56  ;;  %v420_v2 = vadd.f32 %v466_v38, %v419_v14 }
 0x255   :  { %v433_v23 = vadd.f32 %v420_v2, %v545_v0 }
 0x256   :  { %v416_v27 = vpop.f32.mrf.mxu1 }
 0x257   :  { %441 = vst.msk [vmem:[%s880_s7 + $0x20] sm:$0xff] %vm37_vm0, %v433_v23  ;;  %v417_v8 = vadd.f32 %v466_v38, %v416_v27 }
 0x259   :  { %v432_v30 = vadd.f32 %v417_v8, %v571_v7 }
 0x25a   :  { %v421_v31 = vpop.f32.mrf.mxu2 }
 0x25b   :  { %440 = vst.msk [vmem:[%s880_s7 + $0x18] sm:$0xff] %vm37_vm0, %v432_v30  ;;  %v422_v1 = vadd.f32 %v466_v38, %v421_v31 }
 0x25d   :  { %v434_v32 = vadd.f32 %v422_v1, %v566_v6 }
 0x25f   :  { %442 = vst.msk [vmem:[%s880_s7 + $0x28] sm:$0xff] %vm37_vm0, %v434_v32 }
 0x262   :  { %v424_v0 = vpop.f32.mrf.mxu2 }
 0x263   :  { %v425_v42 = vadd.f32 %v466_v38, %v424_v0 }
 0x265   :  { %v435_v35 = vadd.f32 %v425_v42, %v587_v12 }
 0x267   :  { %443 = vst.msk [vmem:[%s880_s7 + $0x30] sm:$0xff] %vm37_vm0, %v435_v35 }
 0x26a   :  { %v426_v7 = vpop.f32.mrf.mxu2 }
 0x26b   :  { %v427_v37 = vadd.f32 %v466_v38, %v426_v7 }
 0x26d   :  { %v436_v39 = vadd.f32 %v427_v37, %v592_v13 }
 0x26f   :  { %444 = vst.msk [vmem:[%s880_s7 + $0x38] sm:$0xff] %vm37_vm0, %v436_v39 }

// kernel: _lambda_.13
= control target key start
LH: loop header
LB: loop body
LE: loop exit
PB: predicated region body
PF: predicated region fallthrough
CT: control target
= control target key end

     0   :  { %s1259_s21 = smov 0   ;;  %s1543_s0 = inlined_call_operand.vmem [shape: f32[2,4,8,16], index: 0, kind: input, shape index: {}]   ;;  %s1544_s1 = inlined_call_operand.vmem [shape: f32[2,8,16], index: 1, kind: input, shape index: {}]   ;;  %s1545_s2 = inlined_call_operand.vmem [shape: f32[1,16], index: 2, kind: input, shape index: {}]   ;;  %s1546_s3 = inlined_call_operand.vmem [shape: f32[1,16], index: 3, kind: input, shape index: {}]   ;;  %s1547_s4 = inlined_call_operand.vmem [shape: f32[16,16], index: 4, kind: input, shape index: {}]   ;;  %s1548_s5 = inlined_call_operand.vmem [shape: f32[16,16], index: 5, kind: input, shape index: {}]   ;;  %s1549_s6 = inlined_call_operand.vmem [shape: f32[1,16], index: 6, kind: input, shape index: {}]   ;;  %s1550_s7 = inlined_call_operand.vmem [shape: f32[1,16], index: 7, kind: input, shape index: {}]   ;;  %s1551_s8 = inlined_call_operand.vmem [shape: f32[1,16], index: 8, kind: input, shape index: {}]   ;;  %s1552_s9 = inlined_call_operand.vmem [shape: f32[16,2], index: 9, kind: input, shape index: {}]   ;;  %s1553_s10 = inlined_call_operand.vmem [shape: f32[16,16], index: 10, kind: input, shape index: {}]   ;;  %s1554_s11 = inlined_call_operand.vmem [shape: f32[1,16], index: 11, kind: input, shape index: {}]   ;;  %s1555_s12 = inlined_call_operand.vmem [shape: f32[2,4,8,16], index: 12, kind: output, shape index: {}]  }
   0x1 LB: > { %s1092_s22 = sadd.s32 4294967295, %s1188_s21   ;;  %p1096_p0 = scmp.ge.s32.totalorder %s1188_s21, 1  ;;  %s1188_s21 = sphi %s1259_s21, %s22_s21  }
   0x2   : > { %p371_p1 = scmp.lt.s32.totalorder %s1188_s21, 3 }
   0x4   : > { %p372_p2 = pnand %p1096_p0, %p371_p1 }
   0x5   : > { %p417_p3 = scmp.lt.s32.totalorder (!%p372_p2), %s1092_s22, 1 }
   0x6   : > { %375 = sbr.rel (%p372_p2) target bundleno = 869 (0x365), region = 68 }
   0xb   : > { %s1565_s22 = smov (!%p417_p3, %s1092_s22), 1  ;;  %vm438_vm0 = vcmask 130048   ;;  %v1190_v10 = vmov 16.0   ;;  %v713_v42 = vld [vmem:[%s1552_s9] sm:$0xff]  ;;  %v714_v43 = vld [vmem:[%s1552_s9 + $0x8] sm:$0xff] }
   0xc   : > { %s1099_s23 = sshll.u32 %s1565_s22, 3  ;;  %s1127_s24 = sshll.u32 %s1565_s22, 5  ;;  %1150 = vrcp.f32 %v1190_v10  ;;  %v716_v44 = vpack.c.bf16 %v714_v43, %v713_v42  ;;  %v548_v49 = vld [vmem:[%s1547_s4] sm:$0xff]  ;;  %v549_v50 = vld [vmem:[%s1547_s4 + $0x8] sm:$0xff] }
   0xd   : > { %s425_s27 = scalar_lea.vmem %s1544_s1, %s1099_s23  ;;  %s421_s30 = scalar_lea.vmem %s1543_s0, %s1127_s24  ;;  %v578_v51 = vld [vmem:[%s1548_s5] sm:$0xff]  ;;  %v552_v53 = vpack.c.bf16 %v549_v50, %v548_v49  ;;  %v579_v54 = vld [vmem:[%s1548_s5 + $0x8] sm:$0xff] }
   0xe   : > { %v680_v0 = vld [vmem:[%s425_s27] sm:$0xff]  ;;  %v1284_v4 = vld [vmem:[%s421_s30 + $0x10] sm:$0xff]  ;;  %v1288_v6 = vld [vmem:[%s421_s30 + $0x8] sm:$0xff]  ;;  %727 = vmatpush.bf16.msra.mxu2 %v716_v44  ;;  %v580_v55 = vpack.c.bf16 %v579_v54, %v578_v51  ;;  %s1193_s27 = smov 120   ;;  %s430_s14 = scalar_lea.vmem %s1555_s12, %s1127_s24 }
   0xf   : > { %v1279_v1 = vld [vmem:[%s421_s30] sm:$0xff]  ;;  %v683_v2 = vsel %vm438_vm0, %v680_v0, 0.0  ;;  %v445_v5 = vsel %vm438_vm0, %v1284_v4, 0.0  ;;  %v1290_v7 = vld [vmem:[%s421_s30 + $0x18] sm:$0xff]  ;;  %v442_v8 = vsel %vm438_vm0, %v1288_v6, 0.0  ;;  %566 = vmatpush.bf16.msra.mxu0 %v552_v53 }
  0x10   : > { %v439_v3 = vsel %vm438_vm0, %v1279_v1, 0.0  ;;  %684 = vadd.xlane.f32.xlu0 %v683_v2  ;;  %446 = vadd.xlane.f32.xlu2 %v445_v5  ;;  %v448_v9 = vsel %vm438_vm0, %v1290_v7, 0.0 }
  0x11   : > { %440 = vadd.xlane.f32.xlu1 %v439_v3  ;;  %592 = vmatpush.bf16.msra.mxu1 %v580_v55 }
  0x12   : > { %v1151_v11 = vpop.eup %1150 }
  0x13   : > { %v452_v12 = vmul.f32 16.0, %v1151_v11  ;;  %vm456_vm1 = vweird.f32 %v1151_v11 }
  0x15   : > { %v453_v13 = vsub.f32 1.0, %v452_v12 }
  0x17   : > { %v454_v14 = vmul.f32 %v1151_v11, %v453_v13 }
  0x18   : > { %449 = vadd.xlane.f32.xlu2 %v448_v9 }
  0x19   : > { %443 = vadd.xlane.f32.xlu1 %v442_v8  ;;  %v455_v15 = vadd.f32 %v1151_v11, %v454_v14 }
  0x1b   : > { %v1296_v16 = vsel %vm456_vm1, %v1151_v11, %v455_v15 }
  0x83   : > { %v685_v17 = vpop.xlane.xlu0 %684  ;;  %v447_v21 = vpop.xlane.xlu2 %446 }
  0x84   : > { %v441_v18 = vpop.xlane.xlu1 %440  ;;  %v686_v19 = vmul.f32 %v685_v17, %v1296_v16  ;;  %v460_v22 = vmul.f32 %v1296_v16, %v447_v21 }
  0x85   : > { %v458_v20 = vmul.f32 %v1296_v16, %v441_v18 }
  0x86   : > { %v1301_v23 = vsub.f32 %v680_v0, %v686_v19  ;;  %v1304_v24 = vsub.f32 %v1284_v4, %v460_v22  ;;  %v1144_v19 = vld [vmem:[%s1550_s7] ss:$0 sm:$0xff] }
  0x87   : > { %v1307_v25 = vsub.f32 %v1279_v1, %v458_v20 }
  0x88   : > { %v688_v26 = vmul.f32 %v1301_v23, %v1301_v23  ;;  %v468_v27 = vmul.f32 %v1304_v24, %v1304_v24 }
  0x89   : > { %v466_v32 = vmul.f32 %v1307_v25, %v1307_v25 }
  0x8a   : > { %v689_v28 = vsel %vm438_vm0, %v688_v26, 0.0  ;;  %v476_v30 = vsel %vm438_vm0, %v468_v27, 0.0  ;;  %v1145_v27 = vld [vmem:[%s1551_s8] ss:$0 sm:$0xff] }
  0x8b   : > { %690 = vadd.xlane.f32.xlu0 %v689_v28  ;;  %v450_v33 = vpop.xlane.xlu2 %449  ;;  %477 = vadd.xlane.f32.xlu2 %v476_v30  ;;  %v470_v36 = vsel %vm438_vm0, %v466_v32, 0.0 }
  0x8c   : > { %v444_v29 = vpop.xlane.xlu1 %443  ;;  %v461_v34 = vmul.f32 %v1296_v16, %v450_v33 }
  0x8d   : > { %v459_v31 = vmul.f32 %v1296_v16, %v444_v29 }
  0x8e   : > { %v1326_v38 = vsub.f32 %v1290_v7, %v461_v34 }
  0x8f   : > { %v1320_v35 = vsub.f32 %v1288_v6, %v459_v31 }
  0x90   : > { %v469_v40 = vmul.f32 %v1326_v38, %v1326_v38 }
  0x91   : > { %v467_v37 = vmul.f32 %v1320_v35, %v1320_v35 }
  0x92   : > { %v479_v41 = vsel %vm438_vm0, %v469_v40, 0.0 }
  0x93   : > { %v473_v39 = vsel %vm438_vm0, %v467_v37, 0.0  ;;  %471 = vadd.xlane.f32.xlu0 %v470_v36 }
  0x94   : > { %474 = vadd.xlane.f32.xlu1 %v473_v39 }
  0x9b   : > { %480 = vadd.xlane.f32.xlu0 %v479_v41  ;;  %v1146_v41 = vld [vmem:[%s1545_s2] ss:$0 sm:$0xff] }
  0xfe   : > { %v691_v45 = vpop.xlane.xlu0 %690  ;;  %v478_v47 = vpop.xlane.xlu2 %477 }
  0xff   : > { %v692_v46 = vmul.f32 %v691_v45, %v1296_v16  ;;  %v484_v48 = vmul.f32 %v478_v47, %v1296_v16  ;;  %v1147_v47 = vld [vmem:[%s1546_s3] ss:$0 sm:$0xff] }
 0x101   : > { %v693_v52 = vadd.f32 1e-05, %v692_v46  ;;  %v1352_v56 = vadd.f32 1e-05, %v484_v48 }
 0x103   : > { %1152 = vrsqrt.f32 %v693_v52  ;;  %vm700_vm3 = vweird.f32 %v693_v52  ;;  %vm516_vm11 = vweird.f32 %v1352_v56 }
 0x104   : > { %1154 = vrsqrt.f32 %v1352_v56 }
 0x106   : > { %v472_v57 = vpop.xlane.xlu0 %471 }
 0x107   : > { %v475_v58 = vpop.xlane.xlu1 %474  ;;  %v482_v59 = vmul.f32 %v472_v57, %v1296_v16 }
 0x108   : > { %v483_v60 = vmul.f32 %v475_v58, %v1296_v16 }
 0x109   : > { %v1153_v61 = vpop.eup %1152  ;;  %v486_v62 = vadd.f32 1e-05, %v482_v59 }
 0x10a   : > { %v487_v63 = vadd.f32 1e-05, %v483_v60  ;;  %v695_v0 = vmul.f32 %v1153_v61, %v693_v52  ;;  %v1357_v3 = vpop.eup %1154  ;;  %vm701_vm2 = vweird.f32 %v1153_v61 }
 0x10b   : > { %1156 = vrsqrt.f32 %v486_v62  ;;  %v511_v12 = vmul.f32 %v1357_v3, %v1352_v56  ;;  %vm702_vm4 = vmor %vm700_vm3, %vm701_vm2  ;;  %vm496_vm5 = vweird.f32 %v486_v62  ;;  %vm517_vm12 = vweird.f32 %v1357_v3 }
 0x10c   : > { %v696_v2 = vmul.f32 %v1153_v61, %v695_v0  ;;  %1158 = vrsqrt.f32 %v487_v63  ;;  %vm506_vm7 = vweird.f32 %v487_v63  ;;  %vm518_vm15 = vmor %vm516_vm11, %vm517_vm12  ;;  %vm733_vm2 = vcmask 15360  }
 0x10d   : > { %v512_v22 = vmul.f32 %v1357_v3, %v511_v12  ;;  %vm781_vm3 = vcmask 1043456  }
 0x10e   : > { %v697_v5 = vmul.f32 0.5, %v696_v2  ;;  %v481_v8 = vpop.xlane.xlu0 %480 }
 0x10f   : > { %v485_v9 = vmul.f32 %v481_v8, %v1296_v16  ;;  %v513_v34 = vmul.f32 0.5, %v512_v22 }
 0x110   : > { %v698_v10 = vsub.f32 1.5, %v697_v5 }
 0x111   : > { %v1157_v11 = vpop.eup %1156  ;;  %v489_v13 = vadd.f32 1e-05, %v485_v9  ;;  %v514_v46 = vsub.f32 1.5, %v513_v34 }
 0x112   : > { %v1159_v14 = vpop.eup %1158  ;;  %v699_v15 = vmul.f32 %v1153_v61, %v698_v10  ;;  %v491_v17 = vmul.f32 %v1157_v11, %v486_v62  ;;  %vm497_vm6 = vweird.f32 %v1157_v11 }
 0x113   : > { %v501_v18 = vmul.f32 %v1159_v14, %v487_v63  ;;  %1160 = vrsqrt.f32 %v489_v13  ;;  %vm507_vm8 = vweird.f32 %v1159_v14  ;;  %vm498_vm9 = vmor %vm496_vm5, %vm497_vm6  ;;  %vm526_vm13 = vweird.f32 %v489_v13 }
 0x114   : > { %v703_v20 = vsel %vm702_vm4, %v1153_v61, %v699_v15  ;;  %v492_v16 = vmul.f32 %v1157_v11, %v491_v17  ;;  %vm508_vm10 = vmor %vm506_vm7, %vm507_vm8  ;;  %v515_v52 = vmul.f32 %v1357_v3, %v514_v46  ;;  %vm767_vm4 = vcmask 64512  }
 0x115   : > { %v502_v21 = vmul.f32 %v1159_v14, %v501_v18  ;;  %v704_v26 = vmul.f32 %v703_v20, %v1301_v23 }
 0x116   : > { %v493_v28 = vmul.f32 0.5, %v492_v16 }
 0x117   : > { %v503_v29 = vmul.f32 0.5, %v502_v21  ;;  %v708_v30 = vmul.f32 %v1144_v19, %v704_v26 }
 0x118   : > { %v494_v31 = vsub.f32 1.5, %v493_v28 }
 0x119   : > { %v1161_v32 = vpop.eup %1160  ;;  %v504_v33 = vsub.f32 1.5, %v503_v29  ;;  %v712_v36 = vadd.f32 %v1145_v27, %v708_v30 }
 0x11a   : > { %v495_v37 = vmul.f32 %v1157_v11, %v494_v31  ;;  %v521_v23 = vmul.f32 %v1161_v32, %v489_v13  ;;  %vm527_vm14 = vweird.f32 %v1161_v32  ;;  %v1191_v13 = vmov 1   ;;  %v1148_v31 = vld [vmem:[%s1549_s6] ss:$0 sm:$0xff] }
 0x11b   : > { %v505_v39 = vmul.f32 %v1159_v14, %v504_v33  ;;  %v715_v40 = vpack.c.bf16 %v712_v36, %v712_v36  ;;  %vm528_vm1 = vmor %vm526_vm13, %vm527_vm14  ;;  %1141 = vset.pattern.permute.xlu1 %v1191_v13  ;;  %1143 = vset.pattern.permute.xlu0 %v1191_v13 }
 0x11c   : > { %v499_v42 = vsel %vm498_vm9, %v1157_v11, %v495_v37  ;;  %v522_v43 = vmul.f32 %v1161_v32, %v521_v23 }
 0x11d   : > { %v530_v44 = vmul.f32 %v499_v42, %v1307_v25  ;;  %v509_v45 = vsel %vm508_vm10, %v1159_v14, %v505_v39  ;;  %1110 = vmatmul.msk.bf16.vlgmr.msra.gmra.mxu2 %vm438_vm0, %v715_v40  ;;  %v1192_v14 = vmov 0  }
 0x11e   : > { %v531_v48 = vmul.f32 %v509_v45, %v1320_v35  ;;  %v523_v49 = vmul.f32 0.5, %v522_v43  ;;  %v519_v35 = vsel %vm518_vm15, %v1357_v3, %v515_v52  ;;  %1142 = vset.pattern.permute.xlu2 %v1192_v14 }
 0x11f   : > { %v537_v50 = vmul.f32 %v1146_v41, %v530_v44  ;;  %v532_v56 = vmul.f32 %v519_v35, %v1304_v24  ;;  %v753_v44 = vld [vmem:[%s1553_s10] sm:$0xff] }
 0x120   : > { %v524_v51 = vsub.f32 1.5, %v523_v49  ;;  %v538_v25 = vmul.f32 %v1146_v41, %v531_v48  ;;  %v777_v46 = vpack.c.bf16 %v753_v44, %v753_v44 }
 0x121   : > { %v544_v53 = vadd.f32 %v1147_v47, %v537_v50  ;;  %v539_v60 = vmul.f32 %v1146_v41, %v532_v56 }
 0x122   : > { %v525_v54 = vmul.f32 %v1161_v32, %v524_v51  ;;  %v545_v55 = vadd.f32 %v1147_v47, %v538_v25 }
 0x123   : > { %v546_v62 = vadd.f32 %v1147_v47, %v539_v60 }
 0x124   : > { %v550_v57 = vpack.c.bf16 %v545_v55, %v544_v53  ;;  %v529_v58 = vsel %vm528_vm1, %v1161_v32, %v525_v54 }
 0x125   : > { %v533_v59 = vmul.f32 %v529_v58, %v1326_v38 }
 0x126   : > { %1102 = vmatmul.msk.bf16.vlgmr.msra.gmra.mxu0 %vm438_vm0, %v550_v57  ;;  %1104 = vmatmul.msk.bf16.vlgmr.msra.gmra.mxu1 %vm438_vm0, %v550_v57 }
 0x127   : > { %v540_v61 = vmul.f32 %v1146_v41, %v533_v59 }
 0x129   : > { %v547_v63 = vadd.f32 %v1147_v47, %v540_v61  ;;  %v1404_v47 = vsel %vm781_vm3, %v777_v46, 0 }
 0x12a   : > { %792 = vmatpush.bf16.msra.mxu3 %v1404_v47  ;;  %924 = vmatpush.bf16.msrb.mxu1 %v1404_v47 }
 0x12b   : > { %v551_v0 = vpack.c.bf16 %v547_v63, %v546_v62 }
 0x12e   : > { %862 = vmatpush.bf16.msrb.mxu3 %v1404_v47 }
 0x136   : > { %1103 = vmatmul.msk.bf16.gmra.mxu0 %vm438_vm0, %v551_v0  ;;  %1105 = vmatmul.msk.bf16.gmra.mxu1 %vm438_vm0, %v551_v0 }
 0x1a0   : > { %v729_v2 = vpop.f32.mrf.mxu2 }
 0x1a1   : > { %v734_v3 = vsel %vm733_vm2, %v729_v2, -inf }
 0x1a2   : > { %v735_v5 = vrot.slane %v734_v3, 4 }
 0x1a3   : > { %v594_v29 = vpop.f32.mrf.mxu1  ;;  %v1394_v41 = vpop.f32.mrf.mxu0 }
 0x1a4   : > { %v736_v8 = vmax.f32 %v734_v3, %v735_v5  ;;  %v595_v33 = vadd.f32 %v1148_v31, %v594_v29 }
 0x1a6   : > { %v737_v9 = vrot.slane %v736_v8, 2  ;;  %v1106_v36 = vmul.f32 -1.442695, %v595_v33 }
 0x1a8   : > { %v738_v10 = vmax.f32 %v736_v8, %v737_v9  ;;  %v731_v24 = vpop.f32.mrf.mxu2 }
 0x1aa   : > { %v739_v11 = vrot.slane %v738_v10, 1 }
 0x1ab   : > { %v596_v30 = vpop.f32.mrf.mxu1  ;;  %v1411_v48 = vpop.f32.mrf.mxu0 }
 0x1ac   : > { %v740_v38 = vmax.f32 %v738_v10, %v739_v11  ;;  %v597_v23 = vadd.f32 %v1148_v31, %v596_v30 }
 0x1ae   : > { %v741_v12 = vsub.f32 %v729_v2, %v740_v38  ;;  %v1107_v42 = vmul.f32 -1.442695, %v597_v23 }
 0x1b0   : > { %v742_v15 = vmul.f32 1.442695, %v741_v12 }
 0x1b2   : > { %1162 = vpow2.f32 %v742_v15 }
 0x1b3   : > { %v599_v32 = vpop.f32.mrf.mxu1  ;;  %v1424_v58 = vpop.f32.mrf.mxu0 }
 0x1b4   : > { %v600_v34 = vadd.f32 %v1148_v31, %v599_v32 }
 0x1b6   : > { %v1108_v37 = vmul.f32 -1.442695, %v600_v34 }
 0x1b8   : > { %v1163_v17 = vpop.eup %1162 }
 0x1b9   : > { %v744_v18 = vsel %vm733_vm2, %v1163_v17, 0.0  ;;  %vm804_vm2 = vcmask 130112  }
 0x1ba   : > { %v745_v19 = vrot.slane %v744_v18, 4 }
 0x1bb   : > { %v601_v49 = vpop.f32.mrf.mxu1  ;;  %v575_v33 = vpop.f32.mrf.mxu0 }
 0x1bc   : > { %v746_v20 = vadd.f32 %v745_v19, %v744_v18  ;;  %v602_v52 = vadd.f32 %v1148_v31, %v601_v49 }
 0x1be   : > { %v747_v16 = vrot.slane %v746_v20, 2  ;;  %v1109_v57 = vmul.f32 -1.442695, %v602_v52 }
 0x1c0   : > { %v748_v21 = vadd.f32 %v747_v16, %v746_v20 }
 0x1c2   : > { %v749_v22 = vrot.slane %v748_v21, 1 }
 0x1c4   : > { %v750_v26 = vadd.f32 %v749_v22, %v748_v21 }
 0x1c6   : > { %1164 = vrcp.f32 %v750_v26 }
 0x1c7   : > { %1166 = vpow2.f32 %v1106_v36 }
 0x1c8   : > { %1168 = vpow2.f32 %v1108_v37 }
 0x1c9   : > { %1170 = vpow2.f32 %v1107_v42 }
 0x1cc   : > { %v1165_v27 = vpop.eup %1164 }
 0x1cd   : > { %v752_v28 = vmul.f32 %v1165_v27, %v1163_v17  ;;  %v1167_v39 = vpop.eup %1166 }
 0x1ce   : > { %v1169_v40 = vpop.eup %1168  ;;  %v1396_v43 = vadd.f32 1.0, %v1167_v39 }
 0x1cf   : > { %763 = vperm.xlu2 %1142, %v752_v28   ;;  %800 = vperm.xlu1 %1141, %v752_v28   ;;  %v1401_v45 = vadd.f32 1.0, %v1169_v40  ;;  %v1171_v50 = vpop.eup %1170 }
 0x1d0   : > { %1172 = vrcp.f32 %v1396_v43  ;;  %v1417_v53 = vadd.f32 1.0, %v1171_v50  ;;  %vm625_vm5 = vweird.f32 %v1396_v43  ;;  %v629_v20 = vand.u32 2147483647, %v1396_v43 }
 0x1d1   : > { %1174 = vrcp.f32 %v1401_v45  ;;  %v631_v16 = vand.u32 2147483648, %v1396_v43  ;;  %vm655_vm8 = vweird.f32 %v1401_v45  ;;  %v661_v21 = vand.u32 2147483648, %v1401_v45 }
 0x1d2   : > { %1176 = vrcp.f32 %v1417_v53  ;;  %v659_v29 = vand.u32 2147483647, %v1401_v45  ;;  %vm630_vm11 = vcmp.eq.f32.partialorder %v629_v20, 8.507059e+37  ;;  %vm640_vm14 = vweird.f32 %v1417_v53 }
 0x1d3   : > { %1178 = vpow2.f32 %v1109_v57  ;;  %v632_v40 = vor.u32 1.1754944e-38, %v631_v16  ;;  %v662_v42 = vor.u32 1.1754944e-38, %v661_v21 }
 0x1d4   : > { %vm660_vm12 = vcmp.eq.f32.partialorder %v659_v29, 8.507059e+37 }
 0x1d6   : > { %v1413_v51 = vpop.eup %1172 }
 0x1d7   : > { %v1415_v25 = vpop.eup %1174  ;;  %v621_v54 = vmul.f32 %v1413_v51, %v1396_v43  ;;  %vm626_vm6 = vweird.f32 %v1413_v51 }
 0x1d8   : > { %v651_v55 = vmul.f32 %v1415_v25, %v1401_v45  ;;  %v1433_v5 = vpop.eup %1176  ;;  %vm656_vm7 = vweird.f32 %v1415_v25  ;;  %vm1451_vm9 = vmor %vm625_vm5, %vm626_vm6 }
 0x1d9   : > { %v622_v35 = vsub.f32 1.0, %v621_v54  ;;  %v1179_v12 = vpop.eup %1178  ;;  %v636_v13 = vmul.f32 %v1433_v5, %v1417_v53  ;;  %vm1461_vm10 = vmor %vm655_vm8, %vm656_vm7  ;;  %vm641_vm13 = vweird.f32 %v1433_v5 }
 0x1da   : > { %v652_v56 = vsub.f32 1.0, %v651_v55  ;;  %v1447_v22 = vadd.f32 1.0, %v1179_v12  ;;  %vm1490_vm15 = vmor %vm640_vm14, %vm641_vm13 }
 0x1db   : > { %v623_v3 = vmul.f32 %v1413_v51, %v622_v35  ;;  %v637_v30 = vsub.f32 1.0, %v636_v13  ;;  %v644_v35 = vand.u32 2147483647, %v1417_v53 }
 0x1dc   : > { %v653_v24 = vmul.f32 %v1415_v25, %v652_v56  ;;  %1180 = vrcp.f32 %v1447_v22  ;;  %v646_v56 = vand.u32 2147483648, %v1417_v53  ;;  %vm670_vm5 = vweird.f32 %v1447_v22 }
 0x1dd   : > { %v624_v14 = vadd.f32 %v1413_v51, %v623_v3  ;;  %v638_v49 = vmul.f32 %v1433_v5, %v637_v30  ;;  %vm645_vm1 = vcmp.eq.f32.partialorder %v644_v35, 8.507059e+37  ;;  %v674_v35 = vand.u32 2147483647, %v1447_v22 }
 0x1de   : > { %v654_v19 = vadd.f32 %v1415_v25, %v653_v24  ;;  %v647_v53 = vor.u32 1.1754944e-38, %v646_v56 }
 0x1df   : > { %v628_v31 = vsel %vm1451_vm9, %v1413_v51, %v624_v14  ;;  %v639_v57 = vadd.f32 %v1433_v5, %v638_v49  ;;  %vm675_vm7 = vcmp.eq.f32.partialorder %v674_v35, 8.507059e+37 }
 0x1e0   : > { %v658_v37 = vsel %vm1461_vm10, %v1415_v25, %v654_v19  ;;  %v1469_v45 = vsel %vm630_vm11, %v632_v40, %v628_v31 }
 0x1e1   : > { %v1471_v46 = vsel %vm660_vm12, %v662_v42, %v658_v37  ;;  %v643_v3 = vsel %vm1490_vm15, %v1433_v5, %v639_v57 }
 0x1e2   : > { %v648_v13 = vsel %vm645_vm1, %v647_v53, %v643_v3 }
 0x229   : > { %v764_v59 = vpop.permute.xlu2 %763 }
 0x22a   : > { %v766_v60 = vmul.f32 %v764_v59, %v1394_v41  ;;  %v842_v61 = vmul.f32 %v764_v59, %v1411_v48  ;;  %v904_v62 = vmul.f32 %v764_v59, %v1424_v58  ;;  %v966_v39 = vmul.f32 %v764_v59, %v575_v33  ;;  %v1481_v59 = vpop.eup %1180 }
 0x22c   : > { %v768_v63 = vsel %vm767_vm4, %v766_v60, 0.0  ;;  %v843_v0 = vsel %vm767_vm4, %v842_v61, 0.0  ;;  %v905_v2 = vsel %vm767_vm4, %v904_v62, 0.0  ;;  %v967_v52 = vsel %vm767_vm4, %v966_v39, 0.0  ;;  %v754_v62 = vld [vmem:[%s1553_s10 + $0x8] sm:$0xff] }
 0x22d   : > { %v769_v8 = vrot.slane %v768_v63, 4  ;;  %v844_v9 = vrot.slane %v843_v0, 4  ;;  %v906_v10 = vrot.slane %v905_v2, 4  ;;  %v968_v60 = vrot.slane %v967_v52, 4 }
 0x22f   : > { %v770_v11 = vadd.f32 %v769_v8, %v768_v63  ;;  %v907_v38 = vadd.f32 %v906_v10, %v905_v2  ;;  %v845_v15 = vadd.f32 %v844_v9, %v843_v0  ;;  %v814_v0 = vpack.c.bf16 %v754_v62, %v754_v62 }
 0x230   : > { %v666_v2 = vmul.f32 %v1481_v59, %v1447_v22  ;;  %v969_v8 = vadd.f32 %v968_v60, %v967_v52 }
 0x231   : > { %v908_v17 = vrot.slane %v907_v38, 2  ;;  %v771_v18 = vrot.slane %v770_v11, 2  ;;  %v846_v34 = vrot.slane %v845_v15, 2  ;;  %v822_v10 = vsel %vm781_vm3, %v814_v0, 0 }
 0x232   : > { %892 = vmatpush.bf16.msrb.mxu0 %v822_v10  ;;  %831 = vmatpush.bf16.msrb.mxu2 %v822_v10  ;;  %v667_v21 = vsub.f32 1.0, %v666_v2  ;;  %vm671_vm3 = vweird.f32 %v1481_v59 }
 0x233   : > { %v909_v26 = vadd.f32 %v908_v17, %v907_v38  ;;  %v772_v28 = vadd.f32 %v771_v18, %v770_v11  ;;  %v847_v50 = vadd.f32 %v846_v34, %v845_v15  ;;  %vm1509_vm6 = vmor %vm670_vm5, %vm671_vm3 }
 0x235   : > { %v773_v36 = vrot.slane %v772_v28, 1  ;;  %v910_v23 = vrot.slane %v909_v26, 1  ;;  %v848_v61 = vrot.slane %v847_v50, 1 }
 0x236   : > { %1016 = vmatpush.bf16.msra.mxu0 %v822_v10  ;;  %954 = vmatpush.bf16.msra.mxu2 %v822_v10 }
 0x237   : > { %v774_v43 = vadd.f32 %v773_v36, %v772_v28  ;;  %v911_v44 = vadd.f32 %v910_v23, %v909_v26  ;;  %v849_v9 = vadd.f32 %v848_v61, %v847_v50 }
 0x239   : > { %v775_v51 = vmul.f32 %v774_v43, %v1469_v45  ;;  %v912_v25 = vmul.f32 %v911_v44, %v1471_v46  ;;  %v850_v26 = vmul.f32 %v849_v9, %v648_v13 }
 0x23b   : > { %v776_v54 = vpack.c.bf16 %v775_v51, %v775_v51  ;;  %v913_v55 = vpack.c.bf16 %v912_v25, %v912_v25  ;;  %v851_v36 = vpack.c.bf16 %v850_v26, %v850_v26 }
 0x23d   : > { %1111 = vmatmul.msk.bf16.vlgmr.msra.gmra.mxu3 %vm767_vm4, %v776_v54  ;;  %1118 = vmatmul.msk.bf16.vlgmr.msrb.gmra.mxu1 %vm767_vm4, %v913_v55  ;;  %v676_v54 = vand.u32 2147483648, %v1447_v22 }
 0x23e   : > { %986 = vmatpush.bf16.msra.mxu3 %v1404_v47 }
 0x23f   : > { %v677_v53 = vor.u32 1.1754944e-38, %v676_v54 }
 0x241   : > { %v801_v47 = vpop.permute.xlu1 %800 }
 0x242   : > { %v803_v24 = vmul.f32 %v801_v47, %v1394_v41  ;;  %v869_v11 = vmul.f32 %v801_v47, %v1411_v48  ;;  %v931_v38 = vmul.f32 %v801_v47, %v1424_v58  ;;  %v993_v12 = vmul.f32 %v801_v47, %v575_v33 }
 0x243   : > { %v970_v41 = vrot.slane %v969_v8, 2  ;;  %v668_v33 = vmul.f32 %v1481_v59, %v667_v21 }
 0x244   : > { %v805_v5 = vsel %vm804_vm2, %v803_v24, 0.0  ;;  %v870_v14 = vsel %vm804_vm2, %v869_v11, 0.0  ;;  %v932_v15 = vsel %vm804_vm2, %v931_v38, 0.0  ;;  %v994_v17 = vsel %vm804_vm2, %v993_v12, 0.0 }
 0x245   : > { %v806_v18 = vrot.slane %v805_v5, 4  ;;  %v871_v19 = vrot.slane %v870_v14, 4  ;;  %v933_v20 = vrot.slane %v932_v15, 4  ;;  %v995_v16 = vrot.slane %v994_v17, 4 }
 0x246   : > { %v971_v34 = vadd.f32 %v970_v41, %v969_v8  ;;  %v669_v49 = vadd.f32 %v1481_v59, %v668_v33 }
 0x247   : > { %v807_v48 = vadd.f32 %v806_v18, %v805_v5  ;;  %v872_v27 = vadd.f32 %v871_v19, %v870_v14  ;;  %v934_v58 = vadd.f32 %v933_v20, %v932_v15  ;;  %v996_v28 = vadd.f32 %v995_v16, %v994_v17  ;;  %v1149_v19 = vld [vmem:[%s1554_s11] ss:$0 sm:$0xff] }
 0x248   : > { %v972_v50 = vrot.slane %v971_v34, 1  ;;  %v673_v62 = vsel %vm1509_vm6, %v1481_v59, %v669_v49  ;;  %v841_v20 = vadd.f32 %v1149_v19, %v1288_v6 }
 0x249   : > { %v935_v29 = vrot.slane %v934_v58, 2  ;;  %v873_v30 = vrot.slane %v872_v27, 2  ;;  %v808_v31 = vrot.slane %v807_v48, 2  ;;  %v997_v32 = vrot.slane %v996_v28, 2 }
 0x24a   : > { %v973_v63 = vadd.f32 %v972_v50, %v971_v34  ;;  %v678_v22 = vsel %vm675_vm7, %v677_v53, %v673_v62  ;;  %v903_v34 = vadd.f32 %v1149_v19, %v1284_v4 }
 0x24b   : > { %v936_v37 = vadd.f32 %v935_v29, %v934_v58  ;;  %v874_v23 = vadd.f32 %v873_v30, %v872_v27  ;;  %v809_v39 = vadd.f32 %v808_v31, %v807_v48  ;;  %v998_v40 = vadd.f32 %v997_v32, %v996_v28 }
 0x24c   : > { %v760_v48 = vadd.f32 %v1149_v19, %v1279_v1  ;;  %v965_v27 = vadd.f32 %v1149_v19, %v1290_v7 }
 0x24d   : > { %1114 = vmatmul.msk.bf16.vlgmr.msrb.gmra.mxu3 %vm767_vm4, %v851_v36  ;;  %v937_v42 = vrot.slane %v936_v37, 1  ;;  %v875_v43 = vrot.slane %v874_v23, 1  ;;  %v810_v44 = vrot.slane %v809_v39, 1  ;;  %v999_v55 = vrot.slane %v998_v40, 1 }
 0x24f   : > { %v938_v51 = vadd.f32 %v937_v42, %v936_v37  ;;  %v876_v25 = vadd.f32 %v875_v43, %v874_v23  ;;  %v811_v52 = vadd.f32 %v810_v44, %v809_v39  ;;  %v1000_v8 = vadd.f32 %v999_v55, %v998_v40 }
 0x251   : > { %v939_v56 = vmul.f32 %v938_v51, %v1471_v46  ;;  %v877_v60 = vmul.f32 %v876_v25, %v648_v13  ;;  %v812_v61 = vmul.f32 %v811_v52, %v1469_v45  ;;  %v974_v46 = vmul.f32 %v973_v63, %v678_v22 }
 0x252   : > { %v1001_v47 = vmul.f32 %v1000_v8, %v678_v22 }
 0x253   : > { %v940_v0 = vpack.c.bf16 %v939_v56, %v939_v56  ;;  %v878_v2 = vpack.c.bf16 %v877_v60, %v877_v60  ;;  %v813_v3 = vpack.c.bf16 %v812_v61, %v812_v61  ;;  %v975_v9 = vpack.c.bf16 %v974_v46, %v974_v46 }
 0x254   : > { %v1002_v45 = vpack.c.bf16 %v1001_v47, %v1001_v47 }
 0x255   : > { %942 = vrot.lane.b32.xlu1 %v940_v0, %s1193_s27  ;;  %880 = vrot.lane.b32.xlu2 %v878_v2, %s1193_s27 }
 0x256   : > { %816 = vrot.lane.b32.xlu0 %v813_v3, %s1193_s27 }
 0x25d   : > { %1122 = vmatmul.msk.bf16.vlgmr.msra.gmra.mxu3 %vm767_vm4, %v975_v9 }
 0x25e   : > { %1004 = vrot.lane.b32.xlu0 %v1002_v45, %s1193_s27 }
 0x2af   : > { %v881_v59 = vpop.permute.xlu2 %880 }
 0x2b0   : > { %1115 = vmatmul.msk.bf16.vlgmr.msrb.gmra.mxu0 %vm767_vm4, %v881_v59 }
 0x2ba   : > { %v926_v10 = vpop.f32.mrf.mxu1 }
 0x2bb   : > { %v930_v36 = vadd.f32 %v926_v10, %v903_v34 }
 0x2c0   : > { %v794_v24 = vpop.f32.mrf.mxu3 }
 0x2c1   : > { %v798_v58 = vadd.f32 %v794_v24, %v760_v48 }
 0x2c2   : > { %v928_v11 = vpop.f32.mrf.mxu1 }
 0x2c7   : > { %v943_v14 = vpop.permute.xlu1 %942 }
 0x2c8   : > { %v817_v38 = vpop.permute.xlu0 %816  ;;  %v796_v12 = vpop.f32.mrf.mxu3 }
 0x2c9   : > { %1112 = vmatmul.msk.bf16.vlgmr.msrb.gmra.mxu2 %vm767_vm4, %v817_v38 }
 0x2d0   : > { %v1005_v13 = vpop.permute.xlu0 %1004  ;;  %v864_v5 = vpop.f32.mrf.mxu3 }
 0x2d1   : > { %1123 = vmatmul.msk.bf16.vlgmr.msra.gmra.mxu0 %vm767_vm4, %v1005_v13  ;;  %v868_v16 = vadd.f32 %v864_v5, %v841_v20 }
 0x2d8   : > { %v866_v15 = vpop.f32.mrf.mxu3 }
 0x2d9   : > { %1119 = vmatmul.msk.bf16.vlgmr.msra.gmra.mxu2 %vm767_vm4, %v943_v14 }
 0x2e0   : > { %v988_v17 = vpop.f32.mrf.mxu3 }
 0x2e1   : > { %v992_v29 = vadd.f32 %v988_v17, %v965_v27 }
 0x2e8   : > { %v990_v18 = vpop.f32.mrf.mxu3 }
 0x32d   : > { %v894_v21 = vpop.f32.mrf.mxu0 }
 0x32e   : > { %v898_v41 = vadd.f32 %v894_v21, %v868_v16 }
 0x330   : > { %1116 = vst.msk [vmem:[%s430_s14 + $0x8] sm:$0xff] %vm438_vm0, %v898_v41 }
 0x335   : > { %v896_v26 = vpop.f32.mrf.mxu0 }
 0x34c   : > { %v833_v28 = vpop.f32.mrf.mxu2 }
 0x34d   : > { %v837_v30 = vadd.f32 %v833_v28, %v798_v58 }
 0x34e   : > { %v1018_v6 = vpop.f32.mrf.mxu0 }
 0x34f   : > { %838 = vst.msk [vmem:[%s430_s14] sm:$0xff] %vm438_vm0, %v837_v30  ;;  %v1022_v31 = vadd.f32 %v1018_v6, %v992_v29 }
 0x351   : > { %1124 = vst.msk [vmem:[%s430_s14 + $0x18] sm:$0xff] %vm438_vm0, %v1022_v31 }
 0x354   : > { %v835_v32 = vpop.f32.mrf.mxu2 }
 0x356   : > { %v1020_v33 = vpop.f32.mrf.mxu0 }
 0x35c   : > { %v956_v37 = vpop.f32.mrf.mxu2 }
 0x35d   : > { %v960_v23 = vadd.f32 %v956_v37, %v930_v36 }
 0x35f   : > { %1120 = vst.msk [vmem:[%s430_s14 + $0x10] sm:$0xff] %vm438_vm0, %v960_v23 }
 0x364   : > { %v958_v1 = vpop.f32.mrf.mxu2 }
 0x365 PF: > { %s22_s21 = sadd.s32 1, %s1188_s21  }
 0x366   : > { %p19_p4 = scmp.ge.s32.totalorder %s22_s21, 4  }
 0x368   :  { %21 = sbr.rel (!%p19_p4) target bundleno = 1 (0x1), region = 107 }

// kernel: neg.2
= control target key start
LH: loop header
LB: loop body
LE: loop exit
PB: predicated region body
PF: predicated region fallthrough
CT: control target
= control target key end

     0   :  { %s24_s0 = inlined_call_operand.vmem [shape: f32[2,4,1], index: 0, kind: input, shape index: {}]   ;;  %s25_s1 = inlined_call_operand.vmem [shape: f32[2,4,1], index: 1, kind: output, shape index: {}]  }
   0x1   :  { %v2_v0 = vld [vmem:[%s24_s0] sm:$0xf] }
   0x2   :  { %v5_v1 = vxor.u32 2147483648, %v2_v0 }
   0x4   :  { %7 = vst [vmem:[%s25_s1] sm:$0xf] %v5_v1 }

// kernel: _lambda_.12
= control target key start
LH: loop header
LB: loop body
LE: loop exit
PB: predicated region body
PF: predicated region fallthrough
CT: control target
= control target key end

     0   :  { %s1196_s13 = smov 0   ;;  %s1420_s0 = inlined_call_operand.vmem [shape: f32[2,4,8,16], index: 0, kind: input, shape index: {}]   ;;  %s1421_s1 = inlined_call_operand.vmem [shape: f32[2,8,16], index: 1, kind: input, shape index: {}]   ;;  %s1422_s2 = inlined_call_operand.vmem [shape: f32[1,16], index: 2, kind: input, shape index: {}]   ;;  %s1423_s3 = inlined_call_operand.vmem [shape: f32[1,16], index: 3, kind: input, shape index: {}]   ;;  %s1424_s4 = inlined_call_operand.vmem [shape: f32[16,8], index: 4, kind: input, shape index: {}]   ;;  %s1425_s5 = inlined_call_operand.vmem [shape: f32[1,8], index: 5, kind: input, shape index: {}]   ;;  %s1426_s6 = inlined_call_operand.vmem [shape: f32[16,8], index: 6, kind: input, shape index: {}]   ;;  %s1427_s7 = inlined_call_operand.vmem [shape: f32[1,8], index: 7, kind: input, shape index: {}]   ;;  %s1428_s8 = inlined_call_operand.vmem [shape: f32[64,16], index: 8, kind: input, shape index: {}]   ;;  %s1429_s9 = inlined_call_operand.vmem [shape: f32[1,16], index: 9, kind: input, shape index: {}]   ;;  %s1430_s10 = inlined_call_operand.vmem [shape: f32[2,8,16], index: 10, kind: output, shape index: {}]  }
   0x1 LB: > { %s1038_s14 = sadd.s32 4294967295, %s1130_s13   ;;  %p1042_p0 = scmp.ge.s32.totalorder %s1130_s13, 1  ;;  %s1130_s13 = sphi %s1196_s13, %s20_s13  }
   0x2   : > { %p321_p1 = scmp.lt.s32.totalorder %s1130_s13, 3 }
   0x4   : > { %p322_p2 = pnand %p1042_p0, %p321_p1 }
   0x5   : > { %p362_p3 = scmp.lt.s32.totalorder (!%p322_p2), %s1038_s14, 1 }
   0x6   : > { %325 = sbr.rel (%p322_p2) target bundleno = 783 (0x30f), region = 60 }
   0xb   : > { %s1432_s14 = smov (!%p362_p3, %s1038_s14), 1  ;;  %vm382_vm0 = vcmask 130048   ;;  %v1132_v8 = vmov 16.0   ;;  %v492_v36 = vld [vmem:[%s1424_s4] sm:$0xff]  ;;  %v493_v37 = vld [vmem:[%s1424_s4 + $0x8] sm:$0xff]  ;;  %vm604_vm14 = vcmask 1043456  }
   0xc   : > { %s1061_s15 = sshll.u32 %s1432_s14, 5  ;;  %1114 = vrcp.f32 %v1132_v8  ;;  %v526_v38 = vld [vmem:[%s1426_s6] sm:$0xff]  ;;  %v496_v41 = vpack.c.bf16 %v493_v37, %v492_v36  ;;  %v527_v42 = vld [vmem:[%s1426_s6 + $0x8] sm:$0xff]  ;;  %v1134_v36 = vmov 1   ;;  %v1135_v37 = vmov 0  }
   0xd   : > { %s366_s18 = scalar_lea.vmem %s1420_s0, %s1061_s15  ;;  %v528_v43 = vpack.c.bf16 %v527_v42, %v526_v38  ;;  %1080 = vset.pattern.permute.xlu1 %v1134_v36  ;;  %1079 = vset.pattern.permute.xlu2 %v1135_v37  ;;  %v1137_v42 = vmov 6   ;;  %vm590_vm15 = vcmask 64512   ;;  %s1045_s15 = sshll.u32 %s1432_s14, 3 }
   0xe   : > { %v378_v0 = vld [vmem:[%s366_s18 + $0x10] sm:$0xff]  ;;  %v376_v1 = vld [vmem:[%s366_s18] sm:$0xff]  ;;  %v379_v4 = vld [vmem:[%s366_s18 + $0x18] sm:$0xff]  ;;  %514 = vmatpush.bf16.msra.mxu0 %v496_v41  ;;  %v1136_v41 = vmov 3   ;;  %s374_s22 = scalar_lea.vmem %s1430_s10, %s1045_s15 }
   0xf   : > { %v389_v2 = vsel %vm382_vm0, %v378_v0, 0.0  ;;  %v383_v3 = vsel %vm382_vm0, %v376_v1, 0.0  ;;  %v377_v5 = vld [vmem:[%s366_s18 + $0x8] sm:$0xff]  ;;  %v392_v6 = vsel %vm382_vm0, %v379_v4, 0.0  ;;  %540 = vmatpush.bf16.msra.mxu1 %v528_v43  ;;  %s370_s18 = scalar_lea.vmem %s1421_s1, %s1045_s15 }
  0x10   : > { %390 = vadd.xlane.f32.xlu1 %v389_v2  ;;  %384 = vadd.xlane.f32.xlu0 %v383_v3  ;;  %v386_v7 = vsel %vm382_vm0, %v377_v5, 0.0 }
  0x12   : > { %v1115_v9 = vpop.eup %1114 }
  0x13   : > { %v396_v10 = vmul.f32 16.0, %v1115_v9  ;;  %vm400_vm1 = vweird.f32 %v1115_v9 }
  0x15   : > { %v397_v11 = vsub.f32 1.0, %v396_v10 }
  0x17   : > { %v398_v12 = vmul.f32 %v1115_v9, %v397_v11 }
  0x18   : > { %393 = vadd.xlane.f32.xlu1 %v392_v6  ;;  %387 = vadd.xlane.f32.xlu0 %v386_v7 }
  0x19   : > { %v399_v13 = vadd.f32 %v1115_v9, %v398_v12 }
  0x1b   : > { %v401_v14 = vsel %vm400_vm1, %v1115_v9, %v399_v13  ;;  %v1109_v9 = vld [vmem:[%s1422_s2] ss:$0 sm:$0xff] }
  0x83   : > { %v391_v15 = vpop.xlane.xlu1 %390  ;;  %v385_v16 = vpop.xlane.xlu0 %384 }
  0x84   : > { %v404_v17 = vmul.f32 %v401_v14, %v391_v15  ;;  %v402_v18 = vmul.f32 %v401_v14, %v385_v16  ;;  %v1110_v16 = vld [vmem:[%s1423_s3] ss:$0 sm:$0xff] }
  0x86   : > { %v1214_v19 = vsub.f32 %v378_v0, %v404_v17  ;;  %v1216_v20 = vsub.f32 %v376_v1, %v402_v18 }
  0x88   : > { %v412_v21 = vmul.f32 %v1214_v19, %v1214_v19  ;;  %v410_v22 = vmul.f32 %v1216_v20, %v1216_v20 }
  0x8a   : > { %v420_v23 = vsel %vm382_vm0, %v412_v21, 0.0  ;;  %v414_v24 = vsel %vm382_vm0, %v410_v22, 0.0 }
  0x8b   : > { %v394_v25 = vpop.xlane.xlu1 %393  ;;  %421 = vadd.xlane.f32.xlu0 %v420_v23  ;;  %415 = vadd.xlane.f32.xlu2 %v414_v24  ;;  %v388_v26 = vpop.xlane.xlu0 %387 }
  0x8c   : > { %v405_v27 = vmul.f32 %v401_v14, %v394_v25  ;;  %v403_v28 = vmul.f32 %v401_v14, %v388_v26 }
  0x8e   : > { %v1224_v29 = vsub.f32 %v379_v4, %v405_v27  ;;  %v1226_v30 = vsub.f32 %v377_v5, %v403_v28 }
  0x90   : > { %v413_v31 = vmul.f32 %v1224_v29, %v1224_v29  ;;  %v411_v32 = vmul.f32 %v1226_v30, %v1226_v30 }
  0x92   : > { %v423_v33 = vsel %vm382_vm0, %v413_v31, 0.0  ;;  %v417_v34 = vsel %vm382_vm0, %v411_v32, 0.0 }
  0x93   : > { %424 = vadd.xlane.f32.xlu1 %v423_v33  ;;  %418 = vadd.xlane.f32.xlu2 %v417_v34 }
  0xfe   : > { %v416_v35 = vpop.xlane.xlu2 %415  ;;  %v422_v40 = vpop.xlane.xlu0 %421 }
  0xff   : > { %v426_v39 = vmul.f32 %v416_v35, %v401_v14  ;;  %v428_v45 = vmul.f32 %v422_v40, %v401_v14  ;;  %v1133_v35 = vmov 2  }
 0x100   : > { %1081 = vset.pattern.permute.xlu0 %v1133_v35 }
 0x101   : > { %v430_v44 = vadd.f32 1e-05, %v426_v39  ;;  %v432_v46 = vadd.f32 1e-05, %v428_v45  ;;  %v1138_v45 = vmov 5  }
 0x103   : > { %1116 = vrsqrt.f32 %v430_v44  ;;  %vm440_vm3 = vweird.f32 %v430_v44  ;;  %vm460_vm10 = vweird.f32 %v432_v46 }
 0x104   : > { %1118 = vrsqrt.f32 %v432_v46 }
 0x106   : > { %v425_v47 = vpop.xlane.xlu1 %424  ;;  %v419_v48 = vpop.xlane.xlu2 %418 }
 0x107   : > { %v429_v49 = vmul.f32 %v425_v47, %v401_v14  ;;  %v427_v50 = vmul.f32 %v419_v48, %v401_v14 }
 0x109   : > { %v1117_v51 = vpop.eup %1116  ;;  %v433_v52 = vadd.f32 1e-05, %v429_v49  ;;  %v431_v53 = vadd.f32 1e-05, %v427_v50  ;;  %v1140_v49 = vmov 4  }
 0x10a   : > { %v435_v54 = vmul.f32 %v1117_v51, %v430_v44  ;;  %v1119_v57 = vpop.eup %1118  ;;  %vm441_vm2 = vweird.f32 %v1117_v51 }
 0x10b   : > { %1120 = vrsqrt.f32 %v433_v52  ;;  %v455_v63 = vmul.f32 %v1119_v57, %v432_v46  ;;  %vm442_vm4 = vmor %vm440_vm3, %vm441_vm2  ;;  %vm450_vm6 = vweird.f32 %v431_v53  ;;  %vm470_vm8 = vweird.f32 %v433_v52 }
 0x10c   : > { %v436_v55 = vmul.f32 %v1117_v51, %v435_v54  ;;  %1122 = vrsqrt.f32 %v431_v53  ;;  %vm461_vm11 = vweird.f32 %v1119_v57  ;;  %v1139_v46 = vmov 7  }
 0x10d   : > { %v456_v4 = vmul.f32 %v1119_v57, %v455_v63  ;;  %vm462_vm13 = vmor %vm460_vm10, %vm461_vm11 }
 0x10e   : > { %v437_v56 = vmul.f32 0.5, %v436_v55 }
 0x10f   : > { %v457_v10 = vmul.f32 0.5, %v456_v4 }
 0x110   : > { %v438_v58 = vsub.f32 1.5, %v437_v56 }
 0x111   : > { %v1121_v59 = vpop.eup %1120  ;;  %v458_v17 = vsub.f32 1.5, %v457_v10  ;;  %v553_v10 = vld [vmem:[%s1428_s8 + $0x8] sm:$0xff] }
 0x112   : > { %v1123_v60 = vpop.eup %1122  ;;  %v465_v61 = vmul.f32 %v1121_v59, %v433_v52  ;;  %v439_v62 = vmul.f32 %v1117_v51, %v438_v58  ;;  %vm471_vm9 = vweird.f32 %v1121_v59  ;;  %v552_v58 = vld [vmem:[%s1428_s8] sm:$0xff] }
 0x113   : > { %v445_v0 = vmul.f32 %v1123_v60, %v431_v53  ;;  %vm451_vm5 = vweird.f32 %v1123_v60  ;;  %vm472_vm12 = vmor %vm470_vm8, %vm471_vm9  ;;  %v459_v23 = vmul.f32 %v1119_v57, %v458_v17 }
 0x114   : > { %v466_v1 = vmul.f32 %v1121_v59, %v465_v61  ;;  %v443_v3 = vsel %vm442_vm4, %v1117_v51, %v439_v62  ;;  %vm452_vm7 = vmor %vm450_vm6, %vm451_vm5 }
 0x115   : > { %v446_v2 = vmul.f32 %v1123_v60, %v445_v0  ;;  %v474_v8 = vmul.f32 %v443_v3, %v1216_v20  ;;  %v463_v26 = vsel %vm462_vm13, %v1119_v57, %v459_v23  ;;  %v1112_v57 = vld [vmem:[%s1427_s7] ss:$0 sm:$0xff] }
 0x116   : > { %v467_v6 = vmul.f32 0.5, %v466_v1  ;;  %v476_v28 = vmul.f32 %v463_v26, %v1214_v19  ;;  %v1111_v19 = vld [vmem:[%s1425_s5] ss:$0 sm:$0xff] }
 0x117   : > { %v447_v5 = vmul.f32 0.5, %v446_v2  ;;  %v481_v15 = vmul.f32 %v1109_v9, %v474_v8 }
 0x118   : > { %v468_v12 = vsub.f32 1.5, %v467_v6  ;;  %v483_v31 = vmul.f32 %v1109_v9, %v476_v28 }
 0x119   : > { %v448_v7 = vsub.f32 1.5, %v447_v5  ;;  %v488_v21 = vadd.f32 %v1110_v16, %v481_v15 }
 0x11a   : > { %v469_v20 = vmul.f32 %v1121_v59, %v468_v12  ;;  %v490_v33 = vadd.f32 %v1110_v16, %v483_v31  ;;  %v651_v12 = vpack.c.bf16 %v553_v10, %v553_v10  ;;  %v555_v31 = vld [vmem:[%s1428_s8 + $0x18] sm:$0xff] }
 0x11b   : > { %v449_v11 = vmul.f32 %v1123_v60, %v448_v7 }
 0x11c   : > { %v473_v25 = vsel %vm472_vm12, %v1121_v59, %v469_v20  ;;  %v600_v59 = vpack.c.bf16 %v552_v58, %v552_v58  ;;  %v656_v15 = vsel %vm604_vm14, %v651_v12, 0 }
 0x11d   : > { %v453_v13 = vsel %vm452_vm7, %v1123_v60, %v449_v11  ;;  %v477_v27 = vmul.f32 %v473_v25, %v1224_v29  ;;  %665 = vmatpush.bf16.msra.mxu3 %v656_v15 }
 0x11e   : > { %v475_v14 = vmul.f32 %v453_v13, %v1226_v30  ;;  %v606_v62 = vsel %vm604_vm14, %v600_v59, 0 }
 0x11f   : > { %v484_v30 = vmul.f32 %v1109_v9, %v477_v27  ;;  %615 = vmatpush.bf16.msra.mxu2 %v606_v62 }
 0x120   : > { %v482_v18 = vmul.f32 %v1109_v9, %v475_v14  ;;  %v554_v14 = vld [vmem:[%s1428_s8 + $0x10] sm:$0xff] }
 0x121   : > { %v491_v32 = vadd.f32 %v1110_v16, %v484_v30 }
 0x122   : > { %v489_v22 = vadd.f32 %v1110_v16, %v482_v18  ;;  %v701_v16 = vpack.c.bf16 %v554_v14, %v554_v14 }
 0x123   : > { %v495_v34 = vpack.c.bf16 %v491_v32, %v490_v33 }
 0x124   : > { %v494_v24 = vpack.c.bf16 %v489_v22, %v488_v21  ;;  %v706_v21 = vsel %vm604_vm14, %v701_v16, 0 }
 0x125   : > { %715 = vmatpush.bf16.msrb.mxu2 %v706_v21 }
 0x126   : > { %1047 = vmatmul.msk.bf16.vlgmr.msra.gmra.mxu0 %vm382_vm0, %v494_v24  ;;  %1049 = vmatmul.msk.bf16.vlgmr.msra.gmra.mxu1 %vm382_vm0, %v494_v24 }
 0x136   : > { %1048 = vmatmul.msk.bf16.gmra.mxu0 %vm382_vm0, %v495_v34  ;;  %1050 = vmatmul.msk.bf16.gmra.mxu1 %vm382_vm0, %v495_v34  ;;  %v751_v34 = vpack.c.bf16 %v555_v31, %v555_v31 }
 0x1a3   : > { %v516_v29 = vpop.f32.mrf.mxu0  ;;  %v542_v55 = vpop.f32.mrf.mxu1 }
 0x1a4   : > { %v517_v38 = vadd.f32 %v1111_v19, %v516_v29  ;;  %v1280_v63 = vadd.f32 %v1112_v57, %v542_v55 }
 0x1a6   : > { %673 = vperm.xlu0 %1081, %v517_v38   ;;  %623 = vperm.xlu1 %1080, %v517_v38  }
 0x1a7   : > { %568 = vperm.xlu2 %1079, %v517_v38  }
 0x1ab   : > { %v518_v39 = vpop.f32.mrf.mxu0  ;;  %v544_v61 = vpop.f32.mrf.mxu1 }
 0x1ac   : > { %v519_v40 = vadd.f32 %v1111_v19, %v518_v39  ;;  %v1282_v0 = vadd.f32 %v1112_v57, %v544_v61 }
 0x1ae   : > { %1084 = vset.pattern.permute.xlu0 %v1135_v37  ;;  %1082 = vset.pattern.permute.xlu1 %v1136_v41 }
 0x1af   : > { %1083 = vset.pattern.permute.xlu2 %v1137_v42  ;;  %573 = vperm.xlu0 %1084, %v519_v40  }
 0x1b0   : > { %723 = vperm.xlu1 %1082, %v517_v38   ;;  %873 = vperm.xlu2 %1083, %v517_v38  }
 0x1b3   : > { %v521_v43 = vpop.f32.mrf.mxu0  ;;  %v547_v9 = vpop.f32.mrf.mxu1 }
 0x1b4   : > { %v522_v44 = vadd.f32 %v1111_v19, %v521_v43  ;;  %v1299_v18 = vadd.f32 %v1112_v57, %v547_v9 }
 0x1b7   : > { %1093 = vset.pattern.permute.xlu0 %v1136_v41 }
 0x1b8   : > { %1088 = vset.pattern.permute.xlu1 %v1137_v42  ;;  %1085 = vset.pattern.permute.xlu2 %v1134_v36 }
 0x1b9   : > { %877 = vperm.xlu1 %1088, %v519_v40   ;;  %627 = vperm.xlu2 %1085, %v519_v40  }
 0x1ba   : > { %731 = vperm.xlu0 %1093, %v522_v44  }
 0x1bb   : > { %v523_v47 = vpop.f32.mrf.mxu0  ;;  %v549_v24 = vpop.f32.mrf.mxu1 }
 0x1bc   : > { %v524_v48 = vadd.f32 %v1111_v19, %v523_v47  ;;  %v1306_v26 = vadd.f32 %v1112_v57, %v549_v24  ;;  %v756_v19 = vsel %vm604_vm14, %v751_v34, 0 }
 0x1bd   : > { %765 = vmatpush.bf16.msrb.mxu3 %v756_v19 }
 0x1c1   : > { %1091 = vset.pattern.permute.xlu1 %v1134_v36  ;;  %1086 = vset.pattern.permute.xlu2 %v1133_v35 }
 0x1c2   : > { %1100 = vset.pattern.permute.xlu0 %v1138_v45  ;;  %677 = vperm.xlu2 %1086, %v519_v40  }
 0x1c3   : > { %823 = vperm.xlu0 %1100, %v517_v38   ;;  %631 = vperm.xlu1 %1091, %v522_v44  }
 0x1ca   : > { %1087 = vset.pattern.permute.xlu2 %v1136_v41 }
 0x1cb   : > { %1101 = vset.pattern.permute.xlu0 %v1139_v46  ;;  %1092 = vset.pattern.permute.xlu1 %v1133_v35 }
 0x1cc   : > { %727 = vperm.xlu2 %1087, %v519_v40   ;;  %923 = vperm.xlu0 %1101, %v517_v38  }
 0x1cd   : > { %681 = vperm.xlu1 %1092, %v522_v44  }
 0x1d4   : > { %1089 = vset.pattern.permute.xlu2 %v1139_v46  ;;  %935 = vperm.xlu0 %1101, %v524_v48  }
 0x1d5   : > { %1094 = vset.pattern.permute.xlu1 %v1137_v42  ;;  %927 = vperm.xlu2 %1089, %v519_v40  }
 0x1d6   : > { %881 = vperm.xlu1 %1094, %v522_v44  }
 0x1dc   : > { %1107 = vset.pattern.permute.xlu0 %v1138_v45 }
 0x1dd   : > { %1090 = vset.pattern.permute.xlu2 %v1135_v37  ;;  %835 = vperm.xlu0 %1107, %v524_v48  }
 0x1de   : > { %1096 = vset.pattern.permute.xlu1 %v1134_v36  ;;  %578 = vperm.xlu2 %1090, %v522_v44  }
 0x1df   : > { %635 = vperm.xlu1 %1096, %v524_v48  }
 0x1e5   : > { %1108 = vset.pattern.permute.xlu0 %v1139_v46 }
 0x1e6   : > { %583 = vperm.xlu2 %1090, %v524_v48  }
 0x1e7   : > { %1099 = vset.pattern.permute.xlu1 %v1140_v49 }
 0x1e8   : > { %777 = vperm.xlu1 %1099, %v519_v40  }
 0x1ee   : > { %1095 = vset.pattern.permute.xlu2 %v1139_v46  ;;  %v557_v46 = vld [vmem:[%s1428_s8 + $0x28] sm:$0xff] }
 0x1ef   : > { %931 = vperm.xlu2 %1095, %v522_v44  }
 0x1f0   : > { %1103 = vset.pattern.permute.xlu1 %v1136_v41 }
 0x1f1   : > { %735 = vperm.xlu1 %1103, %v524_v48  }
 0x1f7   : > { %1097 = vset.pattern.permute.xlu2 %v1133_v35 }
 0x1f8   : > { %685 = vperm.xlu2 %1097, %v524_v48  }
 0x1f9   : > { %1104 = vset.pattern.permute.xlu1 %v1140_v49 }
 0x1fa   : > { %781 = vperm.xlu1 %1104, %v522_v44  }
 0x200   : > { %1098 = vset.pattern.permute.xlu2 %v1140_v49 }
 0x201   : > { %773 = vperm.xlu2 %1098, %v517_v38   ;;  %v569_v50 = vpop.permute.xlu2 %568 }
 0x202   : > { %1105 = vset.pattern.permute.xlu1 %v1137_v42  ;;  %v586_v22 = vmul.f32 %v569_v50, %v1280_v63 }
 0x203   : > { %885 = vperm.xlu1 %1105, %v524_v48  }
 0x204   : > { %v591_v27 = vsel %vm590_vm15, %v586_v22, 0.0 }
 0x209   : > { %1102 = vset.pattern.permute.xlu2 %v1138_v45  ;;  %v556_v45 = vld [vmem:[%s1428_s8 + $0x20] sm:$0xff] }
 0x20a   : > { %827 = vperm.xlu2 %1102, %v519_v40   ;;  %v874_v51 = vpop.permute.xlu2 %873  ;;  %v801_v50 = vpack.c.bf16 %v556_v45, %v556_v45 }
 0x20b   : > { %1106 = vset.pattern.permute.xlu1 %v1140_v49  ;;  %v888_v1 = vmul.f32 %v874_v51, %v1280_v63  ;;  %v851_v51 = vpack.c.bf16 %v557_v46, %v557_v46 }
 0x20c   : > { %785 = vperm.xlu1 %1106, %v524_v48   ;;  %v806_v57 = vsel %vm604_vm14, %v801_v50, 0 }
 0x20d   : > { %v892_v5 = vsel %vm590_vm15, %v888_v1, 0.0  ;;  %v856_v58 = vsel %vm604_vm14, %v851_v51, 0  ;;  %815 = vmatpush.bf16.msrb.mxu0 %v806_v57 }
 0x20e   : > { %865 = vmatpush.bf16.msrb.mxu1 %v856_v58 }
 0x212   : > { %831 = vperm.xlu2 %1102, %v522_v44  }
 0x213   : > { %v1267_v52 = vpop.permute.xlu2 %627 }
 0x214   : > { %v639_v47 = vmul.f32 %v1267_v52, %v1282_v0 }
 0x216   : > { %v643_v52 = vsel %vm590_vm15, %v639_v47, 0.0 }
 0x218   : > { %v624_v53 = vpop.permute.xlu1 %623  ;;  %v674_v3 = vpop.permute.xlu0 %673 }
 0x219   : > { %v638_v43 = vmul.f32 %v624_v53, %v1280_v63  ;;  %v688_v53 = vmul.f32 %v674_v3, %v1280_v63 }
 0x21b   : > { %v642_v55 = vsel %vm590_vm15, %v638_v43, 0.0  ;;  %v692_v1 = vsel %vm590_vm15, %v688_v53, 0.0 }
 0x21c   : > { %v678_v54 = vpop.permute.xlu2 %677  ;;  %v644_v62 = vadd.f32 %v643_v52, %v642_v55 }
 0x21d   : > { %v689_v44 = vmul.f32 %v678_v54, %v1282_v0 }
 0x21f   : > { %v693_v59 = vsel %vm590_vm15, %v689_v44, 0.0 }
 0x221   : > { %v574_v13 = vpop.permute.xlu0 %573 }
 0x222   : > { %v1269_v56 = vpop.permute.xlu1 %723  ;;  %v587_v20 = vmul.f32 %v574_v13, %v1282_v0 }
 0x223   : > { %v738_v34 = vmul.f32 %v1269_v56, %v1280_v63 }
 0x224   : > { %v592_v25 = vsel %vm590_vm15, %v587_v20, 0.0  ;;  %v559_v20 = vld [vmem:[%s1428_s8 + $0x38] sm:$0xff] }
 0x225   : > { %v593_v32 = vadd.f32 %v592_v25, %v591_v27 }
 0x226   : > { %v1277_v60 = vpop.permute.xlu2 %727 }
 0x22b   : > { %v878_v2 = vpop.permute.xlu1 %877 }
 0x22c   : > { %v889_v4 = vmul.f32 %v878_v2, %v1282_v0  ;;  %v1314_v36 = vpop.permute.xlu0 %731 }
 0x22e   : > { %v893_v6 = vsel %vm590_vm15, %v889_v4, 0.0  ;;  %v694_v4 = vadd.f32 %v693_v59, %v692_v1 }
 0x22f   : > { %v1288_v7 = vadd.f32 %v893_v6, %v892_v5  ;;  %v1290_v8 = vpop.permute.xlu2 %927 }
 0x230   : > { %v939_v47 = vmul.f32 %v1290_v8, %v1282_v0 }
 0x232   : > { %v943_v58 = vsel %vm590_vm15, %v939_v47, 0.0 }
 0x235   : > { %v632_v11 = vpop.permute.xlu1 %631  ;;  %v824_v49 = vpop.permute.xlu0 %823 }
 0x236   : > { %v640_v48 = vmul.f32 %v632_v11, %v1299_v18  ;;  %v838_v50 = vmul.f32 %v824_v49, %v1280_v63 }
 0x238   : > { %v579_v17 = vpop.permute.xlu2 %578  ;;  %v645_v61 = vsel %vm590_vm15, %v640_v48, 0.0  ;;  %v842_v8 = vsel %vm590_vm15, %v838_v50, 0.0 }
 0x239   : > { %v588_v23 = vmul.f32 %v579_v17, %v1299_v18  ;;  %v646_v9 = vadd.f32 %v645_v61, %v644_v62  ;;  %v558_v17 = vld [vmem:[%s1428_s8 + $0x30] sm:$0xff] }
 0x23a   : > { %v901_v22 = vpack.c.bf16 %v558_v17, %v558_v17 }
 0x23b   : > { %v594_v28 = vsel %vm590_vm15, %v588_v23, 0.0  ;;  %v951_v23 = vpack.c.bf16 %v559_v20, %v559_v20 }
 0x23c   : > { %v595_v37 = vadd.f32 %v594_v28, %v593_v32  ;;  %v906_v27 = vsel %vm604_vm14, %v901_v22, 0 }
 0x23d   : > { %v956_v28 = vsel %vm604_vm14, %v951_v23, 0 }
 0x23e   : > { %v924_v15 = vpop.permute.xlu0 %923 }
 0x23f   : > { %v682_v30 = vpop.permute.xlu1 %681  ;;  %v938_v45 = vmul.f32 %v924_v15, %v1280_v63 }
 0x240   : > { %v584_v33 = vpop.permute.xlu2 %583  ;;  %v690_v54 = vmul.f32 %v682_v30, %v1299_v18 }
 0x241   : > { %v589_v35 = vmul.f32 %v584_v33, %v1306_v26  ;;  %v739_v33 = vmul.f32 %v1277_v60, %v1282_v0  ;;  %v942_v53 = vsel %vm590_vm15, %v938_v45, 0.0  ;;  %v560_v45 = vld [vmem:[%s370_s18] sm:$0xff] }
 0x242   : > { %v695_v2 = vsel %vm590_vm15, %v690_v54, 0.0  ;;  %v944_v62 = vadd.f32 %v943_v58, %v942_v53 }
 0x243   : > { %v596_v29 = vsel %vm590_vm15, %v589_v35, 0.0  ;;  %v696_v11 = vadd.f32 %v695_v2, %v694_v4  ;;  %v740_v35 = vmul.f32 %v1314_v36, %v1299_v18 }
 0x244   : > { %v597_v38 = vadd.f32 %v596_v29, %v595_v37  ;;  %v743_v37 = vsel %vm590_vm15, %v739_v33, 0.0  ;;  %v742_v29 = vsel %vm590_vm15, %v738_v34, 0.0 }
 0x246   : > { %v598_v39 = vmul.f32 0.25, %v597_v38  ;;  %v936_v19 = vpop.permute.xlu0 %935  ;;  %v745_v38 = vsel %vm590_vm15, %v740_v35, 0.0 }
 0x247   : > { %v941_v1 = vmul.f32 %v936_v19, %v1306_v26 }
 0x248   : > { %v1318_v40 = vpop.permute.xlu1 %881  ;;  %v599_v41 = vpack.c.bf16 %v598_v39, %v598_v39  ;;  %v744_v39 = vadd.f32 %v743_v37, %v742_v29 }
 0x249   : > { %v1320_v42 = vpop.permute.xlu2 %931 }
 0x24a   : > { %1051 = vmatmul.msk.bf16.vlgmr.msra.gmra.mxu2 %vm590_vm15, %v599_v41  ;;  %v746_v44 = vadd.f32 %v745_v38, %v744_v39  ;;  %v940_v48 = vmul.f32 %v1320_v42, %v1299_v18 }
 0x24b   : > { %915 = vmatpush.bf16.msra.mxu2 %v906_v27 }
 0x24c   : > { %v945_v59 = vsel %vm590_vm15, %v940_v48, 0.0 }
 0x24f   : > { %v836_v54 = vpop.permute.xlu0 %835 }
 0x250   : > { %v841_v42 = vmul.f32 %v836_v54, %v1306_v26 }
 0x251   : > { %v636_v3 = vpop.permute.xlu1 %635 }
 0x252   : > { %v641_v5 = vmul.f32 %v636_v3, %v1306_v26  ;;  %v686_v6 = vpop.permute.xlu2 %685  ;;  %v946_v3 = vadd.f32 %v945_v59, %v944_v62 }
 0x253   : > { %v691_v10 = vmul.f32 %v686_v6, %v1306_v26 }
 0x254   : > { %v647_v12 = vsel %vm590_vm15, %v641_v5, 0.0  ;;  %v890_v5 = vmul.f32 %v1318_v40, %v1299_v18 }
 0x255   : > { %v648_v13 = vadd.f32 %v647_v12, %v646_v9  ;;  %v697_v14 = vsel %vm590_vm15, %v691_v10, 0.0  ;;  %v847_v9 = vsel %vm590_vm15, %v841_v42, 0.0  ;;  %v947_v10 = vsel %vm590_vm15, %v941_v1, 0.0 }
 0x256   : > { %v698_v16 = vadd.f32 %v697_v14, %v696_v11  ;;  %v948_v12 = vadd.f32 %v947_v10, %v946_v3 }
 0x257   : > { %v649_v21 = vmul.f32 0.25, %v648_v13  ;;  %v895_v13 = vsel %vm590_vm15, %v890_v5, 0.0 }
 0x258   : > { %v699_v24 = vmul.f32 0.25, %v698_v16  ;;  %v896_v20 = vadd.f32 %v895_v13, %v1288_v7 }
 0x259   : > { %v650_v25 = vpack.c.bf16 %v649_v21, %v649_v21  ;;  %v949_v21 = vmul.f32 0.25, %v948_v12 }
 0x25a   : > { %v700_v30 = vpack.c.bf16 %v699_v24, %v699_v24  ;;  %v778_v31 = vpop.permute.xlu1 %777 }
 0x25b   : > { %1052 = vmatmul.msk.bf16.vlgmr.msra.gmra.mxu3 %vm590_vm15, %v650_v25  ;;  %v774_v32 = vpop.permute.xlu2 %773  ;;  %v789_v23 = vmul.f32 %v778_v31, %v1282_v0  ;;  %v950_v27 = vpack.c.bf16 %v949_v21, %v949_v21 }
 0x25c   : > { %1053 = vmatmul.msk.bf16.vlgmr.msrb.gmra.mxu2 %vm590_vm15, %v700_v30  ;;  %965 = vmatpush.bf16.msra.mxu3 %v956_v28  ;;  %v788_v22 = vmul.f32 %v774_v32, %v1280_v63 }
 0x25d   : > { %v793_v33 = vsel %vm590_vm15, %v789_v23, 0.0 }
 0x25e   : > { %v792_v28 = vsel %vm590_vm15, %v788_v22, 0.0 }
 0x25f   : > { %v794_v63 = vadd.f32 %v793_v33, %v792_v28 }
 0x263   : > { %v736_v41 = vpop.permute.xlu1 %735 }
 0x264   : > { %v741_v60 = vmul.f32 %v736_v41, %v1306_v26  ;;  %v828_v43 = vpop.permute.xlu2 %827 }
 0x265   : > { %v839_v36 = vmul.f32 %v828_v43, %v1282_v0 }
 0x266   : > { %v747_v56 = vsel %vm590_vm15, %v741_v60, 0.0 }
 0x267   : > { %v748_v46 = vadd.f32 %v747_v56, %v746_v44  ;;  %v843_v57 = vsel %vm590_vm15, %v839_v36, 0.0 }
 0x268   : > { %v844_v2 = vadd.f32 %v843_v57, %v842_v8 }
 0x269   : > { %v749_v51 = vmul.f32 0.25, %v748_v46 }
 0x26b   : > { %v750_v55 = vpack.c.bf16 %v749_v51, %v749_v51 }
 0x26c   : > { %v782_v52 = vpop.permute.xlu1 %781  ;;  %v832_v61 = vpop.permute.xlu2 %831 }
 0x26d   : > { %v840_v49 = vmul.f32 %v832_v61, %v1299_v18  ;;  %1054 = vmatmul.msk.bf16.vlgmr.msrb.gmra.mxu3 %vm590_vm15, %v750_v55  ;;  %v790_v24 = vmul.f32 %v782_v52, %v1299_v18 }
 0x26f   : > { %v845_v4 = vsel %vm590_vm15, %v840_v49, 0.0  ;;  %v795_v7 = vsel %vm590_vm15, %v790_v24, 0.0 }
 0x270   : > { %v846_v6 = vadd.f32 %v845_v4, %v844_v2  ;;  %v796_v0 = vadd.f32 %v795_v7, %v794_v63 }
 0x272   : > { %v848_v11 = vadd.f32 %v847_v9, %v846_v6 }
 0x274   : > { %v849_v14 = vmul.f32 0.25, %v848_v11 }
 0x275   : > { %v886_v15 = vpop.permute.xlu1 %885 }
 0x276   : > { %v850_v16 = vpack.c.bf16 %v849_v14, %v849_v14  ;;  %v891_v17 = vmul.f32 %v886_v15, %v1306_v26 }
 0x278   : > { %v897_v40 = vsel %vm590_vm15, %v891_v17, 0.0  ;;  %1056 = vmatmul.msk.bf16.vlgmr.msrb.gmra.mxu1 %vm590_vm15, %v850_v16 }
 0x279   : > { %v898_v25 = vadd.f32 %v897_v40, %v896_v20 }
 0x27b   : > { %v899_v30 = vmul.f32 0.25, %v898_v25 }
 0x27d   : > { %v900_v34 = vpack.c.bf16 %v899_v30, %v899_v30  ;;  %1058 = vmatmul.msk.bf16.vlgmr.msra.gmra.mxu3 %vm590_vm15, %v950_v27 }
 0x27e   : > { %v786_v32 = vpop.permute.xlu1 %785 }
 0x27f   : > { %v791_v35 = vmul.f32 %v786_v32, %v1306_v26  ;;  %1057 = vmatmul.msk.bf16.vlgmr.msra.gmra.mxu2 %vm590_vm15, %v900_v34  ;;  %v1113_v26 = vld [vmem:[%s1429_s9] ss:$0 sm:$0xff] }
 0x280   : > { %v565_v46 = vadd.f32 %v1113_v26, %v560_v45 }
 0x281   : > { %v797_v18 = vsel %vm590_vm15, %v791_v35, 0.0 }
 0x282   : > { %v798_v31 = vadd.f32 %v797_v18, %v796_v0 }
 0x284   : > { %v799_v37 = vmul.f32 0.25, %v798_v31 }
 0x286   : > { %v800_v19 = vpack.c.bf16 %v799_v37, %v799_v37 }
 0x288   : > { %1055 = vmatmul.msk.bf16.vlgmr.msrb.gmra.mxu0 %vm590_vm15, %v800_v19 }
 0x2cd   : > { %v617_v29 = vpop.f32.mrf.mxu2 }
 0x2ce   : > { %v621_v47 = vadd.f32 %v617_v29, %v565_v46 }
 0x2d5   : > { %v619_v38 = vpop.f32.mrf.mxu2 }
 0x2de   : > { %v667_v39 = vpop.f32.mrf.mxu3 }
 0x2df   : > { %v717_v41 = vpop.f32.mrf.mxu2  ;;  %v671_v50 = vadd.f32 %v667_v39, %v621_v47 }
 0x2e1   : > { %v721_v53 = vadd.f32 %v717_v41, %v671_v50 }
 0x2e6   : > { %v669_v60 = vpop.f32.mrf.mxu3 }
 0x2e7   : > { %v719_v43 = vpop.f32.mrf.mxu2 }
 0x2f0   : > { %v767_v44 = vpop.f32.mrf.mxu3 }
 0x2f1   : > { %v771_v55 = vadd.f32 %v767_v44, %v721_v53 }
 0x2f5   : > { %v867_v56 = vpop.f32.mrf.mxu1 }
 0x2f8   : > { %v769_v36 = vpop.f32.mrf.mxu3 }
 0x2fd   : > { %v869_v48 = vpop.f32.mrf.mxu1 }
 0x300   : > { %v967_v51 = vpop.f32.mrf.mxu3 }
 0x302   : > { %v917_v54 = vpop.f32.mrf.mxu2 }
 0x305   : > { %v817_v57 = vpop.f32.mrf.mxu0 }
 0x306   : > { %v821_v58 = vadd.f32 %v817_v57, %v771_v55 }
 0x308   : > { %v871_v59 = vadd.f32 %v867_v56, %v821_v58  ;;  %v969_v52 = vpop.f32.mrf.mxu3 }
 0x30a   : > { %v921_v61 = vadd.f32 %v917_v54, %v871_v59  ;;  %v919_v8 = vpop.f32.mrf.mxu2 }
 0x30c   : > { %v971_v62 = vadd.f32 %v967_v51, %v921_v61 }
 0x30d   : > { %v819_v42 = vpop.f32.mrf.mxu0 }
 0x30e   : > { %972 = vst.msk [vmem:[%s374_s22] sm:$0xff] %vm382_vm0, %v971_v62 }
 0x30f PF: > { %s20_s13 = sadd.s32 1, %s1130_s13  }
 0x310   : > { %p17_p4 = scmp.ge.s32.totalorder %s20_s13, 4  }
 0x312   :  { %19 = sbr.rel (!%p17_p4) target bundleno = 1 (0x1), region = 93 }

// kernel: _lambda_.18
= control target key start
LH: loop header
LB: loop body
LE: loop exit
PB: predicated region body
PF: predicated region fallthrough
CT: control target
= control target key end

     0   :  { %s297_s9 = smov 0   ;;  %s328_s0 = inlined_call_operand.vmem [shape: f32[2,4,1], index: 0, kind: input, shape index: {}]   ;;  %s329_s1 = inlined_call_operand.vmem [shape: f32[2,1,4], index: 1, kind: input, shape index: {}]   ;;  %s330_s2 = inlined_call_operand.vmem [shape: f32[2,4,4], index: 2, kind: output, shape index: {}]  }
   0x1 LB: > { %s249_s10 = sadd.s32 4294967295, %s279_s9   ;;  %p253_p0 = scmp.ge.s32.totalorder %s279_s9, 1  ;;  %s279_s9 = sphi %s297_s9, %s12_s9  }
   0x2   : > { %p119_p1 = scmp.lt.s32.totalorder %s279_s9, 3 }
   0x4   : > { %p120_p2 = pnand %p253_p0, %p119_p1 }
   0x5   : > { %p142_p3 = scmp.lt.s32.totalorder (!%p120_p2), %s249_s10, 1 }
   0x6   : > { %123 = sbr.rel (%p120_p2) target bundleno = 183 (0xb7), region = 28 }
   0xb   : > { %v281_v0 = vmov 0   ;;  %s332_s10 = smov (!%p142_p3, %s249_s10), 1  ;;  %vm166_vm0 = vcmask 27648  }
   0xc   : > { %267 = vset.pattern.permute.xlu0 %v281_v0  ;;  %s254_s11 = sshll.u32 %s332_s10, 2  ;;  %s148_s14 = scalar_lea.vmem %s329_s1, %s332_s10 }
   0xd   : > { %s145_s17 = scalar_lea.vmem %s328_s0, %s254_s11  ;;  %v268_v2 = vld [vmem:[%s148_s14] ss:$0 sm:$0xff]  ;;  %s152_s20 = scalar_lea.vmem %s330_s2, %s254_s11 }
   0xe   : > { %v153_v1 = vld [vmem:[%s145_s17] sm:$0xf] }
   0xf   : > { %157 = vperm.xlu0 %267, %v153_v1  }
  0x81   : > { %v158_v3 = vpop.permute.xlu0 %157 }
  0x82   : > { %v163_v4 = vsub.f32 %v158_v3, %v268_v2 }
  0x84   : > { %v164_v5 = vand.u32 2147483647, %v163_v4 }
  0x86   : > { %v165_v6 = vsub.f32 0.0, %v164_v5 }
  0x88   : > { %v167_v7 = vsel %vm166_vm0, %v165_v6, -inf }
  0x89   : > { %v168_v8 = vrot.slane %v167_v7, 4 }
  0x8b   : > { %v169_v9 = vmax.f32 %v167_v7, %v168_v8 }
  0x8d   : > { %v170_v10 = vrot.slane %v169_v9, 2 }
  0x8f   : > { %v171_v11 = vmax.f32 %v169_v9, %v170_v10 }
  0x91   : > { %v172_v12 = vrot.slane %v171_v11, 1 }
  0x93   : > { %v173_v13 = vmax.f32 %v171_v11, %v172_v12 }
  0x95   : > { %v174_v14 = vsub.f32 %v165_v6, %v173_v13 }
  0x97   : > { %v175_v15 = vmul.f32 1.442695, %v174_v14 }
  0x99   : > { %269 = vpow2.f32 %v175_v15 }
  0x9f   : > { %v270_v16 = vpop.eup %269 }
  0xa0   : > { %v177_v17 = vsel %vm166_vm0, %v270_v16, 0.0 }
  0xa1   : > { %v178_v18 = vrot.slane %v177_v17, 4 }
  0xa3   : > { %v179_v19 = vadd.f32 %v178_v18, %v177_v17 }
  0xa5   : > { %v180_v20 = vrot.slane %v179_v19, 2 }
  0xa7   : > { %v181_v21 = vadd.f32 %v180_v20, %v179_v19 }
  0xa9   : > { %v182_v22 = vrot.slane %v181_v21, 1 }
  0xab   : > { %v183_v23 = vadd.f32 %v182_v22, %v181_v21 }
  0xad   : > { %271 = vrcp.f32 %v183_v23 }
  0xb3   : > { %v272_v24 = vpop.eup %271 }
  0xb4   : > { %v185_v25 = vmul.f32 %v272_v24, %v270_v16 }
  0xb6   : > { %186 = vst.msk [vmem:[%s152_s20] sm:$0xf] %vm166_vm0, %v185_v25 }
  0xb7 PF: > { %s12_s9 = sadd.s32 1, %s279_s9  }
  0xb8   : > { %p9_p4 = scmp.ge.s32.totalorder %s12_s9, 4  }
  0xba   :  { %11 = sbr.rel (!%p9_p4) target bundleno = 1 (0x1), region = 61 }

// kernel: _lambda_.15
= control target key start
LH: loop header
LB: loop body
LE: loop exit
PB: predicated region body
PF: predicated region fallthrough
CT: control target
= control target key end

     0   :  { %vm31_vm0 = vcmask 130048   ;;  %v196_v4 = vmov 16.0   ;;  %vm153_vm8 = vcmask 523264   ;;  %s308_s0 = inlined_call_operand.vmem [shape: f32[16,16], index: 0, kind: input, shape index: {}]   ;;  %s309_s1 = inlined_call_operand.vmem [shape: f32[1,16], index: 1, kind: input, shape index: {}]   ;;  %s310_s2 = inlined_call_operand.vmem [shape: f32[1,16], index: 2, kind: input, shape index: {}]   ;;  %s311_s4 = inlined_call_operand.vmem [shape: f32[1,64], index: 4, kind: input, shape index: {}]   ;;  %s312_s3 = inlined_call_operand.vmem [shape: f32[16,64], index: 3, kind: input, shape index: {}]   ;;  %s313_s6 = inlined_call_operand.vmem [shape: f32[1,16], index: 6, kind: input, shape index: {}]   ;;  %s314_s5 = inlined_call_operand.vmem [shape: f32[64,16], index: 5, kind: input, shape index: {}]   ;;  %s315_s7 = inlined_call_operand.vmem [shape: f32[16,16], index: 7, kind: output, shape index: {}]  }
   0x1   :  { %v240_v0 = vld [vmem:[%s308_s0] sm:$0xff]  ;;  %v247_v2 = vld [vmem:[%s308_s0 + $0x8] sm:$0xff]  ;;  %186 = vrcp.f32 %v196_v4  ;;  %v142_v53 = vld [vmem:[%s314_s5 + $0x30] sm:$0xff] }
   0x2   :  { %v32_v1 = vsel %vm31_vm0, %v240_v0, 0.0  ;;  %v35_v3 = vsel %vm31_vm0, %v247_v2, 0.0  ;;  %v93_v21 = vld [vmem:[%s312_s3] sm:$0xff]  ;;  %v94_v22 = vld [vmem:[%s312_s3 + $0x8] sm:$0xff]  ;;  %v143_v54 = vld [vmem:[%s314_s5 + $0x38] sm:$0xff] }
   0x3   :  { %33 = vadd.xlane.f32.xlu0 %v32_v1  ;;  %v96_v24 = vpack.c.bf16 %v94_v22, %v93_v21  ;;  %v182_v43 = vld [vmem:[%s309_s1] ss:$0 sm:$0xff]  ;;  %v148_v55 = vpack.c.bf16 %v143_v54, %v142_v53  ;;  %v141_v57 = vld [vmem:[%s314_s5 + $0x28] sm:$0xff]  ;;  %v138_v59 = vld [vmem:[%s314_s5 + $0x10] sm:$0xff] }
   0x4   :  { %v183_v48 = vld [vmem:[%s310_s2] ss:$0 sm:$0xff]  ;;  %v139_v60 = vld [vmem:[%s314_s5 + $0x18] sm:$0xff]  ;;  %v137_v63 = vld [vmem:[%s314_s5 + $0x8] sm:$0xff] }
   0x5   :  { %111 = vmatpush.bf16.msra.mxu0 %v96_v24  ;;  %161 = vmatpush.bf16.msra.mxu1 %v148_v55  ;;  %v140_v56 = vld [vmem:[%s314_s5 + $0x20] sm:$0xff]  ;;  %v146_v61 = vpack.c.bf16 %v139_v60, %v138_v59 }
   0x6   :  { %v147_v58 = vpack.c.bf16 %v141_v57, %v140_v56  ;;  %v136_v62 = vld [vmem:[%s314_s5] sm:$0xff] }
   0x7   :  { %v187_v5 = vpop.eup %186  ;;  %v184_v1 = vld [vmem:[%s311_s4] ss:$0 sm:$0xff] }
   0x8   :  { %v39_v6 = vmul.f32 16.0, %v187_v5  ;;  %vm43_vm1 = vweird.f32 %v187_v5 }
   0x9   :  { %162 = vmatpush.bf16.msra.mxu1 %v147_v58 }
   0xa   :  { %v40_v7 = vsub.f32 1.0, %v39_v6 }
   0xb   :  { %36 = vadd.xlane.f32.xlu0 %v35_v3  ;;  %v145_v3 = vpack.c.bf16 %v137_v63, %v136_v62 }
   0xc   :  { %v41_v8 = vmul.f32 %v187_v5, %v40_v7 }
   0xd   :  { %163 = vmatpush.bf16.msra.mxu1 %v146_v61 }
   0xe   :  { %v42_v9 = vadd.f32 %v187_v5, %v41_v8 }
  0x10   :  { %v44_v10 = vsel %vm43_vm1, %v187_v5, %v42_v9 }
  0x11   :  { %164 = vmatpush.bf16.msra.mxu1 %v145_v3 }
  0x76   :  { %v34_v11 = vpop.xlane.xlu0 %33 }
  0x77   :  { %v45_v12 = vmul.f32 %v44_v10, %v34_v11 }
  0x79   :  { %v47_v13 = vsub.f32 %v240_v0, %v45_v12 }
  0x7b   :  { %v49_v14 = vmul.f32 %v47_v13, %v47_v13 }
  0x7d   :  { %v51_v15 = vsel %vm31_vm0, %v49_v14, 0.0 }
  0x7e   :  { %52 = vadd.xlane.f32.xlu1 %v51_v15  ;;  %v37_v16 = vpop.xlane.xlu0 %36 }
  0x7f   :  { %v46_v17 = vmul.f32 %v44_v10, %v37_v16 }
  0x81   :  { %v48_v18 = vsub.f32 %v247_v2, %v46_v17 }
  0x83   :  { %v50_v19 = vmul.f32 %v48_v18, %v48_v18 }
  0x85   :  { %v54_v20 = vsel %vm31_vm0, %v50_v19, 0.0 }
  0x86   :  { %55 = vadd.xlane.f32.xlu1 %v54_v20 }
  0xf1   :  { %v53_v23 = vpop.xlane.xlu1 %52 }
  0xf2   :  { %v57_v25 = vmul.f32 %v53_v23, %v44_v10 }
  0xf4   :  { %v59_v26 = vadd.f32 1e-05, %v57_v25 }
  0xf6   :  { %188 = vrsqrt.f32 %v59_v26  ;;  %vm67_vm3 = vweird.f32 %v59_v26 }
  0xf9   :  { %v56_v27 = vpop.xlane.xlu1 %55 }
  0xfa   :  { %v58_v28 = vmul.f32 %v56_v27, %v44_v10  ;;  %v185_v27 = vld [vmem:[%s313_s6] ss:$0 sm:$0xff] }
  0xfc   :  { %v189_v29 = vpop.eup %188  ;;  %v60_v30 = vadd.f32 1e-05, %v58_v28 }
  0xfd   :  { %v62_v31 = vmul.f32 %v189_v29, %v59_v26  ;;  %vm68_vm2 = vweird.f32 %v189_v29 }
  0xfe   :  { %190 = vrsqrt.f32 %v60_v30  ;;  %vm69_vm4 = vmor %vm67_vm3, %vm68_vm2  ;;  %vm77_vm6 = vweird.f32 %v60_v30 }
  0xff   :  { %v63_v32 = vmul.f32 %v189_v29, %v62_v31 }
 0x101   :  { %v64_v33 = vmul.f32 0.5, %v63_v32 }
 0x103   :  { %v65_v34 = vsub.f32 1.5, %v64_v33 }
 0x104   :  { %v191_v35 = vpop.eup %190 }
 0x105   :  { %v66_v36 = vmul.f32 %v189_v29, %v65_v34  ;;  %v72_v37 = vmul.f32 %v191_v35, %v60_v30  ;;  %vm78_vm5 = vweird.f32 %v191_v35 }
 0x106   :  { %vm79_vm7 = vmor %vm77_vm6, %vm78_vm5 }
 0x107   :  { %v73_v38 = vmul.f32 %v191_v35, %v72_v37  ;;  %v70_v39 = vsel %vm69_vm4, %v189_v29, %v66_v36 }
 0x108   :  { %v81_v42 = vmul.f32 %v70_v39, %v47_v13 }
 0x109   :  { %v74_v40 = vmul.f32 0.5, %v73_v38 }
 0x10a   :  { %v86_v47 = vmul.f32 %v182_v43, %v81_v42 }
 0x10b   :  { %v75_v41 = vsub.f32 1.5, %v74_v40 }
 0x10c   :  { %v91_v50 = vadd.f32 %v183_v48, %v86_v47 }
 0x10d   :  { %v76_v44 = vmul.f32 %v191_v35, %v75_v41 }
 0x10f   :  { %v80_v45 = vsel %vm79_vm7, %v191_v35, %v76_v44 }
 0x110   :  { %v82_v46 = vmul.f32 %v80_v45, %v48_v18 }
 0x112   :  { %v87_v49 = vmul.f32 %v182_v43, %v82_v46 }
 0x114   :  { %v92_v51 = vadd.f32 %v183_v48, %v87_v49 }
 0x116   :  { %v95_v52 = vpack.c.bf16 %v92_v51, %v91_v50 }
 0x118   :  { %179 = vmatmul.msk.bf16.vlgmr.msra.gmra.mxu0 %vm31_vm0, %v95_v52 }
 0x195   :  { %v113_v4 = vpop.f32.mrf.mxu0 }
 0x196   :  { %v114_v5 = vadd.f32 %v184_v1, %v113_v4 }
 0x198   :  { %v118_v6 = vmul.f32 %v114_v5, %v114_v5 }
 0x19a   :  { %v120_v7 = vmul.f32 %v118_v6, %v114_v5 }
 0x19c   :  { %v122_v8 = vmul.f32 0.044715, %v120_v7 }
 0x19d   :  { %v115_v9 = vpop.f32.mrf.mxu0 }
 0x19e   :  { %v124_v10 = vadd.f32 %v122_v8, %v114_v5  ;;  %v116_v11 = vadd.f32 %v184_v1, %v115_v9 }
 0x1a0   :  { %v126_v12 = vmul.f32 0.7978846, %v124_v10  ;;  %v119_v13 = vmul.f32 %v116_v11, %v116_v11 }
 0x1a2   :  { %v121_v14 = vmul.f32 %v119_v13, %v116_v11  ;;  %192 = vtanh.f32 %v126_v12 }
 0x1a4   :  { %v123_v15 = vmul.f32 0.044715, %v121_v14 }
 0x1a6   :  { %v125_v16 = vadd.f32 %v123_v15, %v116_v11 }
 0x1a8   :  { %v127_v17 = vmul.f32 0.7978846, %v125_v16  ;;  %v193_v18 = vpop.eup %192 }
 0x1a9   :  { %v130_v19 = vadd.f32 1.0, %v193_v18 }
 0x1aa   :  { %194 = vtanh.f32 %v127_v17 }
 0x1ab   :  { %v132_v22 = vmul.f32 0.5, %v130_v19 }
 0x1ad   :  { %v134_v24 = vmul.f32 %v132_v22, %v114_v5 }
 0x1b0   :  { %v195_v20 = vpop.eup %194 }
 0x1b1   :  { %v131_v21 = vadd.f32 1.0, %v195_v20 }
 0x1b3   :  { %v133_v23 = vmul.f32 0.5, %v131_v21 }
 0x1b5   :  { %v135_v25 = vmul.f32 %v133_v23, %v116_v11 }
 0x1b7   :  { %v144_v26 = vpack.c.bf16 %v135_v25, %v134_v24 }
 0x1b9   :  { %180 = vmatmul.msk.bf16.vlgmr.msra.gmra.mxu1 %vm153_vm8, %v144_v26 }
 0x236   :  { %v166_v28 = vpop.f32.mrf.mxu1 }
 0x237   :  { %v167_v29 = vadd.f32 %v185_v27, %v166_v28 }
 0x239   :  { %v171_v30 = vadd.f32 %v167_v29, %v240_v0 }
 0x23b   :  { %173 = vst.msk [vmem:[%s315_s7] sm:$0xff] %vm31_vm0, %v171_v30 }
 0x23e   :  { %v168_v31 = vpop.f32.mrf.mxu1 }
 0x23f   :  { %v169_v32 = vadd.f32 %v185_v27, %v168_v31 }
 0x241   :  { %v172_v33 = vadd.f32 %v169_v32, %v247_v2 }
 0x243   :  { %174 = vst.msk [vmem:[%s315_s7 + $0x8] sm:$0xff] %vm31_vm0, %v172_v33 }

// kernel: _lambda_.16
= control target key start
LH: loop header
LB: loop body
LE: loop exit
PB: predicated region body
PF: predicated region fallthrough
CT: control target
= control target key end

     0   :  { %12 = vsyncpa [#allocation3], 0  ;;  %s270_s0 = inlined_call_operand.vmem [shape: f32[16,16], index: 0, kind: input, shape index: {}]   ;;  %s271_s1 = inlined_call_operand.vmem [shape: f32[16,16], index: 1, kind: input, shape index: {}]   ;;  %s272_s2 = inlined_call_operand.vmem [shape: f32[16,32], index: 2, kind: input, shape index: {}]   ;;  %s273_s3 = inlined_call_operand.vmem [shape: f32[1,32], index: 3, kind: input, shape index: {}]   ;;  %s274_s4 = inlined_call_operand.vmem [shape: f32[16,16], index: 4, kind: output, shape index: {0}]   ;;  %s275_s5 = inlined_call_operand.hbm [shape: f32[16,16], index: 5, kind: output, shape index: {1}]   ;;  %s276_s6 = inlined_call_operand.hbm [shape: f32[16,16], index: 6, kind: output, shape index: {2}]  }
   0x1   :  { %v27_v0 = vld [vmem:[%s272_s2] sm:$0xff]  ;;  %v28_v1 = vld [vmem:[%s272_s2 + $0x8] sm:$0xff] }
   0x2   :  { %v23_v2 = vld [vmem:[%s270_s0] sm:$0xff]  ;;  %v30_v3 = vpack.c.bf16 %v28_v1, %v27_v0  ;;  %v24_v4 = vld [vmem:[%s270_s0 + $0x8] sm:$0xff] }
   0x3   :  { %v25_v5 = vmax.f32 %v23_v2, 0.0  ;;  %v26_v6 = vmax.f32 %v24_v4, 0.0 }
   0x4   :  { %13 = vsyncpa [#allocation5], 0  ;;  %46 = vmatpush.bf16.msra.mxu0 %v30_v3  ;;  %vm35_vm0 = vcmask 130048   ;;  %v133_v8 = vld [vmem:[%s273_s3] ss:$0 sm:$0xff]  ;;  %s190_s2 = smov 112  }
   0x5   :  { %v29_v7 = vpack.c.bf16 %v26_v6, %v25_v5  ;;  %s191_s0 = smov [#allocation2]   ;;  %s95_s3 = sshll.u32 %s275_s5, 4  ;;  %v65_v21 = vld [vmem:[%s271_s1] sm:$0xff]  ;;  %v66_v25 = vld [vmem:[%s271_s1 + $0x8] sm:$0xff]  ;;  %s96_s3 = int_to_ptr.hbm [resolvable:$true] %s95_s3 }
   0x6   :  { %s93_s7 = sshll.u32 %s191_s0, 4  ;;  %s192_s10 = smov 128   ;;  %s94_s7 = int_to_ptr.vmem [resolvable:$true] %s93_s7 }
   0x7   :  { %127 = vmatmul.msk.bf16.vlgmr.msra.gmra.mxu0 %vm35_vm0, %v29_v7  ;;  %s193_s11 = smov 8   ;;  %s194_s12 = smov [#allocation4]  }
   0x8   :  { %s106_s13 = sshll.u32 %s194_s12, 4  ;;  %s108_s5 = sshll.u32 %s276_s6, 4  ;;  %s107_s13 = int_to_ptr.vmem [resolvable:$true] %s106_s13  ;;  %s109_s5 = int_to_ptr.hbm [resolvable:$true] %s108_s5 }
  0x84   :  { %v48_v9 = vpop.f32.mrf.mxu0 }
  0x85   :  { %v49_v10 = vadd.f32 %v133_v8, %v48_v9 }
  0x87   :  { %53 = vst.msk [vmem:[#allocation2] sm:$0xff] %vm35_vm0, %v49_v10  ;;  %57 = vrot.lane.b32.xlu1 %v49_v10, %s190_s2  ;;  %v67_v11 = vmul.f32 0.5, %v49_v10 }
  0x89   :  { %v69_v12 = vmul.f32 1.442695, %v67_v11 }
  0x8b   :  { %134 = vpow2.f32 %v69_v12 }
  0x8c   :  { %v50_v13 = vpop.f32.mrf.mxu0 }
  0x8d   :  { %v51_v14 = vadd.f32 %v133_v8, %v50_v13 }
  0x8f   :  { %v68_v15 = vmul.f32 0.5, %v51_v14  ;;  %54 = vst.msk [vmem:[#allocation2 + $0x8] sm:$0xff] %vm35_vm0, %v51_v14  ;;  %59 = vrot.lane.b32.xlu1 %v51_v14, %s190_s2 }
  0x90   :  { %101 = dma.vmem_to_hbm [thread:$0]  %s94_s7, 256, %s96_s3, [#allocation3], %s192_s10, %s192_s10, %s193_s11  }
  0x91   :  { %v135_v16 = vpop.eup %134  ;;  %v71_v17 = vmul.f32 1.442695, %v68_v15 }
  0x92   :  { %75 = vrot.lane.b32.xlu0 %v135_v16, %s190_s2 }
  0x93   :  { %136 = vpow2.f32 %v71_v17 }
  0x99   :  { %v137_v18 = vpop.eup %136 }
  0x9a   :  { %77 = vrot.lane.b32.xlu0 %v137_v18, %s190_s2 }
  0xf9   :  { %v58_v19 = vpop.permute.xlu1 %57 }
  0xfa   :  { %63 = vst.msk [vmem:[#allocation4] sm:$0xff] %vm35_vm0, %v58_v19 }
 0x101   :  { %v60_v20 = vpop.permute.xlu1 %59 }
 0x102   :  { %64 = vst.msk [vmem:[#allocation4 + $0x8] sm:$0xff] %vm35_vm0, %v60_v20 }
 0x103   :  { %114 = dma.vmem_to_hbm [thread:$0]  %s107_s13, 256, %s109_s5, [#allocation5], %s192_s10, %s192_s10, %s193_s11  }
 0x104   :  { %v76_v22 = vpop.permute.xlu0 %75 }
 0x105   :  { %v81_v23 = vmul.f32 %v76_v22, %v65_v21 }
 0x107   :  { %v83_v24 = vadd.f32 %v81_v23, %v49_v10 }
 0x109   :  { %85 = vst.msk [vmem:[%s274_s4] sm:$0xff] %vm35_vm0, %v83_v24 }
 0x10c   :  { %v78_v26 = vpop.permute.xlu0 %77 }
 0x10d   :  { %v82_v27 = vmul.f32 %v78_v26, %v66_v25 }
 0x10f   :  { %v84_v28 = vadd.f32 %v82_v27, %v51_v14 }
 0x111   :  { %86 = vst.msk [vmem:[%s274_s4 + $0x8] sm:$0xff] %vm35_vm0, %v84_v28 }
 0x112   :  { %186 = dma.done.wait [#allocation3], 256  }
 0x113   :  { %187 = vsyncadd [#allocation3], 4294967040 }
 0x114   :  { %188 = dma.done.wait [#allocation5], 256  }
 0x115   :  { %189 = vsyncadd [#allocation5], 4294967040 }
 0x116   :  { %125 = vsyncpa [#allocation3], 1 }
 0x117   :  { %126 = vsyncpa [#allocation5], 1 }

// kernel: _lambda_.19
= control target key start
LH: loop header
LB: loop body
LE: loop exit
PB: predicated region body
PF: predicated region fallthrough
CT: control target
= control target key end

     0   :  { %s713_s27 = smov 0   ;;  %s810_s0 = inlined_call_operand.vmem [shape: f32[2,8,16], index: 0, kind: input, shape index: {}]   ;;  %s811_s1 = inlined_call_operand.vmem [shape: f32[2,4,4], index: 1, kind: input, shape index: {}]   ;;  %s812_s2 = inlined_call_operand.vmem [shape: f32[4,8], index: 2, kind: input, shape index: {}]   ;;  %s813_s3 = inlined_call_operand.vmem [shape: f32[16,16], index: 3, kind: input, shape index: {}]   ;;  %s814_s4 = inlined_call_operand.vmem [shape: f32[8,16], index: 4, kind: input, shape index: {}]   ;;  %s815_s5 = inlined_call_operand.vmem [shape: f32[1,16], index: 5, kind: input, shape index: {}]   ;;  %s816_s6 = inlined_call_operand.vmem [shape: f32[1,16], index: 6, kind: input, shape index: {}]   ;;  %s817_s7 = inlined_call_operand.vmem [shape: f32[1,16], index: 7, kind: input, shape index: {}]   ;;  %s818_s8 = inlined_call_operand.vmem [shape: f32[2,4,8,16], index: 8, kind: output, shape index: {}]  }
   0x1 LB: > { %s613_s28 = sadd.s32 4294967295, %s665_s27   ;;  %p617_p0 = scmp.ge.s32.totalorder %s665_s27, 1  ;;  %s665_s27 = sphi %s713_s27, %s18_s27  }
   0x2   : > { %p270_p1 = scmp.lt.s32.totalorder %s665_s27, 3 }
   0x4   : > { %p271_p2 = pnand %p617_p0, %p270_p1 }
   0x5   : > { %p307_p3 = scmp.lt.s32.totalorder (!%p271_p2), %s613_s28, 1 }
   0x6   : > { %274 = sbr.rel (%p271_p2) target bundleno = 560 (0x230), region = 52 }
   0xb   : > { %v323_v0 = vld [vmem:[%s812_s2] sm:$0xf]  ;;  %vm330_vm0 = vcmask 1041408   ;;  %v348_v3 = vld [vmem:[%s813_s3 + $0x8] sm:$0xff]  ;;  %s820_s28 = smov (!%p307_p3, %s613_s28), 1  ;;  %vm326_vm1 = vcmask 31744  }
   0xc   : > { %v347_v1 = vld [vmem:[%s813_s3] sm:$0xff]  ;;  %v325_v2 = vpack.c.bf16 %v323_v0, %v323_v0  ;;  %s619_s13 = sshll.u32 %s820_s28, 2  ;;  %s618_s17 = sshll.u32 %s820_s28, 3  ;;  %vm379_vm2 = vcmask 1043456   ;;  %vm355_vm3 = vcmask 130048   ;;  %vm375_vm4 = vcmask 64512  }
   0xd   : > { %v350_v4 = vpack.c.bf16 %v348_v3, %v347_v1  ;;  %s314_s16 = scalar_lea.vmem %s811_s1, %s619_s13  ;;  %s310_s20 = scalar_lea.vmem %s810_s0, %s618_s17  ;;  %v372_v8 = vld [vmem:[%s814_s4] sm:$0xff]  ;;  %v667_v34 = vmov 16.0  }
   0xe   : > { %v332_v5 = vsel %vm330_vm0, %v325_v2, 0  ;;  %v322_v6 = vld [vmem:[%s314_s16] sm:$0xf]  ;;  %v374_v9 = vpack.c.bf16 %v372_v8, %v372_v8  ;;  %649 = vrcp.f32 %v667_v34  ;;  %s630_s9 = sshll.u32 %s820_s28, 5 }
   0xf   : > { %341 = vmatpush.bf16.msra.mxu0 %v332_v5  ;;  %366 = vmatpush.bf16.msra.mxu1 %v350_v4  ;;  %v324_v7 = vpack.c.bf16 %v322_v6, %v322_v6  ;;  %v321_v10 = vld [vmem:[%s310_s20] sm:$0xff]  ;;  %s319_s28 = scalar_lea.vmem %s818_s8, %s630_s9 }
  0x10   : > { %v381_v11 = vsel %vm379_vm2, %v374_v9, 0  ;;  %v349_v12 = vpack.c.bf16 %v321_v10, %v321_v10  ;;  %v640_v18 = vld [vmem:[%s815_s5] ss:$0 sm:$0xff] }
  0x11   : > { %390 = vmatpush.bf16.msra.mxu2 %v381_v11 }
  0x12   : > { %622 = vmatmul.msk.bf16.vlgmr.msra.gmra.mxu0 %vm326_vm1, %v324_v7  ;;  %623 = vmatmul.msk.bf16.vlgmr.msra.gmra.mxu1 %vm355_vm3, %v349_v12 }
  0x14   : > { %v650_v35 = vpop.eup %649 }
  0x15   : > { %v404_v36 = vmul.f32 16.0, %v650_v35  ;;  %vm408_vm5 = vweird.f32 %v650_v35 }
  0x17   : > { %v405_v37 = vsub.f32 1.0, %v404_v36 }
  0x19   : > { %v406_v38 = vmul.f32 %v650_v35, %v405_v37 }
  0x1b   : > { %v407_v39 = vadd.f32 %v650_v35, %v406_v38 }
  0x1d   : > { %v409_v40 = vsel %vm408_vm5, %v650_v35, %v407_v39 }
  0x8f   : > { %v343_v13 = vpop.f32.mrf.mxu0  ;;  %v368_v16 = vpop.f32.mrf.mxu1 }
  0x90   : > { %v373_v14 = vpack.c.bf16 %v343_v13, %v343_v13  ;;  %v369_v19 = vadd.f32 %v640_v18, %v368_v16 }
  0x92   : > { %624 = vmatmul.msk.bf16.vlgmr.msra.gmra.mxu2 %vm375_vm4, %v373_v14 }
  0x97   : > { %v345_v15 = vpop.f32.mrf.mxu0  ;;  %v370_v17 = vpop.f32.mrf.mxu1 }
 0x115   : > { %v392_v20 = vpop.f32.mrf.mxu2 }
 0x116   : > { %v474_v21 = vperm.slane %v392_v20, 2  ;;  %v396_v22 = vperm.slane %v392_v20, 0  ;;  %v510_v27 = vperm.slane %v392_v20, 3  ;;  %v438_v28 = vperm.slane %v392_v20, 1 }
 0x118   : > { %v475_v23 = vadd.f32 %v474_v21, %v369_v19  ;;  %v397_v24 = vadd.f32 %v396_v22, %v369_v19  ;;  %v511_v30 = vadd.f32 %v510_v27, %v369_v19  ;;  %v439_v31 = vadd.f32 %v438_v28, %v369_v19  ;;  %v643_v27 = vld [vmem:[%s816_s6] ss:$0 sm:$0xff] }
 0x11a   : > { %v478_v25 = vsel %vm355_vm3, %v475_v23, 0.0  ;;  %v400_v26 = vsel %vm355_vm3, %v397_v24, 0.0  ;;  %v514_v32 = vsel %vm355_vm3, %v511_v30, 0.0  ;;  %v442_v33 = vsel %vm355_vm3, %v439_v31, 0.0 }
 0x11b   : > { %479 = vadd.xlane.f32.xlu1 %v478_v25  ;;  %401 = vadd.xlane.f32.xlu0 %v400_v26 }
 0x11d   : > { %v394_v29 = vpop.f32.mrf.mxu2 }
 0x11e   : > { %v642_v29 = vld [vmem:[%s817_s7] ss:$0 sm:$0xff] }
 0x123   : > { %515 = vadd.xlane.f32.xlu1 %v514_v32  ;;  %443 = vadd.xlane.f32.xlu0 %v442_v33  ;;  %v644_v33 = vld [vmem:[%s817_s7] ss:$0 sm:$0xff] }
 0x18e   : > { %v480_v41 = vpop.xlane.xlu1 %479  ;;  %v402_v42 = vpop.xlane.xlu0 %401 }
 0x18f   : > { %v481_v43 = vmul.f32 %v480_v41, %v409_v40  ;;  %v410_v44 = vmul.f32 %v409_v40, %v402_v42 }
 0x191   : > { %v751_v45 = vsub.f32 %v475_v23, %v481_v43  ;;  %v753_v46 = vsub.f32 %v397_v24, %v410_v44  ;;  %v641_v23 = vld [vmem:[%s816_s6] ss:$0 sm:$0xff] }
 0x192   : > { %v645_v44 = vld [vmem:[%s816_s6] ss:$0 sm:$0xff] }
 0x193   : > { %v483_v47 = vmul.f32 %v751_v45, %v751_v45  ;;  %v412_v48 = vmul.f32 %v753_v46, %v753_v46 }
 0x195   : > { %v484_v49 = vsel %vm355_vm3, %v483_v47, 0.0  ;;  %v413_v50 = vsel %vm355_vm3, %v412_v48, 0.0  ;;  %v647_v47 = vld [vmem:[%s816_s6] ss:$0 sm:$0xff] }
 0x196   : > { %v516_v51 = vpop.xlane.xlu1 %515  ;;  %485 = vadd.xlane.f32.xlu0 %v484_v49  ;;  %414 = vadd.xlane.f32.xlu2 %v413_v50  ;;  %v444_v52 = vpop.xlane.xlu0 %443  ;;  %v646_v48 = vld [vmem:[%s817_s7] ss:$0 sm:$0xff] }
 0x197   : > { %v517_v53 = vmul.f32 %v516_v51, %v409_v40  ;;  %v445_v54 = vmul.f32 %v444_v52, %v409_v40  ;;  %v648_v51 = vld [vmem:[%s817_s7] ss:$0 sm:$0xff] }
 0x199   : > { %v761_v55 = vsub.f32 %v511_v30, %v517_v53  ;;  %v763_v56 = vsub.f32 %v439_v31, %v445_v54 }
 0x19b   : > { %v519_v57 = vmul.f32 %v761_v55, %v761_v55  ;;  %v447_v58 = vmul.f32 %v763_v56, %v763_v56 }
 0x19d   : > { %v520_v59 = vsel %vm355_vm3, %v519_v57, 0.0  ;;  %v448_v60 = vsel %vm355_vm3, %v447_v58, 0.0 }
 0x19e   : > { %521 = vadd.xlane.f32.xlu1 %v520_v59  ;;  %449 = vadd.xlane.f32.xlu2 %v448_v60 }
 0x209   : > { %v415_v61 = vpop.xlane.xlu2 %414  ;;  %v486_v62 = vpop.xlane.xlu0 %485 }
 0x20a   : > { %v416_v63 = vmul.f32 %v415_v61, %v409_v40  ;;  %v487_v0 = vmul.f32 %v486_v62, %v409_v40 }
 0x20c   : > { %v417_v1 = vadd.f32 1e-05, %v416_v63  ;;  %v488_v2 = vadd.f32 1e-05, %v487_v0 }
 0x20e   : > { %651 = vrsqrt.f32 %v417_v1  ;;  %vm424_vm8 = vweird.f32 %v417_v1  ;;  %vm495_vm10 = vweird.f32 %v488_v2 }
 0x20f   : > { %653 = vrsqrt.f32 %v488_v2 }
 0x211   : > { %v522_v3 = vpop.xlane.xlu1 %521  ;;  %v450_v4 = vpop.xlane.xlu2 %449 }
 0x212   : > { %v523_v5 = vmul.f32 %v522_v3, %v409_v40  ;;  %v451_v6 = vmul.f32 %v450_v4, %v409_v40 }
 0x214   : > { %v652_v7 = vpop.eup %651  ;;  %v524_v8 = vadd.f32 1e-05, %v523_v5  ;;  %v452_v9 = vadd.f32 1e-05, %v451_v6 }
 0x215   : > { %v654_v10 = vpop.eup %653  ;;  %v419_v11 = vmul.f32 %v652_v7, %v417_v1  ;;  %vm425_vm6 = vweird.f32 %v652_v7 }
 0x216   : > { %v490_v12 = vmul.f32 %v654_v10, %v488_v2  ;;  %655 = vrsqrt.f32 %v524_v8  ;;  %vm496_vm7 = vweird.f32 %v654_v10  ;;  %vm426_vm9 = vmor %vm424_vm8, %vm425_vm6  ;;  %vm531_vm14 = vweird.f32 %v524_v8 }
 0x217   : > { %v420_v13 = vmul.f32 %v652_v7, %v419_v11  ;;  %657 = vrsqrt.f32 %v452_v9  ;;  %vm497_vm11 = vmor %vm495_vm10, %vm496_vm7  ;;  %vm459_vm0 = vweird.f32 %v452_v9 }
 0x218   : > { %v491_v14 = vmul.f32 %v654_v10, %v490_v12 }
 0x219   : > { %v421_v15 = vmul.f32 0.5, %v420_v13 }
 0x21a   : > { %v492_v16 = vmul.f32 0.5, %v491_v14 }
 0x21b   : > { %v422_v17 = vsub.f32 1.5, %v421_v15 }
 0x21c   : > { %v656_v18 = vpop.eup %655  ;;  %v493_v19 = vsub.f32 1.5, %v492_v16 }
 0x21d   : > { %v658_v20 = vpop.eup %657  ;;  %v423_v21 = vmul.f32 %v652_v7, %v422_v17  ;;  %v526_v22 = vmul.f32 %v656_v18, %v524_v8  ;;  %vm532_vm12 = vweird.f32 %v656_v18 }
 0x21e   : > { %v494_v24 = vmul.f32 %v654_v10, %v493_v19  ;;  %v454_v25 = vmul.f32 %v658_v20, %v452_v9  ;;  %vm460_vm13 = vweird.f32 %v658_v20  ;;  %vm533_vm15 = vmor %vm531_vm14, %vm532_vm12 }
 0x21f   : > { %v427_v26 = vsel %vm426_vm9, %v652_v7, %v423_v21  ;;  %v527_v28 = vmul.f32 %v656_v18, %v526_v22  ;;  %vm461_vm1 = vmor %vm459_vm0, %vm460_vm13 }
 0x220   : > { %v428_v30 = vmul.f32 %v427_v26, %v753_v46  ;;  %v498_v31 = vsel %vm497_vm11, %v654_v10, %v494_v24  ;;  %v455_v32 = vmul.f32 %v658_v20, %v454_v25 }
 0x221   : > { %v499_v34 = vmul.f32 %v498_v31, %v751_v45  ;;  %v528_v35 = vmul.f32 0.5, %v527_v28 }
 0x222   : > { %v432_v36 = vmul.f32 %v641_v23, %v428_v30  ;;  %v456_v37 = vmul.f32 0.5, %v455_v32 }
 0x223   : > { %v503_v38 = vmul.f32 %v643_v27, %v499_v34  ;;  %v529_v39 = vsub.f32 1.5, %v528_v35 }
 0x224   : > { %v436_v40 = vadd.f32 %v642_v29, %v432_v36  ;;  %v457_v41 = vsub.f32 1.5, %v456_v37 }
 0x225   : > { %v507_v42 = vadd.f32 %v644_v33, %v503_v38  ;;  %v530_v43 = vmul.f32 %v656_v18, %v529_v39 }
 0x226   : > { %437 = vst.msk [vmem:[%s319_s28] sm:$0xff] %vm355_vm3, %v436_v40  ;;  %v458_v45 = vmul.f32 %v658_v20, %v457_v41 }
 0x227   : > { %626 = vst.msk [vmem:[%s319_s28 + $0x10] sm:$0xff] %vm355_vm3, %v507_v42  ;;  %v534_v46 = vsel %vm533_vm15, %v656_v18, %v530_v43 }
 0x228   : > { %v535_v49 = vmul.f32 %v534_v46, %v761_v55  ;;  %v462_v50 = vsel %vm461_vm1, %v658_v20, %v458_v45 }
 0x229   : > { %v463_v52 = vmul.f32 %v462_v50, %v763_v56 }
 0x22a   : > { %v539_v53 = vmul.f32 %v645_v44, %v535_v49 }
 0x22b   : > { %v467_v54 = vmul.f32 %v647_v47, %v463_v52 }
 0x22c   : > { %v543_v57 = vadd.f32 %v646_v48, %v539_v53 }
 0x22d   : > { %v471_v58 = vadd.f32 %v648_v51, %v467_v54 }
 0x22e   : > { %627 = vst.msk [vmem:[%s319_s28 + $0x18] sm:$0xff] %vm355_vm3, %v543_v57 }
 0x22f   : > { %625 = vst.msk [vmem:[%s319_s28 + $0x8] sm:$0xff] %vm355_vm3, %v471_v58 }
 0x230 PF: > { %s18_s27 = sadd.s32 1, %s665_s27  }
 0x231   : > { %p15_p4 = scmp.ge.s32.totalorder %s18_s27, 4  }
 0x233   :  { %17 = sbr.rel (!%p15_p4) target bundleno = 1 (0x1), region = 88 }

// kernel: _lambda_.20
= control target key start
LH: loop header
LB: loop body
LE: loop exit
PB: predicated region body
PF: predicated region fallthrough
CT: control target
= control target key end

     0   :  { %s882_s17 = smov 0   ;;  %s992_s0 = inlined_call_operand.vmem [shape: f32[8,8,16], index: 0, kind: input, shape index: {}]   ;;  %s993_s1 = inlined_call_operand.vmem [shape: f32[1,16], index: 1, kind: input, shape index: {}]   ;;  %s994_s2 = inlined_call_operand.vmem [shape: f32[1,16], index: 2, kind: input, shape index: {}]   ;;  %s995_s3 = inlined_call_operand.vmem [shape: f32[16,16], index: 3, kind: input, shape index: {}]   ;;  %s996_s4 = inlined_call_operand.vmem [shape: f32[1,16], index: 4, kind: input, shape index: {}]   ;;  %s997_s5 = inlined_call_operand.vmem [shape: f32[16,16], index: 5, kind: input, shape index: {}]   ;;  %s998_s6 = inlined_call_operand.vmem [shape: f32[1,16], index: 6, kind: input, shape index: {}]   ;;  %s999_s7 = inlined_call_operand.vmem [shape: f32[16,16], index: 7, kind: input, shape index: {}]   ;;  %s1000_s8 = inlined_call_operand.vmem [shape: f32[1,16], index: 8, kind: input, shape index: {}]   ;;  %s1001_s9 = inlined_call_operand.vmem [shape: f32[16,16], index: 9, kind: input, shape index: {}]   ;;  %s1002_s10 = inlined_call_operand.vmem [shape: f32[1,16], index: 10, kind: input, shape index: {}]   ;;  %s1003_s11 = inlined_call_operand.vmem [shape: f32[8,8,16], index: 11, kind: output, shape index: {}]  }
   0x1 LB: > { %s763_s18 = sadd.s32 4294967295, %s818_s17   ;;  %p767_p0 = scmp.ge.s32.totalorder %s818_s17, 1  ;;  %s818_s17 = sphi %s882_s17, %s21_s17  }
   0x2   : > { %p336_p1 = scmp.lt.s32.totalorder %s818_s17, 9 }
   0x4   : > { %p337_p2 = pnand %p767_p0, %p336_p1 }
   0x5   : > { %p374_p3 = scmp.lt.s32.totalorder (!%p337_p2), %s763_s18, 7  ;;  %s821_s12 = smov (!%p337_p2), 120  }
   0x6   : > { %340 = sbr.rel (%p337_p2) target bundleno = 1615 (0x64f), region = 64 }
   0xb   : > { %s1005_s18 = smov (!%p374_p3, %s763_s18), 7  ;;  %vm386_vm0 = vcmask 130048   ;;  %v820_v2 = vmov 16.0   ;;  %v427_v3 = vld [vmem:[%s997_s5] sm:$0xff]  ;;  %v428_v4 = vld [vmem:[%s997_s5 + $0x8] sm:$0xff]  ;;  %vm497_vm5 = vcmask 64512  }
   0xc   : > { %s768_s19 = sshll.u32 %s1005_s18, 3  ;;  %800 = vrcp.f32 %v820_v2  ;;  %v424_v5 = vld [vmem:[%s995_s3] sm:$0xff]  ;;  %v461_v6 = vpack.c.bf16 %v428_v4, %v427_v3  ;;  %v425_v7 = vld [vmem:[%s995_s3 + $0x8] sm:$0xff]  ;;  %vm534_vm6 = vcmask 1043456  }
   0xd   : > { %s377_s22 = scalar_lea.vmem %s992_s0, %s768_s19  ;;  %v441_v8 = vpack.c.bf16 %v425_v7, %v424_v5  ;;  %v430_v20 = vld [vmem:[%s999_s7] sm:$0xff]  ;;  %v431_v21 = vld [vmem:[%s999_s7 + $0x8] sm:$0xff] }
   0xe   : > { %v898_v0 = vld [vmem:[%s377_s22] sm:$0xff]  ;;  %594 = vrot.lane.b32.xlu2 %v461_v6, %s821_s12  ;;  %472 = vmatpush.bf16.msra.mxu1 %v461_v6  ;;  %v478_v22 = vpack.c.bf16 %v431_v21, %v430_v20  ;;  %s381_s22 = scalar_lea.vmem %s1003_s11, %s768_s19 }
   0xf   : > { %v387_v1 = vsel %vm386_vm0, %v898_v0, 0.0  ;;  %455 = vmatpush.bf16.msra.mxu0 %v441_v8  ;;  %v794_v34 = vld [vmem:[%s993_s1] ss:$0 sm:$0xff] }
  0x10   : > { %388 = vadd.xlane.f32.xlu0 %v387_v1  ;;  %489 = vmatpush.bf16.msra.mxu2 %v478_v22  ;;  %v795_v36 = vld [vmem:[%s994_s2] ss:$0 sm:$0xff] }
  0x11   : > { %v797_v41 = vld [vmem:[%s998_s6] ss:$0 sm:$0xff] }
  0x12   : > { %v801_v9 = vpop.eup %800  ;;  %v796_v45 = vld [vmem:[%s996_s4] ss:$0 sm:$0xff] }
  0x13   : > { %v391_v10 = vmul.f32 16.0, %v801_v9  ;;  %vm395_vm1 = vweird.f32 %v801_v9  ;;  %v798_v47 = vld [vmem:[%s1000_s8] ss:$0 sm:$0xff] }
  0x14   : > { %v433_v60 = vld [vmem:[%s1001_s9] sm:$0xff] }
  0x15   : > { %v392_v11 = vsub.f32 1.0, %v391_v10  ;;  %v552_v61 = vpack.c.bf16 %v433_v60, %v433_v60 }
  0x16   : > { %574 = vrot.lane.b32.xlu2 %v441_v8, %s821_s12 }
  0x17   : > { %v393_v12 = vmul.f32 %v801_v9, %v392_v11  ;;  %v557_v62 = vsel %vm534_vm6, %v552_v61, 0 }
  0x18   : > { %566 = vmatpush.bf16.msrb.mxu1 %v557_v62 }
  0x19   : > { %v394_v13 = vadd.f32 %v801_v9, %v393_v12 }
  0x1b   : > { %v396_v14 = vsel %vm395_vm1, %v801_v9, %v394_v13 }
  0x1e   : > { %614 = vrot.lane.b32.xlu2 %v478_v22, %s821_s12 }
  0x68   : > { %v595_v24 = vpop.permute.xlu2 %594 }
  0x70   : > { %v575_v27 = vpop.permute.xlu2 %574 }
  0x71   : > { %587 = vmatpush.bf16.msrb.mxu2 %v575_v27 }
  0x83   : > { %v389_v15 = vpop.xlane.xlu0 %388 }
  0x84   : > { %v397_v16 = vmul.f32 %v396_v14, %v389_v15  ;;  %v615_v15 = vpop.permute.xlu2 %614 }
  0x86   : > { %v398_v17 = vsub.f32 %v898_v0, %v397_v16 }
  0x88   : > { %v399_v18 = vmul.f32 %v398_v17, %v398_v17 }
  0x8a   : > { %v400_v19 = vsel %vm386_vm0, %v399_v18, 0.0 }
  0x8b   : > { %401 = vadd.xlane.f32.xlu0 %v400_v19 }
  0x9f   : > { %597 = vrot.lane.b32.xlu0 %v797_v41, %s821_s12 }
  0xfe   : > { %v402_v23 = vpop.xlane.xlu0 %401 }
  0xff   : > { %v403_v25 = vmul.f32 %v402_v23, %v396_v14 }
 0x101   : > { %v404_v26 = vadd.f32 1e-05, %v403_v25 }
 0x103   : > { %802 = vrsqrt.f32 %v404_v26  ;;  %vm411_vm3 = vweird.f32 %v404_v26 }
 0x109   : > { %v803_v28 = vpop.eup %802 }
 0x10a   : > { %v406_v29 = vmul.f32 %v803_v28, %v404_v26  ;;  %vm412_vm2 = vweird.f32 %v803_v28 }
 0x10b   : > { %vm413_vm4 = vmor %vm411_vm3, %vm412_vm2 }
 0x10c   : > { %v407_v30 = vmul.f32 %v803_v28, %v406_v29 }
 0x10e   : > { %v408_v31 = vmul.f32 0.5, %v407_v30 }
 0x110   : > { %v409_v32 = vsub.f32 1.5, %v408_v31 }
 0x111   : > { %v598_v4 = vpop.permute.xlu0 %597 }
 0x112   : > { %v410_v33 = vmul.f32 %v803_v28, %v409_v32 }
 0x114   : > { %v414_v35 = vsel %vm413_vm4, %v803_v28, %v410_v33 }
 0x115   : > { %v415_v37 = vmul.f32 %v414_v35, %v398_v17 }
 0x117   : > { %v419_v38 = vmul.f32 %v794_v34, %v415_v37 }
 0x119   : > { %v423_v39 = vadd.f32 %v795_v36, %v419_v38 }
 0x11b   : > { %v931_v40 = vpack.c.bf16 %v423_v39, %v423_v39 }
 0x11d   : > { %770 = vmatmul.msk.bf16.vlgmr.msra.gmra.mxu0 %vm386_vm0, %v931_v40  ;;  %771 = vmatmul.msk.bf16.vlgmr.msra.gmra.mxu1 %vm386_vm0, %v931_v40 }
 0x11e   : > { %772 = vmatmul.msk.bf16.vlgmr.msra.gmra.mxu2 %vm386_vm0, %v931_v40 }
 0x12e   : > { %776 = vmatmul.msk.bf16.vlgmr.msrb.gmra.mxu2 %vm386_vm0, %v931_v40 }
 0x19a   : > { %v457_v42 = vpop.f32.mrf.mxu0  ;;  %v474_v43 = vpop.f32.mrf.mxu1 }
 0x19b   : > { %v475_v44 = vadd.f32 %v797_v41, %v474_v43  ;;  %v458_v49 = vadd.f32 %v796_v45, %v457_v42  ;;  %v434_v43 = vld [vmem:[%s1001_s9 + $0x8] sm:$0xff] }
 0x19d   : > { %v496_v46 = vpack.c.bf16 %v475_v44, %v475_v44  ;;  %v495_v55 = vpack.c.bf16 %v458_v49, %v458_v49  ;;  %v688_v44 = vpack.c.bf16 %v434_v43, %v434_v43 }
 0x19f   : > { %v502_v48 = vsel %vm497_vm5, %v496_v46, 0 }
 0x1a0   : > { %511 = vmatpush.bf16.xpose.msra.mxu3 %v502_v48 }
 0x1a1   : > { %v491_v50 = vpop.f32.mrf.mxu2 }
 0x1a2   : > { %v492_v51 = vadd.f32 %v798_v47, %v491_v50  ;;  %v459_v52 = vpop.f32.mrf.mxu0  ;;  %v476_v53 = vpop.f32.mrf.mxu1 }
 0x1a3   : > { %v799_v53 = vld [vmem:[%s1002_s10] ss:$0 sm:$0xff] }
 0x1a4   : > { %v530_v54 = vpack.c.bf16 %v492_v51, %v492_v51 }
 0x1a6   : > { %v536_v56 = vsel %vm534_vm6, %v530_v54, 0  ;;  %v439_v54 = vadd.f32 %v799_v53, %v898_v0 }
 0x1a7   : > { %545 = vmatpush.bf16.msrb.mxu0 %v536_v56  ;;  %773 = vmatmul.msk.bf16.vlgmr.msra.gmra.mxu3 %vm497_vm5, %v495_v55 }
 0x1a8   : > { %607 = vmatpush.bf16.msrb.mxu3 %v595_v24 }
 0x1a9   : > { %v493_v57 = vpop.f32.mrf.mxu2 }
 0x1ab   : > { %627 = vmatpush.bf16.msra.mxu0 %v615_v15 }
 0x1b1   : > { %v589_v58 = vpop.f32.mrf.mxu2 }
 0x1b7   : > { %777 = vmatmul.msk.bf16.vlgmr.msrb.gmra.mxu3 %vm386_vm0, %v931_v40 }
 0x1b9   : > { %v591_v59 = vpop.f32.mrf.mxu2 }
 0x22a   : > { %v513_v63 = vpop.f32.mrf.mxu3 }
 0x22b   : > { %v517_v1 = vmul.f32 0.35355338, %v513_v63 }
 0x22d   : > { %v518_v2 = vsel %vm497_vm5, %v517_v1, -inf }
 0x22e   : > { %519 = vmax.xlane.f32.xlu1 %v518_v2 }
 0x232   : > { %v515_v3 = vpop.f32.mrf.mxu3 }
 0x23a   : > { %v609_v5 = vpop.f32.mrf.mxu3 }
 0x23b   : > { %v610_v6 = vadd.f32 %v609_v5, %v598_v4 }
 0x23d   : > { %v634_v7 = vpack.c.bf16 %v610_v6, %v610_v6 }
 0x23f   : > { %v639_v8 = vsel %vm497_vm5, %v634_v7, 0 }
 0x240   : > { %648 = vmatpush.bf16.xpose.msra.mxu1 %v639_v8 }
 0x242   : > { %v611_v9 = vpop.f32.mrf.mxu3 }
 0x2a1   : > { %v520_v10 = vpop.xlane.xlu1 %519 }
 0x2a2   : > { %v521_v11 = vsub.f32 %v517_v1, %v520_v10 }
 0x2a4   : > { %v522_v12 = vmul.f32 1.442695, %v521_v11 }
 0x2a6   : > { %804 = vpow2.f32 %v522_v12 }
 0x2ac   : > { %v805_v13 = vpop.eup %804 }
 0x2ad   : > { %v524_v14 = vsel %vm497_vm5, %v805_v13, 0.0 }
 0x2ae   : > { %525 = vadd.xlane.f32.xlu1 %v524_v14 }
 0x2c7   : > { %577 = vrot.lane.b32.xlu1 %v796_v45, %s821_s12  ;;  %v693_v45 = vsel %vm534_vm6, %v688_v44, 0 }
 0x2c8   : > { %702 = vmatpush.bf16.msra.mxu3 %v693_v45 }
 0x2cf   : > { %617 = vrot.lane.b32.xlu1 %v798_v47, %s821_s12 }
 0x321   : > { %v526_v16 = vpop.xlane.xlu1 %525 }
 0x322   : > { %806 = vrcp.f32 %v526_v16 }
 0x328   : > { %v807_v17 = vpop.eup %806 }
 0x329   : > { %v528_v18 = vmul.f32 %v807_v17, %v805_v13 }
 0x32b   : > { %v529_v19 = vpack.c.bf16 %v528_v18, %v528_v18 }
 0x32d   : > { %774 = vmatmul.msk.bf16.vlgmr.msrb.gmra.mxu0 %vm497_vm5, %v529_v19 }
 0x339   : > { %v578_v22 = vpop.permute.xlu1 %577 }
 0x33a   : > { %v590_v24 = vadd.f32 %v589_v58, %v578_v22 }
 0x33c   : > { %v633_v27 = vpack.c.bf16 %v590_v24, %v590_v24 }
 0x33d   : > { %778 = vmatmul.msk.bf16.vlgmr.msra.gmra.mxu0 %vm386_vm0, %v931_v40 }
 0x341   : > { %v618_v25 = vpop.permute.xlu1 %617 }
 0x3aa   : > { %v547_v20 = vpop.f32.mrf.mxu0 }
 0x3ab   : > { %v551_v21 = vpack.c.bf16 %v547_v20, %v547_v20 }
 0x3ad   : > { %775 = vmatmul.msk.bf16.vlgmr.msrb.gmra.mxu1 %vm497_vm5, %v551_v21 }
 0x3b2   : > { %v549_v23 = vpop.f32.mrf.mxu0 }
 0x3ba   : > { %v629_v26 = vpop.f32.mrf.mxu0 }
 0x3bb   : > { %v630_v28 = vadd.f32 %v629_v26, %v618_v25 }
 0x3bd   : > { %v667_v29 = vpack.c.bf16 %v630_v28, %v630_v28  ;;  %779 = vmatmul.msk.bf16.vlgmr.msra.gmra.mxu1 %vm497_vm5, %v633_v27 }
 0x3bf   : > { %v672_v30 = vsel %vm534_vm6, %v667_v29, 0 }
 0x3c0   : > { %681 = vmatpush.bf16.msra.mxu2 %v672_v30 }
 0x3c2   : > { %v631_v31 = vpop.f32.mrf.mxu0 }
 0x42a   : > { %v568_v32 = vpop.f32.mrf.mxu1 }
 0x42b   : > { %v572_v55 = vadd.f32 %v568_v32, %v439_v54 }
 0x432   : > { %v570_v33 = vpop.f32.mrf.mxu1 }
 0x43a   : > { %v650_v34 = vpop.f32.mrf.mxu1 }
 0x43b   : > { %v654_v35 = vmul.f32 0.35355338, %v650_v34 }
 0x43d   : > { %v655_v36 = vsel %vm497_vm5, %v654_v35, -inf }
 0x43e   : > { %656 = vmax.xlane.f32.xlu2 %v655_v36 }
 0x442   : > { %v652_v37 = vpop.f32.mrf.mxu1 }
 0x4b1   : > { %v657_v38 = vpop.xlane.xlu2 %656 }
 0x4b2   : > { %v658_v39 = vsub.f32 %v654_v35, %v657_v38 }
 0x4b4   : > { %v659_v40 = vmul.f32 1.442695, %v658_v39 }
 0x4b6   : > { %808 = vpow2.f32 %v659_v40 }
 0x4bc   : > { %v809_v41 = vpop.eup %808 }
 0x4bd   : > { %v661_v42 = vsel %vm497_vm5, %v809_v41, 0.0 }
 0x4be   : > { %662 = vadd.xlane.f32.xlu0 %v661_v42 }
 0x531   : > { %v663_v46 = vpop.xlane.xlu0 %662 }
 0x532   : > { %810 = vrcp.f32 %v663_v46 }
 0x538   : > { %v811_v47 = vpop.eup %810 }
 0x539   : > { %v665_v48 = vmul.f32 %v811_v47, %v809_v41 }
 0x53b   : > { %v666_v49 = vpack.c.bf16 %v665_v48, %v665_v48 }
 0x53d   : > { %780 = vmatmul.msk.bf16.vlgmr.msra.gmra.mxu2 %vm497_vm5, %v666_v49 }
 0x5c0   : > { %v683_v50 = vpop.f32.mrf.mxu2 }
 0x5c1   : > { %v687_v51 = vpack.c.bf16 %v683_v50, %v683_v50 }
 0x5c3   : > { %781 = vmatmul.msk.bf16.vlgmr.msra.gmra.mxu3 %vm497_vm5, %v687_v51 }
 0x5c8   : > { %v685_v52 = vpop.f32.mrf.mxu2 }
 0x646   : > { %v704_v56 = vpop.f32.mrf.mxu3 }
 0x647   : > { %v708_v57 = vadd.f32 %v704_v56, %v572_v55 }
 0x649   : > { %709 = vst.msk [vmem:[%s381_s22] sm:$0xff] %vm386_vm0, %v708_v57 }
 0x64e   : > { %v706_v58 = vpop.f32.mrf.mxu3 }
 0x64f PF: > { %s21_s17 = sadd.s32 1, %s818_s17  }
 0x650   : > { %p18_p4 = scmp.ge.s32.totalorder %s21_s17, 10  }
 0x652   :  { %20 = sbr.rel (!%p18_p4) target bundleno = 1 (0x1), region = 94 }

// kernel: _lambda_.21
= control target key start
LH: loop header
LB: loop body
LE: loop exit
PB: predicated region body
PF: predicated region fallthrough
CT: control target
= control target key end

     0   :  { %s886_s17 = smov 0   ;;  %s994_s0 = inlined_call_operand.vmem [shape: f32[16,4,16], index: 0, kind: input, shape index: {}]   ;;  %s995_s1 = inlined_call_operand.vmem [shape: f32[1,16], index: 1, kind: input, shape index: {}]   ;;  %s996_s2 = inlined_call_operand.vmem [shape: f32[1,16], index: 2, kind: input, shape index: {}]   ;;  %s997_s3 = inlined_call_operand.vmem [shape: f32[16,16], index: 3, kind: input, shape index: {}]   ;;  %s998_s4 = inlined_call_operand.vmem [shape: f32[1,16], index: 4, kind: input, shape index: {}]   ;;  %s999_s5 = inlined_call_operand.vmem [shape: f32[16,16], index: 5, kind: input, shape index: {}]   ;;  %s1000_s6 = inlined_call_operand.vmem [shape: f32[1,16], index: 6, kind: input, shape index: {}]   ;;  %s1001_s7 = inlined_call_operand.vmem [shape: f32[16,16], index: 7, kind: input, shape index: {}]   ;;  %s1002_s8 = inlined_call_operand.vmem [shape: f32[1,16], index: 8, kind: input, shape index: {}]   ;;  %s1003_s9 = inlined_call_operand.vmem [shape: f32[16,16], index: 9, kind: input, shape index: {}]   ;;  %s1004_s10 = inlined_call_operand.vmem [shape: f32[1,16], index: 10, kind: input, shape index: {}]   ;;  %s1005_s11 = inlined_call_operand.vmem [shape: f32[16,4,16], index: 11, kind: output, shape index: {}]  }
   0x1 LB: > { %s767_s18 = sadd.s32 4294967295, %s822_s17   ;;  %p771_p0 = scmp.ge.s32.totalorder %s822_s17, 1  ;;  %s822_s17 = sphi %s886_s17, %s21_s17  }
   0x2   : > { %p336_p1 = scmp.lt.s32.totalorder %s822_s17, 17 }
   0x4   : > { %p337_p2 = pnand %p771_p0, %p336_p1 }
   0x5   : > { %p374_p3 = scmp.lt.s32.totalorder (!%p337_p2), %s767_s18, 15  ;;  %s825_s12 = smov (!%p337_p2), 120  }
   0x6   : > { %340 = sbr.rel (%p337_p2) target bundleno = 1615 (0x64f), region = 64 }
   0xb   : > { %s1007_s18 = smov (!%p374_p3, %s767_s18), 15  ;;  %vm386_vm0 = vcmask 125952   ;;  %v824_v2 = vmov 16.0   ;;  %v427_v3 = vld [vmem:[%s999_s5] sm:$0xff]  ;;  %v428_v4 = vld [vmem:[%s999_s5 + $0x8] sm:$0xff]  ;;  %vm445_vm5 = vcmask 130048  }
   0xc   : > { %s772_s19 = sshll.u32 %s1007_s18, 2  ;;  %804 = vrcp.f32 %v824_v2  ;;  %v424_v5 = vld [vmem:[%s997_s3] sm:$0xff]  ;;  %v462_v6 = vpack.c.bf16 %v428_v4, %v427_v3  ;;  %v425_v7 = vld [vmem:[%s997_s3 + $0x8] sm:$0xff]  ;;  %vm498_vm6 = vcmask 64512   ;;  %vm537_vm7 = vcmask 1041408  }
   0xd   : > { %s377_s22 = scalar_lea.vmem %s994_s0, %s772_s19  ;;  %v441_v8 = vpack.c.bf16 %v425_v7, %v424_v5  ;;  %v430_v20 = vld [vmem:[%s1001_s7] sm:$0xff]  ;;  %v431_v21 = vld [vmem:[%s1001_s7 + $0x8] sm:$0xff]  ;;  %vm559_vm8 = vcmask 1043456   ;;  %vm519_vm9 = vcmask 27648   ;;  %vm533_vm10 = vcmask 31744  }
   0xe   : > { %v902_v0 = vld [vmem:[%s377_s22] sm:$0xf]  ;;  %598 = vrot.lane.b32.xlu2 %v462_v6, %s825_s12  ;;  %473 = vmatpush.bf16.msra.mxu1 %v462_v6  ;;  %v479_v22 = vpack.c.bf16 %v431_v21, %v430_v20  ;;  %v434_v62 = vld [vmem:[%s1003_s9 + $0x8] sm:$0xff]  ;;  %s381_s22 = scalar_lea.vmem %s1005_s11, %s772_s19 }
   0xf   : > { %v387_v1 = vsel %vm386_vm0, %v902_v0, 0.0  ;;  %456 = vmatpush.bf16.msra.mxu0 %v441_v8  ;;  %v798_v34 = vld [vmem:[%s995_s1] ss:$0 sm:$0xff] }
  0x10   : > { %388 = vadd.xlane.f32.xlu0 %v387_v1  ;;  %490 = vmatpush.bf16.msra.mxu2 %v479_v22  ;;  %v799_v36 = vld [vmem:[%s996_s2] ss:$0 sm:$0xff]  ;;  %v692_v1 = vpack.c.bf16 %v434_v62, %v434_v62 }
  0x11   : > { %v801_v41 = vld [vmem:[%s1000_s6] ss:$0 sm:$0xff] }
  0x12   : > { %v805_v9 = vpop.eup %804  ;;  %v800_v45 = vld [vmem:[%s998_s4] ss:$0 sm:$0xff]  ;;  %v697_v2 = vsel %vm559_vm8, %v692_v1, 0 }
  0x13   : > { %v391_v10 = vmul.f32 16.0, %v805_v9  ;;  %vm395_vm1 = vweird.f32 %v805_v9  ;;  %v802_v47 = vld [vmem:[%s1002_s8] ss:$0 sm:$0xff] }
  0x14   : > { %v433_v60 = vld [vmem:[%s1003_s9] sm:$0xff] }
  0x15   : > { %v392_v11 = vsub.f32 1.0, %v391_v10  ;;  %v555_v61 = vpack.c.bf16 %v433_v60, %v433_v60 }
  0x16   : > { %578 = vrot.lane.b32.xlu2 %v441_v8, %s825_s12 }
  0x17   : > { %v393_v12 = vmul.f32 %v805_v9, %v392_v11  ;;  %v561_v63 = vsel %vm559_vm8, %v555_v61, 0 }
  0x18   : > { %570 = vmatpush.bf16.msrb.mxu1 %v561_v63 }
  0x19   : > { %v394_v13 = vadd.f32 %v805_v9, %v393_v12 }
  0x1b   : > { %v396_v14 = vsel %vm395_vm1, %v805_v9, %v394_v13 }
  0x1e   : > { %618 = vrot.lane.b32.xlu2 %v479_v22, %s825_s12 }
  0x68   : > { %v599_v24 = vpop.permute.xlu2 %598 }
  0x70   : > { %v579_v27 = vpop.permute.xlu2 %578 }
  0x71   : > { %591 = vmatpush.bf16.msrb.mxu2 %v579_v27 }
  0x83   : > { %v389_v15 = vpop.xlane.xlu0 %388 }
  0x84   : > { %v397_v16 = vmul.f32 %v396_v14, %v389_v15 }
  0x86   : > { %v398_v17 = vsub.f32 %v902_v0, %v397_v16 }
  0x88   : > { %v399_v18 = vmul.f32 %v398_v17, %v398_v17 }
  0x8a   : > { %v400_v19 = vsel %vm386_vm0, %v399_v18, 0.0  ;;  %v619_v18 = vpop.permute.xlu2 %618 }
  0x8b   : > { %401 = vadd.xlane.f32.xlu0 %v400_v19 }
  0x9f   : > { %601 = vrot.lane.b32.xlu0 %v801_v41, %s825_s12 }
  0xfe   : > { %v402_v23 = vpop.xlane.xlu0 %401 }
  0xff   : > { %v403_v25 = vmul.f32 %v402_v23, %v396_v14 }
 0x101   : > { %v404_v26 = vadd.f32 1e-05, %v403_v25 }
 0x103   : > { %806 = vrsqrt.f32 %v404_v26  ;;  %vm411_vm3 = vweird.f32 %v404_v26 }
 0x109   : > { %v807_v28 = vpop.eup %806 }
 0x10a   : > { %v406_v29 = vmul.f32 %v807_v28, %v404_v26  ;;  %vm412_vm2 = vweird.f32 %v807_v28 }
 0x10b   : > { %vm413_vm4 = vmor %vm411_vm3, %vm412_vm2 }
 0x10c   : > { %v407_v30 = vmul.f32 %v807_v28, %v406_v29 }
 0x10e   : > { %v408_v31 = vmul.f32 0.5, %v407_v30 }
 0x110   : > { %v409_v32 = vsub.f32 1.5, %v408_v31 }
 0x111   : > { %v602_v7 = vpop.permute.xlu0 %601 }
 0x112   : > { %v410_v33 = vmul.f32 %v807_v28, %v409_v32 }
 0x114   : > { %v414_v35 = vsel %vm413_vm4, %v807_v28, %v410_v33 }
 0x115   : > { %v415_v37 = vmul.f32 %v414_v35, %v398_v17 }
 0x117   : > { %v419_v38 = vmul.f32 %v798_v34, %v415_v37 }
 0x119   : > { %v423_v39 = vadd.f32 %v799_v36, %v419_v38 }
 0x11b   : > { %v935_v40 = vpack.c.bf16 %v423_v39, %v423_v39 }
 0x11d   : > { %774 = vmatmul.msk.bf16.vlgmr.msra.gmra.mxu0 %vm445_vm5, %v935_v40  ;;  %775 = vmatmul.msk.bf16.vlgmr.msra.gmra.mxu1 %vm445_vm5, %v935_v40 }
 0x11e   : > { %776 = vmatmul.msk.bf16.vlgmr.msra.gmra.mxu2 %vm445_vm5, %v935_v40 }
 0x12e   : > { %780 = vmatmul.msk.bf16.vlgmr.msrb.gmra.mxu2 %vm445_vm5, %v935_v40 }
 0x19a   : > { %v458_v42 = vpop.f32.mrf.mxu0  ;;  %v475_v43 = vpop.f32.mrf.mxu1 }
 0x19b   : > { %v476_v44 = vadd.f32 %v801_v41, %v475_v43  ;;  %v459_v49 = vadd.f32 %v800_v45, %v458_v42 }
 0x19d   : > { %v497_v46 = vpack.c.bf16 %v476_v44, %v476_v44  ;;  %v496_v55 = vpack.c.bf16 %v459_v49, %v459_v49 }
 0x19f   : > { %v503_v48 = vsel %vm498_vm6, %v497_v46, 0 }
 0x1a0   : > { %512 = vmatpush.bf16.xpose.msra.mxu3 %v503_v48 }
 0x1a1   : > { %v492_v50 = vpop.f32.mrf.mxu2 }
 0x1a2   : > { %v493_v51 = vadd.f32 %v802_v47, %v492_v50  ;;  %v460_v52 = vpop.f32.mrf.mxu0  ;;  %v477_v53 = vpop.f32.mrf.mxu1 }
 0x1a3   : > { %v803_v53 = vld [vmem:[%s1004_s10] ss:$0 sm:$0xff] }
 0x1a4   : > { %v532_v54 = vpack.c.bf16 %v493_v51, %v493_v51 }
 0x1a6   : > { %v539_v56 = vsel %vm537_vm7, %v532_v54, 0  ;;  %v439_v54 = vadd.f32 %v803_v53, %v902_v0 }
 0x1a7   : > { %548 = vmatpush.bf16.msrb.mxu0 %v539_v56  ;;  %777 = vmatmul.msk.bf16.vlgmr.msra.gmra.mxu3 %vm498_vm6, %v496_v55 }
 0x1a8   : > { %611 = vmatpush.bf16.msrb.mxu3 %v599_v24 }
 0x1a9   : > { %v494_v57 = vpop.f32.mrf.mxu2 }
 0x1ab   : > { %631 = vmatpush.bf16.msra.mxu0 %v619_v18 }
 0x1ac   : > { %706 = vmatpush.bf16.msra.mxu3 %v697_v2 }
 0x1b1   : > { %v593_v58 = vpop.f32.mrf.mxu2 }
 0x1b7   : > { %781 = vmatmul.msk.bf16.vlgmr.msrb.gmra.mxu3 %vm445_vm5, %v935_v40 }
 0x1b9   : > { %v595_v59 = vpop.f32.mrf.mxu2 }
 0x22a   : > { %v514_v3 = vpop.f32.mrf.mxu3 }
 0x22b   : > { %v518_v4 = vmul.f32 0.35355338, %v514_v3 }
 0x22d   : > { %v520_v5 = vsel %vm519_vm9, %v518_v4, -inf }
 0x22e   : > { %521 = vmax.xlane.f32.xlu1 %v520_v5 }
 0x232   : > { %v516_v6 = vpop.f32.mrf.mxu3 }
 0x23a   : > { %v613_v8 = vpop.f32.mrf.mxu3 }
 0x23b   : > { %v614_v9 = vadd.f32 %v613_v8, %v602_v7 }
 0x23d   : > { %v638_v10 = vpack.c.bf16 %v614_v9, %v614_v9 }
 0x23f   : > { %v643_v11 = vsel %vm498_vm6, %v638_v10, 0 }
 0x240   : > { %652 = vmatpush.bf16.xpose.msra.mxu1 %v643_v11 }
 0x242   : > { %v615_v12 = vpop.f32.mrf.mxu3 }
 0x2a1   : > { %v522_v13 = vpop.xlane.xlu1 %521 }
 0x2a2   : > { %v523_v14 = vsub.f32 %v518_v4, %v522_v13 }
 0x2a4   : > { %v524_v15 = vmul.f32 1.442695, %v523_v14 }
 0x2a6   : > { %808 = vpow2.f32 %v524_v15 }
 0x2ac   : > { %v809_v16 = vpop.eup %808 }
 0x2ad   : > { %v526_v17 = vsel %vm519_vm9, %v809_v16, 0.0 }
 0x2ae   : > { %527 = vadd.xlane.f32.xlu1 %v526_v17 }
 0x2c7   : > { %581 = vrot.lane.b32.xlu1 %v800_v45, %s825_s12 }
 0x2cf   : > { %621 = vrot.lane.b32.xlu1 %v802_v47, %s825_s12 }
 0x321   : > { %v528_v19 = vpop.xlane.xlu1 %527 }
 0x322   : > { %810 = vrcp.f32 %v528_v19 }
 0x328   : > { %v811_v20 = vpop.eup %810 }
 0x329   : > { %v530_v21 = vmul.f32 %v811_v20, %v809_v16 }
 0x32b   : > { %v531_v22 = vpack.c.bf16 %v530_v21, %v530_v21 }
 0x32d   : > { %778 = vmatmul.msk.bf16.vlgmr.msrb.gmra.mxu0 %vm533_vm10, %v531_v22 }
 0x339   : > { %v582_v25 = vpop.permute.xlu1 %581 }
 0x33a   : > { %v594_v27 = vadd.f32 %v593_v58, %v582_v25 }
 0x33c   : > { %v637_v30 = vpack.c.bf16 %v594_v27, %v594_v27 }
 0x33d   : > { %782 = vmatmul.msk.bf16.vlgmr.msra.gmra.mxu0 %vm445_vm5, %v935_v40 }
 0x341   : > { %v622_v28 = vpop.permute.xlu1 %621 }
 0x3aa   : > { %v550_v23 = vpop.f32.mrf.mxu0 }
 0x3ab   : > { %v554_v24 = vpack.c.bf16 %v550_v23, %v550_v23 }
 0x3ad   : > { %779 = vmatmul.msk.bf16.vlgmr.msrb.gmra.mxu1 %vm498_vm6, %v554_v24 }
 0x3b2   : > { %v552_v26 = vpop.f32.mrf.mxu0 }
 0x3ba   : > { %v633_v29 = vpop.f32.mrf.mxu0 }
 0x3bb   : > { %v634_v31 = vadd.f32 %v633_v29, %v622_v28 }
 0x3bd   : > { %v671_v32 = vpack.c.bf16 %v634_v31, %v634_v31  ;;  %783 = vmatmul.msk.bf16.vlgmr.msra.gmra.mxu1 %vm498_vm6, %v637_v30 }
 0x3bf   : > { %v676_v33 = vsel %vm537_vm7, %v671_v32, 0 }
 0x3c0   : > { %685 = vmatpush.bf16.msra.mxu2 %v676_v33 }
 0x3c2   : > { %v635_v34 = vpop.f32.mrf.mxu0 }
 0x42a   : > { %v572_v35 = vpop.f32.mrf.mxu1 }
 0x42b   : > { %v576_v55 = vadd.f32 %v572_v35, %v439_v54 }
 0x432   : > { %v574_v36 = vpop.f32.mrf.mxu1 }
 0x43a   : > { %v654_v37 = vpop.f32.mrf.mxu1 }
 0x43b   : > { %v658_v38 = vmul.f32 0.35355338, %v654_v37 }
 0x43d   : > { %v659_v39 = vsel %vm519_vm9, %v658_v38, -inf }
 0x43e   : > { %660 = vmax.xlane.f32.xlu2 %v659_v39 }
 0x442   : > { %v656_v40 = vpop.f32.mrf.mxu1 }
 0x4b1   : > { %v661_v41 = vpop.xlane.xlu2 %660 }
 0x4b2   : > { %v662_v42 = vsub.f32 %v658_v38, %v661_v41 }
 0x4b4   : > { %v663_v43 = vmul.f32 1.442695, %v662_v42 }
 0x4b6   : > { %812 = vpow2.f32 %v663_v43 }
 0x4bc   : > { %v813_v44 = vpop.eup %812 }
 0x4bd   : > { %v665_v45 = vsel %vm519_vm9, %v813_v44, 0.0 }
 0x4be   : > { %666 = vadd.xlane.f32.xlu0 %v665_v45 }
 0x531   : > { %v667_v46 = vpop.xlane.xlu0 %666 }
 0x532   : > { %814 = vrcp.f32 %v667_v46 }
 0x538   : > { %v815_v47 = vpop.eup %814 }
 0x539   : > { %v669_v48 = vmul.f32 %v815_v47, %v813_v44 }
 0x53b   : > { %v670_v49 = vpack.c.bf16 %v669_v48, %v669_v48 }
 0x53d   : > { %784 = vmatmul.msk.bf16.vlgmr.msra.gmra.mxu2 %vm533_vm10, %v670_v49 }
 0x5c0   : > { %v687_v50 = vpop.f32.mrf.mxu2 }
 0x5c1   : > { %v691_v51 = vpack.c.bf16 %v687_v50, %v687_v50 }
 0x5c3   : > { %785 = vmatmul.msk.bf16.vlgmr.msra.gmra.mxu3 %vm498_vm6, %v691_v51 }
 0x5c8   : > { %v689_v52 = vpop.f32.mrf.mxu2 }
 0x646   : > { %v708_v56 = vpop.f32.mrf.mxu3 }
 0x647   : > { %v712_v57 = vadd.f32 %v708_v56, %v576_v55 }
 0x649   : > { %713 = vst.msk [vmem:[%s381_s22] sm:$0xf] %vm386_vm0, %v712_v57 }
 0x64e   : > { %v710_v58 = vpop.f32.mrf.mxu3 }
 0x64f PF: > { %s21_s17 = sadd.s32 1, %s822_s17  }
 0x650   : > { %p18_p4 = scmp.ge.s32.totalorder %s21_s17, 18  }
 0x652   :  { %20 = sbr.rel (!%p18_p4) target bundleno = 1 (0x1), region = 94 }

// kernel: _lambda_.22
= control target key start
LH: loop header
LB: loop body
LE: loop exit
PB: predicated region body
PF: predicated region fallthrough
CT: control target
= control target key end

     0   :  { %vm37_vm0 = vcmask 130048   ;;  %v493_v16 = vmov 16.0   ;;  %s853_s0 = inlined_call_operand.vmem [shape: f32[64,16], index: 0, kind: input, shape index: {}]   ;;  %s854_s1 = inlined_call_operand.vmem [shape: f32[1,16], index: 1, kind: input, shape index: {}]   ;;  %s855_s2 = inlined_call_operand.vmem [shape: f32[1,16], index: 2, kind: input, shape index: {}]   ;;  %s856_s4 = inlined_call_operand.vmem [shape: f32[1,32], index: 4, kind: input, shape index: {}]   ;;  %s857_s3 = inlined_call_operand.vmem [shape: f32[16,32], index: 3, kind: input, shape index: {}]   ;;  %s858_s6 = inlined_call_operand.vmem [shape: f32[1,16], index: 6, kind: input, shape index: {}]   ;;  %s859_s5 = inlined_call_operand.vmem [shape: f32[32,16], index: 5, kind: input, shape index: {}]   ;;  %s860_s7 = inlined_call_operand.vmem [shape: f32[64,16], index: 7, kind: output, shape index: {}]  }
   0x1   :  { %v537_v0 = vld [vmem:[%s853_s0 + $0x20] sm:$0xff]  ;;  %v542_v1 = vld [vmem:[%s853_s0 + $0x10] sm:$0xff]  ;;  %v558_v6 = vld [vmem:[%s853_s0 + $0x28] sm:$0xff]  ;;  %459 = vrcp.f32 %v493_v16 }
   0x2   :  { %v547_v2 = vld [vmem:[%s853_s0] sm:$0xff]  ;;  %v50_v3 = vsel %vm37_vm0, %v537_v0, 0.0  ;;  %v44_v4 = vsel %vm37_vm0, %v542_v1, 0.0  ;;  %v563_v7 = vld [vmem:[%s853_s0 + $0x18] sm:$0xff]  ;;  %v568_v8 = vld [vmem:[%s853_s0 + $0x8] sm:$0xff]  ;;  %v53_v9 = vsel %vm37_vm0, %v558_v6, 0.0 }
   0x3   :  { %v38_v5 = vsel %vm37_vm0, %v547_v2, 0.0  ;;  %51 = vadd.xlane.f32.xlu1 %v50_v3  ;;  %45 = vadd.xlane.f32.xlu0 %v44_v4  ;;  %v47_v10 = vsel %vm37_vm0, %v563_v7, 0.0  ;;  %v41_v11 = vsel %vm37_vm0, %v568_v8, 0.0  ;;  %v579_v12 = vld [vmem:[%s853_s0 + $0x30] sm:$0xff]  ;;  %v584_v13 = vld [vmem:[%s853_s0 + $0x38] sm:$0xff] }
   0x4   :  { %39 = vadd.xlane.f32.xlu2 %v38_v5  ;;  %v56_v14 = vsel %vm37_vm0, %v579_v12, 0.0  ;;  %v59_v15 = vsel %vm37_vm0, %v584_v13, 0.0 }
   0x7   :  { %v460_v17 = vpop.eup %459 }
   0x8   :  { %v63_v18 = vmul.f32 16.0, %v460_v17  ;;  %vm67_vm1 = vweird.f32 %v460_v17 }
   0xa   :  { %v64_v19 = vsub.f32 1.0, %v63_v18 }
   0xb   :  { %54 = vadd.xlane.f32.xlu1 %v53_v9  ;;  %48 = vadd.xlane.f32.xlu0 %v47_v10  ;;  %v243_v10 = vld [vmem:[%s857_s3] sm:$0xff] }
   0xc   :  { %42 = vadd.xlane.f32.xlu2 %v41_v11  ;;  %v65_v20 = vmul.f32 %v460_v17, %v64_v19  ;;  %v244_v11 = vld [vmem:[%s857_s3 + $0x8] sm:$0xff] }
   0xe   :  { %v66_v21 = vadd.f32 %v460_v17, %v65_v20 }
  0x10   :  { %v590_v22 = vsel %vm67_vm1, %v460_v17, %v66_v21 }
  0x13   :  { %57 = vadd.xlane.f32.xlu0 %v56_v14  ;;  %60 = vadd.xlane.f32.xlu1 %v59_v15  ;;  %v249_v14 = vpack.c.bf16 %v244_v11, %v243_v10 }
  0x15   :  { %451 = vmatpush.bf16.msra.mxu3 %v249_v14  ;;  %273 = vmatpush.bf16.msra.mxu0 %v249_v14  ;;  %v696_v14 = vld [vmem:[%s854_s1] ss:$0 sm:$0xff] }
  0x76   :  { %v52_v23 = vpop.xlane.xlu1 %51  ;;  %v46_v24 = vpop.xlane.xlu0 %45 }
  0x77   :  { %v73_v25 = vmul.f32 %v590_v22, %v52_v23  ;;  %v71_v26 = vmul.f32 %v590_v22, %v46_v24  ;;  %v40_v27 = vpop.xlane.xlu2 %39 }
  0x78   :  { %v69_v36 = vmul.f32 %v590_v22, %v40_v27 }
  0x79   :  { %v595_v28 = vsub.f32 %v537_v0, %v73_v25  ;;  %v598_v29 = vsub.f32 %v542_v1, %v71_v26 }
  0x7a   :  { %v620_v44 = vsub.f32 %v547_v2, %v69_v36 }
  0x7b   :  { %v89_v30 = vmul.f32 %v595_v28, %v595_v28  ;;  %v87_v31 = vmul.f32 %v598_v29, %v598_v29 }
  0x7c   :  { %v85_v55 = vmul.f32 %v620_v44, %v620_v44 }
  0x7d   :  { %v105_v32 = vsel %vm37_vm0, %v89_v30, 0.0  ;;  %v99_v33 = vsel %vm37_vm0, %v87_v31, 0.0 }
  0x7e   :  { %106 = vadd.xlane.f32.xlu1 %v105_v32  ;;  %v55_v34 = vpop.xlane.xlu1 %54  ;;  %v49_v35 = vpop.xlane.xlu0 %48  ;;  %100 = vadd.xlane.f32.xlu2 %v99_v33  ;;  %v93_v59 = vsel %vm37_vm0, %v85_v55, 0.0 }
  0x7f   :  { %v74_v37 = vmul.f32 %v590_v22, %v55_v34  ;;  %v72_v38 = vmul.f32 %v590_v22, %v49_v35  ;;  %v43_v39 = vpop.xlane.xlu2 %42 }
  0x80   :  { %v70_v40 = vmul.f32 %v590_v22, %v43_v39 }
  0x81   :  { %v611_v41 = vsub.f32 %v558_v6, %v74_v37  ;;  %v614_v42 = vsub.f32 %v563_v7, %v72_v38 }
  0x82   :  { %v617_v43 = vsub.f32 %v568_v8, %v70_v40 }
  0x83   :  { %v88_v45 = vmul.f32 %v614_v42, %v614_v42  ;;  %v90_v46 = vmul.f32 %v611_v41, %v611_v41 }
  0x84   :  { %v86_v47 = vmul.f32 %v617_v43, %v617_v43 }
  0x85   :  { %v102_v48 = vsel %vm37_vm0, %v88_v45, 0.0  ;;  %v108_v49 = vsel %vm37_vm0, %v90_v46, 0.0 }
  0x86   :  { %103 = vadd.xlane.f32.xlu0 %v102_v48  ;;  %v58_v50 = vpop.xlane.xlu0 %57  ;;  %109 = vadd.xlane.f32.xlu2 %v108_v49  ;;  %v96_v51 = vsel %vm37_vm0, %v86_v47, 0.0  ;;  %v61_v52 = vpop.xlane.xlu1 %60 }
  0x87   :  { %v75_v53 = vmul.f32 %v590_v22, %v58_v50  ;;  %97 = vadd.xlane.f32.xlu1 %v96_v51  ;;  %v76_v54 = vmul.f32 %v590_v22, %v61_v52 }
  0x89   :  { %v636_v56 = vsub.f32 %v579_v12, %v75_v53  ;;  %v639_v57 = vsub.f32 %v584_v13, %v76_v54 }
  0x8b   :  { %v91_v58 = vmul.f32 %v636_v56, %v636_v56  ;;  %v92_v61 = vmul.f32 %v639_v57, %v639_v57 }
  0x8d   :  { %v111_v60 = vsel %vm37_vm0, %v91_v58, 0.0  ;;  %v114_v62 = vsel %vm37_vm0, %v92_v61, 0.0 }
  0x8e   :  { %112 = vadd.xlane.f32.xlu2 %v111_v60  ;;  %94 = vadd.xlane.f32.xlu0 %v93_v59 }
  0x96   :  { %115 = vadd.xlane.f32.xlu0 %v114_v62 }
  0xf1   :  { %v107_v63 = vpop.xlane.xlu1 %106  ;;  %v101_v3 = vpop.xlane.xlu2 %100 }
  0xf2   :  { %v119_v4 = vmul.f32 %v101_v3, %v590_v22  ;;  %v121_v5 = vmul.f32 %v107_v63, %v590_v22 }
  0xf4   :  { %v127_v9 = vadd.f32 1e-05, %v119_v4  ;;  %v656_v15 = vadd.f32 1e-05, %v121_v5 }
  0xf6   :  { %461 = vrsqrt.f32 %v127_v9  ;;  %vm159_vm3 = vweird.f32 %v127_v9  ;;  %vm179_vm13 = vweird.f32 %v656_v15 }
  0xf7   :  { %463 = vrsqrt.f32 %v656_v15 }
  0xf9   :  { %v104_v16 = vpop.xlane.xlu0 %103  ;;  %v110_v17 = vpop.xlane.xlu2 %109 }
  0xfa   :  { %v120_v18 = vmul.f32 %v104_v16, %v590_v22  ;;  %v98_v19 = vpop.xlane.xlu1 %97  ;;  %v122_v20 = vmul.f32 %v110_v17, %v590_v22 }
  0xfb   :  { %v118_v21 = vmul.f32 %v98_v19, %v590_v22 }
  0xfc   :  { %v128_v23 = vadd.f32 1e-05, %v120_v18  ;;  %v662_v24 = vadd.f32 1e-05, %v122_v20  ;;  %v462_v25 = vpop.eup %461 }
  0xfd   :  { %v126_v26 = vadd.f32 1e-05, %v118_v21  ;;  %v154_v27 = vmul.f32 %v462_v25, %v127_v9  ;;  %v665_v33 = vpop.eup %463  ;;  %vm160_vm2 = vweird.f32 %v462_v25 }
  0xfe   :  { %465 = vrsqrt.f32 %v128_v23  ;;  %v174_v45 = vmul.f32 %v665_v33, %v656_v15  ;;  %vm678_vm4 = vmor %vm159_vm3, %vm160_vm2  ;;  %vm169_vm5 = vweird.f32 %v128_v23  ;;  %vm189_vm11 = vweird.f32 %v662_v24 }
  0xff   :  { %467 = vrsqrt.f32 %v126_v26  ;;  %v155_v30 = vmul.f32 %v462_v25, %v154_v27  ;;  %vm149_vm7 = vweird.f32 %v126_v26  ;;  %vm180_vm14 = vweird.f32 %v665_v33 }
 0x100   :  { %469 = vrsqrt.f32 %v662_v24  ;;  %v175_v55 = vmul.f32 %v665_v33, %v174_v45  ;;  %vm732_vm3 = vmor %vm179_vm13, %vm180_vm14 }
 0x101   :  { %v95_v31 = vpop.xlane.xlu0 %94  ;;  %v113_v32 = vpop.xlane.xlu2 %112  ;;  %v156_v34 = vmul.f32 0.5, %v155_v30 }
 0x102   :  { %v117_v35 = vmul.f32 %v95_v31, %v590_v22  ;;  %v123_v39 = vmul.f32 %v113_v32, %v590_v22  ;;  %v176_v16 = vmul.f32 0.5, %v175_v55 }
 0x103   :  { %v157_v37 = vsub.f32 1.5, %v156_v34 }
 0x104   :  { %v466_v36 = vpop.eup %465  ;;  %v668_v38 = vadd.f32 1e-05, %v117_v35  ;;  %v682_v54 = vadd.f32 1e-05, %v123_v39  ;;  %v177_v27 = vsub.f32 1.5, %v176_v16 }
 0x105   :  { %v468_v40 = vpop.eup %467  ;;  %v164_v46 = vmul.f32 %v466_v36, %v128_v23  ;;  %v158_v48 = vmul.f32 %v462_v25, %v157_v37  ;;  %vm170_vm6 = vweird.f32 %v466_v36  ;;  %v712_v23 = vld [vmem:[%s855_s2] ss:$0 sm:$0xff] }
 0x106   :  { %v673_v47 = vpop.eup %469  ;;  %v144_v49 = vmul.f32 %v468_v40, %v126_v26  ;;  %471 = vrsqrt.f32 %v668_v38  ;;  %vm150_vm8 = vweird.f32 %v468_v40  ;;  %vm171_vm9 = vmor %vm169_vm5, %vm170_vm6  ;;  %vm139_vm15 = vweird.f32 %v668_v38 }
 0x107   :  { %v165_v50 = vmul.f32 %v466_v36, %v164_v46  ;;  %v184_v51 = vmul.f32 %v673_v47, %v662_v24  ;;  %v162_v58 = vsel %vm678_vm4, %v462_v25, %v158_v48  ;;  %473 = vrsqrt.f32 %v682_v54  ;;  %vm701_vm10 = vmor %vm149_vm7, %vm150_vm8 }
 0x108   :  { %v145_v53 = vmul.f32 %v468_v40, %v144_v49  ;;  %v215_v9 = vmul.f32 %v162_v58, %v598_v29  ;;  %vm190_vm12 = vweird.f32 %v673_v47  ;;  %v178_v45 = vmul.f32 %v665_v33, %v177_v27 }
 0x109   :  { %v166_v59 = vmul.f32 0.5, %v165_v50  ;;  %v185_v60 = vmul.f32 %v673_v47, %v184_v51  ;;  %v116_v61 = vpop.xlane.xlu0 %115  ;;  %vm725_vm2 = vmor %vm189_vm11, %vm190_vm12  ;;  %vm199_vm7 = vweird.f32 %v682_v54  ;;  %vm381_vm11 = vcmask 261120  }
 0x10a   :  { %v146_v62 = vmul.f32 0.5, %v145_v53  ;;  %v124_v63 = vmul.f32 %v116_v61, %v590_v22  ;;  %v226_v26 = vmul.f32 %v696_v14, %v215_v9  ;;  %v182_v55 = vsel %vm732_vm3, %v665_v33, %v178_v45 }
 0x10b   :  { %v167_v3 = vsub.f32 1.5, %v166_v59  ;;  %v186_v4 = vmul.f32 0.5, %v185_v60 }
 0x10c   :  { %v472_v5 = vpop.eup %471  ;;  %v147_v10 = vsub.f32 1.5, %v146_v62  ;;  %v691_v11 = vadd.f32 1e-05, %v124_v63  ;;  %v237_v15 = vadd.f32 %v712_v23, %v226_v26  ;;  %v369_v26 = vld [vmem:[%s859_s5 + $0x10] sm:$0xff] }
 0x10d   :  { %v168_v17 = vmul.f32 %v466_v36, %v167_v3  ;;  %v134_v22 = vmul.f32 %v472_v5, %v668_v38  ;;  %v187_v20 = vsub.f32 1.5, %v186_v4  ;;  %v474_v32 = vpop.eup %473  ;;  %vm140_vm1 = vweird.f32 %v472_v5 }
 0x10e   :  { %v148_v18 = vmul.f32 %v468_v40, %v147_v10  ;;  %475 = vrsqrt.f32 %v691_v11  ;;  %v194_v48 = vmul.f32 %v474_v32, %v682_v54  ;;  %vm141_vm4 = vmor %vm139_vm15, %vm140_vm1  ;;  %vm209_vm5 = vweird.f32 %v691_v11 }
 0x10f   :  { %v172_v19 = vsel %vm171_vm9, %v466_v36, %v168_v17  ;;  %v135_v21 = vmul.f32 %v472_v5, %v134_v22  ;;  %v188_v34 = vmul.f32 %v673_v47, %v187_v20  ;;  %vm200_vm8 = vweird.f32 %v474_v32 }
 0x110   :  { %v216_v25 = vmul.f32 %v172_v19, %v614_v42  ;;  %v152_v30 = vsel %vm701_vm10, %v468_v40, %v148_v18  ;;  %v195_v58 = vmul.f32 %v474_v32, %v194_v48  ;;  %vm201_vm10 = vmor %vm199_vm7, %vm200_vm8 }
 0x111   :  { %v136_v31 = vmul.f32 0.5, %v135_v21  ;;  %v214_v37 = vmul.f32 %v152_v30, %v617_v43  ;;  %v192_v49 = vsel %vm725_vm2, %v673_v47, %v188_v34  ;;  %v217_v47 = vmul.f32 %v182_v55, %v595_v28 }
 0x112   :  { %v227_v42 = vmul.f32 %v696_v14, %v216_v25  ;;  %v218_v59 = vmul.f32 %v192_v49, %v611_v41  ;;  %v196_v63 = vmul.f32 0.5, %v195_v58 }
 0x113   :  { %v137_v35 = vsub.f32 1.5, %v136_v31  ;;  %v225_v53 = vmul.f32 %v696_v14, %v214_v37  ;;  %v228_v33 = vmul.f32 %v696_v14, %v217_v47  ;;  %v367_v31 = vld [vmem:[%s859_s5] sm:$0xff] }
 0x114   :  { %v476_v36 = vpop.eup %475  ;;  %v238_v40 = vadd.f32 %v712_v23, %v227_v42  ;;  %v229_v4 = vmul.f32 %v696_v14, %v218_v59  ;;  %v197_v9 = vsub.f32 1.5, %v196_v63 }
 0x115   :  { %v138_v38 = vmul.f32 %v472_v5, %v137_v35  ;;  %v204_v43 = vmul.f32 %v476_v36, %v691_v11  ;;  %vm210_vm6 = vweird.f32 %v476_v36  ;;  %v239_v10 = vadd.f32 %v712_v23, %v228_v33 }
 0x116   :  { %v246_v24 = vpack.c.bf16 %v238_v40, %v237_v15  ;;  %v240_v41 = vadd.f32 %v712_v23, %v229_v4  ;;  %vm211_vm9 = vmor %vm209_vm5, %vm210_vm6  ;;  %v198_v16 = vmul.f32 %v474_v32, %v197_v9 }
 0x117   :  { %v142_v50 = vsel %vm141_vm4, %v472_v5, %v138_v38  ;;  %v205_v51 = vmul.f32 %v476_v36, %v204_v43 }
 0x118   :  { %v213_v52 = vmul.f32 %v142_v50, %v620_v44  ;;  %444 = vmatmul.msk.bf16.vlgmr.msra.gmra.mxu3 %vm37_vm0, %v246_v24  ;;  %v236_v44 = vadd.f32 %v712_v23, %v225_v53  ;;  %v247_v17 = vpack.c.bf16 %v240_v41, %v239_v10  ;;  %v202_v18 = vsel %vm201_vm10, %v474_v32, %v198_v16  ;;  %v368_v32 = vld [vmem:[%s859_s5 + $0x8] sm:$0xff] }
 0x119   :  { %v206_v61 = vmul.f32 0.5, %v205_v51  ;;  %v219_v11 = vmul.f32 %v202_v18, %v636_v56  ;;  %v375_v42 = vpack.c.bf16 %v368_v32, %v367_v31 }
 0x11a   :  { %v224_v60 = vmul.f32 %v696_v14, %v213_v52 }
 0x11b   :  { %v207_v5 = vsub.f32 1.5, %v206_v61  ;;  %v230_v54 = vmul.f32 %v696_v14, %v219_v11 }
 0x11c   :  { %v235_v62 = vadd.f32 %v712_v23, %v224_v60 }
 0x11d   :  { %v208_v28 = vmul.f32 %v476_v36, %v207_v5  ;;  %v241_v21 = vadd.f32 %v712_v23, %v230_v54 }
 0x11e   :  { %v245_v3 = vpack.c.bf16 %v236_v44, %v235_v62 }
 0x11f   :  { %v212_v22 = vsel %vm211_vm9, %v476_v36, %v208_v28 }
 0x120   :  { %443 = vmatmul.msk.bf16.vlgmr.msra.gmra.mxu0 %vm37_vm0, %v245_v3  ;;  %v220_v29 = vmul.f32 %v212_v22, %v639_v57  ;;  %v370_v57 = vld [vmem:[%s859_s5 + $0x18] sm:$0xff] }
 0x121   :  { %v376_v27 = vpack.c.bf16 %v370_v57, %v369_v26 }
 0x122   :  { %v231_v19 = vmul.f32 %v696_v14, %v220_v29  ;;  %v776_v14 = vld [vmem:[%s856_s4] ss:$0 sm:$0xff] }
 0x123   :  { %400 = vmatpush.bf16.msra.mxu1 %v376_v27  ;;  %452 = vmatpush.bf16.msra.mxu2 %v376_v27 }
 0x124   :  { %v242_v20 = vadd.f32 %v712_v23, %v231_v19 }
 0x126   :  { %v248_v25 = vpack.c.bf16 %v242_v20, %v241_v21 }
 0x127   :  { %401 = vmatpush.bf16.msra.mxu1 %v375_v42  ;;  %453 = vmatpush.bf16.msra.mxu2 %v375_v42 }
 0x128   :  { %445 = vmatmul.msk.bf16.gmra.mxu3 %vm37_vm0, %v247_v17 }
 0x138   :  { %446 = vmatmul.msk.bf16.gmra.mxu3 %vm37_vm0, %v248_v25 }
 0x19b   :  { %v280_v56 = vpop.f32.mrf.mxu3 }
 0x19c   :  { %v786_v37 = vadd.f32 %v776_v14, %v280_v56 }
 0x19d   :  { %v275_v30 = vpop.f32.mrf.mxu0 }
 0x19e   :  { %v276_v23 = vadd.f32 %v776_v14, %v275_v30  ;;  %v297_v48 = vmul.f32 %v786_v37, %v786_v37 }
 0x1a0   :  { %v295_v34 = vmul.f32 %v276_v23, %v276_v23  ;;  %v305_v52 = vmul.f32 %v297_v48, %v786_v37 }
 0x1a2   :  { %v303_v35 = vmul.f32 %v295_v34, %v276_v23  ;;  %v313_v61 = vmul.f32 0.044715, %v305_v52 }
 0x1a3   :  { %v282_v36 = vpop.f32.mrf.mxu3 }
 0x1a4   :  { %v311_v39 = vmul.f32 0.044715, %v303_v35  ;;  %v789_v15 = vadd.f32 %v776_v14, %v282_v36  ;;  %v321_v5 = vadd.f32 %v313_v61, %v786_v37 }
 0x1a5   :  { %v277_v40 = vpop.f32.mrf.mxu0 }
 0x1a6   :  { %v319_v45 = vadd.f32 %v311_v39, %v276_v23  ;;  %v298_v46 = vmul.f32 %v789_v15, %v789_v15  ;;  %v278_v38 = vadd.f32 %v776_v14, %v277_v40  ;;  %v329_v22 = vmul.f32 0.7978846, %v321_v5 }
 0x1a8   :  { %v327_v43 = vmul.f32 0.7978846, %v319_v45  ;;  %v296_v24 = vmul.f32 %v278_v38, %v278_v38  ;;  %v306_v49 = vmul.f32 %v298_v46, %v789_v15 }
 0x1aa   :  { %v304_v50 = vmul.f32 %v296_v24, %v278_v38  ;;  %477 = vtanh.f32 %v327_v43  ;;  %v314_v58 = vmul.f32 0.044715, %v306_v49 }
 0x1ab   :  { %v285_v51 = vpop.f32.mrf.mxu3 }
 0x1ac   :  { %v312_v53 = vmul.f32 0.044715, %v304_v50  ;;  %v286_v55 = vadd.f32 %v776_v14, %v285_v51  ;;  %v322_v44 = vadd.f32 %v314_v58, %v789_v15 }
 0x1ae   :  { %v320_v59 = vadd.f32 %v312_v53, %v278_v38  ;;  %v299_v60 = vmul.f32 %v286_v55, %v286_v55  ;;  %v330_v41 = vmul.f32 0.7978846, %v322_v44 }
 0x1b0   :  { %v328_v47 = vmul.f32 0.7978846, %v320_v59  ;;  %v307_v62 = vmul.f32 %v299_v60, %v286_v55  ;;  %v478_v63 = vpop.eup %477 }
 0x1b1   :  { %v343_v28 = vadd.f32 1.0, %v478_v63 }
 0x1b2   :  { %479 = vtanh.f32 %v328_v47  ;;  %v315_v3 = vmul.f32 0.044715, %v307_v62 }
 0x1b3   :  { %v287_v4 = vpop.f32.mrf.mxu3  ;;  %481 = vtanh.f32 %v330_v41  ;;  %v351_v11 = vmul.f32 0.5, %v343_v28 }
 0x1b4   :  { %v323_v33 = vadd.f32 %v315_v3, %v286_v55  ;;  %v288_v9 = vadd.f32 %v776_v14, %v287_v4 }
 0x1b5   :  { %v359_v26 = vmul.f32 %v351_v11, %v276_v23 }
 0x1b6   :  { %v331_v10 = vmul.f32 0.7978846, %v323_v33  ;;  %v300_v16 = vmul.f32 %v288_v9, %v288_v9 }
 0x1b8   :  { %v480_v17 = vpop.eup %479  ;;  %v308_v18 = vmul.f32 %v300_v16, %v288_v9  ;;  %483 = vtanh.f32 %v331_v10 }
 0x1b9   :  { %v344_v29 = vadd.f32 1.0, %v480_v17  ;;  %485 = vtanh.f32 %v329_v22  ;;  %v482_v30 = vpop.eup %481 }
 0x1ba   :  { %v316_v19 = vmul.f32 0.044715, %v308_v18  ;;  %v346_v40 = vadd.f32 1.0, %v482_v30 }
 0x1bb   :  { %v290_v54 = vpop.f32.mrf.mxu3  ;;  %v352_v20 = vmul.f32 0.5, %v344_v29 }
 0x1bc   :  { %v324_v21 = vadd.f32 %v316_v19, %v288_v9  ;;  %v291_v25 = vadd.f32 %v776_v14, %v290_v54  ;;  %v354_v50 = vmul.f32 0.5, %v346_v40 }
 0x1bd   :  { %v360_v57 = vmul.f32 %v352_v20, %v278_v38 }
 0x1be   :  { %v332_v56 = vmul.f32 0.7978846, %v324_v21  ;;  %v301_v27 = vmul.f32 %v291_v25, %v291_v25  ;;  %v484_v32 = vpop.eup %483  ;;  %v362_v61 = vmul.f32 %v354_v50, %v789_v15 }
 0x1bf   :  { %v371_v31 = vpack.c.bf16 %v360_v57, %v359_v26  ;;  %v486_v34 = vpop.eup %485  ;;  %v347_v39 = vadd.f32 1.0, %v484_v32 }
 0x1c0   :  { %487 = vtanh.f32 %v332_v56  ;;  %v309_v42 = vmul.f32 %v301_v27, %v291_v25  ;;  %v345_v23 = vadd.f32 1.0, %v486_v34 }
 0x1c1   :  { %447 = vmatmul.msk.bf16.vlgmr.msra.gmra.mxu1 %vm381_vm11, %v371_v31  ;;  %v355_v49 = vmul.f32 0.5, %v347_v39 }
 0x1c2   :  { %v317_v35 = vmul.f32 0.044715, %v309_v42  ;;  %v353_v53 = vmul.f32 0.5, %v345_v23 }
 0x1c3   :  { %v292_v36 = vpop.f32.mrf.mxu3  ;;  %v363_v59 = vmul.f32 %v355_v49, %v286_v55 }
 0x1c4   :  { %v325_v45 = vadd.f32 %v317_v35, %v291_v25  ;;  %v293_v46 = vadd.f32 %v776_v14, %v292_v36  ;;  %v361_v14 = vmul.f32 %v353_v53, %v786_v37  ;;  %v458_v37 = vld [vmem:[%s858_s6] ss:$0 sm:$0xff] }
 0x1c6   :  { %v488_v38 = vpop.eup %487  ;;  %v333_v48 = vmul.f32 0.7978846, %v325_v45  ;;  %v302_v43 = vmul.f32 %v293_v46, %v293_v46  ;;  %v372_v63 = vpack.c.bf16 %v362_v61, %v361_v14 }
 0x1c7   :  { %v348_v24 = vadd.f32 1.0, %v488_v38 }
 0x1c8   :  { %v310_v51 = vmul.f32 %v302_v43, %v293_v46  ;;  %489 = vtanh.f32 %v333_v48 }
 0x1c9   :  { %v356_v52 = vmul.f32 0.5, %v348_v24 }
 0x1ca   :  { %v318_v58 = vmul.f32 0.044715, %v310_v51 }
 0x1cb   :  { %v364_v60 = vmul.f32 %v356_v52, %v288_v9 }
 0x1cc   :  { %v326_v47 = vadd.f32 %v318_v58, %v293_v46 }
 0x1cd   :  { %v373_v62 = vpack.c.bf16 %v364_v60, %v363_v59 }
 0x1ce   :  { %v334_v44 = vmul.f32 0.7978846, %v326_v47  ;;  %v490_v3 = vpop.eup %489 }
 0x1cf   :  { %449 = vmatmul.msk.bf16.vlgmr.msra.gmra.mxu2 %vm381_vm11, %v373_v62  ;;  %v349_v4 = vadd.f32 1.0, %v490_v3 }
 0x1d0   :  { %491 = vtanh.f32 %v334_v44 }
 0x1d1   :  { %448 = vmatmul.msk.bf16.gmra.mxu1 %vm381_vm11, %v372_v63  ;;  %v357_v41 = vmul.f32 0.5, %v349_v4 }
 0x1d3   :  { %v365_v9 = vmul.f32 %v357_v41, %v291_v25 }
 0x1d6   :  { %v492_v5 = vpop.eup %491 }
 0x1d7   :  { %v350_v33 = vadd.f32 1.0, %v492_v5 }
 0x1d9   :  { %v358_v55 = vmul.f32 0.5, %v350_v33 }
 0x1db   :  { %v366_v28 = vmul.f32 %v358_v55, %v293_v46 }
 0x1dd   :  { %v374_v15 = vpack.c.bf16 %v366_v28, %v365_v9 }
 0x1df   :  { %450 = vmatmul.msk.bf16.gmra.mxu2 %vm381_vm11, %v374_v15 }
 0x23e   :  { %v403_v10 = vpop.f32.mrf.mxu1 }
 0x23f   :  { %v404_v16 = vadd.f32 %v458_v37, %v403_v10 }
 0x241   :  { %v423_v17 = vadd.f32 %v404_v16, %v547_v2 }
 0x243   :  { %431 = vst.msk [vmem:[%s860_s7] sm:$0xff] %vm37_vm0, %v423_v17 }
 0x246   :  { %v405_v22 = vpop.f32.mrf.mxu1 }
 0x247   :  { %v406_v18 = vadd.f32 %v458_v37, %v405_v22 }
 0x249   :  { %v424_v29 = vadd.f32 %v406_v18, %v568_v8 }
 0x24b   :  { %432 = vst.msk [vmem:[%s860_s7 + $0x8] sm:$0xff] %vm37_vm0, %v424_v29 }
 0x24e   :  { %v408_v11 = vpop.f32.mrf.mxu1 }
 0x24f   :  { %v409_v19 = vadd.f32 %v458_v37, %v408_v11 }
 0x251   :  { %v425_v54 = vadd.f32 %v409_v19, %v542_v1 }
 0x252   :  { %v413_v20 = vpop.f32.mrf.mxu2 }
 0x253   :  { %433 = vst.msk [vmem:[%s860_s7 + $0x10] sm:$0xff] %vm37_vm0, %v425_v54  ;;  %v414_v2 = vadd.f32 %v458_v37, %v413_v20 }
 0x255   :  { %v427_v21 = vadd.f32 %v414_v2, %v537_v0 }
 0x256   :  { %v410_v25 = vpop.f32.mrf.mxu1 }
 0x257   :  { %435 = vst.msk [vmem:[%s860_s7 + $0x20] sm:$0xff] %vm37_vm0, %v427_v21  ;;  %v411_v8 = vadd.f32 %v458_v37, %v410_v25 }
 0x259   :  { %v426_v26 = vadd.f32 %v411_v8, %v563_v7 }
 0x25a   :  { %v415_v57 = vpop.f32.mrf.mxu2 }
 0x25b   :  { %434 = vst.msk [vmem:[%s860_s7 + $0x18] sm:$0xff] %vm37_vm0, %v426_v26  ;;  %v416_v1 = vadd.f32 %v458_v37, %v415_v57 }
 0x25d   :  { %v428_v56 = vadd.f32 %v416_v1, %v558_v6 }
 0x25f   :  { %436 = vst.msk [vmem:[%s860_s7 + $0x28] sm:$0xff] %vm37_vm0, %v428_v56 }
 0x262   :  { %v418_v0 = vpop.f32.mrf.mxu2 }
 0x263   :  { %v419_v27 = vadd.f32 %v458_v37, %v418_v0 }
 0x265   :  { %v429_v30 = vadd.f32 %v419_v27, %v579_v12 }
 0x267   :  { %437 = vst.msk [vmem:[%s860_s7 + $0x30] sm:$0xff] %vm37_vm0, %v429_v30 }
 0x26a   :  { %v420_v7 = vpop.f32.mrf.mxu2 }
 0x26b   :  { %v421_v31 = vadd.f32 %v458_v37, %v420_v7 }
 0x26d   :  { %v430_v32 = vadd.f32 %v421_v31, %v584_v13 }
 0x26f   :  { %438 = vst.msk [vmem:[%s860_s7 + $0x38] sm:$0xff] %vm37_vm0, %v430_v32 }

// kernel: _lambda_.23
= control target key start
LH: loop header
LB: loop body
LE: loop exit
PB: predicated region body
PF: predicated region fallthrough
CT: control target
= control target key end

     0   :  { %vm32_vm0 = vcmask 130048   ;;  %s769_s0 = inlined_call_operand.vmem [shape: f32[64,16], index: 0, kind: input, shape index: {}]   ;;  %s770_s1 = inlined_call_operand.vmem [shape: f32[1,16], index: 1, kind: input, shape index: {}]   ;;  %s771_s2 = inlined_call_operand.vmem [shape: f32[1,16], index: 2, kind: input, shape index: {}]   ;;  %s772_s3 = inlined_call_operand.vmem [shape: f32[16,12], index: 3, kind: input, shape index: {}]   ;;  %s773_s4 = inlined_call_operand.vmem [shape: f32[1,12], index: 4, kind: input, shape index: {}]   ;;  %s774_s5 = inlined_call_operand.hbm [shape: f32[64,12], index: 5, kind: output, shape index: {}]  }
   0x1   :  { %v28_v0 = vld [vmem:[%s769_s0 + $0x30] sm:$0xff]  ;;  %v26_v1 = vld [vmem:[%s769_s0 + $0x20] sm:$0xff]  ;;  %v29_v6 = vld [vmem:[%s769_s0 + $0x38] sm:$0xff] }
   0x2   :  { %v22_v2 = vld [vmem:[%s769_s0] sm:$0xff]  ;;  %v51_v3 = vsel %vm32_vm0, %v28_v0, 0.0  ;;  %v45_v4 = vsel %vm32_vm0, %v26_v1, 0.0  ;;  %v27_v7 = vld [vmem:[%s769_s0 + $0x28] sm:$0xff] }
   0x3   :  { %v33_v5 = vsel %vm32_vm0, %v22_v2, 0.0  ;;  %52 = vadd.xlane.f32.xlu1 %v51_v3  ;;  %46 = vadd.xlane.f32.xlu0 %v45_v4 }
   0x4   :  { %34 = vadd.xlane.f32.xlu2 %v33_v5 }
   0x5   :  { %10 = vsyncpa [#allocation3], 0  ;;  %v23_v8 = vld [vmem:[%s769_s0 + $0x8] sm:$0xff]  ;;  %v54_v9 = vsel %vm32_vm0, %v29_v6, 0.0  ;;  %v48_v10 = vsel %vm32_vm0, %v27_v7, 0.0  ;;  %v24_v12 = vld [vmem:[%s769_s0 + $0x10] sm:$0xff] }
   0x6   :  { %v36_v11 = vsel %vm32_vm0, %v23_v8, 0.0  ;;  %v25_v13 = vld [vmem:[%s769_s0 + $0x18] sm:$0xff]  ;;  %v39_v14 = vsel %vm32_vm0, %v24_v12, 0.0  ;;  %v463_v16 = vmov 16.0   ;;  %s377_s18 = sshll.u32 %s774_s5, 4  ;;  %s465_s19 = smov 128   ;;  %s378_s18 = int_to_ptr.hbm [resolvable:$true] %s377_s18 }
   0x7   :  { %v42_v15 = vsel %vm32_vm0, %v25_v13, 0.0  ;;  %403 = vrcp.f32 %v463_v16  ;;  %s466_s20 = smov 8  }
   0xb   :  { %55 = vadd.xlane.f32.xlu1 %v54_v9  ;;  %49 = vadd.xlane.f32.xlu0 %v48_v10 }
   0xc   :  { %37 = vadd.xlane.f32.xlu2 %v36_v11 }
   0xd   :  { %v404_v17 = vpop.eup %403 }
   0xe   :  { %v58_v18 = vmul.f32 16.0, %v404_v17  ;;  %vm62_vm1 = vweird.f32 %v404_v17 }
  0x10   :  { %v59_v19 = vsub.f32 1.0, %v58_v18 }
  0x12   :  { %v60_v20 = vmul.f32 %v404_v17, %v59_v19 }
  0x13   :  { %40 = vadd.xlane.f32.xlu0 %v39_v14  ;;  %43 = vadd.xlane.f32.xlu1 %v42_v15 }
  0x14   :  { %v61_v21 = vadd.f32 %v404_v17, %v60_v20 }
  0x16   :  { %v529_v22 = vsel %vm62_vm1, %v404_v17, %v61_v21 }
  0x76   :  { %v53_v23 = vpop.xlane.xlu1 %52  ;;  %v47_v24 = vpop.xlane.xlu0 %46 }
  0x77   :  { %v70_v25 = vmul.f32 %v529_v22, %v53_v23  ;;  %v68_v26 = vmul.f32 %v529_v22, %v47_v24  ;;  %v35_v27 = vpop.xlane.xlu2 %34 }
  0x78   :  { %v64_v36 = vmul.f32 %v529_v22, %v35_v27 }
  0x79   :  { %v533_v28 = vsub.f32 %v28_v0, %v70_v25  ;;  %v535_v29 = vsub.f32 %v26_v1, %v68_v26 }
  0x7a   :  { %v553_v44 = vsub.f32 %v22_v2, %v64_v36 }
  0x7b   :  { %v86_v30 = vmul.f32 %v533_v28, %v533_v28  ;;  %v84_v31 = vmul.f32 %v535_v29, %v535_v29 }
  0x7c   :  { %v80_v55 = vmul.f32 %v553_v44, %v553_v44 }
  0x7d   :  { %v106_v32 = vsel %vm32_vm0, %v86_v30, 0.0  ;;  %v100_v33 = vsel %vm32_vm0, %v84_v31, 0.0 }
  0x7e   :  { %v56_v34 = vpop.xlane.xlu1 %55  ;;  %v50_v35 = vpop.xlane.xlu0 %49  ;;  %107 = vadd.xlane.f32.xlu1 %v106_v32  ;;  %101 = vadd.xlane.f32.xlu2 %v100_v33  ;;  %v88_v59 = vsel %vm32_vm0, %v80_v55, 0.0 }
  0x7f   :  { %v71_v37 = vmul.f32 %v529_v22, %v56_v34  ;;  %v69_v38 = vmul.f32 %v529_v22, %v50_v35  ;;  %v38_v39 = vpop.xlane.xlu2 %37 }
  0x80   :  { %v65_v40 = vmul.f32 %v529_v22, %v38_v39 }
  0x81   :  { %v547_v41 = vsub.f32 %v29_v6, %v71_v37  ;;  %v549_v42 = vsub.f32 %v27_v7, %v69_v38  ;;  %v610_v38 = vld [vmem:[%s770_s1] ss:$0 sm:$0xff] }
  0x82   :  { %v551_v43 = vsub.f32 %v23_v8, %v65_v40 }
  0x83   :  { %v85_v45 = vmul.f32 %v549_v42, %v549_v42  ;;  %v87_v46 = vmul.f32 %v547_v41, %v547_v41 }
  0x84   :  { %v81_v47 = vmul.f32 %v551_v43, %v551_v43 }
  0x85   :  { %v103_v48 = vsel %vm32_vm0, %v85_v45, 0.0  ;;  %v109_v49 = vsel %vm32_vm0, %v87_v46, 0.0 }
  0x86   :  { %104 = vadd.xlane.f32.xlu0 %v103_v48  ;;  %v41_v50 = vpop.xlane.xlu0 %40  ;;  %110 = vadd.xlane.f32.xlu2 %v109_v49  ;;  %v91_v51 = vsel %vm32_vm0, %v81_v47, 0.0  ;;  %v44_v52 = vpop.xlane.xlu1 %43 }
  0x87   :  { %v66_v53 = vmul.f32 %v529_v22, %v41_v50  ;;  %92 = vadd.xlane.f32.xlu1 %v91_v51  ;;  %v67_v54 = vmul.f32 %v529_v22, %v44_v52  ;;  %v310_v51 = vld [vmem:[%s772_s3] sm:$0xff]  ;;  %v311_v52 = vld [vmem:[%s772_s3 + $0x8] sm:$0xff] }
  0x89   :  { %v568_v56 = vsub.f32 %v24_v12, %v66_v53  ;;  %v570_v57 = vsub.f32 %v25_v13, %v67_v54  ;;  %v633_v53 = vld [vmem:[%s771_s2] ss:$0 sm:$0xff] }
  0x8b   :  { %v82_v58 = vmul.f32 %v568_v56, %v568_v56  ;;  %v83_v61 = vmul.f32 %v570_v57, %v570_v57 }
  0x8d   :  { %v94_v60 = vsel %vm32_vm0, %v82_v58, 0.0  ;;  %v97_v62 = vsel %vm32_vm0, %v83_v61, 0.0 }
  0x8e   :  { %95 = vadd.xlane.f32.xlu2 %v94_v60  ;;  %89 = vadd.xlane.f32.xlu0 %v88_v59 }
  0x96   :  { %98 = vadd.xlane.f32.xlu0 %v97_v62 }
  0xf1   :  { %v108_v63 = vpop.xlane.xlu1 %107  ;;  %v102_v0 = vpop.xlane.xlu2 %101 }
  0xf2   :  { %v118_v1 = vmul.f32 %v108_v63, %v529_v22  ;;  %v116_v2 = vmul.f32 %v102_v0, %v529_v22 }
  0xf4   :  { %v126_v3 = vadd.f32 1e-05, %v118_v1  ;;  %v124_v4 = vadd.f32 1e-05, %v116_v2  ;;  %v316_v1 = vpack.c.bf16 %v311_v52, %v310_v51 }
  0xf6   :  { %405 = vrsqrt.f32 %v126_v3  ;;  %vm194_vm2 = vweird.f32 %v126_v3  ;;  %vm174_vm5 = vweird.f32 %v124_v4  ;;  %394 = vmatpush.bf16.msra.mxu2 %v316_v1  ;;  %395 = vmatpush.bf16.msra.mxu3 %v316_v1 }
  0xf7   :  { %407 = vrsqrt.f32 %v124_v4  ;;  %340 = vmatpush.bf16.msra.mxu0 %v316_v1  ;;  %393 = vmatpush.bf16.msra.mxu1 %v316_v1 }
  0xf9   :  { %v105_v5 = vpop.xlane.xlu0 %104  ;;  %v111_v6 = vpop.xlane.xlu2 %110 }
  0xfa   :  { %v117_v7 = vmul.f32 %v105_v5, %v529_v22  ;;  %v93_v8 = vpop.xlane.xlu1 %92  ;;  %v119_v9 = vmul.f32 %v111_v6, %v529_v22 }
  0xfb   :  { %v113_v10 = vmul.f32 %v93_v8, %v529_v22 }
  0xfc   :  { %v406_v11 = vpop.eup %405  ;;  %v584_v12 = vadd.f32 1e-05, %v117_v7  ;;  %v586_v13 = vadd.f32 1e-05, %v119_v9 }
  0xfd   :  { %v408_v14 = vpop.eup %407  ;;  %v189_v15 = vmul.f32 %v406_v11, %v126_v3  ;;  %v588_v16 = vadd.f32 1e-05, %v113_v10  ;;  %vm195_vm3 = vweird.f32 %v406_v11 }
  0xfe   :  { %v169_v17 = vmul.f32 %v408_v14, %v124_v4  ;;  %409 = vrsqrt.f32 %v584_v12  ;;  %vm175_vm4 = vweird.f32 %v408_v14  ;;  %vm196_vm6 = vmor %vm194_vm2, %vm195_vm3  ;;  %vm184_vm7 = vweird.f32 %v584_v12 }
  0xff   :  { %v190_v18 = vmul.f32 %v406_v11, %v189_v15  ;;  %411 = vrsqrt.f32 %v588_v16  ;;  %vm176_vm8 = vmor %vm174_vm5, %vm175_vm4  ;;  %vm144_vm9 = vweird.f32 %v588_v16  ;;  %vm204_vm12 = vweird.f32 %v586_v13 }
 0x100   :  { %v170_v19 = vmul.f32 %v408_v14, %v169_v17  ;;  %413 = vrsqrt.f32 %v586_v13 }
 0x101   :  { %v191_v20 = vmul.f32 0.5, %v190_v18  ;;  %v90_v21 = vpop.xlane.xlu0 %89  ;;  %v96_v23 = vpop.xlane.xlu2 %95 }
 0x102   :  { %v171_v24 = vmul.f32 0.5, %v170_v19  ;;  %v112_v25 = vmul.f32 %v90_v21, %v529_v22  ;;  %v114_v26 = vmul.f32 %v96_v23, %v529_v22 }
 0x103   :  { %v192_v27 = vsub.f32 1.5, %v191_v20 }
 0x104   :  { %v595_v30 = vpop.eup %409  ;;  %v172_v31 = vsub.f32 1.5, %v171_v24  ;;  %v597_v32 = vadd.f32 1e-05, %v112_v25  ;;  %v603_v36 = vadd.f32 1e-05, %v114_v26 }
 0x105   :  { %v599_v33 = vpop.eup %411  ;;  %v193_v34 = vmul.f32 %v406_v11, %v192_v27  ;;  %v179_v35 = vmul.f32 %v595_v30, %v584_v12  ;;  %vm185_vm10 = vweird.f32 %v595_v30 }
 0x106   :  { %v605_v37 = vpop.eup %413  ;;  %v173_v39 = vmul.f32 %v408_v14, %v172_v31  ;;  %v139_v40 = vmul.f32 %v599_v33, %v588_v16  ;;  %415 = vrsqrt.f32 %v597_v32  ;;  %vm145_vm11 = vweird.f32 %v599_v33  ;;  %vm186_vm1 = vmor %vm184_vm7, %vm185_vm10 }
 0x107   :  { %v197_v45 = vsel %vm196_vm6, %v406_v11, %v193_v34  ;;  %v180_v46 = vmul.f32 %v595_v30, %v179_v35  ;;  %v199_v47 = vmul.f32 %v605_v37, %v586_v13  ;;  %417 = vrsqrt.f32 %v603_v36  ;;  %vm652_vm14 = vmor %vm144_vm9, %vm145_vm11 }
 0x108   :  { %v214_v48 = vmul.f32 %v197_v45, %v533_v28  ;;  %v177_v49 = vsel %vm176_vm8, %v408_v14, %v173_v39  ;;  %v140_v50 = vmul.f32 %v599_v33, %v139_v40  ;;  %vm205_vm13 = vweird.f32 %v605_v37 }
 0x109   :  { %v212_v28 = vmul.f32 %v177_v49, %v535_v29  ;;  %v181_v54 = vmul.f32 0.5, %v180_v46  ;;  %v200_v55 = vmul.f32 %v605_v37, %v199_v47  ;;  %v99_v58 = vpop.xlane.xlu0 %98  ;;  %vm134_vm15 = vweird.f32 %v597_v32  ;;  %vm206_vm3 = vmor %vm204_vm12, %vm205_vm13 }
 0x10a   :  { %v225_v59 = vmul.f32 %v610_v38, %v214_v48  ;;  %v141_v60 = vmul.f32 0.5, %v140_v50  ;;  %v115_v61 = vmul.f32 %v99_v58, %v529_v22  ;;  %vm154_vm2 = vweird.f32 %v603_v36 }
 0x10b   :  { %v223_v62 = vmul.f32 %v610_v38, %v212_v28  ;;  %v182_v63 = vsub.f32 1.5, %v181_v54  ;;  %v201_v0 = vmul.f32 0.5, %v200_v55  ;;  %vm362_vm11 = vcmask 97280  }
 0x10c   :  { %v416_v2 = vpop.eup %415  ;;  %v142_v29 = vsub.f32 1.5, %v141_v60  ;;  %v644_v3 = vadd.f32 1e-05, %v115_v61  ;;  %v659_v8 = vadd.f32 %v633_v53, %v225_v59 }
 0x10d   :  { %v647_v4 = vadd.f32 %v633_v53, %v223_v62  ;;  %v183_v5 = vmul.f32 %v595_v30, %v182_v63  ;;  %v202_v6 = vsub.f32 1.5, %v201_v0  ;;  %v129_v7 = vmul.f32 %v416_v2, %v597_v32  ;;  %v418_v10 = vpop.eup %417 }
 0x10e   :  { %v143_v9 = vmul.f32 %v599_v33, %v142_v29  ;;  %419 = vrsqrt.f32 %v644_v3  ;;  %vm135_vm4 = vweird.f32 %v416_v2  ;;  %v149_v18 = vmul.f32 %v418_v10, %v603_v36 }
 0x10f   :  { %v187_v11 = vsel %vm186_vm1, %v595_v30, %v183_v5  ;;  %v203_v14 = vmul.f32 %v605_v37, %v202_v6  ;;  %v130_v15 = vmul.f32 %v416_v2, %v129_v7  ;;  %v242_v16 = vmul.f32 %v647_v4, %v647_v4  ;;  %vm136_vm7 = vmor %vm134_vm15, %vm135_vm4 }
 0x110   :  { %v213_v12 = vmul.f32 %v187_v11, %v549_v42  ;;  %v147_v17 = vsel %vm652_vm14, %v599_v33, %v143_v9  ;;  %v150_v25 = vmul.f32 %v418_v10, %v149_v18  ;;  %v244_v26 = vmul.f32 %v659_v8, %v659_v8 }
 0x111   :  { %v209_v19 = vmul.f32 %v147_v17, %v551_v43  ;;  %v207_v20 = vsel %vm206_vm3, %v605_v37, %v203_v14  ;;  %v131_v21 = vmul.f32 0.5, %v130_v15  ;;  %v250_v23 = vmul.f32 %v242_v16, %v647_v4 }
 0x112   :  { %v224_v42 = vmul.f32 %v610_v38, %v213_v12  ;;  %v215_v24 = vmul.f32 %v207_v20, %v547_v41  ;;  %vm155_vm5 = vweird.f32 %v418_v10  ;;  %v151_v34 = vmul.f32 0.5, %v150_v25 }
 0x113   :  { %v220_v13 = vmul.f32 %v610_v38, %v209_v19  ;;  %v132_v27 = vsub.f32 1.5, %v131_v21  ;;  %v258_v30 = vmul.f32 0.044715, %v250_v23  ;;  %v252_v35 = vmul.f32 %v244_v26, %v659_v8  ;;  %vm156_vm8 = vmor %vm154_vm2, %vm155_vm5 }
 0x114   :  { %v420_v31 = vpop.eup %419  ;;  %v690_v43 = vadd.f32 %v633_v53, %v224_v42  ;;  %v226_v33 = vmul.f32 %v610_v38, %v215_v24  ;;  %v152_v45 = vsub.f32 1.5, %v151_v34  ;;  %vm164_vm9 = vweird.f32 %v644_v3 }
 0x115   :  { %v695_v41 = vadd.f32 %v633_v53, %v220_v13  ;;  %v133_v37 = vmul.f32 %v416_v2, %v132_v27  ;;  %v159_v39 = vmul.f32 %v420_v31, %v644_v3  ;;  %vm165_vm6 = vweird.f32 %v420_v31 }
 0x116   :  { %v699_v40 = vadd.f32 %v633_v53, %v226_v33  ;;  %v243_v46 = vmul.f32 %v690_v43, %v690_v43  ;;  %v266_v47 = vadd.f32 %v258_v30, %v647_v4  ;;  %v260_v50 = vmul.f32 0.044715, %v252_v35  ;;  %vm166_vm10 = vmor %vm164_vm9, %vm165_vm6 }
 0x117   :  { %v137_v48 = vsel %vm136_vm7, %v416_v2, %v133_v37  ;;  %v160_v49 = vmul.f32 %v420_v31, %v159_v39  ;;  %v239_v51 = vmul.f32 %v695_v41, %v695_v41  ;;  %v153_v28 = vmul.f32 %v418_v10, %v152_v45 }
 0x118   :  { %v208_v52 = vmul.f32 %v137_v48, %v553_v44  ;;  %v251_v54 = vmul.f32 %v243_v46, %v690_v43  ;;  %v274_v55 = vmul.f32 0.7978846, %v266_v47  ;;  %v245_v58 = vmul.f32 %v699_v40, %v699_v40 }
 0x119   :  { %v161_v32 = vmul.f32 0.5, %v160_v49  ;;  %v268_v59 = vadd.f32 %v260_v50, %v659_v8  ;;  %v247_v60 = vmul.f32 %v239_v51, %v695_v41  ;;  %v157_v62 = vsel %vm156_vm8, %v418_v10, %v153_v28 }
 0x11a   :  { %v219_v61 = vmul.f32 %v610_v38, %v208_v52  ;;  %v259_v44 = vmul.f32 0.044715, %v251_v54  ;;  %421 = vtanh.f32 %v274_v55  ;;  %v210_v63 = vmul.f32 %v157_v62, %v568_v56 }
 0x11b   :  { %v162_v0 = vsub.f32 1.5, %v161_v32  ;;  %v253_v1 = vmul.f32 %v245_v58, %v699_v40  ;;  %v276_v36 = vmul.f32 0.7978846, %v268_v59  ;;  %v255_v5 = vmul.f32 0.044715, %v247_v60 }
 0x11c   :  { %v722_v2 = vadd.f32 %v633_v53, %v219_v61  ;;  %v267_v29 = vadd.f32 %v259_v44, %v690_v43  ;;  %v221_v22 = vmul.f32 %v610_v38, %v210_v63 }
 0x11d   :  { %v163_v6 = vmul.f32 %v420_v31, %v162_v0  ;;  %v261_v7 = vmul.f32 0.044715, %v253_v1  ;;  %423 = vtanh.f32 %v276_v36  ;;  %v263_v10 = vadd.f32 %v255_v5, %v695_v41 }
 0x11e   :  { %v275_v56 = vmul.f32 0.7978846, %v267_v29  ;;  %v238_v9 = vmul.f32 %v722_v2, %v722_v2  ;;  %v732_v11 = vadd.f32 %v633_v53, %v221_v22 }
 0x11f   :  { %v167_v3 = vsel %vm166_vm10, %v420_v31, %v163_v6  ;;  %v269_v14 = vadd.f32 %v261_v7, %v699_v40  ;;  %v271_v17 = vmul.f32 0.7978846, %v263_v10 }
 0x120   :  { %v422_v15 = vpop.eup %421  ;;  %v211_v16 = vmul.f32 %v167_v3, %v570_v57  ;;  %425 = vtanh.f32 %v275_v56  ;;  %v246_v12 = vmul.f32 %v238_v9, %v722_v2  ;;  %v240_v19 = vmul.f32 %v732_v11, %v732_v11 }
 0x121   :  { %v277_v18 = vmul.f32 0.7978846, %v269_v14  ;;  %427 = vtanh.f32 %v271_v17  ;;  %v290_v42 = vadd.f32 1.0, %v422_v15 }
 0x122   :  { %v222_v20 = vmul.f32 %v610_v38, %v211_v16  ;;  %v254_v21 = vmul.f32 0.044715, %v246_v12  ;;  %v248_v24 = vmul.f32 %v240_v19, %v732_v11 }
 0x123   :  { %v424_v23 = vpop.eup %423  ;;  %429 = vtanh.f32 %v277_v18  ;;  %v298_v34 = vmul.f32 0.5, %v290_v42 }
 0x124   :  { %v233_v25 = vadd.f32 %v633_v53, %v222_v20  ;;  %v262_v57 = vadd.f32 %v254_v21, %v722_v2  ;;  %v256_v26 = vmul.f32 0.044715, %v248_v24  ;;  %v292_v27 = vadd.f32 1.0, %v424_v23 }
 0x125   :  { %v306_v49 = vmul.f32 %v298_v34, %v647_v4 }
 0x126   :  { %v426_v13 = vpop.eup %425  ;;  %v270_v30 = vmul.f32 0.7978846, %v262_v57  ;;  %v241_v31 = vmul.f32 %v233_v25, %v233_v25  ;;  %v264_v38 = vadd.f32 %v256_v26, %v732_v11  ;;  %v300_v48 = vmul.f32 0.5, %v292_v27 }
 0x127   :  { %v291_v33 = vadd.f32 1.0, %v426_v13  ;;  %v428_v35 = vpop.eup %427 }
 0x128   :  { %431 = vtanh.f32 %v270_v30  ;;  %v249_v37 = vmul.f32 %v241_v31, %v233_v25  ;;  %v272_v46 = vmul.f32 0.7978846, %v264_v38  ;;  %v287_v51 = vadd.f32 1.0, %v428_v35 }
 0x129   :  { %v430_v39 = vpop.eup %429  ;;  %v299_v45 = vmul.f32 0.5, %v291_v33  ;;  %v308_v32 = vmul.f32 %v300_v48, %v659_v8 }
 0x12a   :  { %v293_v47 = vadd.f32 1.0, %v430_v39  ;;  %v257_v53 = vmul.f32 0.044715, %v249_v37  ;;  %433 = vtanh.f32 %v272_v46  ;;  %v295_v61 = vmul.f32 0.5, %v287_v51 }
 0x12b   :  { %v307_v50 = vmul.f32 %v299_v45, %v690_v43 }
 0x12c   :  { %v301_v52 = vmul.f32 0.5, %v293_v47  ;;  %v265_v28 = vadd.f32 %v257_v53, %v233_v25  ;;  %v303_v63 = vmul.f32 %v295_v61, %v695_v41 }
 0x12d   :  { %v314_v54 = vpack.c.bf16 %v307_v50, %v306_v49 }
 0x12e   :  { %v432_v55 = vpop.eup %431  ;;  %v309_v58 = vmul.f32 %v301_v52, %v699_v40  ;;  %v273_v59 = vmul.f32 0.7978846, %v265_v28 }
 0x12f   :  { %391 = vmatmul.msk.bf16.vlgmr.msra.gmra.mxu2 %vm32_vm0, %v314_v54  ;;  %v286_v60 = vadd.f32 1.0, %v432_v55 }
 0x130   :  { %v315_v62 = vpack.c.bf16 %v309_v58, %v308_v32  ;;  %435 = vtanh.f32 %v273_v59  ;;  %v434_v4 = vpop.eup %433 }
 0x131   :  { %v294_v44 = vmul.f32 0.5, %v286_v60  ;;  %v288_v0 = vadd.f32 1.0, %v434_v4 }
 0x132   :  { %392 = vmatmul.msk.bf16.vlgmr.msra.gmra.mxu3 %vm32_vm0, %v315_v62 }
 0x133   :  { %v302_v43 = vmul.f32 %v294_v44, %v722_v2  ;;  %v296_v36 = vmul.f32 0.5, %v288_v0  ;;  %v402_v2 = vld [vmem:[%s773_s4] ss:$0 sm:$0xff]  ;;  %s464_s4 = smov [#allocation2]  }
 0x134   :  { %s375_s15 = sshll.u32 %s464_s4, 4  ;;  %s376_s15 = int_to_ptr.vmem [resolvable:$true] %s375_s15 }
 0x135   :  { %v312_v1 = vpack.c.bf16 %v303_v63, %v302_v43  ;;  %v304_v5 = vmul.f32 %v296_v36, %v732_v11 }
 0x136   :  { %v436_v8 = vpop.eup %435 }
 0x137   :  { %389 = vmatmul.msk.bf16.vlgmr.msra.gmra.mxu0 %vm32_vm0, %v312_v1  ;;  %v289_v40 = vadd.f32 1.0, %v436_v8 }
 0x139   :  { %v297_v29 = vmul.f32 0.5, %v289_v40 }
 0x13b   :  { %v305_v22 = vmul.f32 %v297_v29, %v233_v25 }
 0x13d   :  { %v313_v6 = vpack.c.bf16 %v305_v22, %v304_v5 }
 0x13f   :  { %390 = vmatmul.msk.bf16.vlgmr.msra.gmra.mxu1 %vm32_vm0, %v313_v6 }
 0x1b2   :  { %v352_v7 = vpop.f32.mrf.mxu2 }
 0x1b3   :  { %v353_v41 = vadd.f32 %v402_v2, %v352_v7 }
 0x1b4   :  { %v342_v56 = vpop.f32.mrf.mxu0 }
 0x1b5   :  { %367 = vst.msk [vmem:[#allocation2 + $0x20] sm:$0xff] %vm362_vm11, %v353_v41  ;;  %v357_v9 = vpop.f32.mrf.mxu3  ;;  %v343_v10 = vadd.f32 %v402_v2, %v342_v56 }
 0x1b6   :  { %v358_v3 = vadd.f32 %v402_v2, %v357_v9 }
 0x1b7   :  { %363 = vst.msk [vmem:[#allocation2] sm:$0xff] %vm362_vm11, %v343_v10 }
 0x1b8   :  { %369 = vst.msk [vmem:[#allocation2 + $0x30] sm:$0xff] %vm362_vm11, %v358_v3 }
 0x1ba   :  { %v354_v11 = vpop.f32.mrf.mxu2 }
 0x1bb   :  { %v355_v14 = vadd.f32 %v402_v2, %v354_v11 }
 0x1bc   :  { %v344_v15 = vpop.f32.mrf.mxu0  ;;  %v347_v16 = vpop.f32.mrf.mxu1 }
 0x1bd   :  { %368 = vst.msk [vmem:[#allocation2 + $0x28] sm:$0xff] %vm362_vm11, %v355_v14  ;;  %v359_v12 = vpop.f32.mrf.mxu3  ;;  %v345_v17 = vadd.f32 %v402_v2, %v344_v15  ;;  %v348_v18 = vadd.f32 %v402_v2, %v347_v16 }
 0x1be   :  { %v360_v19 = vadd.f32 %v402_v2, %v359_v12 }
 0x1bf   :  { %364 = vst.msk [vmem:[#allocation2 + $0x8] sm:$0xff] %vm362_vm11, %v345_v17 }
 0x1c0   :  { %370 = vst.msk [vmem:[#allocation2 + $0x38] sm:$0xff] %vm362_vm11, %v360_v19 }
 0x1c1   :  { %365 = vst.msk [vmem:[#allocation2 + $0x10] sm:$0xff] %vm362_vm11, %v348_v18 }
 0x1c4   :  { %v349_v20 = vpop.f32.mrf.mxu1 }
 0x1c5   :  { %v350_v21 = vadd.f32 %v402_v2, %v349_v20 }
 0x1c7   :  { %366 = vst.msk [vmem:[#allocation2 + $0x18] sm:$0xff] %vm362_vm11, %v350_v21 }
 0x1c8   :  { %383 = dma.vmem_to_hbm [thread:$0]  %s376_s15, 1024, %s378_s18, [#allocation3], %s465_s19, %s465_s19, %s466_s20  }
 0x1c9   :  { %461 = dma.done.wait [#allocation3], 1024  }
 0x1ca   :  { %462 = vsyncadd [#allocation3], 4294966272 }
 0x1cb   :  { %388 = vsyncpa [#allocation3], 1 }

</bundles_post_ra>
